<compile_context>
chip_gen: v7x
topology: tpu7x:2x2x1
jax: 0.10.0
libtpu: 0.0.40
codegen_flags: <defaults>
</compile_context>

<pallas_src>
import functools

import jax
import jax.numpy as jnp
from jax.experimental import pallas as pl
from jax.experimental.pallas import tpu as pltpu


def _round_up(v, m):
    return (v + m - 1) // m * m


# ----------------------------------------------------------------------------
# Pallas kernels
# ----------------------------------------------------------------------------
def _matmul_bias_kernel(x_ref, w_ref, b_ref, o_ref, acc_ref, *, relu):
    """o = x @ w + b, optionally ReLU.  Grid = (M/tm, N/tn, K/tk)."""
    @pl.when(pl.program_id(2) == 0)
    def _():
        acc_ref[...] = jnp.zeros_like(acc_ref)

    acc_ref[...] += jnp.dot(x_ref[...], w_ref[...],
                            preferred_element_type=jnp.float32)

    @pl.when(pl.program_id(2) == pl.num_programs(2) - 1)
    def _():
        y = acc_ref[...] + b_ref[...]
        if relu:
            y = jnp.maximum(y, 0.0)
        o_ref[...] = y.astype(o_ref.dtype)


def _conv45_kernel(p_ref, w4_ref, b4_ref, w5_ref, b5_ref, o_ref):
    """Fused conv4 (im2col matmul) + ReLU + conv5 (1x1 matmul) + ReLU."""
    h = jnp.dot(p_ref[...], w4_ref[...], preferred_element_type=jnp.float32)
    h = jnp.maximum(h + b4_ref[...], 0.0)
    h = jnp.dot(h.astype(w5_ref.dtype), w5_ref[...],
                preferred_element_type=jnp.float32)
    o_ref[...] = jnp.maximum(h + b5_ref[...], 0.0).astype(o_ref.dtype)


def _fc_fused_kernel(x_ref, w1_ref, b1_ref, w2_ref, b2_ref, w3_ref, b3_ref,
                     o_ref):
    """Fused fc1+ReLU, fc2+ReLU, fc3 — all weights resident in VMEM."""
    h = jnp.dot(x_ref[...], w1_ref[...], preferred_element_type=jnp.float32)
    h = jnp.maximum(h + b1_ref[...], 0.0)
    h = jnp.dot(h.astype(w2_ref.dtype), w2_ref[...],
                preferred_element_type=jnp.float32)
    h = jnp.maximum(h + b2_ref[...], 0.0)
    h = jnp.dot(h.astype(w3_ref.dtype), w3_ref[...],
                preferred_element_type=jnp.float32)
    o_ref[...] = (h + b3_ref[...]).astype(o_ref.dtype)


def _maxpool_relu_kernel(x_ref, o_ref):
    """x: (9, L) window-tap-major; o = relu(max over the 9 taps)."""
    o_ref[...] = jnp.maximum(
        jnp.max(x_ref[...], axis=0, keepdims=True), 0.0).astype(o_ref.dtype)


# ----------------------------------------------------------------------------
# Wrappers
# ----------------------------------------------------------------------------
def matmul_bias(x, w, b, *, relu, out_dtype=None, tm=512, tk=512):
    """y = x @ w + b (optionally ReLU).  x:(M,K)  w:(K,N)  b:(N,).

    Exact output shape (M, N): M uses a cdiv grid (partial last block rows are
    discarded on store), N uses a full-extent lane block when N < 128, and K
    is only padded up to the bf16 sublane multiple when it cannot be tiled.
    """
    M, K = x.shape
    K2, N = w.shape
    assert K == K2, (K, K2)
    out_dtype = out_dtype or x.dtype

    if K % tk == 0:
        kt, nk = tk, K // tk                      # K reduction over nk steps
    else:
        kp = _round_up(K, 16)                     # e.g. conv1: 27 -> 32
        if kp != K:
            x = jnp.pad(x, ((0, 0), (0, kp - K)))
            w = jnp.pad(w, ((0, kp - K), (0, 0)))
        kt, nk = kp, 1                            # single full-extent K block

    tm_eff = tm if M > tm else M
    gm = pl.cdiv(M, tm_eff)
    if N % 128 == 0:
        tn_eff, gn = 128, N // 128
    else:
        assert N < 128, N
        tn_eff, gn = N, 1                         # full-extent N, no padding

    b2 = b.reshape(1, N).astype(jnp.float32)

    return pl.pallas_call(
        functools.partial(_matmul_bias_kernel, relu=relu),
        out_shape=jax.ShapeDtypeStruct((M, N), out_dtype),
        grid_spec=pltpu.PrefetchScalarGridSpec(
            num_scalar_prefetch=0,
            grid=(gm, gn, nk),
            in_specs=[
                pl.BlockSpec((tm_eff, kt), lambda i, j, k: (i, k)),
                pl.BlockSpec((kt, tn_eff), lambda i, j, k: (k, j)),
                pl.BlockSpec((1, tn_eff), lambda i, j, k: (0, j)),
            ],
            out_specs=pl.BlockSpec((tm_eff, tn_eff), lambda i, j, k: (i, j)),
            scratch_shapes=[pltpu.VMEM((tm_eff, tn_eff), jnp.float32)],
        ),
        compiler_params=pltpu.CompilerParams(
            dimension_semantics=("parallel", "parallel", "arbitrary"),
            vmem_limit_bytes=32 * 1024 * 1024),
    )(x, w, b2)


def _im2col_nhwc(x, kh, kw, stride):
    """x: (N,H,W,C) NHWC -> (N*OH*OW, KH*KW*C); column order (kh, kw, c)."""
    n, h, w, c = x.shape
    oh = (h - kh) // stride + 1
    ow = (w - kw) // stride + 1
    if kh == 1 and kw == 1 and stride == 1:
        return x.reshape(n * oh * ow, c), (oh, ow)
    taps = []
    for di in range(kh):
        for dj in range(kw):
            taps.append(x[:, di:di + stride * (oh - 1) + 1:stride,
                             dj:dj + stride * (ow - 1) + 1:stride, :])
    p = jnp.stack(taps, axis=3)                   # (N, OH, OW, KH*KW, C)
    return p.reshape(n * oh * ow, kh * kw * c), (oh, ow)


def conv2d_nhwc(x, w, b, stride, *, relu, tm=512, tk=512):
    """Valid-padding conv.  x: NHWC;  w: (Co,Ci,KH,KW) PyTorch;  returns NHWC."""
    n = x.shape[0]
    co, ci, kh, kw = w.shape
    patches, (oh, ow) = _im2col_nhwc(x, kh, kw, stride)
    wmat = jnp.transpose(w, (2, 3, 1, 0)).reshape(kh * kw * ci, co)
    y = matmul_bias(patches, wmat.astype(x.dtype), b, relu=relu, tm=tm, tk=tk)
    return y.reshape(n, oh, ow, co)


def maxpool3_relu(x):
    """MaxPool2d(3,3) + ReLU on an NHWC activation (ReLU fused in kernel)."""
    n, h, w, c = x.shape
    oh, ow = (h - 3) // 3 + 1, (w - 3) // 3 + 1
    taps = []
    for di in range(3):
        for dj in range(3):
            taps.append(x[:, di:di + 3 * (oh - 1) + 1:3,
                             dj:dj + 3 * (ow - 1) + 1:3, :])
    stacked = jnp.stack(taps, axis=0).reshape(9, n * oh * ow * c)
    L = stacked.shape[1]
    lp = _round_up(L, 128)                        # lane-dense width
    if lp != L:
        stacked = jnp.pad(stacked, ((0, 0), (0, lp - L)))
    out = pl.pallas_call(
        _maxpool_relu_kernel,
        out_shape=jax.ShapeDtypeStruct((1, lp), x.dtype),
        grid=(1,),
        in_specs=[pl.BlockSpec((9, lp), lambda i: (0, 0))],
        out_specs=pl.BlockSpec((1, lp), lambda i: (0, 0)),
    )(stacked)
    return out[0, :L].reshape(n, oh, ow, c)


def conv45_fused(x, w4, b4, w5, b5):
    """conv4(3x3,s2)+ReLU and conv5(1x1)+ReLU fused in one tiny kernel."""
    n = x.shape[0]
    co4, ci4, k4, _ = w4.shape
    co5 = w5.shape[0]
    patches, (oh, ow) = _im2col_nhwc(x, k4, k4, 2)          # (32, 288)
    m, k = patches.shape
    w4m = jnp.transpose(w4, (2, 3, 1, 0)).reshape(k, co4).astype(x.dtype)
    w5m = w5.reshape(co5, co4).T.astype(x.dtype)            # (16, 8)
    b4r = b4.reshape(1, co4).astype(jnp.float32)
    b5r = b5.reshape(1, co5).astype(jnp.float32)
    out = pl.pallas_call(
        _conv45_kernel,
        out_shape=jax.ShapeDtypeStruct((m, co5), x.dtype),
        grid=(1,),
        in_specs=[
            pl.BlockSpec((m, k), lambda i: (0, 0)),
            pl.BlockSpec((k, co4), lambda i: (0, 0)),
            pl.BlockSpec((1, co4), lambda i: (0, 0)),
            pl.BlockSpec((co4, co5), lambda i: (0, 0)),
            pl.BlockSpec((1, co5), lambda i: (0, 0)),
        ],
        out_specs=pl.BlockSpec((m, co5), lambda i: (0, 0)),
    )(patches, w4m, b4r, w5m, b5r)
    return out.reshape(n, oh, ow, co5)                      # NHWC (2,4,4,8)


def fc_fused(x, w1, b1, w2, b2, w3, b3, *, out_dtype=jnp.float32):
    """Fused fc1+ReLU, fc2+ReLU, fc3.  x: (B, 128); weights PyTorch (out,in)."""
    bsz = x.shape[0]
    mp = _round_up(bsz, 8)                        # pad batch only to 8
    if mp != bsz:
        x = jnp.pad(x, ((0, mp - bsz), (0, 0)))
    w1m = w1.T.astype(x.dtype)                    # (128, 256)
    w2m = w2.T.astype(x.dtype)                    # (256, 128)
    w3m = w3.T.astype(x.dtype)                    # (128, 101)
    n3 = w3m.shape[1]
    b1r = b1.reshape(1, -1).astype(jnp.float32)
    b2r = b2.reshape(1, -1).astype(jnp.float32)
    b3r = b3.reshape(1, -1).astype(jnp.float32)

    def full(a):
        return pl.BlockSpec(a.shape, lambda i, _nd=a.ndim: (0,) * _nd)

    out = pl.pallas_call(
        _fc_fused_kernel,
        out_shape=jax.ShapeDtypeStruct((mp, n3), out_dtype),
        grid=(1,),
        in_specs=[full(x), full(w1m), full(b1r), full(w2m), full(b2r),
                  full(w3m), full(b3r)],
        out_specs=pl.BlockSpec((mp, n3), lambda i: (0, 0)),
    )(x, w1m, b1r, w2m, b2r, w3m, b3r)
    return out[:bsz]


# ----------------------------------------------------------------------------
# Model
# ----------------------------------------------------------------------------
def init_params(key):
    def conv_init(k, co, ci, kh, kw):
        k1, k2 = jax.random.split(k)
        fan = ci * kh * kw
        w = jax.random.normal(k1, (co, ci, kh, kw), jnp.float32) / jnp.sqrt(fan)
        b = 0.01 * jax.random.normal(k2, (co,), jnp.float32)
        return w, b

    def fc_init(k, co, ci):
        k1, k2 = jax.random.split(k)
        w = jax.random.normal(k1, (co, ci), jnp.float32) / jnp.sqrt(ci)
        b = 0.01 * jax.random.normal(k2, (co,), jnp.float32)
        return w, b

    keys = jax.random.split(key, 8)
    p = {}
    p["conv1_w"], p["conv1_b"] = conv_init(keys[0], 128, 3, 3, 3)
    p["conv2_w"], p["conv2_b"] = conv_init(keys[1], 64, 128, 4, 4)
    p["conv3_w"], p["conv3_b"] = conv_init(keys[2], 32, 64, 4, 4)
    p["conv4_w"], p["conv4_b"] = conv_init(keys[3], 16, 32, 3, 3)
    p["conv5_w"], p["conv5_b"] = conv_init(keys[4], 8, 16, 1, 1)
    p["fc1_w"], p["fc1_b"] = fc_init(keys[5], 256, 8 * 4 * 4)
    p["fc2_w"], p["fc2_b"] = fc_init(keys[6], 128, 256)
    p["fc3_w"], p["fc3_b"] = fc_init(keys[7], 101, 128)
    return p


def net_forward(params, x):
    dt = jnp.bfloat16
    # Single layout change at the boundary: NCHW -> NHWC, f32 -> bf16.
    x = jnp.transpose(x.astype(dt), (0, 2, 3, 1))
    # Dropout2d layers are identity at inference time (eval mode).
    x = conv2d_nhwc(x, params["conv1_w"], params["conv1_b"], 2, relu=True,
                    tm=1024)                                  # relu(drop1(conv1))
    x = conv2d_nhwc(x, params["conv2_w"], params["conv2_b"], 2, relu=True)
    x = conv2d_nhwc(x, params["conv3_w"], params["conv3_b"], 2, relu=False)
    x = maxpool3_relu(x)                                      # relu(pool1(drop1(.)))
    x = conv45_fused(x, params["conv4_w"], params["conv4_b"],
                     params["conv5_w"], params["conv5_b"])    # relu(conv4/5)
    n = x.shape[0]
    x = x.reshape(n, -1)                 # NHWC flatten: feature order (h,w,c)
    # Permute fc1 weights from PyTorch's NCHW flatten order (c,h,w) to (h,w,c)
    # so no activation transpose is needed before the FC stack.
    w1 = params["fc1_w"].reshape(256, 8, 4, 4).transpose(0, 2, 3, 1)
    w1 = w1.reshape(256, 8 * 4 * 4)
    return fc_fused(x, w1, params["fc1_b"], params["fc2_w"], params["fc2_b"],
                    params["fc3_w"], params["fc3_b"])


if __name__ == "__main__":
    key = jax.random.PRNGKey(0)
    kx, kp = jax.random.split(key)
    # 256x256 is the smallest standard spatial size for which the conv/pool
    # stack reaches the 4x4x8 feature map implied by x.view(-1, 8*4*4).
    x = jax.random.normal(kx, (2, 3, 256, 256), jnp.float32)
    params = init_params(kp)

    fwd = jax.jit(net_forward)
    out = fwd(params, x)
    jax.block_until_ready(out)
    assert out.shape == (2, 101), out.shape
    print("KERNEL_OK")
</pallas_src>

<mosaic_0001>
module attributes {stable_mosaic.version = 11 : i64} {
  func.func @_matmul_bias_kernel(%arg0: i32, %arg1: i32, %arg2: i32, %arg3: memref<1024x32xbf16, #tpu.memory_space<vmem>>, %arg4: memref<32x128xbf16, #tpu.memory_space<vmem>>, %arg5: memref<1x128xf32, #tpu.memory_space<vmem>>, %arg6: memref<1024x128xbf16, #tpu.memory_space<vmem>>, %arg7: memref<1024x128xf32, #tpu.memory_space<vmem>>) attributes {dimension_semantics = [#tpu.dimension_semantics<parallel>, #tpu.dimension_semantics<parallel>, #tpu.dimension_semantics<arbitrary>], iteration_bounds = array<i64: 32, 1, 1>, scalar_prefetch = 0 : i64, scratch_operands = 1 : i64, tpu.core_type = #tpu.core_type<tc>, window_params = [{transform_indices = @transform_0, window_bounds = array<i64: 1024, 32>}, {transform_indices = @transform_1, window_bounds = array<i64: 32, 128>}, {transform_indices = @transform_2, window_bounds = array<i64: 1, 128>}, {transform_indices = @transform_3, window_bounds = array<i64: 1024, 128>}]} {
    %c0_i32 = arith.constant 0 : i32
    %0 = arith.cmpi eq, %arg2, %c0_i32 : i32
    %1 = arith.extui %0 : i1 to i32
    %c0_i32_0 = arith.constant 0 : i32
    %2 = arith.cmpi ne, %1, %c0_i32_0 : i32
    scf.if %2 {
      %cst_10 = arith.constant 0.000000e+00 : f32
      %12 = vector.broadcast %cst_10 : f32 to vector<1024x128xf32>
      %c0_11 = arith.constant 0 : index
      %c0_12 = arith.constant 0 : index
      %13 = vector.load %arg7[%c0_11, %c0_12] : memref<1024x128xf32, #tpu.memory_space<vmem>>, vector<1024x128xf32>
      tpu.vector_store %arg7[%c0_11, %c0_12], %12 {strides = array<i32>} : memref<1024x128xf32, #tpu.memory_space<vmem>>, vector<1024x128xf32>,
    } else {
    }
    %c0 = arith.constant 0 : index
    %c0_1 = arith.constant 0 : index
    %3 = vector.load %arg7[%c0, %c0_1] : memref<1024x128xf32, #tpu.memory_space<vmem>>, vector<1024x128xf32>
    %c0_2 = arith.constant 0 : index
    %c0_3 = arith.constant 0 : index
    %4 = vector.load %arg3[%c0_2, %c0_3] : memref<1024x32xbf16, #tpu.memory_space<vmem>>, vector<1024x32xbf16>
    %c0_4 = arith.constant 0 : index
    %c0_5 = arith.constant 0 : index
    %5 = vector.load %arg4[%c0_4, %c0_5] : memref<32x128xbf16, #tpu.memory_space<vmem>>, vector<32x128xbf16>
    %cst = arith.constant dense<0.000000e+00> : vector<1024x128xf32>
    %6 = tpu.matmul %4, %5, %cst {dimension_numbers = #tpu.dot_dimension_numbers<[1], [0], [0], [1], [0, 0, 1, 1], [], []>} : vector<1024x32xbf16>, vector<32x128xbf16>, vector<1024x128xf32> -> vector<1024x128xf32>
    %7 = arith.addf %3, %6 : vector<1024x128xf32>
    %c0_6 = arith.constant 0 : index
    %c0_7 = arith.constant 0 : index
    %8 = vector.load %arg7[%c0_6, %c0_7] : memref<1024x128xf32, #tpu.memory_space<vmem>>, vector<1024x128xf32>
    tpu.vector_store %arg7[%c0_6, %c0_7], %7 {strides = array<i32>} : memref<1024x128xf32, #tpu.memory_space<vmem>>, vector<1024x128xf32>,
    %c0_i32_8 = arith.constant 0 : i32
    %9 = arith.cmpi eq, %arg2, %c0_i32_8 : i32
    %10 = arith.extui %9 : i1 to i32
    %c0_i32_9 = arith.constant 0 : i32
    %11 = arith.cmpi ne, %10, %c0_i32_9 : i32
    scf.if %11 {
      %c0_10 = arith.constant 0 : index
      %c0_11 = arith.constant 0 : index
      %12 = vector.load %arg7[%c0_10, %c0_11] : memref<1024x128xf32, #tpu.memory_space<vmem>>, vector<1024x128xf32>
      %c0_12 = arith.constant 0 : index
      %c0_13 = arith.constant 0 : index
      %13 = vector.load %arg5[%c0_12, %c0_13] : memref<1x128xf32, #tpu.memory_space<vmem>>, vector<1x128xf32>
      %14 = vector.broadcast %13 : vector<1x128xf32> to vector<1024x128xf32>
      %15 = arith.addf %12, %14 : vector<1024x128xf32>
      %cst_14 = arith.constant 0.000000e+00 : f32
      %16 = vector.broadcast %cst_14 : f32 to vector<1024x128xf32>
      %17 = arith.maximumf %15, %16 : vector<1024x128xf32>
      %18 = arith.truncf %17 : vector<1024x128xf32> to vector<1024x128xbf16>
      %c0_15 = arith.constant 0 : index
      %c0_16 = arith.constant 0 : index
      %19 = vector.load %arg6[%c0_15, %c0_16] : memref<1024x128xbf16, #tpu.memory_space<vmem>>, vector<1024x128xbf16>
      tpu.vector_store %arg6[%c0_15, %c0_16], %18 {strides = array<i32>} : memref<1024x128xbf16, #tpu.memory_space<vmem>>, vector<1024x128xbf16>,
    } else {
    }
    return
  }
  func.func @transform_0(%arg0: i32, %arg1: i32, %arg2: i32) -> (i32, i32) {
    %c0_i32 = arith.constant 0 : i32
    return %arg0, %arg2 : i32, i32
  }
  func.func @transform_1(%arg0: i32, %arg1: i32, %arg2: i32) -> (i32, i32) {
    %c0_i32 = arith.constant 0 : i32
    return %arg2, %arg1 : i32, i32
  }
  func.func @transform_2(%arg0: i32, %arg1: i32, %arg2: i32) -> (i32, i32) {
    %c0_i32 = arith.constant 0 : i32
    %c0_i32_0 = arith.constant 0 : i32
    return %c0_i32, %arg1 : i32, i32
  }
  func.func @transform_3(%arg0: i32, %arg1: i32, %arg2: i32) -> (i32, i32) {
    %c0_i32 = arith.constant 0 : i32
    return %arg0, %arg1 : i32, i32
  }
}

module attributes {stable_mosaic.version = 11 : i64} {
  func.func @_matmul_bias_kernel(%arg0: i32, %arg1: i32, %arg2: i32, %arg3: memref<512x512xbf16, #tpu.memory_space<vmem>>, %arg4: memref<512x64xbf16, #tpu.memory_space<vmem>>, %arg5: memref<1x64xf32, #tpu.memory_space<vmem>>, %arg6: memref<512x64xbf16, #tpu.memory_space<vmem>>, %arg7: memref<512x64xf32, #tpu.memory_space<vmem>>) attributes {dimension_semantics = [#tpu.dimension_semantics<parallel>, #tpu.dimension_semantics<parallel>, #tpu.dimension_semantics<arbitrary>], iteration_bounds = array<i64: 16, 1, 4>, scalar_prefetch = 0 : i64, scratch_operands = 1 : i64, tpu.core_type = #tpu.core_type<tc>, window_params = [{transform_indices = @transform_0, window_bounds = array<i64: 512, 512>}, {transform_indices = @transform_1, window_bounds = array<i64: 512, 64>}, {transform_indices = @transform_2, window_bounds = array<i64: 1, 64>}, {transform_indices = @transform_3, window_bounds = array<i64: 512, 64>}]} {
    %c0_i32 = arith.constant 0 : i32
    %0 = arith.cmpi eq, %arg2, %c0_i32 : i32
    %1 = arith.extui %0 : i1 to i32
    %c0_i32_0 = arith.constant 0 : i32
    %2 = arith.cmpi ne, %1, %c0_i32_0 : i32
    scf.if %2 {
      %cst_9 = arith.constant 0.000000e+00 : f32
      %12 = vector.broadcast %cst_9 : f32 to vector<512x64xf32>
      %c0_10 = arith.constant 0 : index
      %c0_11 = arith.constant 0 : index
      %13 = vector.load %arg7[%c0_10, %c0_11] : memref<512x64xf32, #tpu.memory_space<vmem>>, vector<512x64xf32>
      tpu.vector_store %arg7[%c0_10, %c0_11], %12 {strides = array<i32>} : memref<512x64xf32, #tpu.memory_space<vmem>>, vector<512x64xf32>,
    } else {
    }
    %c0 = arith.constant 0 : index
    %c0_1 = arith.constant 0 : index
    %3 = vector.load %arg7[%c0, %c0_1] : memref<512x64xf32, #tpu.memory_space<vmem>>, vector<512x64xf32>
    %c0_2 = arith.constant 0 : index
    %c0_3 = arith.constant 0 : index
    %4 = vector.load %arg3[%c0_2, %c0_3] : memref<512x512xbf16, #tpu.memory_space<vmem>>, vector<512x512xbf16>
    %c0_4 = arith.constant 0 : index
    %c0_5 = arith.constant 0 : index
    %5 = vector.load %arg4[%c0_4, %c0_5] : memref<512x64xbf16, #tpu.memory_space<vmem>>, vector<512x64xbf16>
    %cst = arith.constant dense<0.000000e+00> : vector<512x64xf32>
    %6 = tpu.matmul %4, %5, %cst {dimension_numbers = #tpu.dot_dimension_numbers<[1], [0], [0], [1], [0, 0, 1, 1], [], []>} : vector<512x512xbf16>, vector<512x64xbf16>, vector<512x64xf32> -> vector<512x64xf32>
    %7 = arith.addf %3, %6 : vector<512x64xf32>
    %c0_6 = arith.constant 0 : index
    %c0_7 = arith.constant 0 : index
    %8 = vector.load %arg7[%c0_6, %c0_7] : memref<512x64xf32, #tpu.memory_space<vmem>>, vector<512x64xf32>
    tpu.vector_store %arg7[%c0_6, %c0_7], %7 {strides = array<i32>} : memref<512x64xf32, #tpu.memory_space<vmem>>, vector<512x64xf32>,
    %c3_i32 = arith.constant 3 : i32
    %9 = arith.cmpi eq, %arg2, %c3_i32 : i32
    %10 = arith.extui %9 : i1 to i32
    %c0_i32_8 = arith.constant 0 : i32
    %11 = arith.cmpi ne, %10, %c0_i32_8 : i32
    scf.if %11 {
      %c0_9 = arith.constant 0 : index
      %c0_10 = arith.constant 0 : index
      %12 = vector.load %arg7[%c0_9, %c0_10] : memref<512x64xf32, #tpu.memory_space<vmem>>, vector<512x64xf32>
      %c0_11 = arith.constant 0 : index
      %c0_12 = arith.constant 0 : index
      %13 = vector.load %arg5[%c0_11, %c0_12] : memref<1x64xf32, #tpu.memory_space<vmem>>, vector<1x64xf32>
      %14 = vector.broadcast %13 : vector<1x64xf32> to vector<512x64xf32>
      %15 = arith.addf %12, %14 : vector<512x64xf32>
      %cst_13 = arith.constant 0.000000e+00 : f32
      %16 = vector.broadcast %cst_13 : f32 to vector<512x64xf32>
      %17 = arith.maximumf %15, %16 : vector<512x64xf32>
      %18 = arith.truncf %17 : vector<512x64xf32> to vector<512x64xbf16>
      %c0_14 = arith.constant 0 : index
      %c0_15 = arith.constant 0 : index
      %19 = vector.load %arg6[%c0_14, %c0_15] : memref<512x64xbf16, #tpu.memory_space<vmem>>, vector<512x64xbf16>
      tpu.vector_store %arg6[%c0_14, %c0_15], %18 {strides = array<i32>} : memref<512x64xbf16, #tpu.memory_space<vmem>>, vector<512x64xbf16>,
    } else {
    }
    return
  }
  func.func @transform_0(%arg0: i32, %arg1: i32, %arg2: i32) -> (i32, i32) {
    %c0_i32 = arith.constant 0 : i32
    return %arg0, %arg2 : i32, i32
  }
  func.func @transform_1(%arg0: i32, %arg1: i32, %arg2: i32) -> (i32, i32) {
    %c0_i32 = arith.constant 0 : i32
    return %arg2, %arg1 : i32, i32
  }
  func.func @transform_2(%arg0: i32, %arg1: i32, %arg2: i32) -> (i32, i32) {
    %c0_i32 = arith.constant 0 : i32
    %c0_i32_0 = arith.constant 0 : i32
    return %c0_i32, %arg1 : i32, i32
  }
  func.func @transform_3(%arg0: i32, %arg1: i32, %arg2: i32) -> (i32, i32) {
    %c0_i32 = arith.constant 0 : i32
    return %arg0, %arg1 : i32, i32
  }
}

module attributes {stable_mosaic.version = 11 : i64} {
  func.func @_matmul_bias_kernel(%arg0: i32, %arg1: i32, %arg2: i32, %arg3: memref<512x512xbf16, #tpu.memory_space<vmem>>, %arg4: memref<512x32xbf16, #tpu.memory_space<vmem>>, %arg5: memref<1x32xf32, #tpu.memory_space<vmem>>, %arg6: memref<512x32xbf16, #tpu.memory_space<vmem>>, %arg7: memref<512x32xf32, #tpu.memory_space<vmem>>) attributes {dimension_semantics = [#tpu.dimension_semantics<parallel>, #tpu.dimension_semantics<parallel>, #tpu.dimension_semantics<arbitrary>], iteration_bounds = array<i64: 4, 1, 2>, scalar_prefetch = 0 : i64, scratch_operands = 1 : i64, tpu.core_type = #tpu.core_type<tc>, window_params = [{transform_indices = @transform_0, window_bounds = array<i64: 512, 512>}, {transform_indices = @transform_1, window_bounds = array<i64: 512, 32>}, {transform_indices = @transform_2, window_bounds = array<i64: 1, 32>}, {transform_indices = @transform_3, window_bounds = array<i64: 512, 32>}]} {
    %c0_i32 = arith.constant 0 : i32
    %0 = arith.cmpi eq, %arg2, %c0_i32 : i32
    %1 = arith.extui %0 : i1 to i32
    %c0_i32_0 = arith.constant 0 : i32
    %2 = arith.cmpi ne, %1, %c0_i32_0 : i32
    scf.if %2 {
      %cst_9 = arith.constant 0.000000e+00 : f32
      %12 = vector.broadcast %cst_9 : f32 to vector<512x32xf32>
      %c0_10 = arith.constant 0 : index
      %c0_11 = arith.constant 0 : index
      %13 = vector.load %arg7[%c0_10, %c0_11] : memref<512x32xf32, #tpu.memory_space<vmem>>, vector<512x32xf32>
      tpu.vector_store %arg7[%c0_10, %c0_11], %12 {strides = array<i32>} : memref<512x32xf32, #tpu.memory_space<vmem>>, vector<512x32xf32>,
    } else {
    }
    %c0 = arith.constant 0 : index
    %c0_1 = arith.constant 0 : index
    %3 = vector.load %arg7[%c0, %c0_1] : memref<512x32xf32, #tpu.memory_space<vmem>>, vector<512x32xf32>
    %c0_2 = arith.constant 0 : index
    %c0_3 = arith.constant 0 : index
    %4 = vector.load %arg3[%c0_2, %c0_3] : memref<512x512xbf16, #tpu.memory_space<vmem>>, vector<512x512xbf16>
    %c0_4 = arith.constant 0 : index
    %c0_5 = arith.constant 0 : index
    %5 = vector.load %arg4[%c0_4, %c0_5] : memref<512x32xbf16, #tpu.memory_space<vmem>>, vector<512x32xbf16>
    %cst = arith.constant dense<0.000000e+00> : vector<512x32xf32>
    %6 = tpu.matmul %4, %5, %cst {dimension_numbers = #tpu.dot_dimension_numbers<[1], [0], [0], [1], [0, 0, 1, 1], [], []>} : vector<512x512xbf16>, vector<512x32xbf16>, vector<512x32xf32> -> vector<512x32xf32>
    %7 = arith.addf %3, %6 : vector<512x32xf32>
    %c0_6 = arith.constant 0 : index
    %c0_7 = arith.constant 0 : index
    %8 = vector.load %arg7[%c0_6, %c0_7] : memref<512x32xf32, #tpu.memory_space<vmem>>, vector<512x32xf32>
    tpu.vector_store %arg7[%c0_6, %c0_7], %7 {strides = array<i32>} : memref<512x32xf32, #tpu.memory_space<vmem>>, vector<512x32xf32>,
    %c1_i32 = arith.constant 1 : i32
    %9 = arith.cmpi eq, %arg2, %c1_i32 : i32
    %10 = arith.extui %9 : i1 to i32
    %c0_i32_8 = arith.constant 0 : i32
    %11 = arith.cmpi ne, %10, %c0_i32_8 : i32
    scf.if %11 {
      %c0_9 = arith.constant 0 : index
      %c0_10 = arith.constant 0 : index
      %12 = vector.load %arg7[%c0_9, %c0_10] : memref<512x32xf32, #tpu.memory_space<vmem>>, vector<512x32xf32>
      %c0_11 = arith.constant 0 : index
      %c0_12 = arith.constant 0 : index
      %13 = vector.load %arg5[%c0_11, %c0_12] : memref<1x32xf32, #tpu.memory_space<vmem>>, vector<1x32xf32>
      %14 = vector.broadcast %13 : vector<1x32xf32> to vector<512x32xf32>
      %15 = arith.addf %12, %14 : vector<512x32xf32>
      %16 = arith.truncf %15 : vector<512x32xf32> to vector<512x32xbf16>
      %c0_13 = arith.constant 0 : index
      %c0_14 = arith.constant 0 : index
      %17 = vector.load %arg6[%c0_13, %c0_14] : memref<512x32xbf16, #tpu.memory_space<vmem>>, vector<512x32xbf16>
      tpu.vector_store %arg6[%c0_13, %c0_14], %16 {strides = array<i32>} : memref<512x32xbf16, #tpu.memory_space<vmem>>, vector<512x32xbf16>,
    } else {
    }
    return
  }
  func.func @transform_0(%arg0: i32, %arg1: i32, %arg2: i32) -> (i32, i32) {
    %c0_i32 = arith.constant 0 : i32
    return %arg0, %arg2 : i32, i32
  }
  func.func @transform_1(%arg0: i32, %arg1: i32, %arg2: i32) -> (i32, i32) {
    %c0_i32 = arith.constant 0 : i32
    return %arg2, %arg1 : i32, i32
  }
  func.func @transform_2(%arg0: i32, %arg1: i32, %arg2: i32) -> (i32, i32) {
    %c0_i32 = arith.constant 0 : i32
    %c0_i32_0 = arith.constant 0 : i32
    return %c0_i32, %arg1 : i32, i32
  }
  func.func @transform_3(%arg0: i32, %arg1: i32, %arg2: i32) -> (i32, i32) {
    %c0_i32 = arith.constant 0 : i32
    return %arg0, %arg1 : i32, i32
  }
}

module attributes {stable_mosaic.version = 11 : i64} {
  func.func @_maxpool_relu_kernel(%arg0: i32, %arg1: memref<9x6400xbf16, #tpu.memory_space<vmem>>, %arg2: memref<1x6400xbf16, #tpu.memory_space<vmem>>) attributes {dimension_semantics = [#tpu.dimension_semantics<arbitrary>], iteration_bounds = array<i64: 1>, scalar_prefetch = 0 : i64, scratch_operands = 0 : i64, tpu.core_type = #tpu.core_type<tc>, window_params = [{pipeline_mode = #tpu.pipeline_mode<synchronous>, transform_indices = @transform_0, window_bounds = array<i64: 9, 6400>}, {pipeline_mode = #tpu.pipeline_mode<synchronous>, transform_indices = @transform_1, window_bounds = array<i64: 1, 6400>}]} {
    %c0 = arith.constant 0 : index
    %c0_0 = arith.constant 0 : index
    %0 = vector.load %arg1[%c0, %c0_0] : memref<9x6400xbf16, #tpu.memory_space<vmem>>, vector<9x6400xbf16>
    %cst = arith.constant dense<0xFF80> : vector<6400xbf16>
    %1 = vector.multi_reduction <maximumf>, %0, %cst [0] : vector<9x6400xbf16> to vector<6400xbf16>
    %2 = vector.shape_cast %1 : vector<6400xbf16> to vector<1x6400xbf16>
    %cst_1 = arith.constant 0.000000e+00 : bf16
    %3 = vector.broadcast %cst_1 : bf16 to vector<1x6400xbf16>
    %4 = arith.maximumf %2, %3 : vector<1x6400xbf16>
    %c0_2 = arith.constant 0 : index
    %c0_3 = arith.constant 0 : index
    %5 = vector.load %arg2[%c0_2, %c0_3] : memref<1x6400xbf16, #tpu.memory_space<vmem>>, vector<1x6400xbf16>
    tpu.vector_store %arg2[%c0_2, %c0_3], %4 {strides = array<i32>} : memref<1x6400xbf16, #tpu.memory_space<vmem>>, vector<1x6400xbf16>,
    return
  }
  func.func @transform_0(%arg0: i32) -> (i32, i32) {
    %c0_i32 = arith.constant 0 : i32
    %c0_i32_0 = arith.constant 0 : i32
    %c0_i32_1 = arith.constant 0 : i32
    return %c0_i32, %c0_i32_0 : i32, i32
  }
  func.func @transform_1(%arg0: i32) -> (i32, i32) {
    %c0_i32 = arith.constant 0 : i32
    %c0_i32_0 = arith.constant 0 : i32
    %c0_i32_1 = arith.constant 0 : i32
    return %c0_i32, %c0_i32_0 : i32, i32
  }
}

module attributes {stable_mosaic.version = 11 : i64} {
  func.func @_conv45_kernel(%arg0: i32, %arg1: memref<32x288xbf16, #tpu.memory_space<vmem>>, %arg2: memref<288x16xbf16, #tpu.memory_space<vmem>>, %arg3: memref<1x16xf32, #tpu.memory_space<vmem>>, %arg4: memref<16x8xbf16, #tpu.memory_space<vmem>>, %arg5: memref<1x8xf32, #tpu.memory_space<vmem>>, %arg6: memref<32x8xbf16, #tpu.memory_space<vmem>>) attributes {dimension_semantics = [#tpu.dimension_semantics<arbitrary>], iteration_bounds = array<i64: 1>, scalar_prefetch = 0 : i64, scratch_operands = 0 : i64, tpu.core_type = #tpu.core_type<tc>, window_params = [{pipeline_mode = #tpu.pipeline_mode<synchronous>, transform_indices = @transform_0, window_bounds = array<i64: 32, 288>}, {pipeline_mode = #tpu.pipeline_mode<synchronous>, transform_indices = @transform_1, window_bounds = array<i64: 288, 16>}, {pipeline_mode = #tpu.pipeline_mode<synchronous>, transform_indices = @transform_2, window_bounds = array<i64: 1, 16>}, {pipeline_mode = #tpu.pipeline_mode<synchronous>, transform_indices = @transform_3, window_bounds = array<i64: 16, 8>}, {pipeline_mode = #tpu.pipeline_mode<synchronous>, transform_indices = @transform_4, window_bounds = array<i64: 1, 8>}, {pipeline_mode = #tpu.pipeline_mode<synchronous>, transform_indices = @transform_5, window_bounds = array<i64: 32, 8>}]} {
    %c0 = arith.constant 0 : index
    %c0_0 = arith.constant 0 : index
    %0 = vector.load %arg1[%c0, %c0_0] : memref<32x288xbf16, #tpu.memory_space<vmem>>, vector<32x288xbf16>
    %c0_1 = arith.constant 0 : index
    %c0_2 = arith.constant 0 : index
    %1 = vector.load %arg2[%c0_1, %c0_2] : memref<288x16xbf16, #tpu.memory_space<vmem>>, vector<288x16xbf16>
    %cst = arith.constant dense<0.000000e+00> : vector<32x16xf32>
    %2 = tpu.matmul %0, %1, %cst {dimension_numbers = #tpu.dot_dimension_numbers<[1], [0], [0], [1], [0, 0, 1, 1], [], []>} : vector<32x288xbf16>, vector<288x16xbf16>, vector<32x16xf32> -> vector<32x16xf32>
    %c0_3 = arith.constant 0 : index
    %c0_4 = arith.constant 0 : index
    %3 = vector.load %arg3[%c0_3, %c0_4] : memref<1x16xf32, #tpu.memory_space<vmem>>, vector<1x16xf32>
    %4 = vector.broadcast %3 : vector<1x16xf32> to vector<32x16xf32>
    %5 = arith.addf %2, %4 : vector<32x16xf32>
    %cst_5 = arith.constant 0.000000e+00 : f32
    %6 = vector.broadcast %cst_5 : f32 to vector<32x16xf32>
    %7 = arith.maximumf %5, %6 : vector<32x16xf32>
    %8 = arith.truncf %7 : vector<32x16xf32> to vector<32x16xbf16>
    %c0_6 = arith.constant 0 : index
    %c0_7 = arith.constant 0 : index
    %9 = vector.load %arg4[%c0_6, %c0_7] : memref<16x8xbf16, #tpu.memory_space<vmem>>, vector<16x8xbf16>
    %cst_8 = arith.constant dense<0.000000e+00> : vector<32x8xf32>
    %10 = tpu.matmul %8, %9, %cst_8 {dimension_numbers = #tpu.dot_dimension_numbers<[1], [0], [0], [1], [0, 0, 1, 1], [], []>} : vector<32x16xbf16>, vector<16x8xbf16>, vector<32x8xf32> -> vector<32x8xf32>
    %c0_9 = arith.constant 0 : index
    %c0_10 = arith.constant 0 : index
    %11 = vector.load %arg5[%c0_9, %c0_10] : memref<1x8xf32, #tpu.memory_space<vmem>>, vector<1x8xf32>
    %12 = vector.broadcast %11 : vector<1x8xf32> to vector<32x8xf32>
    %13 = arith.addf %10, %12 : vector<32x8xf32>
    %cst_11 = arith.constant 0.000000e+00 : f32
    %14 = vector.broadcast %cst_11 : f32 to vector<32x8xf32>
    %15 = arith.maximumf %13, %14 : vector<32x8xf32>
    %16 = arith.truncf %15 : vector<32x8xf32> to vector<32x8xbf16>
    %c0_12 = arith.constant 0 : index
    %c0_13 = arith.constant 0 : index
    %17 = vector.load %arg6[%c0_12, %c0_13] : memref<32x8xbf16, #tpu.memory_space<vmem>>, vector<32x8xbf16>
    tpu.vector_store %arg6[%c0_12, %c0_13], %16 {strides = array<i32>} : memref<32x8xbf16, #tpu.memory_space<vmem>>, vector<32x8xbf16>,
    return
  }
  func.func @transform_0(%arg0: i32) -> (i32, i32) {
    %c0_i32 = arith.constant 0 : i32
    %c0_i32_0 = arith.constant 0 : i32
    %c0_i32_1 = arith.constant 0 : i32
    return %c0_i32, %c0_i32_0 : i32, i32
  }
  func.func @transform_1(%arg0: i32) -> (i32, i32) {
    %c0_i32 = arith.constant 0 : i32
    %c0_i32_0 = arith.constant 0 : i32
    %c0_i32_1 = arith.constant 0 : i32
    return %c0_i32, %c0_i32_0 : i32, i32
  }
  func.func @transform_2(%arg0: i32) -> (i32, i32) {
    %c0_i32 = arith.constant 0 : i32
    %c0_i32_0 = arith.constant 0 : i32
    %c0_i32_1 = arith.constant 0 : i32
    return %c0_i32, %c0_i32_0 : i32, i32
  }
  func.func @transform_3(%arg0: i32) -> (i32, i32) {
    %c0_i32 = arith.constant 0 : i32
    %c0_i32_0 = arith.constant 0 : i32
    %c0_i32_1 = arith.constant 0 : i32
    return %c0_i32, %c0_i32_0 : i32, i32
  }
  func.func @transform_4(%arg0: i32) -> (i32, i32) {
    %c0_i32 = arith.constant 0 : i32
    %c0_i32_0 = arith.constant 0 : i32
    %c0_i32_1 = arith.constant 0 : i32
    return %c0_i32, %c0_i32_0 : i32, i32
  }
  func.func @transform_5(%arg0: i32) -> (i32, i32) {
    %c0_i32 = arith.constant 0 : i32
    %c0_i32_0 = arith.constant 0 : i32
    %c0_i32_1 = arith.constant 0 : i32
    return %c0_i32, %c0_i32_0 : i32, i32
  }
}

module attributes {stable_mosaic.version = 11 : i64} {
  func.func @_fc_fused_kernel(%arg0: i32, %arg1: memref<8x128xbf16, #tpu.memory_space<vmem>>, %arg2: memref<128x256xbf16, #tpu.memory_space<vmem>>, %arg3: memref<1x256xf32, #tpu.memory_space<vmem>>, %arg4: memref<256x128xbf16, #tpu.memory_space<vmem>>, %arg5: memref<1x128xf32, #tpu.memory_space<vmem>>, %arg6: memref<128x101xbf16, #tpu.memory_space<vmem>>, %arg7: memref<1x101xf32, #tpu.memory_space<vmem>>, %arg8: memref<8x101xf32, #tpu.memory_space<vmem>>) attributes {dimension_semantics = [#tpu.dimension_semantics<arbitrary>], iteration_bounds = array<i64: 1>, scalar_prefetch = 0 : i64, scratch_operands = 0 : i64, tpu.core_type = #tpu.core_type<tc>, window_params = [{pipeline_mode = #tpu.pipeline_mode<synchronous>, transform_indices = @transform_0, window_bounds = array<i64: 8, 128>}, {pipeline_mode = #tpu.pipeline_mode<synchronous>, transform_indices = @transform_1, window_bounds = array<i64: 128, 256>}, {pipeline_mode = #tpu.pipeline_mode<synchronous>, transform_indices = @transform_2, window_bounds = array<i64: 1, 256>}, {pipeline_mode = #tpu.pipeline_mode<synchronous>, transform_indices = @transform_3, window_bounds = array<i64: 256, 128>}, {pipeline_mode = #tpu.pipeline_mode<synchronous>, transform_indices = @transform_4, window_bounds = array<i64: 1, 128>}, {pipeline_mode = #tpu.pipeline_mode<synchronous>, transform_indices = @transform_5, window_bounds = array<i64: 128, 101>}, {pipeline_mode = #tpu.pipeline_mode<synchronous>, transform_indices = @transform_6, window_bounds = array<i64: 1, 101>}, {pipeline_mode = #tpu.pipeline_mode<synchronous>, transform_indices = @transform_7, window_bounds = array<i64: 8, 101>}]} {
    %c0 = arith.constant 0 : index
    %c0_0 = arith.constant 0 : index
    %0 = vector.load %arg1[%c0, %c0_0] : memref<8x128xbf16, #tpu.memory_space<vmem>>, vector<8x128xbf16>
    %c0_1 = arith.constant 0 : index
    %c0_2 = arith.constant 0 : index
    %1 = vector.load %arg2[%c0_1, %c0_2] : memref<128x256xbf16, #tpu.memory_space<vmem>>, vector<128x256xbf16>
    %cst = arith.constant dense<0.000000e+00> : vector<8x256xf32>
    %2 = tpu.matmul %0, %1, %cst {dimension_numbers = #tpu.dot_dimension_numbers<[1], [0], [0], [1], [0, 0, 1, 1], [], []>} : vector<8x128xbf16>, vector<128x256xbf16>, vector<8x256xf32> -> vector<8x256xf32>
    %c0_3 = arith.constant 0 : index
    %c0_4 = arith.constant 0 : index
    %3 = vector.load %arg3[%c0_3, %c0_4] : memref<1x256xf32, #tpu.memory_space<vmem>>, vector<1x256xf32>
    %4 = vector.broadcast %3 : vector<1x256xf32> to vector<8x256xf32>
    %5 = arith.addf %2, %4 : vector<8x256xf32>
    %cst_5 = arith.constant 0.000000e+00 : f32
    %6 = vector.broadcast %cst_5 : f32 to vector<8x256xf32>
    %7 = arith.maximumf %5, %6 : vector<8x256xf32>
    %8 = arith.truncf %7 : vector<8x256xf32> to vector<8x256xbf16>
    %c0_6 = arith.constant 0 : index
    %c0_7 = arith.constant 0 : index
    %9 = vector.load %arg4[%c0_6, %c0_7] : memref<256x128xbf16, #tpu.memory_space<vmem>>, vector<256x128xbf16>
    %cst_8 = arith.constant dense<0.000000e+00> : vector<8x128xf32>
    %10 = tpu.matmul %8, %9, %cst_8 {dimension_numbers = #tpu.dot_dimension_numbers<[1], [0], [0], [1], [0, 0, 1, 1], [], []>} : vector<8x256xbf16>, vector<256x128xbf16>, vector<8x128xf32> -> vector<8x128xf32>
    %c0_9 = arith.constant 0 : index
    %c0_10 = arith.constant 0 : index
    %11 = vector.load %arg5[%c0_9, %c0_10] : memref<1x128xf32, #tpu.memory_space<vmem>>, vector<1x128xf32>
    %12 = vector.broadcast %11 : vector<1x128xf32> to vector<8x128xf32>
    %13 = arith.addf %10, %12 : vector<8x128xf32>
    %cst_11 = arith.constant 0.000000e+00 : f32
    %14 = vector.broadcast %cst_11 : f32 to vector<8x128xf32>
    %15 = arith.maximumf %13, %14 : vector<8x128xf32>
    %16 = arith.truncf %15 : vector<8x128xf32> to vector<8x128xbf16>
    %c0_12 = arith.constant 0 : index
    %c0_13 = arith.constant 0 : index
    %17 = vector.load %arg6[%c0_12, %c0_13] : memref<128x101xbf16, #tpu.memory_space<vmem>>, vector<128x101xbf16>
    %cst_14 = arith.constant dense<0.000000e+00> : vector<8x101xf32>
    %18 = tpu.matmul %16, %17, %cst_14 {dimension_numbers = #tpu.dot_dimension_numbers<[1], [0], [0], [1], [0, 0, 1, 1], [], []>} : vector<8x128xbf16>, vector<128x101xbf16>, vector<8x101xf32> -> vector<8x101xf32>
    %c0_15 = arith.constant 0 : index
    %c0_16 = arith.constant 0 : index
    %19 = vector.load %arg7[%c0_15, %c0_16] : memref<1x101xf32, #tpu.memory_space<vmem>>, vector<1x101xf32>
    %20 = vector.broadcast %19 : vector<1x101xf32> to vector<8x101xf32>
    %21 = arith.addf %18, %20 : vector<8x101xf32>
    %c0_17 = arith.constant 0 : index
    %c0_18 = arith.constant 0 : index
    %22 = vector.load %arg8[%c0_17, %c0_18] : memref<8x101xf32, #tpu.memory_space<vmem>>, vector<8x101xf32>
    tpu.vector_store %arg8[%c0_17, %c0_18], %21 {strides = array<i32>} : memref<8x101xf32, #tpu.memory_space<vmem>>, vector<8x101xf32>,
    return
  }
  func.func @transform_0(%arg0: i32) -> (i32, i32) {
    %c0_i32 = arith.constant 0 : i32
    %c0_i32_0 = arith.constant 0 : i32
    %c0_i32_1 = arith.constant 0 : i32
    return %c0_i32, %c0_i32_0 : i32, i32
  }
  func.func @transform_1(%arg0: i32) -> (i32, i32) {
    %c0_i32 = arith.constant 0 : i32
    %c0_i32_0 = arith.constant 0 : i32
    %c0_i32_1 = arith.constant 0 : i32
    return %c0_i32, %c0_i32_0 : i32, i32
  }
  func.func @transform_2(%arg0: i32) -> (i32, i32) {
    %c0_i32 = arith.constant 0 : i32
    %c0_i32_0 = arith.constant 0 : i32
    %c0_i32_1 = arith.constant 0 : i32
    return %c0_i32, %c0_i32_0 : i32, i32
  }
  func.func @transform_3(%arg0: i32) -> (i32, i32) {
    %c0_i32 = arith.constant 0 : i32
    %c0_i32_0 = arith.constant 0 : i32
    %c0_i32_1 = arith.constant 0 : i32
    return %c0_i32, %c0_i32_0 : i32, i32
  }
  func.func @transform_4(%arg0: i32) -> (i32, i32) {
    %c0_i32 = arith.constant 0 : i32
    %c0_i32_0 = arith.constant 0 : i32
    %c0_i32_1 = arith.constant 0 : i32
    return %c0_i32, %c0_i32_0 : i32, i32
  }
  func.func @transform_5(%arg0: i32) -> (i32, i32) {
    %c0_i32 = arith.constant 0 : i32
    %c0_i32_0 = arith.constant 0 : i32
    %c0_i32_1 = arith.constant 0 : i32
    return %c0_i32, %c0_i32_0 : i32, i32
  }
  func.func @transform_6(%arg0: i32) -> (i32, i32) {
    %c0_i32 = arith.constant 0 : i32
    %c0_i32_0 = arith.constant 0 : i32
    %c0_i32_1 = arith.constant 0 : i32
    return %c0_i32, %c0_i32_0 : i32, i32
  }
  func.func @transform_7(%arg0: i32) -> (i32, i32) {
    %c0_i32 = arith.constant 0 : i32
    %c0_i32_0 = arith.constant 0 : i32
    %c0_i32_1 = arith.constant 0 : i32
    return %c0_i32, %c0_i32_0 : i32, i32
  }
}

</mosaic_0001>

<bundles_post_ra>
// kernel: net_forward.6
= control target key start
LH: loop header
LB: loop body
LE: loop exit
PB: predicated region body
PF: predicated region fallthrough
CT: control target
= control target key end

     0   :  { %s4833_s12 = smov 0   ;;  %s4835_s13 = smov 0   ;;  %s5424_s0 = inlined_call_operand.vmem [shape: bf16[32258,32], index: 0, kind: input, shape index: {}]   ;;  %s5425_s1 = inlined_call_operand.vmem [shape: bf16[32,128], index: 1, kind: input, shape index: {}]   ;;  %s5426_s2 = inlined_call_operand.vmem [shape: f32[1,128], index: 2, kind: input, shape index: {}]   ;;  %s5427_s3 = inlined_call_operand.vmem [shape: bf16[32258,128], index: 3, kind: output, shape index: {}]  }
   0x1   :  { %s4837_s14 = smov 0   ;;  %s4839_s15 = smov 0  }
   0x2   :  { %s4841_s16 = smov 0  }
   0x3 LB: > { %s3537_s17 = sadd.s32 4294967295, %s4779_s16   ;;  %s32_s18 = sadd.s32 1, %s4775_s15  ;;  %s4779_s16 = sphi %s4841_s16, %s13_s16   ;;  %s4775_s15 = sphi %s4839_s15, %s5435_s15   ;;  %s4771_s14 = sphi %s4837_s14, %s5434_s14   ;;  %s4767_s13 = sphi %s4835_s13, %s5433_s13   ;;  %s4763_s12 = sphi %s4833_s12, %s5432_s12  }
   0x4   : > { %p34_p0 = scmp.ge.s32.totalorder %s32_s18, 32  ;;  %s123_s19 = sadd.s32 1, %s4767_s13 }
   0x5   : > { %p133_p1 = scmp.ne.s32.totalorder %s4767_s13, %s4763_s12  ;;  %p134_p2 = scmp.eq.s32.totalorder %s3537_s17, 31 }
   0x6   : > { %s5437_s18 = smov (%p34_p0, %s32_s18), 0  ;;  %p3543_p4 = scmp.ge.s32.totalorder %s4779_s16, 1 }
   0x7   : > { %p4865_p3 = por %p134_p2, %p133_p1  ;;  %s118_s21 = ssub.s32 %s4775_s15, %s5437_s18 }
   0x8   : > { %p196_p5 = scmp.lt.s32.totalorder %s4779_s16, 33  ;;  %p121_p6 = scmp.eq.s32.totalorder %s118_s21, 0 }
   0xa   : > { %p197_p7 = pnand %p3543_p4, %p196_p5 }
   0xb   : > { %s4874_s22 = scalar_select %p121_p6, %s4767_s13, %s123_s19  }
   0xc   : > { %200 = sbr.rel (%p197_p7) target bundleno = 459 (0x1cb), region = 32  ;;  %v4643_v0 = vld [vmem:[%s5425_s1] sm:$0xff] (!%p197_p7)   ;;  %s4880_s25 = sshll.u32 (!%p197_p7), %s4771_s14, 7  ;;  %v4644_v1 = vld [vmem:[%s5425_s1 + $0x8] sm:$0xff] (!%p197_p7)   ;;  %vm996_vm0 = vcmask (!%p197_p7), 261120  }
   0xd   : > { %p242_p8 = scmp.lt.s32.totalorder (!%p197_p7), %s4880_s25, 4032  ;;  %4403 = vmatprep.subr.bf16.mxu0 (!%p197_p7), %v4643_v0  ;;  %4535 = vmatprep.subr.bf16.mxu1 (!%p197_p7), %v4643_v0  ;;  %s234_s8 = sand.u32 (!%p197_p7), 1, %s4763_s12  }
   0xe   : > { %4404 = vmatpush3.bf16.msra.mxu0 (!%p197_p7), %v4643_v0  ;;  %4537 = vmatpush3.bf16.msra.mxu1 (!%p197_p7), %v4643_v0  ;;  %s3544_s9 = sshll.u32 (!%p197_p7), %s234_s8, 9 }
   0xf   : > { %4405 = vmatprep.subr.bf16.mxu0 (!%p197_p7), %v4644_v1  ;;  %4536 = vmatprep.subr.bf16.mxu1 (!%p197_p7), %v4644_v1  ;;  %s5034_s10 = scalar_lea.vmem (!%p197_p7), [#allocation3], %s3544_s9  }
  0x12   : > { %4406 = vmatpush3.bf16.msra.mxu0 (!%p197_p7), %v4644_v1  ;;  %4538 = vmatpush3.bf16.msra.mxu1 (!%p197_p7), %v4644_v1 }
  0x13   : > { %s243_s28 = scalar_select %p242_p8, %s4880_s25, 4032 }
  0x14   : > { %s3032_s11 = ssub.s32 (%p4865_p3), 4033, %s4880_s25  ;;  %s3951_s12 = sshll.u32 (%p4865_p3), %s4771_s14, 9 }
  0x15   : > { %s3546_s29 = sshll.u32 %s243_s28, 2  ;;  %p3033_p9 = scmp.lt.s32.totalorder (%p4865_p3), %s3032_s11, 128 }
  0x16   : > { %s4890_s5 = scalar_lea.vmem %s5424_s0, %s3546_s29  ;;  %s5227_s21 = scalar_lea.vmem (%p4865_p3), %s5427_s3, %s3951_s12  }
  0x17   : > { %v4645_v2 = vld [vmem:[%s4890_s5] sm:$0xff]   ;;  %v4647_v4 = vld [vmem:[%s4890_s5 + $0x8] sm:$0xff]   ;;  %v4649_v6 = vld [vmem:[%s4890_s5 + $0x10] sm:$0xff]  }
  0x18   : > { %v4646_v3 = vld [vmem:[%s4890_s5 + $0x100] sm:$0xff]   ;;  %4407 = vmatprep.mubr.msk.bf16.mxu0 %vm996_vm0, %v4645_v2  ;;  %v4648_v5 = vld [vmem:[%s4890_s5 + $0x108] sm:$0xff]   ;;  %v4650_v7 = vld [vmem:[%s4890_s5 + $0x110] sm:$0xff]  }
  0x19   : > { %4471 = vmatprep.mubr.msk.bf16.mxu1 %vm996_vm0, %v4646_v3  ;;  %4408 = vmatmul.mubr.msk.bf16.vlgmr.msra.gmra.mrb[0].mxu0 %vm996_vm0, %v4647_v4  ;;  %v4651_v8 = vld [vmem:[%s4890_s5 + $0x18] sm:$0xff]   ;;  %v4653_v10 = vld [vmem:[%s4890_s5 + $0x20] sm:$0xff]   ;;  %v4655_v12 = vld [vmem:[%s4890_s5 + $0x28] sm:$0xff]  }
  0x1a   : > { %4472 = vmatmul.mubr.msk.bf16.vlgmr.msra.gmra.mrb[0].mxu1 %vm996_vm0, %v4648_v5  ;;  %4411 = vmatprep.mubr.msk.bf16.mxu0 %vm996_vm0, %v4649_v6  ;;  %v4652_v9 = vld [vmem:[%s4890_s5 + $0x118] sm:$0xff]   ;;  %v4654_v11 = vld [vmem:[%s4890_s5 + $0x120] sm:$0xff]   ;;  %v4656_v13 = vld [vmem:[%s4890_s5 + $0x128] sm:$0xff]  }
  0x1b   : > { %4475 = vmatprep.mubr.msk.bf16.mxu1 %vm996_vm0, %v4650_v7  ;;  %v4657_v14 = vld [vmem:[%s4890_s5 + $0x30] sm:$0xff]   ;;  %v4659_v16 = vld [vmem:[%s4890_s5 + $0x38] sm:$0xff]   ;;  %v4661_v18 = vld [vmem:[%s4890_s5 + $0x40] sm:$0xff]  }
  0x1c   : > { %v4658_v15 = vld [vmem:[%s4890_s5 + $0x130] sm:$0xff]   ;;  %v4660_v17 = vld [vmem:[%s4890_s5 + $0x138] sm:$0xff]   ;;  %v4662_v19 = vld [vmem:[%s4890_s5 + $0x140] sm:$0xff]  }
  0x1d   : > { %v4663_v20 = vld [vmem:[%s4890_s5 + $0x48] sm:$0xff]   ;;  %v4665_v22 = vld [vmem:[%s4890_s5 + $0x50] sm:$0xff]   ;;  %v4667_v24 = vld [vmem:[%s4890_s5 + $0x58] sm:$0xff]  }
  0x1e   : > { %v4664_v21 = vld [vmem:[%s4890_s5 + $0x148] sm:$0xff]   ;;  %v4666_v23 = vld [vmem:[%s4890_s5 + $0x150] sm:$0xff]   ;;  %v4668_v25 = vld [vmem:[%s4890_s5 + $0x158] sm:$0xff]  }
  0x1f   : > { %v4669_v26 = vld [vmem:[%s4890_s5 + $0x60] sm:$0xff]   ;;  %v4671_v28 = vld [vmem:[%s4890_s5 + $0x68] sm:$0xff]   ;;  %v4673_v30 = vld [vmem:[%s4890_s5 + $0x70] sm:$0xff]  }
  0x20   : > { %v4670_v27 = vld [vmem:[%s4890_s5 + $0x160] sm:$0xff]   ;;  %v4672_v29 = vld [vmem:[%s4890_s5 + $0x168] sm:$0xff]   ;;  %v4674_v31 = vld [vmem:[%s4890_s5 + $0x170] sm:$0xff]  }
  0x21   : > { %4412 = vmatmul.mubr.msk.bf16.gmra.mrb[4].mxu0 %vm996_vm0, %v4651_v8  ;;  %v4675_v32 = vld [vmem:[%s4890_s5 + $0x78] sm:$0xff]   ;;  %v4677_v34 = vld [vmem:[%s4890_s5 + $0x80] sm:$0xff]   ;;  %v4679_v36 = vld [vmem:[%s4890_s5 + $0x88] sm:$0xff]  }
  0x22   : > { %4476 = vmatmul.mubr.msk.bf16.gmra.mrb[4].mxu1 %vm996_vm0, %v4652_v9  ;;  %4415 = vmatprep.mubr.msk.bf16.mxu0 %vm996_vm0, %v4653_v10  ;;  %v4676_v33 = vld [vmem:[%s4890_s5 + $0x178] sm:$0xff]   ;;  %v4678_v35 = vld [vmem:[%s4890_s5 + $0x180] sm:$0xff]   ;;  %v4680_v37 = vld [vmem:[%s4890_s5 + $0x188] sm:$0xff]  }
  0x23   : > { %4479 = vmatprep.mubr.msk.bf16.mxu1 %vm996_vm0, %v4654_v11  ;;  %v4681_v38 = vld [vmem:[%s4890_s5 + $0x90] sm:$0xff]   ;;  %v4683_v40 = vld [vmem:[%s4890_s5 + $0x98] sm:$0xff]   ;;  %v4685_v42 = vld [vmem:[%s4890_s5 + $0xa0] sm:$0xff]  }
  0x24   : > { %v4682_v39 = vld [vmem:[%s4890_s5 + $0x190] sm:$0xff]   ;;  %v4684_v41 = vld [vmem:[%s4890_s5 + $0x198] sm:$0xff]   ;;  %v4686_v43 = vld [vmem:[%s4890_s5 + $0x1a0] sm:$0xff]  }
  0x25   : > { %v4687_v44 = vld [vmem:[%s4890_s5 + $0xa8] sm:$0xff]   ;;  %v4689_v46 = vld [vmem:[%s4890_s5 + $0xb0] sm:$0xff]   ;;  %v4691_v48 = vld [vmem:[%s4890_s5 + $0xb8] sm:$0xff]  }
  0x26   : > { %v4688_v45 = vld [vmem:[%s4890_s5 + $0x1a8] sm:$0xff]   ;;  %v4690_v47 = vld [vmem:[%s4890_s5 + $0x1b0] sm:$0xff]   ;;  %v4692_v49 = vld [vmem:[%s4890_s5 + $0x1b8] sm:$0xff]  }
  0x27   : > { %v4693_v50 = vld [vmem:[%s4890_s5 + $0xc0] sm:$0xff]   ;;  %v4695_v52 = vld [vmem:[%s4890_s5 + $0xc8] sm:$0xff]   ;;  %v4697_v54 = vld [vmem:[%s4890_s5 + $0xd0] sm:$0xff]  }
  0x28   : > { %v4694_v51 = vld [vmem:[%s4890_s5 + $0x1c0] sm:$0xff]   ;;  %v4696_v53 = vld [vmem:[%s4890_s5 + $0x1c8] sm:$0xff]   ;;  %v4698_v55 = vld [vmem:[%s4890_s5 + $0x1d0] sm:$0xff]  }
  0x29   : > { %4416 = vmatmul.mubr.msk.bf16.gmra.mrb[8].mxu0 %vm996_vm0, %v4655_v12  ;;  %v4699_v56 = vld [vmem:[%s4890_s5 + $0xd8] sm:$0xff]   ;;  %v4701_v58 = vld [vmem:[%s4890_s5 + $0xe0] sm:$0xff]   ;;  %v4703_v60 = vld [vmem:[%s4890_s5 + $0xe8] sm:$0xff]  }
  0x2a   : > { %4480 = vmatmul.mubr.msk.bf16.gmra.mrb[8].mxu1 %vm996_vm0, %v4656_v13  ;;  %4419 = vmatprep.mubr.msk.bf16.mxu0 %vm996_vm0, %v4657_v14  ;;  %v4700_v57 = vld [vmem:[%s4890_s5 + $0x1d8] sm:$0xff]   ;;  %v4702_v59 = vld [vmem:[%s4890_s5 + $0x1e0] sm:$0xff]   ;;  %v4704_v61 = vld [vmem:[%s4890_s5 + $0x1e8] sm:$0xff]  }
  0x2b   : > { %4483 = vmatprep.mubr.msk.bf16.mxu1 %vm996_vm0, %v4658_v15  ;;  %v4705_v62 = vld [vmem:[%s4890_s5 + $0xf0] sm:$0xff]   ;;  %v4707_v0 = vld [vmem:[%s4890_s5 + $0xf8] sm:$0xff]   ;;  %v5023_v2 = vld [vmem:[%s5426_s2] ss:$0 sm:$0xff] }
  0x2c   : > { %v4706_v63 = vld [vmem:[%s4890_s5 + $0x1f0] sm:$0xff]   ;;  %v4708_v1 = vld [vmem:[%s4890_s5 + $0x1f8] sm:$0xff]  }
  0x31   : > { %4420 = vmatmul.mubr.msk.bf16.gmra.mrb[12].mxu0 %vm996_vm0, %v4659_v16 }
  0x32   : > { %4484 = vmatmul.mubr.msk.bf16.gmra.mrb[12].mxu1 %vm996_vm0, %v4660_v17  ;;  %4423 = vmatprep.mubr.msk.bf16.mxu0 %vm996_vm0, %v4661_v18 }
  0x33   : > { %4487 = vmatprep.mubr.msk.bf16.mxu1 %vm996_vm0, %v4662_v19 }
  0x39   : > { %4424 = vmatmul.mubr.msk.bf16.gmra.mrb[16].mxu0 %vm996_vm0, %v4663_v20 }
  0x3a   : > { %4488 = vmatmul.mubr.msk.bf16.gmra.mrb[16].mxu1 %vm996_vm0, %v4664_v21  ;;  %4427 = vmatprep.mubr.msk.bf16.mxu0 %vm996_vm0, %v4665_v22 }
  0x3b   : > { %4491 = vmatprep.mubr.msk.bf16.mxu1 %vm996_vm0, %v4666_v23 }
  0x41   : > { %4428 = vmatmul.mubr.msk.bf16.gmra.mrb[20].mxu0 %vm996_vm0, %v4667_v24 }
  0x42   : > { %4492 = vmatmul.mubr.msk.bf16.gmra.mrb[20].mxu1 %vm996_vm0, %v4668_v25  ;;  %4431 = vmatprep.mubr.msk.bf16.mxu0 %vm996_vm0, %v4669_v26 }
  0x43   : > { %4495 = vmatprep.mubr.msk.bf16.mxu1 %vm996_vm0, %v4670_v27 }
  0x49   : > { %4432 = vmatmul.mubr.msk.bf16.gmra.mrb[24].mxu0 %vm996_vm0, %v4671_v28 }
  0x4a   : > { %4496 = vmatmul.mubr.msk.bf16.gmra.mrb[24].mxu1 %vm996_vm0, %v4672_v29  ;;  %4435 = vmatprep.mubr.msk.bf16.mxu0 %vm996_vm0, %v4673_v30 }
  0x4b   : > { %4499 = vmatprep.mubr.msk.bf16.mxu1 %vm996_vm0, %v4674_v31 }
  0x51   : > { %4436 = vmatmul.mubr.msk.bf16.gmra.mrb[28].mxu0 %vm996_vm0, %v4675_v32 }
  0x52   : > { %4500 = vmatmul.mubr.msk.bf16.gmra.mrb[28].mxu1 %vm996_vm0, %v4676_v33  ;;  %4439 = vmatprep.mubr.msk.bf16.mxu0 %vm996_vm0, %v4677_v34 }
  0x53   : > { %4503 = vmatprep.mubr.msk.bf16.mxu1 %vm996_vm0, %v4678_v35 }
  0x59   : > { %4440 = vmatmul.mubr.msk.bf16.gmra.mrb[32].mxu0 %vm996_vm0, %v4679_v36 }
  0x5a   : > { %4504 = vmatmul.mubr.msk.bf16.gmra.mrb[32].mxu1 %vm996_vm0, %v4680_v37  ;;  %4443 = vmatprep.mubr.msk.bf16.mxu0 %vm996_vm0, %v4681_v38 }
  0x5b   : > { %4507 = vmatprep.mubr.msk.bf16.mxu1 %vm996_vm0, %v4682_v39 }
  0x61   : > { %4444 = vmatmul.mubr.msk.bf16.gmra.mrb[36].mxu0 %vm996_vm0, %v4683_v40 }
  0x62   : > { %4508 = vmatmul.mubr.msk.bf16.gmra.mrb[36].mxu1 %vm996_vm0, %v4684_v41  ;;  %4447 = vmatprep.mubr.msk.bf16.mxu0 %vm996_vm0, %v4685_v42 }
  0x63   : > { %4511 = vmatprep.mubr.msk.bf16.mxu1 %vm996_vm0, %v4686_v43 }
  0x69   : > { %4448 = vmatmul.mubr.msk.bf16.gmra.mrb[40].mxu0 %vm996_vm0, %v4687_v44 }
  0x6a   : > { %4512 = vmatmul.mubr.msk.bf16.gmra.mrb[40].mxu1 %vm996_vm0, %v4688_v45  ;;  %4451 = vmatprep.mubr.msk.bf16.mxu0 %vm996_vm0, %v4689_v46 }
  0x6b   : > { %4515 = vmatprep.mubr.msk.bf16.mxu1 %vm996_vm0, %v4690_v47 }
  0x71   : > { %4452 = vmatmul.mubr.msk.bf16.gmra.mrb[44].mxu0 %vm996_vm0, %v4691_v48 }
  0x72   : > { %4516 = vmatmul.mubr.msk.bf16.gmra.mrb[44].mxu1 %vm996_vm0, %v4692_v49  ;;  %4455 = vmatprep.mubr.msk.bf16.mxu0 %vm996_vm0, %v4693_v50 }
  0x73   : > { %4519 = vmatprep.mubr.msk.bf16.mxu1 %vm996_vm0, %v4694_v51 }
  0x79   : > { %4456 = vmatmul.mubr.msk.bf16.gmra.mrb[48].mxu0 %vm996_vm0, %v4695_v52 }
  0x7a   : > { %4520 = vmatmul.mubr.msk.bf16.gmra.mrb[48].mxu1 %vm996_vm0, %v4696_v53  ;;  %4459 = vmatprep.mubr.msk.bf16.mxu0 %vm996_vm0, %v4697_v54 }
  0x7b   : > { %4523 = vmatprep.mubr.msk.bf16.mxu1 %vm996_vm0, %v4698_v55 }
  0x81   : > { %4460 = vmatmul.mubr.msk.bf16.gmra.mrb[52].mxu0 %vm996_vm0, %v4699_v56 }
  0x82   : > { %4524 = vmatmul.mubr.msk.bf16.gmra.mrb[52].mxu1 %vm996_vm0, %v4700_v57  ;;  %4463 = vmatprep.mubr.msk.bf16.mxu0 %vm996_vm0, %v4701_v58 }
  0x83   : > { %4527 = vmatprep.mubr.msk.bf16.mxu1 %vm996_vm0, %v4702_v59 }
  0x89   : > { %4464 = vmatmul.mubr.msk.bf16.gmra.mrb[56].mxu0 %vm996_vm0, %v4703_v60 }
  0x8a   : > { %4528 = vmatmul.mubr.msk.bf16.gmra.mrb[56].mxu1 %vm996_vm0, %v4704_v61  ;;  %4467 = vmatprep.mubr.msk.bf16.mxu0 %vm996_vm0, %v4705_v62 }
  0x8b   : > { %4531 = vmatprep.mubr.msk.bf16.mxu1 %vm996_vm0, %v4706_v63 }
  0x91   : > { %4468 = vmatmul.mubr.msk.bf16.gmra.mrb[60].mxu0 %vm996_vm0, %v4707_v0 }
  0x92   : > { %4532 = vmatmul.mubr.msk.bf16.gmra.mrb[60].mxu1 %vm996_vm0, %v4708_v1 }
  0xec   : > { %v4409_v3 = vpop.f32.mrb[0].mxu0 }
  0xed   : > { %v2130_v4 = vadd.f32 %v4409_v3, %v5023_v2  ;;  %v4473_v5 = vpop.f32.mrb[0].mxu1  ;;  %v1223_v6 = vpop.f32.mrb[1].mxu0 }
  0xee   : > { %v2194_v7 = vadd.f32 %v4473_v5, %v5023_v2  ;;  %v2128_v8 = vadd.f32 %v5023_v2, %v1223_v6  ;;  %v1479_v9 = vpop.f32.mrb[1].mxu1  ;;  %v4410_v10 = vpop.f32.mrb[2].mxu0 }
  0xef   : > { %v2192_v11 = vadd.f32 %v5023_v2, %v1479_v9  ;;  %v2131_v12 = vadd.f32 %v4410_v10, %v5023_v2  ;;  %v4474_v13 = vpop.f32.mrb[2].mxu1  ;;  %v1226_v14 = vpop.f32.mrb[3].mxu0  ;;  %v2258_v18 = vmax.f32 %v2130_v4, 0.0 }
  0xf0   : > { %v2195_v15 = vadd.f32 %v4474_v13, %v5023_v2  ;;  %v2129_v16 = vadd.f32 %v5023_v2, %v1226_v14  ;;  %v1482_v17 = vpop.f32.mrb[3].mxu1  ;;  %v2322_v21 = vmax.f32 %v2194_v7, 0.0  ;;  %v2256_v22 = vmax.f32 %v2128_v8, 0.0 }
  0xf1   : > { %v2259_v19 = vmax.f32 %v2131_v12, 0.0  ;;  %v2193_v20 = vadd.f32 %v5023_v2, %v1482_v17  ;;  %v2320_v25 = vmax.f32 %v2192_v11, 0.0 }
  0xf2   : > { %v2323_v23 = vmax.f32 %v2195_v15, 0.0  ;;  %v2257_v24 = vmax.f32 %v2129_v16, 0.0 }
  0xf3   : > { %v3962_v26 = vpack.c.bf16 %v2259_v19, %v2258_v18  ;;  %v2321_v27 = vmax.f32 %v2193_v20, 0.0 }
  0xf4   : > { %v4122_v28 = vpack.c.bf16 %v2323_v23, %v2322_v21  ;;  %v3957_v29 = vpack.c.bf16 %v2257_v24, %v2256_v22  ;;  %v4413_v30 = vpop.f32.mrb[4].mxu0 }
  0xf5   : > { %4274 = vst [vmem:[%s5034_s10 + $0x8] sm:$0xff] %v3962_v26   ;;  %v4117_v31 = vpack.c.bf16 %v2321_v27, %v2320_v25  ;;  %v2134_v32 = vadd.f32 %v4413_v30, %v5023_v2  ;;  %v4477_v33 = vpop.f32.mrb[4].mxu1  ;;  %v1239_v34 = vpop.f32.mrb[5].mxu0 }
  0xf6   : > { %4306 = vst [vmem:[%s5034_s10 + $0x108] sm:$0xff] %v4122_v28   ;;  %3958 = vst [vmem:[%s5034_s10] sm:$0xff] %v3957_v29   ;;  %v2198_v35 = vadd.f32 %v4477_v33, %v5023_v2  ;;  %v2132_v36 = vadd.f32 %v5023_v2, %v1239_v34  ;;  %v1495_v37 = vpop.f32.mrb[5].mxu1  ;;  %v4414_v38 = vpop.f32.mrb[6].mxu0 }
  0xf7   : > { %4305 = vst [vmem:[%s5034_s10 + $0x100] sm:$0xff] %v4117_v31   ;;  %v2196_v39 = vadd.f32 %v5023_v2, %v1495_v37  ;;  %v2135_v40 = vadd.f32 %v4414_v38, %v5023_v2  ;;  %v4478_v41 = vpop.f32.mrb[6].mxu1  ;;  %v1242_v42 = vpop.f32.mrb[7].mxu0  ;;  %v2262_v46 = vmax.f32 %v2134_v32, 0.0 }
  0xf8   : > { %v2199_v43 = vadd.f32 %v4478_v41, %v5023_v2  ;;  %v2133_v44 = vadd.f32 %v5023_v2, %v1242_v42  ;;  %v1498_v45 = vpop.f32.mrb[7].mxu1  ;;  %v2326_v49 = vmax.f32 %v2198_v35, 0.0  ;;  %v2260_v50 = vmax.f32 %v2132_v36, 0.0 }
  0xf9   : > { %v2263_v47 = vmax.f32 %v2135_v40, 0.0  ;;  %v2197_v48 = vadd.f32 %v5023_v2, %v1498_v45  ;;  %v2324_v53 = vmax.f32 %v2196_v39, 0.0 }
  0xfa   : > { %v2327_v51 = vmax.f32 %v2199_v43, 0.0  ;;  %v2261_v52 = vmax.f32 %v2133_v44, 0.0 }
  0xfb   : > { %v3972_v54 = vpack.c.bf16 %v2263_v47, %v2262_v46  ;;  %v2325_v55 = vmax.f32 %v2197_v48, 0.0 }
  0xfc   : > { %v4132_v56 = vpack.c.bf16 %v2327_v51, %v2326_v49  ;;  %v3967_v57 = vpack.c.bf16 %v2261_v52, %v2260_v50  ;;  %v4417_v58 = vpop.f32.mrb[8].mxu0 }
  0xfd   : > { %4276 = vst [vmem:[%s5034_s10 + $0x18] sm:$0xff] %v3972_v54   ;;  %v4127_v59 = vpack.c.bf16 %v2325_v55, %v2324_v53  ;;  %v2138_v60 = vadd.f32 %v4417_v58, %v5023_v2  ;;  %v4481_v61 = vpop.f32.mrb[8].mxu1  ;;  %v1255_v62 = vpop.f32.mrb[9].mxu0 }
  0xfe   : > { %4308 = vst [vmem:[%s5034_s10 + $0x118] sm:$0xff] %v4132_v56   ;;  %4275 = vst [vmem:[%s5034_s10 + $0x10] sm:$0xff] %v3967_v57   ;;  %v2202_v63 = vadd.f32 %v4481_v61, %v5023_v2  ;;  %v2136_v0 = vadd.f32 %v5023_v2, %v1255_v62  ;;  %v1511_v1 = vpop.f32.mrb[9].mxu1  ;;  %v4418_v3 = vpop.f32.mrb[10].mxu0 }
  0xff   : > { %4307 = vst [vmem:[%s5034_s10 + $0x110] sm:$0xff] %v4127_v59   ;;  %v2200_v4 = vadd.f32 %v5023_v2, %v1511_v1  ;;  %v2139_v5 = vadd.f32 %v4418_v3, %v5023_v2  ;;  %v4482_v6 = vpop.f32.mrb[10].mxu1  ;;  %v1258_v7 = vpop.f32.mrb[11].mxu0  ;;  %v2266_v11 = vmax.f32 %v2138_v60, 0.0 }
 0x100   : > { %v2203_v8 = vadd.f32 %v4482_v6, %v5023_v2  ;;  %v2137_v9 = vadd.f32 %v5023_v2, %v1258_v7  ;;  %v1514_v10 = vpop.f32.mrb[11].mxu1  ;;  %v2330_v14 = vmax.f32 %v2202_v63, 0.0  ;;  %v2264_v15 = vmax.f32 %v2136_v0, 0.0 }
 0x101   : > { %v2267_v12 = vmax.f32 %v2139_v5, 0.0  ;;  %v2201_v13 = vadd.f32 %v5023_v2, %v1514_v10  ;;  %v2328_v18 = vmax.f32 %v2200_v4, 0.0 }
 0x102   : > { %v2331_v16 = vmax.f32 %v2203_v8, 0.0  ;;  %v2265_v17 = vmax.f32 %v2137_v9, 0.0 }
 0x103   : > { %v3982_v19 = vpack.c.bf16 %v2267_v12, %v2266_v11  ;;  %v2329_v20 = vmax.f32 %v2201_v13, 0.0 }
 0x104   : > { %v4142_v21 = vpack.c.bf16 %v2331_v16, %v2330_v14  ;;  %v3977_v22 = vpack.c.bf16 %v2265_v17, %v2264_v15  ;;  %v4421_v23 = vpop.f32.mrb[12].mxu0 }
 0x105   : > { %4278 = vst [vmem:[%s5034_s10 + $0x28] sm:$0xff] %v3982_v19   ;;  %v4137_v24 = vpack.c.bf16 %v2329_v20, %v2328_v18  ;;  %v2142_v25 = vadd.f32 %v4421_v23, %v5023_v2  ;;  %v4485_v26 = vpop.f32.mrb[12].mxu1  ;;  %v1271_v27 = vpop.f32.mrb[13].mxu0 }
 0x106   : > { %4310 = vst [vmem:[%s5034_s10 + $0x128] sm:$0xff] %v4142_v21   ;;  %4277 = vst [vmem:[%s5034_s10 + $0x20] sm:$0xff] %v3977_v22   ;;  %v2206_v28 = vadd.f32 %v4485_v26, %v5023_v2  ;;  %v2140_v29 = vadd.f32 %v5023_v2, %v1271_v27  ;;  %v1527_v30 = vpop.f32.mrb[13].mxu1  ;;  %v4422_v31 = vpop.f32.mrb[14].mxu0 }
 0x107   : > { %4309 = vst [vmem:[%s5034_s10 + $0x120] sm:$0xff] %v4137_v24   ;;  %v2204_v32 = vadd.f32 %v5023_v2, %v1527_v30  ;;  %v2143_v33 = vadd.f32 %v4422_v31, %v5023_v2  ;;  %v4486_v34 = vpop.f32.mrb[14].mxu1  ;;  %v1274_v35 = vpop.f32.mrb[15].mxu0  ;;  %v2270_v39 = vmax.f32 %v2142_v25, 0.0 }
 0x108   : > { %v2207_v36 = vadd.f32 %v4486_v34, %v5023_v2  ;;  %v2141_v37 = vadd.f32 %v5023_v2, %v1274_v35  ;;  %v1530_v38 = vpop.f32.mrb[15].mxu1  ;;  %v2334_v42 = vmax.f32 %v2206_v28, 0.0  ;;  %v2268_v43 = vmax.f32 %v2140_v29, 0.0 }
 0x109   : > { %v2271_v40 = vmax.f32 %v2143_v33, 0.0  ;;  %v2205_v41 = vadd.f32 %v5023_v2, %v1530_v38  ;;  %v2332_v46 = vmax.f32 %v2204_v32, 0.0 }
 0x10a   : > { %v2335_v44 = vmax.f32 %v2207_v36, 0.0  ;;  %v2269_v45 = vmax.f32 %v2141_v37, 0.0 }
 0x10b   : > { %v3992_v47 = vpack.c.bf16 %v2271_v40, %v2270_v39  ;;  %v2333_v48 = vmax.f32 %v2205_v41, 0.0 }
 0x10c   : > { %v4152_v49 = vpack.c.bf16 %v2335_v44, %v2334_v42  ;;  %v3987_v50 = vpack.c.bf16 %v2269_v45, %v2268_v43  ;;  %v4425_v51 = vpop.f32.mrb[16].mxu0 }
 0x10d   : > { %4280 = vst [vmem:[%s5034_s10 + $0x38] sm:$0xff] %v3992_v47   ;;  %v4147_v52 = vpack.c.bf16 %v2333_v48, %v2332_v46  ;;  %v2146_v53 = vadd.f32 %v4425_v51, %v5023_v2  ;;  %v4489_v54 = vpop.f32.mrb[16].mxu1  ;;  %v1287_v55 = vpop.f32.mrb[17].mxu0 }
 0x10e   : > { %4312 = vst [vmem:[%s5034_s10 + $0x138] sm:$0xff] %v4152_v49   ;;  %4279 = vst [vmem:[%s5034_s10 + $0x30] sm:$0xff] %v3987_v50   ;;  %v2210_v56 = vadd.f32 %v4489_v54, %v5023_v2  ;;  %v2144_v57 = vadd.f32 %v5023_v2, %v1287_v55  ;;  %v1543_v58 = vpop.f32.mrb[17].mxu1  ;;  %v4426_v59 = vpop.f32.mrb[18].mxu0 }
 0x10f   : > { %4311 = vst [vmem:[%s5034_s10 + $0x130] sm:$0xff] %v4147_v52   ;;  %v2208_v60 = vadd.f32 %v5023_v2, %v1543_v58  ;;  %v2147_v61 = vadd.f32 %v4426_v59, %v5023_v2  ;;  %v4490_v62 = vpop.f32.mrb[18].mxu1  ;;  %v1290_v63 = vpop.f32.mrb[19].mxu0  ;;  %v2274_v4 = vmax.f32 %v2146_v53, 0.0 }
 0x110   : > { %v2211_v0 = vadd.f32 %v4490_v62, %v5023_v2  ;;  %v2145_v1 = vadd.f32 %v5023_v2, %v1290_v63  ;;  %v1546_v3 = vpop.f32.mrb[19].mxu1  ;;  %v2338_v7 = vmax.f32 %v2210_v56, 0.0  ;;  %v2272_v8 = vmax.f32 %v2144_v57, 0.0 }
 0x111   : > { %v2275_v5 = vmax.f32 %v2147_v61, 0.0  ;;  %v2209_v6 = vadd.f32 %v5023_v2, %v1546_v3  ;;  %v2336_v11 = vmax.f32 %v2208_v60, 0.0 }
 0x112   : > { %v2339_v9 = vmax.f32 %v2211_v0, 0.0  ;;  %v2273_v10 = vmax.f32 %v2145_v1, 0.0 }
 0x113   : > { %v4002_v12 = vpack.c.bf16 %v2275_v5, %v2274_v4  ;;  %v2337_v13 = vmax.f32 %v2209_v6, 0.0 }
 0x114   : > { %v4162_v14 = vpack.c.bf16 %v2339_v9, %v2338_v7  ;;  %v3997_v15 = vpack.c.bf16 %v2273_v10, %v2272_v8  ;;  %v4429_v16 = vpop.f32.mrb[20].mxu0 }
 0x115   : > { %4282 = vst [vmem:[%s5034_s10 + $0x48] sm:$0xff] %v4002_v12   ;;  %v4157_v17 = vpack.c.bf16 %v2337_v13, %v2336_v11  ;;  %v2150_v18 = vadd.f32 %v4429_v16, %v5023_v2  ;;  %v4493_v19 = vpop.f32.mrb[20].mxu1  ;;  %v1303_v20 = vpop.f32.mrb[21].mxu0 }
 0x116   : > { %4314 = vst [vmem:[%s5034_s10 + $0x148] sm:$0xff] %v4162_v14   ;;  %4281 = vst [vmem:[%s5034_s10 + $0x40] sm:$0xff] %v3997_v15   ;;  %v2214_v21 = vadd.f32 %v4493_v19, %v5023_v2  ;;  %v2148_v22 = vadd.f32 %v5023_v2, %v1303_v20  ;;  %v1559_v23 = vpop.f32.mrb[21].mxu1  ;;  %v4430_v24 = vpop.f32.mrb[22].mxu0 }
 0x117   : > { %4313 = vst [vmem:[%s5034_s10 + $0x140] sm:$0xff] %v4157_v17   ;;  %v2212_v25 = vadd.f32 %v5023_v2, %v1559_v23  ;;  %v2151_v26 = vadd.f32 %v4430_v24, %v5023_v2  ;;  %v4494_v27 = vpop.f32.mrb[22].mxu1  ;;  %v1306_v28 = vpop.f32.mrb[23].mxu0  ;;  %v2278_v32 = vmax.f32 %v2150_v18, 0.0 }
 0x118   : > { %v2215_v29 = vadd.f32 %v4494_v27, %v5023_v2  ;;  %v2149_v30 = vadd.f32 %v5023_v2, %v1306_v28  ;;  %v1562_v31 = vpop.f32.mrb[23].mxu1  ;;  %v2342_v35 = vmax.f32 %v2214_v21, 0.0  ;;  %v2276_v36 = vmax.f32 %v2148_v22, 0.0 }
 0x119   : > { %v2279_v33 = vmax.f32 %v2151_v26, 0.0  ;;  %v2213_v34 = vadd.f32 %v5023_v2, %v1562_v31  ;;  %v2340_v39 = vmax.f32 %v2212_v25, 0.0 }
 0x11a   : > { %v2343_v37 = vmax.f32 %v2215_v29, 0.0  ;;  %v2277_v38 = vmax.f32 %v2149_v30, 0.0 }
 0x11b   : > { %v4012_v40 = vpack.c.bf16 %v2279_v33, %v2278_v32  ;;  %v2341_v41 = vmax.f32 %v2213_v34, 0.0 }
 0x11c   : > { %v4172_v42 = vpack.c.bf16 %v2343_v37, %v2342_v35  ;;  %v4007_v43 = vpack.c.bf16 %v2277_v38, %v2276_v36  ;;  %v4433_v44 = vpop.f32.mrb[24].mxu0 }
 0x11d   : > { %4284 = vst [vmem:[%s5034_s10 + $0x58] sm:$0xff] %v4012_v40   ;;  %v4167_v45 = vpack.c.bf16 %v2341_v41, %v2340_v39  ;;  %v2154_v46 = vadd.f32 %v4433_v44, %v5023_v2  ;;  %v4497_v47 = vpop.f32.mrb[24].mxu1  ;;  %v1319_v48 = vpop.f32.mrb[25].mxu0 }
 0x11e   : > { %4316 = vst [vmem:[%s5034_s10 + $0x158] sm:$0xff] %v4172_v42   ;;  %4283 = vst [vmem:[%s5034_s10 + $0x50] sm:$0xff] %v4007_v43   ;;  %v2218_v49 = vadd.f32 %v4497_v47, %v5023_v2  ;;  %v2152_v50 = vadd.f32 %v5023_v2, %v1319_v48  ;;  %v1575_v51 = vpop.f32.mrb[25].mxu1  ;;  %v4434_v52 = vpop.f32.mrb[26].mxu0 }
 0x11f   : > { %4315 = vst [vmem:[%s5034_s10 + $0x150] sm:$0xff] %v4167_v45   ;;  %v2216_v53 = vadd.f32 %v5023_v2, %v1575_v51  ;;  %v2155_v54 = vadd.f32 %v4434_v52, %v5023_v2  ;;  %v4498_v55 = vpop.f32.mrb[26].mxu1  ;;  %v1322_v56 = vpop.f32.mrb[27].mxu0  ;;  %v2282_v60 = vmax.f32 %v2154_v46, 0.0 }
 0x120   : > { %v2219_v57 = vadd.f32 %v4498_v55, %v5023_v2  ;;  %v2153_v58 = vadd.f32 %v5023_v2, %v1322_v56  ;;  %v1578_v59 = vpop.f32.mrb[27].mxu1  ;;  %v2346_v63 = vmax.f32 %v2218_v49, 0.0  ;;  %v2280_v0 = vmax.f32 %v2152_v50, 0.0 }
 0x121   : > { %v2283_v61 = vmax.f32 %v2155_v54, 0.0  ;;  %v2217_v62 = vadd.f32 %v5023_v2, %v1578_v59  ;;  %v2344_v4 = vmax.f32 %v2216_v53, 0.0 }
 0x122   : > { %v2347_v1 = vmax.f32 %v2219_v57, 0.0  ;;  %v2281_v3 = vmax.f32 %v2153_v58, 0.0 }
 0x123   : > { %v4022_v5 = vpack.c.bf16 %v2283_v61, %v2282_v60  ;;  %v2345_v6 = vmax.f32 %v2217_v62, 0.0 }
 0x124   : > { %v4182_v7 = vpack.c.bf16 %v2347_v1, %v2346_v63  ;;  %v4017_v8 = vpack.c.bf16 %v2281_v3, %v2280_v0  ;;  %v4437_v9 = vpop.f32.mrb[28].mxu0 }
 0x125   : > { %4286 = vst [vmem:[%s5034_s10 + $0x68] sm:$0xff] %v4022_v5   ;;  %v4177_v10 = vpack.c.bf16 %v2345_v6, %v2344_v4  ;;  %v2158_v11 = vadd.f32 %v4437_v9, %v5023_v2  ;;  %v4501_v12 = vpop.f32.mrb[28].mxu1  ;;  %v1335_v13 = vpop.f32.mrb[29].mxu0 }
 0x126   : > { %4318 = vst [vmem:[%s5034_s10 + $0x168] sm:$0xff] %v4182_v7   ;;  %4285 = vst [vmem:[%s5034_s10 + $0x60] sm:$0xff] %v4017_v8   ;;  %v2222_v14 = vadd.f32 %v4501_v12, %v5023_v2  ;;  %v2156_v15 = vadd.f32 %v5023_v2, %v1335_v13  ;;  %v1591_v16 = vpop.f32.mrb[29].mxu1  ;;  %v4438_v17 = vpop.f32.mrb[30].mxu0 }
 0x127   : > { %4317 = vst [vmem:[%s5034_s10 + $0x160] sm:$0xff] %v4177_v10   ;;  %v2220_v18 = vadd.f32 %v5023_v2, %v1591_v16  ;;  %v2159_v19 = vadd.f32 %v4438_v17, %v5023_v2  ;;  %v4502_v20 = vpop.f32.mrb[30].mxu1  ;;  %v1338_v21 = vpop.f32.mrb[31].mxu0  ;;  %v2286_v25 = vmax.f32 %v2158_v11, 0.0 }
 0x128   : > { %v2223_v22 = vadd.f32 %v4502_v20, %v5023_v2  ;;  %v2157_v23 = vadd.f32 %v5023_v2, %v1338_v21  ;;  %v1594_v24 = vpop.f32.mrb[31].mxu1  ;;  %v2350_v28 = vmax.f32 %v2222_v14, 0.0  ;;  %v2284_v29 = vmax.f32 %v2156_v15, 0.0 }
 0x129   : > { %v2287_v26 = vmax.f32 %v2159_v19, 0.0  ;;  %v2221_v27 = vadd.f32 %v5023_v2, %v1594_v24  ;;  %v2348_v32 = vmax.f32 %v2220_v18, 0.0 }
 0x12a   : > { %v2351_v30 = vmax.f32 %v2223_v22, 0.0  ;;  %v2285_v31 = vmax.f32 %v2157_v23, 0.0 }
 0x12b   : > { %v4032_v33 = vpack.c.bf16 %v2287_v26, %v2286_v25  ;;  %v2349_v34 = vmax.f32 %v2221_v27, 0.0 }
 0x12c   : > { %v4192_v35 = vpack.c.bf16 %v2351_v30, %v2350_v28  ;;  %v4027_v36 = vpack.c.bf16 %v2285_v31, %v2284_v29  ;;  %v4441_v37 = vpop.f32.mrb[32].mxu0 }
 0x12d   : > { %4288 = vst [vmem:[%s5034_s10 + $0x78] sm:$0xff] %v4032_v33   ;;  %v4187_v38 = vpack.c.bf16 %v2349_v34, %v2348_v32  ;;  %v2162_v39 = vadd.f32 %v4441_v37, %v5023_v2  ;;  %v4505_v40 = vpop.f32.mrb[32].mxu1  ;;  %v1351_v41 = vpop.f32.mrb[33].mxu0 }
 0x12e   : > { %4320 = vst [vmem:[%s5034_s10 + $0x178] sm:$0xff] %v4192_v35   ;;  %4287 = vst [vmem:[%s5034_s10 + $0x70] sm:$0xff] %v4027_v36   ;;  %v2226_v42 = vadd.f32 %v4505_v40, %v5023_v2  ;;  %v2160_v43 = vadd.f32 %v5023_v2, %v1351_v41  ;;  %v1607_v44 = vpop.f32.mrb[33].mxu1  ;;  %v4442_v45 = vpop.f32.mrb[34].mxu0 }
 0x12f   : > { %4319 = vst [vmem:[%s5034_s10 + $0x170] sm:$0xff] %v4187_v38   ;;  %v2224_v46 = vadd.f32 %v5023_v2, %v1607_v44  ;;  %v2163_v47 = vadd.f32 %v4442_v45, %v5023_v2  ;;  %v4506_v48 = vpop.f32.mrb[34].mxu1  ;;  %v1354_v49 = vpop.f32.mrb[35].mxu0  ;;  %v2290_v53 = vmax.f32 %v2162_v39, 0.0 }
 0x130   : > { %v2227_v50 = vadd.f32 %v4506_v48, %v5023_v2  ;;  %v2161_v51 = vadd.f32 %v5023_v2, %v1354_v49  ;;  %v1610_v52 = vpop.f32.mrb[35].mxu1  ;;  %v2354_v56 = vmax.f32 %v2226_v42, 0.0  ;;  %v2288_v57 = vmax.f32 %v2160_v43, 0.0 }
 0x131   : > { %v2291_v54 = vmax.f32 %v2163_v47, 0.0  ;;  %v2225_v55 = vadd.f32 %v5023_v2, %v1610_v52  ;;  %v2352_v60 = vmax.f32 %v2224_v46, 0.0 }
 0x132   : > { %v2355_v58 = vmax.f32 %v2227_v50, 0.0  ;;  %v2289_v59 = vmax.f32 %v2161_v51, 0.0 }
 0x133   : > { %v4042_v61 = vpack.c.bf16 %v2291_v54, %v2290_v53  ;;  %v2353_v62 = vmax.f32 %v2225_v55, 0.0 }
 0x134   : > { %v4202_v63 = vpack.c.bf16 %v2355_v58, %v2354_v56  ;;  %v4037_v0 = vpack.c.bf16 %v2289_v59, %v2288_v57  ;;  %v4445_v1 = vpop.f32.mrb[36].mxu0 }
 0x135   : > { %4290 = vst [vmem:[%s5034_s10 + $0x88] sm:$0xff] %v4042_v61   ;;  %v4197_v3 = vpack.c.bf16 %v2353_v62, %v2352_v60  ;;  %v2166_v4 = vadd.f32 %v4445_v1, %v5023_v2  ;;  %v4509_v5 = vpop.f32.mrb[36].mxu1  ;;  %v1367_v6 = vpop.f32.mrb[37].mxu0 }
 0x136   : > { %4322 = vst [vmem:[%s5034_s10 + $0x188] sm:$0xff] %v4202_v63   ;;  %4289 = vst [vmem:[%s5034_s10 + $0x80] sm:$0xff] %v4037_v0   ;;  %v2230_v7 = vadd.f32 %v4509_v5, %v5023_v2  ;;  %v2164_v8 = vadd.f32 %v5023_v2, %v1367_v6  ;;  %v1623_v9 = vpop.f32.mrb[37].mxu1  ;;  %v4446_v10 = vpop.f32.mrb[38].mxu0 }
 0x137   : > { %4321 = vst [vmem:[%s5034_s10 + $0x180] sm:$0xff] %v4197_v3   ;;  %v2228_v11 = vadd.f32 %v5023_v2, %v1623_v9  ;;  %v2167_v12 = vadd.f32 %v4446_v10, %v5023_v2  ;;  %v4510_v13 = vpop.f32.mrb[38].mxu1  ;;  %v1370_v14 = vpop.f32.mrb[39].mxu0  ;;  %v2294_v18 = vmax.f32 %v2166_v4, 0.0 }
 0x138   : > { %v2231_v15 = vadd.f32 %v4510_v13, %v5023_v2  ;;  %v2165_v16 = vadd.f32 %v5023_v2, %v1370_v14  ;;  %v1626_v17 = vpop.f32.mrb[39].mxu1  ;;  %v2358_v21 = vmax.f32 %v2230_v7, 0.0  ;;  %v2292_v22 = vmax.f32 %v2164_v8, 0.0 }
 0x139   : > { %v2295_v19 = vmax.f32 %v2167_v12, 0.0  ;;  %v2229_v20 = vadd.f32 %v5023_v2, %v1626_v17  ;;  %v2356_v25 = vmax.f32 %v2228_v11, 0.0 }
 0x13a   : > { %v2359_v23 = vmax.f32 %v2231_v15, 0.0  ;;  %v2293_v24 = vmax.f32 %v2165_v16, 0.0 }
 0x13b   : > { %v4052_v26 = vpack.c.bf16 %v2295_v19, %v2294_v18  ;;  %v2357_v27 = vmax.f32 %v2229_v20, 0.0 }
 0x13c   : > { %v4212_v28 = vpack.c.bf16 %v2359_v23, %v2358_v21  ;;  %v4047_v29 = vpack.c.bf16 %v2293_v24, %v2292_v22  ;;  %v4449_v30 = vpop.f32.mrb[40].mxu0 }
 0x13d   : > { %4292 = vst [vmem:[%s5034_s10 + $0x98] sm:$0xff] %v4052_v26   ;;  %v4207_v31 = vpack.c.bf16 %v2357_v27, %v2356_v25  ;;  %v2170_v32 = vadd.f32 %v4449_v30, %v5023_v2  ;;  %v4513_v33 = vpop.f32.mrb[40].mxu1  ;;  %v1383_v34 = vpop.f32.mrb[41].mxu0 }
 0x13e   : > { %4324 = vst [vmem:[%s5034_s10 + $0x198] sm:$0xff] %v4212_v28   ;;  %4291 = vst [vmem:[%s5034_s10 + $0x90] sm:$0xff] %v4047_v29   ;;  %v2234_v35 = vadd.f32 %v4513_v33, %v5023_v2  ;;  %v2168_v36 = vadd.f32 %v5023_v2, %v1383_v34  ;;  %v1639_v37 = vpop.f32.mrb[41].mxu1  ;;  %v4450_v38 = vpop.f32.mrb[42].mxu0 }
 0x13f   : > { %4323 = vst [vmem:[%s5034_s10 + $0x190] sm:$0xff] %v4207_v31   ;;  %v2232_v39 = vadd.f32 %v5023_v2, %v1639_v37  ;;  %v2171_v40 = vadd.f32 %v4450_v38, %v5023_v2  ;;  %v4514_v41 = vpop.f32.mrb[42].mxu1  ;;  %v1386_v42 = vpop.f32.mrb[43].mxu0  ;;  %v2298_v46 = vmax.f32 %v2170_v32, 0.0 }
 0x140   : > { %v2235_v43 = vadd.f32 %v4514_v41, %v5023_v2  ;;  %v2169_v44 = vadd.f32 %v5023_v2, %v1386_v42  ;;  %v1642_v45 = vpop.f32.mrb[43].mxu1  ;;  %v2362_v49 = vmax.f32 %v2234_v35, 0.0  ;;  %v2296_v50 = vmax.f32 %v2168_v36, 0.0 }
 0x141   : > { %v2299_v47 = vmax.f32 %v2171_v40, 0.0  ;;  %v2233_v48 = vadd.f32 %v5023_v2, %v1642_v45  ;;  %v2360_v53 = vmax.f32 %v2232_v39, 0.0 }
 0x142   : > { %v2363_v51 = vmax.f32 %v2235_v43, 0.0  ;;  %v2297_v52 = vmax.f32 %v2169_v44, 0.0 }
 0x143   : > { %v4062_v54 = vpack.c.bf16 %v2299_v47, %v2298_v46  ;;  %v2361_v55 = vmax.f32 %v2233_v48, 0.0 }
 0x144   : > { %v4222_v56 = vpack.c.bf16 %v2363_v51, %v2362_v49  ;;  %v4057_v57 = vpack.c.bf16 %v2297_v52, %v2296_v50  ;;  %v4453_v58 = vpop.f32.mrb[44].mxu0 }
 0x145   : > { %4294 = vst [vmem:[%s5034_s10 + $0xa8] sm:$0xff] %v4062_v54   ;;  %v4217_v59 = vpack.c.bf16 %v2361_v55, %v2360_v53  ;;  %v2174_v60 = vadd.f32 %v4453_v58, %v5023_v2  ;;  %v4517_v61 = vpop.f32.mrb[44].mxu1  ;;  %v1399_v62 = vpop.f32.mrb[45].mxu0 }
 0x146   : > { %4326 = vst [vmem:[%s5034_s10 + $0x1a8] sm:$0xff] %v4222_v56   ;;  %4293 = vst [vmem:[%s5034_s10 + $0xa0] sm:$0xff] %v4057_v57   ;;  %v2238_v63 = vadd.f32 %v4517_v61, %v5023_v2  ;;  %v2172_v0 = vadd.f32 %v5023_v2, %v1399_v62  ;;  %v1655_v1 = vpop.f32.mrb[45].mxu1  ;;  %v4454_v3 = vpop.f32.mrb[46].mxu0 }
 0x147   : > { %4325 = vst [vmem:[%s5034_s10 + $0x1a0] sm:$0xff] %v4217_v59   ;;  %v2236_v4 = vadd.f32 %v5023_v2, %v1655_v1  ;;  %v2175_v5 = vadd.f32 %v4454_v3, %v5023_v2  ;;  %v4518_v6 = vpop.f32.mrb[46].mxu1  ;;  %v1402_v7 = vpop.f32.mrb[47].mxu0  ;;  %v2302_v11 = vmax.f32 %v2174_v60, 0.0 }
 0x148   : > { %v2239_v8 = vadd.f32 %v4518_v6, %v5023_v2  ;;  %v2173_v9 = vadd.f32 %v5023_v2, %v1402_v7  ;;  %v1658_v10 = vpop.f32.mrb[47].mxu1  ;;  %v2366_v14 = vmax.f32 %v2238_v63, 0.0  ;;  %v2300_v15 = vmax.f32 %v2172_v0, 0.0 }
 0x149   : > { %v2303_v12 = vmax.f32 %v2175_v5, 0.0  ;;  %v2237_v13 = vadd.f32 %v5023_v2, %v1658_v10  ;;  %v2364_v18 = vmax.f32 %v2236_v4, 0.0 }
 0x14a   : > { %v2367_v16 = vmax.f32 %v2239_v8, 0.0  ;;  %v2301_v17 = vmax.f32 %v2173_v9, 0.0 }
 0x14b   : > { %v4072_v19 = vpack.c.bf16 %v2303_v12, %v2302_v11  ;;  %v2365_v20 = vmax.f32 %v2237_v13, 0.0 }
 0x14c   : > { %v4232_v21 = vpack.c.bf16 %v2367_v16, %v2366_v14  ;;  %v4067_v22 = vpack.c.bf16 %v2301_v17, %v2300_v15  ;;  %v4457_v23 = vpop.f32.mrb[48].mxu0 }
 0x14d   : > { %4296 = vst [vmem:[%s5034_s10 + $0xb8] sm:$0xff] %v4072_v19   ;;  %v4227_v24 = vpack.c.bf16 %v2365_v20, %v2364_v18  ;;  %v2178_v25 = vadd.f32 %v4457_v23, %v5023_v2  ;;  %v4521_v26 = vpop.f32.mrb[48].mxu1  ;;  %v1415_v27 = vpop.f32.mrb[49].mxu0 }
 0x14e   : > { %4328 = vst [vmem:[%s5034_s10 + $0x1b8] sm:$0xff] %v4232_v21   ;;  %4295 = vst [vmem:[%s5034_s10 + $0xb0] sm:$0xff] %v4067_v22   ;;  %v2242_v28 = vadd.f32 %v4521_v26, %v5023_v2  ;;  %v2176_v29 = vadd.f32 %v5023_v2, %v1415_v27  ;;  %v1671_v30 = vpop.f32.mrb[49].mxu1  ;;  %v4458_v31 = vpop.f32.mrb[50].mxu0 }
 0x14f   : > { %4327 = vst [vmem:[%s5034_s10 + $0x1b0] sm:$0xff] %v4227_v24   ;;  %v2240_v32 = vadd.f32 %v5023_v2, %v1671_v30  ;;  %v2179_v33 = vadd.f32 %v4458_v31, %v5023_v2  ;;  %v4522_v34 = vpop.f32.mrb[50].mxu1  ;;  %v1418_v35 = vpop.f32.mrb[51].mxu0  ;;  %v2306_v39 = vmax.f32 %v2178_v25, 0.0 }
 0x150   : > { %v2243_v36 = vadd.f32 %v4522_v34, %v5023_v2  ;;  %v2177_v37 = vadd.f32 %v5023_v2, %v1418_v35  ;;  %v1674_v38 = vpop.f32.mrb[51].mxu1  ;;  %v2370_v42 = vmax.f32 %v2242_v28, 0.0  ;;  %v2304_v43 = vmax.f32 %v2176_v29, 0.0 }
 0x151   : > { %v2307_v40 = vmax.f32 %v2179_v33, 0.0  ;;  %v2241_v41 = vadd.f32 %v5023_v2, %v1674_v38  ;;  %v2368_v46 = vmax.f32 %v2240_v32, 0.0 }
 0x152   : > { %v2371_v44 = vmax.f32 %v2243_v36, 0.0  ;;  %v2305_v45 = vmax.f32 %v2177_v37, 0.0 }
 0x153   : > { %v4082_v47 = vpack.c.bf16 %v2307_v40, %v2306_v39  ;;  %v2369_v48 = vmax.f32 %v2241_v41, 0.0 }
 0x154   : > { %v4242_v49 = vpack.c.bf16 %v2371_v44, %v2370_v42  ;;  %v4077_v50 = vpack.c.bf16 %v2305_v45, %v2304_v43  ;;  %v4461_v51 = vpop.f32.mrb[52].mxu0 }
 0x155   : > { %4298 = vst [vmem:[%s5034_s10 + $0xc8] sm:$0xff] %v4082_v47   ;;  %v4237_v52 = vpack.c.bf16 %v2369_v48, %v2368_v46  ;;  %v2182_v53 = vadd.f32 %v4461_v51, %v5023_v2  ;;  %v4525_v54 = vpop.f32.mrb[52].mxu1  ;;  %v1431_v55 = vpop.f32.mrb[53].mxu0 }
 0x156   : > { %4330 = vst [vmem:[%s5034_s10 + $0x1c8] sm:$0xff] %v4242_v49   ;;  %4297 = vst [vmem:[%s5034_s10 + $0xc0] sm:$0xff] %v4077_v50   ;;  %v2246_v56 = vadd.f32 %v4525_v54, %v5023_v2  ;;  %v2180_v57 = vadd.f32 %v5023_v2, %v1431_v55  ;;  %v1687_v58 = vpop.f32.mrb[53].mxu1  ;;  %v4462_v59 = vpop.f32.mrb[54].mxu0 }
 0x157   : > { %4329 = vst [vmem:[%s5034_s10 + $0x1c0] sm:$0xff] %v4237_v52   ;;  %v2244_v60 = vadd.f32 %v5023_v2, %v1687_v58  ;;  %v2183_v61 = vadd.f32 %v4462_v59, %v5023_v2  ;;  %v4526_v62 = vpop.f32.mrb[54].mxu1  ;;  %v1434_v63 = vpop.f32.mrb[55].mxu0  ;;  %v2310_v4 = vmax.f32 %v2182_v53, 0.0 }
 0x158   : > { %v2247_v0 = vadd.f32 %v4526_v62, %v5023_v2  ;;  %v2181_v1 = vadd.f32 %v5023_v2, %v1434_v63  ;;  %v1690_v3 = vpop.f32.mrb[55].mxu1  ;;  %v2374_v7 = vmax.f32 %v2246_v56, 0.0  ;;  %v2308_v8 = vmax.f32 %v2180_v57, 0.0 }
 0x159   : > { %v2311_v5 = vmax.f32 %v2183_v61, 0.0  ;;  %v2245_v6 = vadd.f32 %v5023_v2, %v1690_v3  ;;  %v2372_v11 = vmax.f32 %v2244_v60, 0.0 }
 0x15a   : > { %v2375_v9 = vmax.f32 %v2247_v0, 0.0  ;;  %v2309_v10 = vmax.f32 %v2181_v1, 0.0 }
 0x15b   : > { %v4092_v12 = vpack.c.bf16 %v2311_v5, %v2310_v4  ;;  %v2373_v13 = vmax.f32 %v2245_v6, 0.0 }
 0x15c   : > { %v4252_v14 = vpack.c.bf16 %v2375_v9, %v2374_v7  ;;  %v4087_v15 = vpack.c.bf16 %v2309_v10, %v2308_v8  ;;  %v4465_v16 = vpop.f32.mrb[56].mxu0 }
 0x15d   : > { %4300 = vst [vmem:[%s5034_s10 + $0xd8] sm:$0xff] %v4092_v12   ;;  %v4247_v17 = vpack.c.bf16 %v2373_v13, %v2372_v11  ;;  %v2186_v18 = vadd.f32 %v4465_v16, %v5023_v2  ;;  %v4529_v19 = vpop.f32.mrb[56].mxu1  ;;  %v1447_v20 = vpop.f32.mrb[57].mxu0 }
 0x15e   : > { %4332 = vst [vmem:[%s5034_s10 + $0x1d8] sm:$0xff] %v4252_v14   ;;  %4299 = vst [vmem:[%s5034_s10 + $0xd0] sm:$0xff] %v4087_v15   ;;  %v2250_v21 = vadd.f32 %v4529_v19, %v5023_v2  ;;  %v2184_v22 = vadd.f32 %v5023_v2, %v1447_v20  ;;  %v1703_v23 = vpop.f32.mrb[57].mxu1  ;;  %v4466_v24 = vpop.f32.mrb[58].mxu0 }
 0x15f   : > { %4331 = vst [vmem:[%s5034_s10 + $0x1d0] sm:$0xff] %v4247_v17   ;;  %v2248_v25 = vadd.f32 %v5023_v2, %v1703_v23  ;;  %v2187_v26 = vadd.f32 %v4466_v24, %v5023_v2  ;;  %v4530_v27 = vpop.f32.mrb[58].mxu1  ;;  %v1450_v28 = vpop.f32.mrb[59].mxu0  ;;  %v2314_v32 = vmax.f32 %v2186_v18, 0.0 }
 0x160   : > { %v2251_v29 = vadd.f32 %v4530_v27, %v5023_v2  ;;  %v2185_v30 = vadd.f32 %v5023_v2, %v1450_v28  ;;  %v1706_v31 = vpop.f32.mrb[59].mxu1  ;;  %v2378_v35 = vmax.f32 %v2250_v21, 0.0  ;;  %v2312_v36 = vmax.f32 %v2184_v22, 0.0 }
 0x161   : > { %v2315_v33 = vmax.f32 %v2187_v26, 0.0  ;;  %v2249_v34 = vadd.f32 %v5023_v2, %v1706_v31  ;;  %v2376_v39 = vmax.f32 %v2248_v25, 0.0 }
 0x162   : > { %v2379_v37 = vmax.f32 %v2251_v29, 0.0  ;;  %v2313_v38 = vmax.f32 %v2185_v30, 0.0 }
 0x163   : > { %v4102_v40 = vpack.c.bf16 %v2315_v33, %v2314_v32  ;;  %v2377_v41 = vmax.f32 %v2249_v34, 0.0 }
 0x164   : > { %v4262_v42 = vpack.c.bf16 %v2379_v37, %v2378_v35  ;;  %v4097_v43 = vpack.c.bf16 %v2313_v38, %v2312_v36  ;;  %v4469_v44 = vpop.f32.mrb[60].mxu0 }
 0x165   : > { %4302 = vst [vmem:[%s5034_s10 + $0xe8] sm:$0xff] %v4102_v40   ;;  %v4257_v45 = vpack.c.bf16 %v2377_v41, %v2376_v39  ;;  %v2190_v46 = vadd.f32 %v4469_v44, %v5023_v2  ;;  %v4533_v47 = vpop.f32.mrb[60].mxu1  ;;  %v1463_v48 = vpop.f32.mrb[61].mxu0 }
 0x166   : > { %4334 = vst [vmem:[%s5034_s10 + $0x1e8] sm:$0xff] %v4262_v42   ;;  %4301 = vst [vmem:[%s5034_s10 + $0xe0] sm:$0xff] %v4097_v43   ;;  %v2254_v49 = vadd.f32 %v4533_v47, %v5023_v2  ;;  %v2188_v50 = vadd.f32 %v5023_v2, %v1463_v48  ;;  %v1719_v51 = vpop.f32.mrb[61].mxu1  ;;  %v4470_v52 = vpop.f32.mrb[62].mxu0 }
 0x167   : > { %4333 = vst [vmem:[%s5034_s10 + $0x1e0] sm:$0xff] %v4257_v45   ;;  %v2252_v53 = vadd.f32 %v5023_v2, %v1719_v51  ;;  %v2191_v54 = vadd.f32 %v4470_v52, %v5023_v2  ;;  %v4534_v55 = vpop.f32.mrb[62].mxu1  ;;  %v1466_v56 = vpop.f32.mrb[63].mxu0  ;;  %v2318_v60 = vmax.f32 %v2190_v46, 0.0 }
 0x168   : > { %v2255_v57 = vadd.f32 %v4534_v55, %v5023_v2  ;;  %v2189_v58 = vadd.f32 %v5023_v2, %v1466_v56  ;;  %v1722_v59 = vpop.f32.mrb[63].mxu1  ;;  %v2382_v63 = vmax.f32 %v2254_v49, 0.0  ;;  %v2316_v0 = vmax.f32 %v2188_v50, 0.0 }
 0x169   : > { %v2319_v61 = vmax.f32 %v2191_v54, 0.0  ;;  %v2253_v62 = vadd.f32 %v5023_v2, %v1722_v59  ;;  %v2380_v4 = vmax.f32 %v2252_v53, 0.0  ;;  %3030 = sbr.rel (!%p4865_p3) target bundleno = 459 (0x1cb), region = 44 }
 0x16a   : > { %v2383_v1 = vmax.f32 %v2255_v57, 0.0  ;;  %v2317_v3 = vmax.f32 %v2189_v58, 0.0 }
 0x16b   : > { %v4112_v5 = vpack.c.bf16 %v2319_v61, %v2318_v60  ;;  %v2381_v6 = vmax.f32 %v2253_v62, 0.0 }
 0x16c   : > { %v4272_v7 = vpack.c.bf16 %v2383_v1, %v2382_v63  ;;  %v4107_v8 = vpack.c.bf16 %v2317_v3, %v2316_v0 }
 0x16d   : > { %4304 = vst [vmem:[%s5034_s10 + $0xf8] sm:$0xff] %v4112_v5   ;;  %v4267_v9 = vpack.c.bf16 %v2381_v6, %v2380_v4 }
 0x16e   : > { %4336 = vst [vmem:[%s5034_s10 + $0x1f8] sm:$0xff] %v4272_v7   ;;  %4303 = vst [vmem:[%s5034_s10 + $0xf0] sm:$0xff] %v4107_v8  }
 0x16f   : > { %4335 = vst [vmem:[%s5034_s10 + $0x1f0] sm:$0xff] %v4267_v9  }
 0x170   : > { %s5439_s11 = smov (!%p3033_p9, %s3032_s11), 128 }
 0x171   : > { %s3808_s23 = sshll.u32 %s5439_s11, 6 }
 0x172   : > { %p3811_p10 = scmp.eq.s32.totalorder %s3808_s23, 0 }
 0x173   : > { %s5233_s24 = sshrl.u32 (!%p3811_p10), %s5439_s11, 6 }
 0x174   : > { %3042 = sbr.rel (%p3811_p10) target bundleno = 459 (0x1cb), region = 48  ;;  %p3812_p11 = scmp.le.s32.totalorder (!%p3811_p10), %s5233_s24, 0 }
 0x17b   : > { %3464 = sbr.rel (%p3812_p11) target bundleno = 438 (0x1b6), region = 126  ;;  %s5429_s14 = smov (!%p3812_p11), %s5227_s21 }
 0x17c   : > { %s5430_s20 = smov (!%p3812_p11), %s5034_s10  ;;  %s5242_s25 = smov (!%p3812_p11), 0  }
 0x17d   : > { %s5244_s26 = smov (!%p3812_p11), 0  }
 0x182 LB: >> { %v3058_v2 = vld [vmem:[%s4787_s20] sm:$0xf]  ;;  %v3060_v10 = vld [vmem:[%s4787_s20 + $0x4] sm:$0xf]  ;;  %v3062_v11 = vld [vmem:[%s4787_s20 + $0x8] sm:$0xf]  ;;  %s4795_s26 = sphi %s5244_s26, %s3052_s26   ;;  %s4791_s25 = sphi %s5242_s25, %s5431_s25   ;;  %s4787_s20 = sphi %s5430_s20, %s3191_s20   ;;  %s4783_s14 = sphi %s5429_s14, %s3192_s14  }
 0x183   : >> { %3059 = vst [vmem:[%s4783_s14] sm:$0xf] %v3058_v2  ;;  %3061 = vst [vmem:[%s4783_s14 + $0x4] sm:$0xf] %v3060_v10  ;;  %v3064_v12 = vld [vmem:[%s4787_s20 + $0xc] sm:$0xf]  ;;  %s3186_s27 = sadd.s32 1, %s4791_s25 }
 0x184   : >> { %3063 = vst [vmem:[%s4783_s14 + $0x8] sm:$0xf] %v3062_v11  ;;  %v3066_v13 = vld [vmem:[%s4787_s20 + $0x10] sm:$0xf]  ;;  %v3068_v14 = vld [vmem:[%s4787_s20 + $0x14] sm:$0xf]  ;;  %p3187_p12 = scmp.ge.s32.totalorder %s3186_s27, %s5233_s24 }
 0x185   : >> { %3065 = vst [vmem:[%s4783_s14 + $0xc] sm:$0xf] %v3064_v12  ;;  %3067 = vst [vmem:[%s4783_s14 + $0x10] sm:$0xf] %v3066_v13  ;;  %v3070_v15 = vld [vmem:[%s4787_s20 + $0x18] sm:$0xf] }
 0x186   : >> { %3069 = vst [vmem:[%s4783_s14 + $0x14] sm:$0xf] %v3068_v14  ;;  %v3072_v16 = vld [vmem:[%s4787_s20 + $0x1c] sm:$0xf]  ;;  %v3074_v17 = vld [vmem:[%s4787_s20 + $0x20] sm:$0xf] }
 0x187   : >> { %3071 = vst [vmem:[%s4783_s14 + $0x18] sm:$0xf] %v3070_v15  ;;  %3073 = vst [vmem:[%s4783_s14 + $0x1c] sm:$0xf] %v3072_v16  ;;  %v3076_v18 = vld [vmem:[%s4787_s20 + $0x24] sm:$0xf] }
 0x188   : >> { %3075 = vst [vmem:[%s4783_s14 + $0x20] sm:$0xf] %v3074_v17  ;;  %v3078_v19 = vld [vmem:[%s4787_s20 + $0x28] sm:$0xf]  ;;  %v3080_v20 = vld [vmem:[%s4787_s20 + $0x2c] sm:$0xf] }
 0x189   : >> { %3077 = vst [vmem:[%s4783_s14 + $0x24] sm:$0xf] %v3076_v18  ;;  %3079 = vst [vmem:[%s4783_s14 + $0x28] sm:$0xf] %v3078_v19  ;;  %v3082_v21 = vld [vmem:[%s4787_s20 + $0x30] sm:$0xf] }
 0x18a   : >> { %3081 = vst [vmem:[%s4783_s14 + $0x2c] sm:$0xf] %v3080_v20  ;;  %v3084_v22 = vld [vmem:[%s4787_s20 + $0x34] sm:$0xf]  ;;  %v3086_v23 = vld [vmem:[%s4787_s20 + $0x38] sm:$0xf] }
 0x18b   : >> { %3083 = vst [vmem:[%s4783_s14 + $0x30] sm:$0xf] %v3082_v21  ;;  %3085 = vst [vmem:[%s4783_s14 + $0x34] sm:$0xf] %v3084_v22  ;;  %v3088_v24 = vld [vmem:[%s4787_s20 + $0x3c] sm:$0xf] }
 0x18c   : >> { %3087 = vst [vmem:[%s4783_s14 + $0x38] sm:$0xf] %v3086_v23  ;;  %v3090_v25 = vld [vmem:[%s4787_s20 + $0x40] sm:$0xf]  ;;  %v3092_v26 = vld [vmem:[%s4787_s20 + $0x44] sm:$0xf] }
 0x18d   : >> { %3089 = vst [vmem:[%s4783_s14 + $0x3c] sm:$0xf] %v3088_v24  ;;  %3091 = vst [vmem:[%s4783_s14 + $0x40] sm:$0xf] %v3090_v25  ;;  %v3094_v27 = vld [vmem:[%s4787_s20 + $0x48] sm:$0xf] }
 0x18e   : >> { %3093 = vst [vmem:[%s4783_s14 + $0x44] sm:$0xf] %v3092_v26  ;;  %v3096_v28 = vld [vmem:[%s4787_s20 + $0x4c] sm:$0xf]  ;;  %v3098_v29 = vld [vmem:[%s4787_s20 + $0x50] sm:$0xf] }
 0x18f   : >> { %3095 = vst [vmem:[%s4783_s14 + $0x48] sm:$0xf] %v3094_v27  ;;  %3097 = vst [vmem:[%s4783_s14 + $0x4c] sm:$0xf] %v3096_v28  ;;  %v3100_v30 = vld [vmem:[%s4787_s20 + $0x54] sm:$0xf] }
 0x190   : >> { %3099 = vst [vmem:[%s4783_s14 + $0x50] sm:$0xf] %v3098_v29  ;;  %v3102_v31 = vld [vmem:[%s4787_s20 + $0x58] sm:$0xf]  ;;  %v3104_v32 = vld [vmem:[%s4787_s20 + $0x5c] sm:$0xf] }
 0x191   : >> { %3101 = vst [vmem:[%s4783_s14 + $0x54] sm:$0xf] %v3100_v30  ;;  %3103 = vst [vmem:[%s4783_s14 + $0x58] sm:$0xf] %v3102_v31  ;;  %v3106_v33 = vld [vmem:[%s4787_s20 + $0x60] sm:$0xf] }
 0x192   : >> { %3105 = vst [vmem:[%s4783_s14 + $0x5c] sm:$0xf] %v3104_v32  ;;  %v3108_v34 = vld [vmem:[%s4787_s20 + $0x64] sm:$0xf]  ;;  %v3110_v35 = vld [vmem:[%s4787_s20 + $0x68] sm:$0xf] }
 0x193   : >> { %3107 = vst [vmem:[%s4783_s14 + $0x60] sm:$0xf] %v3106_v33  ;;  %3109 = vst [vmem:[%s4783_s14 + $0x64] sm:$0xf] %v3108_v34  ;;  %v3112_v36 = vld [vmem:[%s4787_s20 + $0x6c] sm:$0xf] }
 0x194   : >> { %3111 = vst [vmem:[%s4783_s14 + $0x68] sm:$0xf] %v3110_v35  ;;  %v3114_v37 = vld [vmem:[%s4787_s20 + $0x70] sm:$0xf]  ;;  %v3116_v38 = vld [vmem:[%s4787_s20 + $0x74] sm:$0xf] }
 0x195   : >> { %3113 = vst [vmem:[%s4783_s14 + $0x6c] sm:$0xf] %v3112_v36  ;;  %3115 = vst [vmem:[%s4783_s14 + $0x70] sm:$0xf] %v3114_v37  ;;  %v3118_v39 = vld [vmem:[%s4787_s20 + $0x78] sm:$0xf] }
 0x196   : >> { %3117 = vst [vmem:[%s4783_s14 + $0x74] sm:$0xf] %v3116_v38  ;;  %v3120_v40 = vld [vmem:[%s4787_s20 + $0x7c] sm:$0xf]  ;;  %v3122_v41 = vld [vmem:[%s4787_s20 + $0x80] sm:$0xf] }
 0x197   : >> { %3119 = vst [vmem:[%s4783_s14 + $0x78] sm:$0xf] %v3118_v39  ;;  %3121 = vst [vmem:[%s4783_s14 + $0x7c] sm:$0xf] %v3120_v40  ;;  %v3124_v42 = vld [vmem:[%s4787_s20 + $0x84] sm:$0xf] }
 0x198   : >> { %3123 = vst [vmem:[%s4783_s14 + $0x80] sm:$0xf] %v3122_v41  ;;  %v3126_v43 = vld [vmem:[%s4787_s20 + $0x88] sm:$0xf]  ;;  %v3128_v44 = vld [vmem:[%s4787_s20 + $0x8c] sm:$0xf] }
 0x199   : >> { %3125 = vst [vmem:[%s4783_s14 + $0x84] sm:$0xf] %v3124_v42  ;;  %3127 = vst [vmem:[%s4783_s14 + $0x88] sm:$0xf] %v3126_v43  ;;  %v3130_v45 = vld [vmem:[%s4787_s20 + $0x90] sm:$0xf] }
 0x19a   : >> { %3129 = vst [vmem:[%s4783_s14 + $0x8c] sm:$0xf] %v3128_v44  ;;  %v3132_v46 = vld [vmem:[%s4787_s20 + $0x94] sm:$0xf]  ;;  %v3134_v47 = vld [vmem:[%s4787_s20 + $0x98] sm:$0xf] }
 0x19b   : >> { %3131 = vst [vmem:[%s4783_s14 + $0x90] sm:$0xf] %v3130_v45  ;;  %3133 = vst [vmem:[%s4783_s14 + $0x94] sm:$0xf] %v3132_v46  ;;  %v3136_v48 = vld [vmem:[%s4787_s20 + $0x9c] sm:$0xf] }
 0x19c   : >> { %3135 = vst [vmem:[%s4783_s14 + $0x98] sm:$0xf] %v3134_v47  ;;  %v3138_v49 = vld [vmem:[%s4787_s20 + $0xa0] sm:$0xf]  ;;  %v3140_v50 = vld [vmem:[%s4787_s20 + $0xa4] sm:$0xf] }
 0x19d   : >> { %3137 = vst [vmem:[%s4783_s14 + $0x9c] sm:$0xf] %v3136_v48  ;;  %3139 = vst [vmem:[%s4783_s14 + $0xa0] sm:$0xf] %v3138_v49  ;;  %v3142_v51 = vld [vmem:[%s4787_s20 + $0xa8] sm:$0xf] }
 0x19e   : >> { %3141 = vst [vmem:[%s4783_s14 + $0xa4] sm:$0xf] %v3140_v50  ;;  %v3144_v52 = vld [vmem:[%s4787_s20 + $0xac] sm:$0xf]  ;;  %v3146_v53 = vld [vmem:[%s4787_s20 + $0xb0] sm:$0xf] }
 0x19f   : >> { %3143 = vst [vmem:[%s4783_s14 + $0xa8] sm:$0xf] %v3142_v51  ;;  %3145 = vst [vmem:[%s4783_s14 + $0xac] sm:$0xf] %v3144_v52  ;;  %v3148_v54 = vld [vmem:[%s4787_s20 + $0xb4] sm:$0xf] }
 0x1a0   : >> { %3147 = vst [vmem:[%s4783_s14 + $0xb0] sm:$0xf] %v3146_v53  ;;  %v3150_v55 = vld [vmem:[%s4787_s20 + $0xb8] sm:$0xf]  ;;  %v3152_v56 = vld [vmem:[%s4787_s20 + $0xbc] sm:$0xf] }
 0x1a1   : >> { %3149 = vst [vmem:[%s4783_s14 + $0xb4] sm:$0xf] %v3148_v54  ;;  %3151 = vst [vmem:[%s4783_s14 + $0xb8] sm:$0xf] %v3150_v55  ;;  %v3154_v57 = vld [vmem:[%s4787_s20 + $0xc0] sm:$0xf] }
 0x1a2   : >> { %3153 = vst [vmem:[%s4783_s14 + $0xbc] sm:$0xf] %v3152_v56  ;;  %v3156_v58 = vld [vmem:[%s4787_s20 + $0xc4] sm:$0xf]  ;;  %v3158_v59 = vld [vmem:[%s4787_s20 + $0xc8] sm:$0xf] }
 0x1a3   : >> { %3155 = vst [vmem:[%s4783_s14 + $0xc0] sm:$0xf] %v3154_v57  ;;  %3157 = vst [vmem:[%s4783_s14 + $0xc4] sm:$0xf] %v3156_v58  ;;  %v3160_v60 = vld [vmem:[%s4787_s20 + $0xcc] sm:$0xf] }
 0x1a4   : >> { %3159 = vst [vmem:[%s4783_s14 + $0xc8] sm:$0xf] %v3158_v59  ;;  %v3162_v61 = vld [vmem:[%s4787_s20 + $0xd0] sm:$0xf]  ;;  %v3164_v62 = vld [vmem:[%s4787_s20 + $0xd4] sm:$0xf] }
 0x1a5   : >> { %3161 = vst [vmem:[%s4783_s14 + $0xcc] sm:$0xf] %v3160_v60  ;;  %3163 = vst [vmem:[%s4783_s14 + $0xd0] sm:$0xf] %v3162_v61  ;;  %v3166_v63 = vld [vmem:[%s4787_s20 + $0xd8] sm:$0xf] }
 0x1a6   : >> { %3165 = vst [vmem:[%s4783_s14 + $0xd4] sm:$0xf] %v3164_v62  ;;  %v3168_v0 = vld [vmem:[%s4787_s20 + $0xdc] sm:$0xf]  ;;  %v3170_v1 = vld [vmem:[%s4787_s20 + $0xe0] sm:$0xf] }
 0x1a7   : >> { %3167 = vst [vmem:[%s4783_s14 + $0xd8] sm:$0xf] %v3166_v63  ;;  %3169 = vst [vmem:[%s4783_s14 + $0xdc] sm:$0xf] %v3168_v0  ;;  %v3172_v3 = vld [vmem:[%s4787_s20 + $0xe4] sm:$0xf] }
 0x1a8   : >> { %3171 = vst [vmem:[%s4783_s14 + $0xe0] sm:$0xf] %v3170_v1  ;;  %v3174_v4 = vld [vmem:[%s4787_s20 + $0xe8] sm:$0xf]  ;;  %v3176_v5 = vld [vmem:[%s4787_s20 + $0xec] sm:$0xf] }
 0x1a9   : >> { %3173 = vst [vmem:[%s4783_s14 + $0xe4] sm:$0xf] %v3172_v3  ;;  %3175 = vst [vmem:[%s4783_s14 + $0xe8] sm:$0xf] %v3174_v4  ;;  %v3178_v6 = vld [vmem:[%s4787_s20 + $0xf0] sm:$0xf] }
 0x1aa   : >> { %3177 = vst [vmem:[%s4783_s14 + $0xec] sm:$0xf] %v3176_v5  ;;  %v3180_v7 = vld [vmem:[%s4787_s20 + $0xf4] sm:$0xf]  ;;  %v3182_v8 = vld [vmem:[%s4787_s20 + $0xf8] sm:$0xf] }
 0x1ab   : >> { %3179 = vst [vmem:[%s4783_s14 + $0xf0] sm:$0xf] %v3178_v6  ;;  %3181 = vst [vmem:[%s4783_s14 + $0xf4] sm:$0xf] %v3180_v7  ;;  %v3184_v9 = vld [vmem:[%s4787_s20 + $0xfc] sm:$0xf] }
 0x1ac   : >> { %3183 = vst [vmem:[%s4783_s14 + $0xf8] sm:$0xf] %v3182_v8  ;;  %3185 = vst [vmem:[%s4783_s14 + $0xfc] sm:$0xf] %v3184_v9  ;;  %s5441_s27 = smov (%p3187_p12, %s3186_s27), 0  ;;  %s3052_s26 = sadd.s32 1, %s4795_s26  }
 0x1ad   : >> { %s3813_s28 = sshll.u32 %s5441_s27, 8  ;;  %p3051_p13 = scmp.ge.s32.totalorder %s3052_s26, %s5233_s24 }
 0x1ae   : >> { %s3191_s20 = scalar_lea.vmem %s5034_s10, %s3813_s28 [#allocation3]   ;;  %s3192_s14 = scalar_lea.vmem %s5227_s21, %s3813_s28  }
 0x1af   : >> { %s5431_s25 = smov %s5441_s27  ;;  %3054 = sbr.rel (!%p3051_p13) target bundleno = 386 (0x182), region = 132 }
 0x1b6 PF: > { %s5401_s29 = sand.u32 63, %s5439_s11   ;;  %s3952_s30 = sshll.u32 %s5233_s24, 8 }
 0x1b7   : > { %s3197_s4 = scalar_lea.vmem %s5034_s10, %s3952_s30 [#allocation3]   ;;  %s3199_s5 = scalar_lea.vmem %s5227_s21, %s3952_s30  }
 0x1b8   : > { %p3818_p0 = scmp.le.s32.totalorder %s5401_s29, 0 }
 0x1b9   : > { %s4797_s6 = smov (!%p3818_p0), %s3199_s5   ;;  %s4801_s7 = smov (!%p3818_p0), %s3197_s4  }
 0x1ba   : > { %3478 = sbr.rel (%p3818_p0) target bundleno = 459 (0x1cb), region = 137  ;;  %s4805_s8 = smov (!%p3818_p0), 0  }
 0x1bb   : > { %s4809_s9 = smov (!%p3818_p0), 0  }
 0x1c1 LB: >> { %v3209_v2 = vld [vmem:[%s4803_s7] sm:$0xf]  ;;  %s3211_s11 = sadd.s32 1, %s4807_s8  ;;  %s3203_s9 = sadd.s32 1, %s4811_s9   ;;  %s4811_s9 = sphi %s4809_s9, %s3203_s9   ;;  %s4807_s8 = sphi %s4805_s8, %s4806_s8   ;;  %s4803_s7 = sphi %s4801_s7, %s3216_s7   ;;  %s4799_s6 = sphi %s4797_s6, %s3217_s6  }
 0x1c2   : >> { %3210 = vst [vmem:[%s4799_s6] sm:$0xf] %v3209_v2  ;;  %p3212_p1 = scmp.ge.s32.totalorder %s3211_s11, %s5401_s29  ;;  %p3202_p2 = scmp.ge.s32.totalorder %s3203_s9, %s5401_s29 }
 0x1c4   : >> { %s5443_s11 = smov (%p3212_p1, %s3211_s11), 0  ;;  %3205 = sbr.rel (!%p3202_p2) target bundleno = 449 (0x1c1), region = 143 }
 0x1c5   : >> { %s3819_s10 = sshll.u32 %s5443_s11, 2  ;;  %s4806_s8 = smov %s5443_s11  }
 0x1c6   : >> { %s3216_s7 = scalar_lea.vmem %s3197_s4, %s3819_s10 [#allocation3]   ;;  %s3217_s6 = scalar_lea.vmem %s3199_s5, %s3819_s10  }
 0x1cb PF: > { %s13_s16 = sadd.s32 1, %s4779_s16   ;;  %s5432_s12 = smov %s4767_s13 }
 0x1cc   : > { %p10_p3 = scmp.ge.s32.totalorder %s13_s16, 34   ;;  %s5433_s13 = smov %s4874_s22 }
 0x1cd   : > { %s5434_s14 = smov %s4775_s15  ;;  %s5435_s15 = smov %s5437_s18 }
 0x1ce   :  { %12 = sbr.rel (!%p10_p3) target bundleno = 3 (0x3), region = 154 }

// kernel: net_forward.7
= control target key start
LH: loop header
LB: loop body
LE: loop exit
PB: predicated region body
PF: predicated region fallthrough
CT: control target
= control target key end

     0   :  { %8 = vsyncpa [#allocation4], 0  ;;  %s5051_s0 = inlined_call_operand.hbm [shape: bf16[7688,2048], index: 0, kind: input, shape index: {}]   ;;  %s5052_s1 = inlined_call_operand.vmem [shape: bf16[2048,64], index: 1, kind: input, shape index: {}]   ;;  %s5053_s2 = inlined_call_operand.vmem [shape: f32[1,64], index: 2, kind: input, shape index: {}]   ;;  %s5054_s3 = inlined_call_operand.vmem [shape: bf16[7688,64], index: 3, kind: output, shape index: {}]  }
   0x1   :  { %10 = vsyncpa [#allocation4 + $0x1], 0  ;;  %s4099_s12 = smov 0   ;;  %s4101_s13 = smov 0  }
   0x2   :  { %s4103_s14 = smov 0   ;;  %s4105_s15 = smov 0  }
   0x3   :  { %s4107_s16 = smov 0   ;;  %s4109_s17 = smov 0  }
   0x4   :  { %s4111_s18 = smov 0   ;;  %s4113_s19 = smov 0  }
   0x5   :  { %s4115_s20 = smov 0   ;;  %s4117_s21 = smov 0  }
   0x6 LB: > { %s3190_s22 = sadd.s32 4294967295, %s4039_s21   ;;  %s28_s23 = sadd.s32 1, %s4031_s19  ;;  %s4039_s21 = sphi %s4117_s21, %s16_s21   ;;  %s4035_s20 = sphi %s4115_s20, %s5075_s20   ;;  %s4031_s19 = sphi %s4113_s19, %s5074_s19   ;;  %s4027_s18 = sphi %s4111_s18, %s5073_s18   ;;  %s4023_s17 = sphi %s4109_s17, %s5072_s17   ;;  %s4019_s16 = sphi %s4107_s16, %s5071_s16   ;;  %s4015_s15 = sphi %s4105_s15, %s5070_s15   ;;  %s4011_s14 = sphi %s4103_s14, %s5069_s14   ;;  %s4007_s13 = sphi %s4101_s13, %s5068_s13   ;;  %s4003_s12 = sphi %s4099_s12, %s5067_s12  }
   0x7   : > { %p29_p0 = scmp.ge.s32.totalorder %s28_s23, 4  ;;  %s35_s24 = sadd.s32 1, %s4035_s20 }
   0x8   : > { %s44_s25 = sadd.s32 1, %s4019_s16  ;;  %p51_p1 = scmp.ne.s32.totalorder %s4019_s16, %s4015_s15 }
   0x9   : > { %s5077_s23 = smov (%p29_p0, %s28_s23), 0  ;;  %s5079_s24 = smov (!%p29_p0, %s35_s24), %s4035_s20 }
   0xa   : > { %5057 = sst [smem:[#allocation7_spill]] %s5077_s23  ;;  %s40_s26 = ssub.s32 %s4031_s19, %s5077_s23 }
   0xb   : > { %p52_p2 = scmp.eq.s32.totalorder %s4039_s21, 0  ;;  %p37_p3 = scmp.ge.s32.totalorder %s5079_s24, 16 }
   0xc   : > { %p57_p4 = scmp.ne.s32.totalorder %s4015_s15, %s4011_s14  ;;  %p58_p6 = scmp.eq.s32.totalorder %s3190_s22, 0 }
   0xd   : > { %p4160_p5 = por %p52_p2, %p51_p1  ;;  %s5081_s24 = smov (%p37_p3, %s5079_s24), 0 }
   0xe   : > { %5059 = sst [smem:[#allocation8_spill]] %s5081_s24  ;;  %p4166_p7 = por %p58_p6, %p57_p4 }
   0xf   : > { %s126_s29 = sadd.s32 1, %s4007_s13  ;;  %s39_s30 = ssub.s32 %s4035_s20, %s5081_s24 }
  0x10   : > { %p136_p8 = scmp.ne.s32.totalorder %s4007_s13, %s4003_s12  ;;  %s41_s4 = sor.u32 %s40_s26, %s39_s30 }
  0x11   : > { %p124_p9 = scmp.eq.s32.totalorder %s39_s30, 0  ;;  %p42_p10 = scmp.eq.s32.totalorder %s41_s4, 0 }
  0x12   : > { %p137_p11 = scmp.eq.s32.totalorder %s3190_s22, 63  ;;  %p3194_p13 = scmp.ge.s32.totalorder %s4039_s21, 64 }
  0x13   : > { %s4176_s5 = scalar_select %p124_p9, %s4007_s13, %s126_s29  }
  0x14   : > { %s4179_s6 = scalar_select %p42_p10, %s4019_s16, %s44_s25  }
  0x15   : > { %p4181_p12 = por %p137_p11, %p136_p8  ;;  %165 = sbr.rel (%p3194_p13) target bundleno = 65 (0x41), region = 20 }
  0x1c   : > { %168 = sbr.rel (!%p4160_p5) target bundleno = 65 (0x41), region = 24  ;;  %s169_s8 = sand.u32 (%p4160_p5), 1, %s4019_s16  }
  0x1d   : > { %s3196_s9 = sshll.u32 (%p4160_p5), %s4035_s20, 6  ;;  %s3195_s10 = sshll.u32 (%p4160_p5), %s169_s8, 10 }
  0x1e   : > { %s3197_s11 = sshll.u32 (%p4160_p5), %s4031_s19, 2  ;;  %s176_s14 = ssub.s32 (%p4160_p5), 961, %s3196_s9 }
  0x1f   : > { %p177_p0 = scmp.lt.s32.totalorder (%p4160_p5), %s176_s14, 64  ;;  %s4194_s26 = scalar_lea.sflag (%p4160_p5), [#allocation4], %s169_s8 }
  0x20   : > { %s173_s29 = scalar_lea.vmem (%p4160_p5), [#allocation3], %s3195_s10 }
  0x23   : > { %s5083_s14 = smov (!%p177_p0, %s176_s14), 64 }
  0x24   : > { %s4191_s22 = sshll.u32 %s5083_s14, 8 }
  0x25   : > { %s182_s25 = ssub.s32 16384, %s4191_s22 }
  0x26   : > { %183 = vsyncadd %s4194_s26, %s182_s25  ;;  %p3200_p1 = scmp.ne.s32.totalorder %s4191_s22, 0  ;;  %s3455_s27 = sshll.u32 %s4035_s20, 10 }
  0x27   : > { %s186_s30 = sadd.s32 %s3455_s27, %s3197_s11  ;;  %s190_s4 = sshll.u32 %s173_s29, 4  ;;  %s4199_s4 = int_to_ptr.vmem [resolvable:$true] %s190_s4 }
  0x28   : > { %s3202_s9 = sshll.u32 %s186_s30, 6  ;;  %s3901_s25 = scalar_lea.hbm %s5051_s0, 984064 }
  0x29   : > { %s4204_s23 = scalar_lea.hbm %s5051_s0, %s3202_s9 }
  0x2a   : > { %s3897_s8 = scalar_lea.hbm %s4204_s23, %s4191_s22  ;;  %p3902_p5 = scmp.lt.u32.totalorder %s4204_s23, %s5051_s0 }
  0x2b   : > { %p3898_p2 = scmp.ne.s32.totalorder %s4204_s23, %s3897_s8  ;;  %p3903_p6 = scmp.lt.u32.totalorder %s3901_s25, %s3897_s8 }
  0x2c   : > { %p3905_p9 = scmp.lt.u32.totalorder %s3897_s8, %s4204_s23 }
  0x2d   : > { %p3899_p3 = pnand %p3898_p2, %p3200_p1  ;;  %p3904_p8 = por %p3903_p6, %p3902_p5 }
  0x2f   : > { %p3900_p4 = pneg %p3899_p3  ;;  %p3906_p10 = por %p3905_p9, %p3904_p8 }
  0x31   : > { %p3907_p11 = pnand %p3906_p10, %p3900_p4 }
  0x33   : > { %3910 = shalt.err (!%p3907_p11)
}
  0x34   : > { %s3911_s24 = scalar_lea.vmem %s4199_s4, %s4191_s22  ;;  %s4073_s30 = smov [#allocation3]  }
  0x35   : > { %p3912_p13 = scmp.ne.s32.totalorder %s4199_s4, %s3911_s24  ;;  %s3915_s9 = sshll.u32 %s4073_s30, 4  ;;  %s3916_s9 = int_to_ptr.vmem [resolvable:$false] %s3915_s9 }
  0x36   : > { %s3917_s14 = scalar_lea.vmem %s3916_s9, 32768  ;;  %p3918_p3 = scmp.lt.s32.totalorder %s4199_s4, %s3916_s9 }
  0x37   : > { %p3913_p0 = pnand %p3912_p13, %p3200_p1  ;;  %p3919_p5 = scmp.lt.s32.totalorder %s3917_s14, %s3911_s24 }
  0x39   : > { %p3914_p2 = pneg %p3913_p0  ;;  %p3920_p6 = por %p3919_p5, %p3918_p3 }
  0x3b   : > { %p3921_p8 = pnand %p3920_p6, %p3914_p2 }
  0x3d   : > { %3924 = shalt.err (!%p3921_p8)
}
  0x3e   : > { %s4074_s8 = smov 1024   ;;  %s4075_s10 = smov 256  }
  0x3f   : > { %s4076_s11 = smov 16  }
  0x40   : > { %196 = dma.hbm_to_vmem [thread:$0]  (%p3200_p1), %s4204_s23, %s4191_s22, %s4199_s4, %s4194_s26, %s4074_s8, %s4075_s10, %s4076_s11  }
  0x41 PF: > { %p3205_p4 = scmp.ge.s32.totalorder %s4039_s21, 1  ;;  %p210_p9 = scmp.lt.s32.totalorder %s4039_s21, 65 }
  0x43   : > { %p211_p10 = pnand %p3205_p4, %p210_p9 }
  0x44   : > { %s216_s25 = sand.u32 (!%p211_p10), 1, %s4015_s15  }
  0x45   : > { %214 = sbr.rel (%p211_p10) target bundleno = 778 (0x30a), region = 32  ;;  %s3206_s29 = sshll.u32 (!%p211_p10), %s216_s25, 10 }
  0x46   : > { %s217_s27 = scalar_lea.sflag (!%p211_p10), [#allocation4], %s216_s25  ;;  %s4234_s24 = scalar_lea.vmem (!%p211_p10), [#allocation3], %s3206_s29 }
  0x4c   : > { %3998 = dma.done.wait (%p4166_p7), %s217_s27, 16384  }
  0x4d   : > { %4000 = vsyncadd (%p4166_p7), %s217_s27, 4294950912  ;;  %s250_s23 = sand.u32 1, %s4003_s12   ;;  %s3208_s22 = sshll.u32 %s4023_s17, 6 }
  0x4e   : > { %s3207_s26 = sshll.u32 %s250_s23, 8  ;;  %p261_p1 = scmp.lt.s32.totalorder %s3208_s22, 255 }
  0x4f   : > { %s4247_s8 = scalar_lea.vmem [#allocation5], %s3207_s26   ;;  %p3210_p11 = scmp.ne.s32.totalorder %s4023_s17, 0 }
  0x50   : > { %s5085_s22 = smov (!%p261_p1, %s3208_s22), 255  ;;  %vm282_vm0 = vcmask (!%p3210_p11), 523264   ;;  %v4077_v0 = vmov (!%p3210_p11), 0.0  }
  0x51   : > { %s3209_s4 = sshll.u32 %s5085_s22, 2  ;;  %281 = sbr.rel (%p3210_p11) target bundleno = 113 (0x71), region = 40  ;;  %283 = vst.msk [vmem:[#allocation2] sm:$0xff] (!%p3210_p11), %vm282_vm0, %v4077_v0  ;;  %284 = vst.msk [vmem:[#allocation2 + $0x8] sm:$0xff] (!%p3210_p11), %vm282_vm0, %v4077_v0 }
  0x52   : > { %s4245_s14 = scalar_lea.vmem %s5052_s1, %s3209_s4  ;;  %285 = vst.msk [vmem:[#allocation2 + $0x10] sm:$0xff] (!%p3210_p11), %vm282_vm0, %v4077_v0  ;;  %286 = vst.msk [vmem:[#allocation2 + $0x18] sm:$0xff] (!%p3210_p11), %vm282_vm0, %v4077_v0 }
  0x53   : > { %287 = vst.msk [vmem:[#allocation2 + $0x20] sm:$0xff] (!%p3210_p11), %vm282_vm0, %v4077_v0  ;;  %288 = vst.msk [vmem:[#allocation2 + $0x28] sm:$0xff] (!%p3210_p11), %vm282_vm0, %v4077_v0 }
  0x54   : > { %289 = vst.msk [vmem:[#allocation2 + $0x30] sm:$0xff] (!%p3210_p11), %vm282_vm0, %v4077_v0  ;;  %290 = vst.msk [vmem:[#allocation2 + $0x38] sm:$0xff] (!%p3210_p11), %vm282_vm0, %v4077_v0 }
  0x55   : > { %291 = vst.msk [vmem:[#allocation2 + $0x40] sm:$0xff] (!%p3210_p11), %vm282_vm0, %v4077_v0  ;;  %292 = vst.msk [vmem:[#allocation2 + $0x48] sm:$0xff] (!%p3210_p11), %vm282_vm0, %v4077_v0 }
  0x56   : > { %293 = vst.msk [vmem:[#allocation2 + $0x50] sm:$0xff] (!%p3210_p11), %vm282_vm0, %v4077_v0  ;;  %294 = vst.msk [vmem:[#allocation2 + $0x58] sm:$0xff] (!%p3210_p11), %vm282_vm0, %v4077_v0 }
  0x57   : > { %295 = vst.msk [vmem:[#allocation2 + $0x60] sm:$0xff] (!%p3210_p11), %vm282_vm0, %v4077_v0  ;;  %296 = vst.msk [vmem:[#allocation2 + $0x68] sm:$0xff] (!%p3210_p11), %vm282_vm0, %v4077_v0 }
  0x58   : > { %297 = vst.msk [vmem:[#allocation2 + $0x70] sm:$0xff] %vm282_vm0, %v4077_v0  ;;  %298 = vst.msk [vmem:[#allocation2 + $0x78] sm:$0xff] %vm282_vm0, %v4077_v0 }
  0x59   : > { %299 = vst.msk [vmem:[#allocation2 + $0x80] sm:$0xff] %vm282_vm0, %v4077_v0  ;;  %300 = vst.msk [vmem:[#allocation2 + $0x88] sm:$0xff] %vm282_vm0, %v4077_v0 }
  0x5a   : > { %301 = vst.msk [vmem:[#allocation2 + $0x90] sm:$0xff] %vm282_vm0, %v4077_v0  ;;  %302 = vst.msk [vmem:[#allocation2 + $0x98] sm:$0xff] %vm282_vm0, %v4077_v0 }
  0x5b   : > { %303 = vst.msk [vmem:[#allocation2 + $0xa0] sm:$0xff] %vm282_vm0, %v4077_v0  ;;  %304 = vst.msk [vmem:[#allocation2 + $0xa8] sm:$0xff] %vm282_vm0, %v4077_v0 }
  0x5c   : > { %305 = vst.msk [vmem:[#allocation2 + $0xb0] sm:$0xff] %vm282_vm0, %v4077_v0  ;;  %306 = vst.msk [vmem:[#allocation2 + $0xb8] sm:$0xff] %vm282_vm0, %v4077_v0 }
  0x5d   : > { %307 = vst.msk [vmem:[#allocation2 + $0xc0] sm:$0xff] %vm282_vm0, %v4077_v0  ;;  %308 = vst.msk [vmem:[#allocation2 + $0xc8] sm:$0xff] %vm282_vm0, %v4077_v0 }
  0x5e   : > { %309 = vst.msk [vmem:[#allocation2 + $0xd0] sm:$0xff] %vm282_vm0, %v4077_v0  ;;  %310 = vst.msk [vmem:[#allocation2 + $0xd8] sm:$0xff] %vm282_vm0, %v4077_v0 }
  0x5f   : > { %311 = vst.msk [vmem:[#allocation2 + $0xe0] sm:$0xff] %vm282_vm0, %v4077_v0  ;;  %312 = vst.msk [vmem:[#allocation2 + $0xe8] sm:$0xff] %vm282_vm0, %v4077_v0 }
  0x60   : > { %313 = vst.msk [vmem:[#allocation2 + $0xf0] sm:$0xff] %vm282_vm0, %v4077_v0  ;;  %314 = vst.msk [vmem:[#allocation2 + $0xf8] sm:$0xff] %vm282_vm0, %v4077_v0 }
  0x61   : > { %315 = vst.msk [vmem:[#allocation2 + $0x100] sm:$0xff] %vm282_vm0, %v4077_v0  ;;  %316 = vst.msk [vmem:[#allocation2 + $0x108] sm:$0xff] %vm282_vm0, %v4077_v0 }
  0x62   : > { %317 = vst.msk [vmem:[#allocation2 + $0x110] sm:$0xff] %vm282_vm0, %v4077_v0  ;;  %318 = vst.msk [vmem:[#allocation2 + $0x118] sm:$0xff] %vm282_vm0, %v4077_v0 }
  0x63   : > { %319 = vst.msk [vmem:[#allocation2 + $0x120] sm:$0xff] %vm282_vm0, %v4077_v0  ;;  %320 = vst.msk [vmem:[#allocation2 + $0x128] sm:$0xff] %vm282_vm0, %v4077_v0 }
  0x64   : > { %321 = vst.msk [vmem:[#allocation2 + $0x130] sm:$0xff] %vm282_vm0, %v4077_v0  ;;  %322 = vst.msk [vmem:[#allocation2 + $0x138] sm:$0xff] %vm282_vm0, %v4077_v0 }
  0x65   : > { %323 = vst.msk [vmem:[#allocation2 + $0x140] sm:$0xff] %vm282_vm0, %v4077_v0  ;;  %324 = vst.msk [vmem:[#allocation2 + $0x148] sm:$0xff] %vm282_vm0, %v4077_v0 }
  0x66   : > { %325 = vst.msk [vmem:[#allocation2 + $0x150] sm:$0xff] %vm282_vm0, %v4077_v0  ;;  %326 = vst.msk [vmem:[#allocation2 + $0x158] sm:$0xff] %vm282_vm0, %v4077_v0 }
  0x67   : > { %327 = vst.msk [vmem:[#allocation2 + $0x160] sm:$0xff] %vm282_vm0, %v4077_v0  ;;  %328 = vst.msk [vmem:[#allocation2 + $0x168] sm:$0xff] %vm282_vm0, %v4077_v0 }
  0x68   : > { %329 = vst.msk [vmem:[#allocation2 + $0x170] sm:$0xff] %vm282_vm0, %v4077_v0  ;;  %330 = vst.msk [vmem:[#allocation2 + $0x178] sm:$0xff] %vm282_vm0, %v4077_v0 }
  0x69   : > { %331 = vst.msk [vmem:[#allocation2 + $0x180] sm:$0xff] %vm282_vm0, %v4077_v0  ;;  %332 = vst.msk [vmem:[#allocation2 + $0x188] sm:$0xff] %vm282_vm0, %v4077_v0 }
  0x6a   : > { %333 = vst.msk [vmem:[#allocation2 + $0x190] sm:$0xff] %vm282_vm0, %v4077_v0  ;;  %334 = vst.msk [vmem:[#allocation2 + $0x198] sm:$0xff] %vm282_vm0, %v4077_v0 }
  0x6b   : > { %335 = vst.msk [vmem:[#allocation2 + $0x1a0] sm:$0xff] %vm282_vm0, %v4077_v0  ;;  %336 = vst.msk [vmem:[#allocation2 + $0x1a8] sm:$0xff] %vm282_vm0, %v4077_v0 }
  0x6c   : > { %337 = vst.msk [vmem:[#allocation2 + $0x1b0] sm:$0xff] %vm282_vm0, %v4077_v0  ;;  %338 = vst.msk [vmem:[#allocation2 + $0x1b8] sm:$0xff] %vm282_vm0, %v4077_v0 }
  0x6d   : > { %339 = vst.msk [vmem:[#allocation2 + $0x1c0] sm:$0xff] %vm282_vm0, %v4077_v0  ;;  %340 = vst.msk [vmem:[#allocation2 + $0x1c8] sm:$0xff] %vm282_vm0, %v4077_v0 }
  0x6e   : > { %341 = vst.msk [vmem:[#allocation2 + $0x1d0] sm:$0xff] %vm282_vm0, %v4077_v0  ;;  %342 = vst.msk [vmem:[#allocation2 + $0x1d8] sm:$0xff] %vm282_vm0, %v4077_v0 }
  0x6f   : > { %343 = vst.msk [vmem:[#allocation2 + $0x1e0] sm:$0xff] %vm282_vm0, %v4077_v0  ;;  %344 = vst.msk [vmem:[#allocation2 + $0x1e8] sm:$0xff] %vm282_vm0, %v4077_v0 }
  0x70   : > { %345 = vst.msk [vmem:[#allocation2 + $0x1f0] sm:$0xff] %vm282_vm0, %v4077_v0  ;;  %346 = vst.msk [vmem:[#allocation2 + $0x1f8] sm:$0xff] %vm282_vm0, %v4077_v0 }
  0x71 PF: > { %v3673_v1 = vld [vmem:[%s4245_s14] sm:$0xff]   ;;  %v4078_v2 = vmov 0   ;;  %v3675_v4 = vld [vmem:[%s4245_s14 + $0x8] sm:$0xff]   ;;  %v3677_v6 = vld [vmem:[%s4245_s14 + $0x10] sm:$0xff]   ;;  %vm2077_vm1 = vcmask 523264   ;;  %p3371_p7 = scmp.ne.s32.totalorder %s4023_s17, 3 }
  0x72   : > { %1435 = vmatprep.subr.bf16.mxu0 %v4078_v2  ;;  %1724 = vmatprep.subr.bf16.mxu1 %v4078_v2  ;;  %v3674_v3 = vld [vmem:[%s4245_s14 + $0x80] sm:$0xff]   ;;  %v3676_v5 = vld [vmem:[%s4245_s14 + $0x88] sm:$0xff]   ;;  %v3678_v7 = vld [vmem:[%s4245_s14 + $0x90] sm:$0xff]   ;;  %vm2601_vm2 = vcmask (!%p3371_p7), 519168  }
  0x73   : > { %1436 = vmatpush1.bf16.msra.mxu0 %v3673_v1  ;;  %1725 = vmatpush1.bf16.msra.mxu1 %v3674_v3  ;;  %v3679_v8 = vld [vmem:[%s4245_s14 + $0x18] sm:$0xff]   ;;  %v3681_v10 = vld [vmem:[%s4245_s14 + $0x20] sm:$0xff]   ;;  %v3683_v12 = vld [vmem:[%s4245_s14 + $0x28] sm:$0xff]  }
  0x74   : > { %1437 = vmatprep.subr.bf16.mxu0 %v4078_v2  ;;  %1726 = vmatprep.subr.bf16.mxu1 %v4078_v2  ;;  %v3680_v9 = vld [vmem:[%s4245_s14 + $0x98] sm:$0xff]   ;;  %v3682_v11 = vld [vmem:[%s4245_s14 + $0xa0] sm:$0xff]   ;;  %v3684_v13 = vld [vmem:[%s4245_s14 + $0xa8] sm:$0xff]  }
  0x75   : > { %v3685_v14 = vld [vmem:[%s4245_s14 + $0x30] sm:$0xff]   ;;  %v3687_v16 = vld [vmem:[%s4245_s14 + $0x38] sm:$0xff]   ;;  %v3689_v18 = vld [vmem:[%s4245_s14 + $0x40] sm:$0xff]  }
  0x76   : > { %v3686_v15 = vld [vmem:[%s4245_s14 + $0xb0] sm:$0xff]   ;;  %v3688_v17 = vld [vmem:[%s4245_s14 + $0xb8] sm:$0xff]   ;;  %v3690_v19 = vld [vmem:[%s4245_s14 + $0xc0] sm:$0xff]  }
  0x77   : > { %1438 = vmatpush1.bf16.msra.mxu0 %v3675_v4  ;;  %1727 = vmatpush1.bf16.msra.mxu1 %v3676_v5  ;;  %v3707_v20 = vld [vmem:[%s4234_s24 + $0x4] ss:$16 sps:$4 sm:$0xff]   ;;  %v3691_v21 = vld [vmem:[%s4245_s14 + $0x48] sm:$0xff]   ;;  %v3695_v26 = vld [vmem:[%s4245_s14 + $0x58] sm:$0xff]  }
  0x78   : > { %1439 = vmatprep.subr.bf16.mxu0 %v4078_v2  ;;  %1728 = vmatprep.subr.bf16.mxu1 %v4078_v2  ;;  %v3710_v22 = vld [vmem:[%s4234_s24 + $0xc] ss:$16 sps:$4 sm:$0xff]   ;;  %v3693_v24 = vld [vmem:[%s4245_s14 + $0x50] sm:$0xff]   ;;  %v3697_v28 = vld [vmem:[%s4245_s14 + $0x60] sm:$0xff]  }
  0x79   : > { %v3692_v23 = vld [vmem:[%s4245_s14 + $0xc8] sm:$0xff]   ;;  %1467 = vmatprep.mubr.bf16.mxu0 %v3707_v20  ;;  %1756 = vmatprep.mubr.bf16.mxu1 %v3710_v22  ;;  %v3694_v25 = vld [vmem:[%s4245_s14 + $0xd0] sm:$0xff]   ;;  %v3696_v27 = vld [vmem:[%s4245_s14 + $0xd8] sm:$0xff]  }
  0x7a   : > { %v3698_v29 = vld [vmem:[%s4245_s14 + $0xe0] sm:$0xff]   ;;  %v3699_v30 = vld [vmem:[%s4245_s14 + $0x68] sm:$0xff]   ;;  %v3701_v32 = vld [vmem:[%s4245_s14 + $0x70] sm:$0xff]  }
  0x7b   : > { %1440 = vmatpush1.bf16.msra.mxu0 %v3677_v6  ;;  %1729 = vmatpush1.bf16.msra.mxu1 %v3678_v7  ;;  %v3700_v31 = vld [vmem:[%s4245_s14 + $0xe8] sm:$0xff]   ;;  %v3702_v33 = vld [vmem:[%s4245_s14 + $0xf0] sm:$0xff]   ;;  %v3703_v34 = vld [vmem:[%s4245_s14 + $0x78] sm:$0xff]  }
  0x7c   : > { %1441 = vmatprep.subr.bf16.mxu0 %v4078_v2  ;;  %1730 = vmatprep.subr.bf16.mxu1 %v4078_v2  ;;  %v3704_v35 = vld [vmem:[%s4245_s14 + $0xf8] sm:$0xff]   ;;  %v3705_v36 = vld [vmem:[%s4234_s24] ss:$16 sps:$4 sm:$0xff]   ;;  %v3711_v38 = vld [vmem:[%s4234_s24 + $0x24] ss:$16 sps:$4 sm:$0xff]  }
  0x7d   : > { %v3708_v37 = vld [vmem:[%s4234_s24 + $0x8] ss:$16 sps:$4 sm:$0xff]   ;;  %v3713_v39 = vld [vmem:[%s4234_s24 + $0x2c] ss:$16 sps:$4 sm:$0xff]   ;;  %v3715_v40 = vld [vmem:[%s4234_s24 + $0x20] ss:$16 sps:$4 sm:$0xff]  }
  0x7e   : > { %v3716_v41 = vld [vmem:[%s4234_s24 + $0x28] ss:$16 sps:$4 sm:$0xff]   ;;  %v3717_v42 = vld [vmem:[%s4234_s24 + $0x44] ss:$16 sps:$4 sm:$0xff]   ;;  %v3719_v43 = vld [vmem:[%s4234_s24 + $0x4c] ss:$16 sps:$4 sm:$0xff]  }
  0x7f   : > { %1442 = vmatpush1.bf16.msra.mxu0 %v3679_v8  ;;  %1731 = vmatpush1.bf16.msra.mxu1 %v3680_v9  ;;  %v3721_v44 = vld [vmem:[%s4234_s24 + $0x40] ss:$16 sps:$4 sm:$0xff]   ;;  %v3722_v45 = vld [vmem:[%s4234_s24 + $0x48] ss:$16 sps:$4 sm:$0xff]   ;;  %v3723_v46 = vld [vmem:[%s4234_s24 + $0x64] ss:$16 sps:$4 sm:$0xff]  }
  0x80   : > { %1443 = vmatprep.subr.bf16.mxu0 %v4078_v2  ;;  %1732 = vmatprep.subr.bf16.mxu1 %v4078_v2  ;;  %v3725_v47 = vld [vmem:[%s4234_s24 + $0x6c] ss:$16 sps:$4 sm:$0xff]   ;;  %v3727_v48 = vld [vmem:[%s4234_s24 + $0x60] ss:$16 sps:$4 sm:$0xff]   ;;  %v3728_v49 = vld [vmem:[%s4234_s24 + $0x68] ss:$16 sps:$4 sm:$0xff]  }
  0x81   : > { %v3729_v50 = vld [vmem:[%s4234_s24 + $0x84] ss:$16 sps:$4 sm:$0xff]   ;;  %v3731_v51 = vld [vmem:[%s4234_s24 + $0x8c] ss:$16 sps:$4 sm:$0xff]   ;;  %v3733_v52 = vld [vmem:[%s4234_s24 + $0x80] ss:$16 sps:$4 sm:$0xff]  }
  0x82   : > { %v3734_v53 = vld [vmem:[%s4234_s24 + $0x88] ss:$16 sps:$4 sm:$0xff]   ;;  %v3735_v54 = vld [vmem:[%s4234_s24 + $0xa4] ss:$16 sps:$4 sm:$0xff]   ;;  %v3737_v55 = vld [vmem:[%s4234_s24 + $0xac] ss:$16 sps:$4 sm:$0xff]  }
  0x83   : > { %1444 = vmatpush1.bf16.msra.mxu0 %v3681_v10  ;;  %1733 = vmatpush1.bf16.msra.mxu1 %v3682_v11  ;;  %v3739_v56 = vld [vmem:[%s4234_s24 + $0xa0] ss:$16 sps:$4 sm:$0xff]   ;;  %v3740_v57 = vld [vmem:[%s4234_s24 + $0xa8] ss:$16 sps:$4 sm:$0xff]   ;;  %v3741_v58 = vld [vmem:[%s4234_s24 + $0xc4] ss:$16 sps:$4 sm:$0xff]  }
  0x84   : > { %1445 = vmatprep.subr.bf16.mxu0 %v4078_v2  ;;  %1734 = vmatprep.subr.bf16.mxu1 %v4078_v2  ;;  %v3743_v59 = vld [vmem:[%s4234_s24 + $0xcc] ss:$16 sps:$4 sm:$0xff]   ;;  %v3745_v60 = vld [vmem:[%s4234_s24 + $0xc0] ss:$16 sps:$4 sm:$0xff]   ;;  %v3746_v61 = vld [vmem:[%s4234_s24 + $0xc8] ss:$16 sps:$4 sm:$0xff]  }
  0x85   : > { %v3747_v62 = vld [vmem:[%s4234_s24 + $0xe4] ss:$16 sps:$4 sm:$0xff]   ;;  %v3749_v63 = vld [vmem:[%s4234_s24 + $0xec] ss:$16 sps:$4 sm:$0xff]   ;;  %v3751_v0 = vld [vmem:[%s4234_s24 + $0xe0] ss:$16 sps:$4 sm:$0xff]  }
  0x86   : > { %v3752_v1 = vld [vmem:[%s4234_s24 + $0xe8] ss:$16 sps:$4 sm:$0xff]   ;;  %v3755_v3 = vld [vmem:[%s4234_s24 + $0x10c] ss:$16 sps:$4 sm:$0xff]   ;;  %v3757_v4 = vld [vmem:[%s4234_s24 + $0x100] ss:$16 sps:$4 sm:$0xff]  }
  0x87   : > { %1446 = vmatpush1.bf16.msra.mxu0 %v3683_v12  ;;  %1735 = vmatpush1.bf16.msra.mxu1 %v3684_v13  ;;  %v3758_v5 = vld [vmem:[%s4234_s24 + $0x108] ss:$16 sps:$4 sm:$0xff]   ;;  %v3759_v6 = vld [vmem:[%s4234_s24 + $0x124] ss:$16 sps:$4 sm:$0xff]   ;;  %v3761_v7 = vld [vmem:[%s4234_s24 + $0x12c] ss:$16 sps:$4 sm:$0xff]  }
  0x88   : > { %1447 = vmatprep.subr.bf16.mxu0 %v4078_v2  ;;  %1736 = vmatprep.subr.bf16.mxu1 %v4078_v2  ;;  %v3763_v8 = vld [vmem:[%s4234_s24 + $0x120] ss:$16 sps:$4 sm:$0xff]   ;;  %v3764_v9 = vld [vmem:[%s4234_s24 + $0x128] ss:$16 sps:$4 sm:$0xff]   ;;  %v3765_v10 = vld [vmem:[%s4234_s24 + $0x144] ss:$16 sps:$4 sm:$0xff]  }
  0x89   : > { %v3767_v11 = vld [vmem:[%s4234_s24 + $0x14c] ss:$16 sps:$4 sm:$0xff]   ;;  %v3769_v12 = vld [vmem:[%s4234_s24 + $0x140] ss:$16 sps:$4 sm:$0xff]   ;;  %v3770_v13 = vld [vmem:[%s4234_s24 + $0x148] ss:$16 sps:$4 sm:$0xff]  }
  0x8a   : > { %v3781_v20 = vld [vmem:[%s4234_s24 + $0x180] ss:$16 sps:$4 sm:$0xff]   ;;  %v3783_v22 = vld [vmem:[%s4234_s24 + $0x1a4] ss:$16 sps:$4 sm:$0xff]  }
  0x8b   : > { %1448 = vmatpush1.bf16.msra.mxu0 %v3685_v14  ;;  %1737 = vmatpush1.bf16.msra.mxu1 %v3686_v15  ;;  %v3771_v14 = vld [vmem:[%s4234_s24 + $0x164] ss:$16 sps:$4 sm:$0xff]   ;;  %v3773_v15 = vld [vmem:[%s4234_s24 + $0x16c] ss:$16 sps:$4 sm:$0xff]  }
  0x8c   : > { %1449 = vmatprep.subr.bf16.mxu0 %v4078_v2  ;;  %1738 = vmatprep.subr.bf16.mxu1 %v4078_v2 }
  0x8f   : > { %1450 = vmatpush1.bf16.msra.mxu0 %v3687_v16  ;;  %1739 = vmatpush1.bf16.msra.mxu1 %v3688_v17  ;;  %v3775_v16 = vld [vmem:[%s4234_s24 + $0x160] ss:$16 sps:$4 sm:$0xff]   ;;  %v3776_v17 = vld [vmem:[%s4234_s24 + $0x168] ss:$16 sps:$4 sm:$0xff]  }
  0x90   : > { %1451 = vmatprep.subr.bf16.mxu0 %v4078_v2  ;;  %1740 = vmatprep.subr.bf16.mxu1 %v4078_v2 }
  0x93   : > { %1452 = vmatpush1.bf16.msra.mxu0 %v3689_v18  ;;  %1741 = vmatpush1.bf16.msra.mxu1 %v3690_v19  ;;  %v3777_v18 = vld [vmem:[%s4234_s24 + $0x184] ss:$16 sps:$4 sm:$0xff]   ;;  %v3779_v19 = vld [vmem:[%s4234_s24 + $0x18c] ss:$16 sps:$4 sm:$0xff]  }
  0x94   : > { %1453 = vmatprep.subr.bf16.mxu0 %v4078_v2  ;;  %1742 = vmatprep.subr.bf16.mxu1 %v4078_v2 }
  0x97   : > { %1454 = vmatpush1.bf16.msra.mxu0 %v3691_v21  ;;  %1743 = vmatpush1.bf16.msra.mxu1 %v3692_v23  ;;  %v3782_v21 = vld [vmem:[%s4234_s24 + $0x188] ss:$16 sps:$4 sm:$0xff]   ;;  %v3785_v23 = vld [vmem:[%s4234_s24 + $0x1ac] ss:$16 sps:$4 sm:$0xff]  }
  0x98   : > { %1455 = vmatprep.subr.bf16.mxu0 %v4078_v2  ;;  %1744 = vmatprep.subr.bf16.mxu1 %v4078_v2 }
  0x9b   : > { %1456 = vmatpush1.bf16.msra.mxu0 %v3693_v24  ;;  %1745 = vmatpush1.bf16.msra.mxu1 %v3694_v25  ;;  %v3787_v24 = vld [vmem:[%s4234_s24 + $0x1a0] ss:$16 sps:$4 sm:$0xff]   ;;  %v3788_v25 = vld [vmem:[%s4234_s24 + $0x1a8] ss:$16 sps:$4 sm:$0xff]  }
  0x9c   : > { %1457 = vmatprep.subr.bf16.mxu0 %v4078_v2  ;;  %1746 = vmatprep.subr.bf16.mxu1 %v4078_v2 }
  0x9f   : > { %1458 = vmatpush1.bf16.msra.mxu0 %v3695_v26  ;;  %1747 = vmatpush1.bf16.msra.mxu1 %v3696_v27  ;;  %v3789_v26 = vld [vmem:[%s4234_s24 + $0x1c4] ss:$16 sps:$4 sm:$0xff]   ;;  %v3791_v27 = vld [vmem:[%s4234_s24 + $0x1cc] ss:$16 sps:$4 sm:$0xff]  }
  0xa0   : > { %1459 = vmatprep.subr.bf16.mxu0 %v4078_v2  ;;  %1748 = vmatprep.subr.bf16.mxu1 %v4078_v2 }
  0xa3   : > { %1460 = vmatpush1.bf16.msra.mxu0 %v3697_v28  ;;  %1749 = vmatpush1.bf16.msra.mxu1 %v3698_v29  ;;  %v3793_v28 = vld [vmem:[%s4234_s24 + $0x1c0] ss:$16 sps:$4 sm:$0xff]   ;;  %v3794_v29 = vld [vmem:[%s4234_s24 + $0x1c8] ss:$16 sps:$4 sm:$0xff]  }
  0xa4   : > { %1461 = vmatprep.subr.bf16.mxu0 %v4078_v2  ;;  %1750 = vmatprep.subr.bf16.mxu1 %v4078_v2 }
  0xa7   : > { %1462 = vmatpush1.bf16.msra.mxu0 %v3699_v30  ;;  %1751 = vmatpush1.bf16.msra.mxu1 %v3700_v31  ;;  %v3795_v30 = vld [vmem:[%s4234_s24 + $0x1e4] ss:$16 sps:$4 sm:$0xff]   ;;  %v3797_v31 = vld [vmem:[%s4234_s24 + $0x1ec] ss:$16 sps:$4 sm:$0xff]  }
  0xa8   : > { %1463 = vmatprep.subr.bf16.mxu0 %v4078_v2  ;;  %1752 = vmatprep.subr.bf16.mxu1 %v4078_v2 }
  0xab   : > { %1464 = vmatpush1.bf16.msra.mxu0 %v3701_v32  ;;  %1753 = vmatpush1.bf16.msra.mxu1 %v3702_v33  ;;  %v3799_v32 = vld [vmem:[%s4234_s24 + $0x1e0] ss:$16 sps:$4 sm:$0xff]   ;;  %v3800_v33 = vld [vmem:[%s4234_s24 + $0x1e8] ss:$16 sps:$4 sm:$0xff]  }
  0xac   : > { %1465 = vmatprep.subr.bf16.mxu0 %v4078_v2  ;;  %1754 = vmatprep.subr.bf16.mxu1 %v4078_v2  ;;  %v3753_v2 = vld [vmem:[%s4234_s24 + $0x104] ss:$16 sps:$4 sm:$0xff]  }
  0xaf   : > { %1466 = vmatpush1.bf16.msra.mxu0 %v3703_v34  ;;  %1755 = vmatpush1.bf16.msra.mxu1 %v3704_v35  ;;  %v3801_v34 = vld [vmem:[%s4234_s24 + $0x204] ss:$16 sps:$4 sm:$0xff]   ;;  %v3803_v35 = vld [vmem:[%s4234_s24 + $0x20c] ss:$16 sps:$4 sm:$0xff]  }
  0xb2   : > { %1468 = vmatmul.mubr.bf16.vlgmr.msra.gmra.mrb[0].mxu0 %v3705_v36  ;;  %1757 = vmatmul.mubr.bf16.vlgmr.msra.gmra.mrb[0].mxu1 %v3708_v37  ;;  %v3805_v36 = vld [vmem:[%s4234_s24 + $0x200] ss:$16 sps:$4 sm:$0xff]   ;;  %v3806_v37 = vld [vmem:[%s4234_s24 + $0x208] ss:$16 sps:$4 sm:$0xff]  }
  0xb3   : > { %1475 = vmatprep.mubr.bf16.mxu0 %v3711_v38  ;;  %1764 = vmatprep.mubr.bf16.mxu1 %v3713_v39  ;;  %v3807_v38 = vld [vmem:[%s4234_s24 + $0x224] ss:$16 sps:$4 sm:$0xff]   ;;  %v3809_v39 = vld [vmem:[%s4234_s24 + $0x22c] ss:$16 sps:$4 sm:$0xff]  }
  0xba   : > { %1476 = vmatmul.mubr.bf16.gmra.mrb[4].mxu0 %v3715_v40  ;;  %1765 = vmatmul.mubr.bf16.gmra.mrb[4].mxu1 %v3716_v41  ;;  %v3811_v40 = vld [vmem:[%s4234_s24 + $0x220] ss:$16 sps:$4 sm:$0xff]   ;;  %v3812_v41 = vld [vmem:[%s4234_s24 + $0x228] ss:$16 sps:$4 sm:$0xff]  }
  0xbb   : > { %1483 = vmatprep.mubr.bf16.mxu0 %v3717_v42  ;;  %1772 = vmatprep.mubr.bf16.mxu1 %v3719_v43  ;;  %v3813_v42 = vld [vmem:[%s4234_s24 + $0x244] ss:$16 sps:$4 sm:$0xff]   ;;  %v3815_v43 = vld [vmem:[%s4234_s24 + $0x24c] ss:$16 sps:$4 sm:$0xff]  }
  0xc2   : > { %1484 = vmatmul.mubr.bf16.gmra.mrb[8].mxu0 %v3721_v44  ;;  %1773 = vmatmul.mubr.bf16.gmra.mrb[8].mxu1 %v3722_v45  ;;  %v3817_v44 = vld [vmem:[%s4234_s24 + $0x240] ss:$16 sps:$4 sm:$0xff]   ;;  %v3818_v45 = vld [vmem:[%s4234_s24 + $0x248] ss:$16 sps:$4 sm:$0xff]  }
  0xc3   : > { %1491 = vmatprep.mubr.bf16.mxu0 %v3723_v46  ;;  %1780 = vmatprep.mubr.bf16.mxu1 %v3725_v47  ;;  %v3819_v46 = vld [vmem:[%s4234_s24 + $0x264] ss:$16 sps:$4 sm:$0xff]   ;;  %v3821_v47 = vld [vmem:[%s4234_s24 + $0x26c] ss:$16 sps:$4 sm:$0xff]  }
  0xca   : > { %1492 = vmatmul.mubr.bf16.gmra.mrb[12].mxu0 %v3727_v48  ;;  %1781 = vmatmul.mubr.bf16.gmra.mrb[12].mxu1 %v3728_v49  ;;  %v3823_v48 = vld [vmem:[%s4234_s24 + $0x260] ss:$16 sps:$4 sm:$0xff]   ;;  %v3824_v49 = vld [vmem:[%s4234_s24 + $0x268] ss:$16 sps:$4 sm:$0xff]  }
  0xcb   : > { %1499 = vmatprep.mubr.bf16.mxu0 %v3729_v50  ;;  %1788 = vmatprep.mubr.bf16.mxu1 %v3731_v51  ;;  %v3825_v50 = vld [vmem:[%s4234_s24 + $0x284] ss:$16 sps:$4 sm:$0xff]   ;;  %v3827_v51 = vld [vmem:[%s4234_s24 + $0x28c] ss:$16 sps:$4 sm:$0xff]  }
  0xd2   : > { %1500 = vmatmul.mubr.bf16.gmra.mrb[16].mxu0 %v3733_v52  ;;  %1789 = vmatmul.mubr.bf16.gmra.mrb[16].mxu1 %v3734_v53  ;;  %v3829_v52 = vld [vmem:[%s4234_s24 + $0x280] ss:$16 sps:$4 sm:$0xff]   ;;  %v3830_v53 = vld [vmem:[%s4234_s24 + $0x288] ss:$16 sps:$4 sm:$0xff]  }
  0xd3   : > { %1507 = vmatprep.mubr.bf16.mxu0 %v3735_v54  ;;  %1796 = vmatprep.mubr.bf16.mxu1 %v3737_v55  ;;  %v3831_v54 = vld [vmem:[%s4234_s24 + $0x2a4] ss:$16 sps:$4 sm:$0xff]   ;;  %v3833_v55 = vld [vmem:[%s4234_s24 + $0x2ac] ss:$16 sps:$4 sm:$0xff]  }
  0xda   : > { %1508 = vmatmul.mubr.bf16.gmra.mrb[20].mxu0 %v3739_v56  ;;  %1797 = vmatmul.mubr.bf16.gmra.mrb[20].mxu1 %v3740_v57  ;;  %v3835_v56 = vld [vmem:[%s4234_s24 + $0x2a0] ss:$16 sps:$4 sm:$0xff]   ;;  %v3836_v57 = vld [vmem:[%s4234_s24 + $0x2a8] ss:$16 sps:$4 sm:$0xff]  }
  0xdb   : > { %1515 = vmatprep.mubr.bf16.mxu0 %v3741_v58  ;;  %1804 = vmatprep.mubr.bf16.mxu1 %v3743_v59  ;;  %v3837_v58 = vld [vmem:[%s4234_s24 + $0x2c4] ss:$16 sps:$4 sm:$0xff]   ;;  %v3839_v59 = vld [vmem:[%s4234_s24 + $0x2cc] ss:$16 sps:$4 sm:$0xff]  }
  0xe2   : > { %1516 = vmatmul.mubr.bf16.gmra.mrb[24].mxu0 %v3745_v60  ;;  %1805 = vmatmul.mubr.bf16.gmra.mrb[24].mxu1 %v3746_v61  ;;  %v3841_v60 = vld [vmem:[%s4234_s24 + $0x2c0] ss:$16 sps:$4 sm:$0xff]   ;;  %v3842_v61 = vld [vmem:[%s4234_s24 + $0x2c8] ss:$16 sps:$4 sm:$0xff]  }
  0xe3   : > { %1523 = vmatprep.mubr.bf16.mxu0 %v3747_v62  ;;  %1812 = vmatprep.mubr.bf16.mxu1 %v3749_v63  ;;  %v3843_v62 = vld [vmem:[%s4234_s24 + $0x2e4] ss:$16 sps:$4 sm:$0xff]   ;;  %v3845_v63 = vld [vmem:[%s4234_s24 + $0x2ec] ss:$16 sps:$4 sm:$0xff]  }
  0xea   : > { %1524 = vmatmul.mubr.bf16.gmra.mrb[28].mxu0 %v3751_v0  ;;  %1813 = vmatmul.mubr.bf16.gmra.mrb[28].mxu1 %v3752_v1  ;;  %v3847_v0 = vld [vmem:[%s4234_s24 + $0x2e0] ss:$16 sps:$4 sm:$0xff]   ;;  %v3848_v1 = vld [vmem:[%s4234_s24 + $0x2e8] ss:$16 sps:$4 sm:$0xff]  }
  0xeb   : > { %1531 = vmatprep.mubr.bf16.mxu0 %v3753_v2  ;;  %1820 = vmatprep.mubr.bf16.mxu1 %v3755_v3  ;;  %v3849_v2 = vld [vmem:[%s4234_s24 + $0x304] ss:$16 sps:$4 sm:$0xff]   ;;  %v3851_v3 = vld [vmem:[%s4234_s24 + $0x30c] ss:$16 sps:$4 sm:$0xff]  }
  0xf2   : > { %1532 = vmatmul.mubr.bf16.gmra.mrb[32].mxu0 %v3757_v4  ;;  %1821 = vmatmul.mubr.bf16.gmra.mrb[32].mxu1 %v3758_v5  ;;  %v3853_v4 = vld [vmem:[%s4234_s24 + $0x300] ss:$16 sps:$4 sm:$0xff]   ;;  %v3854_v5 = vld [vmem:[%s4234_s24 + $0x308] ss:$16 sps:$4 sm:$0xff]  }
  0xf3   : > { %1539 = vmatprep.mubr.bf16.mxu0 %v3759_v6  ;;  %1828 = vmatprep.mubr.bf16.mxu1 %v3761_v7  ;;  %v3855_v6 = vld [vmem:[%s4234_s24 + $0x324] ss:$16 sps:$4 sm:$0xff]   ;;  %v3857_v7 = vld [vmem:[%s4234_s24 + $0x32c] ss:$16 sps:$4 sm:$0xff]  }
  0xfa   : > { %1540 = vmatmul.mubr.bf16.gmra.mrb[36].mxu0 %v3763_v8  ;;  %1829 = vmatmul.mubr.bf16.gmra.mrb[36].mxu1 %v3764_v9  ;;  %v3859_v8 = vld [vmem:[%s4234_s24 + $0x320] ss:$16 sps:$4 sm:$0xff]   ;;  %v3860_v9 = vld [vmem:[%s4234_s24 + $0x328] ss:$16 sps:$4 sm:$0xff]  }
  0xfb   : > { %1547 = vmatprep.mubr.bf16.mxu0 %v3765_v10  ;;  %1836 = vmatprep.mubr.bf16.mxu1 %v3767_v11  ;;  %v3861_v10 = vld [vmem:[%s4234_s24 + $0x344] ss:$16 sps:$4 sm:$0xff]   ;;  %v3863_v11 = vld [vmem:[%s4234_s24 + $0x34c] ss:$16 sps:$4 sm:$0xff]  }
 0x102   : > { %1548 = vmatmul.mubr.bf16.gmra.mrb[40].mxu0 %v3769_v12  ;;  %1837 = vmatmul.mubr.bf16.gmra.mrb[40].mxu1 %v3770_v13  ;;  %v3865_v12 = vld [vmem:[%s4234_s24 + $0x340] ss:$16 sps:$4 sm:$0xff]   ;;  %v3866_v13 = vld [vmem:[%s4234_s24 + $0x348] ss:$16 sps:$4 sm:$0xff]  }
 0x103   : > { %1555 = vmatprep.mubr.bf16.mxu0 %v3771_v14  ;;  %1844 = vmatprep.mubr.bf16.mxu1 %v3773_v15  ;;  %v3867_v14 = vld [vmem:[%s4234_s24 + $0x364] ss:$16 sps:$4 sm:$0xff]   ;;  %v3869_v15 = vld [vmem:[%s4234_s24 + $0x36c] ss:$16 sps:$4 sm:$0xff]  }
 0x10a   : > { %1556 = vmatmul.mubr.bf16.gmra.mrb[44].mxu0 %v3775_v16  ;;  %1845 = vmatmul.mubr.bf16.gmra.mrb[44].mxu1 %v3776_v17  ;;  %v347_v17 = vld [vmem:[#allocation2] sm:$0xff] }
 0x10b   : > { %1563 = vmatprep.mubr.bf16.mxu0 %v3777_v18  ;;  %1852 = vmatprep.mubr.bf16.mxu1 %v3779_v19 }
 0x112   : > { %1564 = vmatmul.mubr.bf16.gmra.mrb[48].mxu0 %v3781_v20  ;;  %1853 = vmatmul.mubr.bf16.gmra.mrb[48].mxu1 %v3782_v21  ;;  %v3871_v20 = vld [vmem:[%s4234_s24 + $0x360] ss:$16 sps:$4 sm:$0xff]  }
 0x113   : > { %1571 = vmatprep.mubr.bf16.mxu0 %v3783_v22  ;;  %1860 = vmatprep.mubr.bf16.mxu1 %v3785_v23 }
 0x11a   : > { %1572 = vmatmul.mubr.bf16.gmra.mrb[52].mxu0 %v3787_v24  ;;  %1861 = vmatmul.mubr.bf16.gmra.mrb[52].mxu1 %v3788_v25  ;;  %v3872_v24 = vld [vmem:[%s4234_s24 + $0x368] ss:$16 sps:$4 sm:$0xff]   ;;  %v3873_v25 = vld [vmem:[%s4234_s24 + $0x384] ss:$16 sps:$4 sm:$0xff]  }
 0x11b   : > { %1579 = vmatprep.mubr.bf16.mxu0 %v3789_v26  ;;  %1868 = vmatprep.mubr.bf16.mxu1 %v3791_v27  ;;  %v348_v26 = vld [vmem:[#allocation2 + $0x8] sm:$0xff] }
 0x122   : > { %1580 = vmatmul.mubr.bf16.gmra.mrb[56].mxu0 %v3793_v28  ;;  %1869 = vmatmul.mubr.bf16.gmra.mrb[56].mxu1 %v3794_v29  ;;  %v3875_v29 = vld [vmem:[%s4234_s24 + $0x38c] ss:$16 sps:$4 sm:$0xff]  }
 0x123   : > { %1587 = vmatprep.mubr.bf16.mxu0 %v3795_v30  ;;  %1876 = vmatprep.mubr.bf16.mxu1 %v3797_v31 }
 0x12a   : > { %1588 = vmatmul.mubr.bf16.gmra.mrb[60].mxu0 %v3799_v32  ;;  %1877 = vmatmul.mubr.bf16.gmra.mrb[60].mxu1 %v3800_v33 }
 0x12b   : > { %1595 = vmatprep.mubr.bf16.mxu0 %v3801_v34  ;;  %1884 = vmatprep.mubr.bf16.mxu1 %v3803_v35  ;;  %v349_v35 = vld [vmem:[#allocation2 + $0x10] sm:$0xff] }
 0x132   : > { %1596 = vmatmul.mubr.bf16.gmra.mrb[64].mxu0 %v3805_v36  ;;  %1885 = vmatmul.mubr.bf16.gmra.mrb[64].mxu1 %v3806_v37 }
 0x133   : > { %1603 = vmatprep.mubr.bf16.mxu0 %v3807_v38  ;;  %1892 = vmatprep.mubr.bf16.mxu1 %v3809_v39  ;;  %v3877_v38 = vld [vmem:[%s4234_s24 + $0x380] ss:$16 sps:$4 sm:$0xff]  }
 0x13a   : > { %1604 = vmatmul.mubr.bf16.gmra.mrb[68].mxu0 %v3811_v40  ;;  %1893 = vmatmul.mubr.bf16.gmra.mrb[68].mxu1 %v3812_v41 }
 0x13b   : > { %1611 = vmatprep.mubr.bf16.mxu0 %v3813_v42  ;;  %1900 = vmatprep.mubr.bf16.mxu1 %v3815_v43  ;;  %v3878_v42 = vld [vmem:[%s4234_s24 + $0x388] ss:$16 sps:$4 sm:$0xff]   ;;  %v3879_v43 = vld [vmem:[%s4234_s24 + $0x3a4] ss:$16 sps:$4 sm:$0xff]  }
 0x142   : > { %1612 = vmatmul.mubr.bf16.gmra.mrb[72].mxu0 %v3817_v44  ;;  %1901 = vmatmul.mubr.bf16.gmra.mrb[72].mxu1 %v3818_v45  ;;  %v350_v44 = vld [vmem:[#allocation2 + $0x18] sm:$0xff] }
 0x143   : > { %1619 = vmatprep.mubr.bf16.mxu0 %v3819_v46  ;;  %1908 = vmatprep.mubr.bf16.mxu1 %v3821_v47  ;;  %v3881_v47 = vld [vmem:[%s4234_s24 + $0x3ac] ss:$16 sps:$4 sm:$0xff]  }
 0x14a   : > { %1620 = vmatmul.mubr.bf16.gmra.mrb[76].mxu0 %v3823_v48  ;;  %1909 = vmatmul.mubr.bf16.gmra.mrb[76].mxu1 %v3824_v49 }
 0x14b   : > { %1627 = vmatprep.mubr.bf16.mxu0 %v3825_v50  ;;  %1916 = vmatprep.mubr.bf16.mxu1 %v3827_v51 }
 0x152   : > { %1628 = vmatmul.mubr.bf16.gmra.mrb[80].mxu0 %v3829_v52  ;;  %1917 = vmatmul.mubr.bf16.gmra.mrb[80].mxu1 %v3830_v53  ;;  %v351_v53 = vld [vmem:[#allocation2 + $0x20] sm:$0xff] }
 0x153   : > { %1635 = vmatprep.mubr.bf16.mxu0 %v3831_v54  ;;  %1924 = vmatprep.mubr.bf16.mxu1 %v3833_v55 }
 0x15a   : > { %1636 = vmatmul.mubr.bf16.gmra.mrb[84].mxu0 %v3835_v56  ;;  %1925 = vmatmul.mubr.bf16.gmra.mrb[84].mxu1 %v3836_v57  ;;  %v3883_v56 = vld [vmem:[%s4234_s24 + $0x3a0] ss:$16 sps:$4 sm:$0xff]  }
 0x15b   : > { %1643 = vmatprep.mubr.bf16.mxu0 %v3837_v58  ;;  %1932 = vmatprep.mubr.bf16.mxu1 %v3839_v59 }
 0x162   : > { %1644 = vmatmul.mubr.bf16.gmra.mrb[88].mxu0 %v3841_v60  ;;  %1933 = vmatmul.mubr.bf16.gmra.mrb[88].mxu1 %v3842_v61  ;;  %v3884_v60 = vld [vmem:[%s4234_s24 + $0x3a8] ss:$16 sps:$4 sm:$0xff]   ;;  %v3885_v61 = vld [vmem:[%s4234_s24 + $0x3c4] ss:$16 sps:$4 sm:$0xff]  }
 0x163   : > { %1651 = vmatprep.mubr.bf16.mxu0 %v3843_v62  ;;  %1940 = vmatprep.mubr.bf16.mxu1 %v3845_v63  ;;  %v352_v62 = vld [vmem:[#allocation2 + $0x28] sm:$0xff] }
 0x16a   : > { %1652 = vmatmul.mubr.bf16.gmra.mrb[92].mxu0 %v3847_v0  ;;  %1941 = vmatmul.mubr.bf16.gmra.mrb[92].mxu1 %v3848_v1  ;;  %v3887_v1 = vld [vmem:[%s4234_s24 + $0x3cc] ss:$16 sps:$4 sm:$0xff]  }
 0x16b   : > { %1659 = vmatprep.mubr.bf16.mxu0 %v3849_v2  ;;  %1948 = vmatprep.mubr.bf16.mxu1 %v3851_v3 }
 0x172   : > { %1660 = vmatmul.mubr.bf16.gmra.mrb[96].mxu0 %v3853_v4  ;;  %1949 = vmatmul.mubr.bf16.gmra.mrb[96].mxu1 %v3854_v5 }
 0x173   : > { %1667 = vmatprep.mubr.bf16.mxu0 %v3855_v6  ;;  %1956 = vmatprep.mubr.bf16.mxu1 %v3857_v7  ;;  %v353_v7 = vld [vmem:[#allocation2 + $0x30] sm:$0xff] }
 0x17a   : > { %1668 = vmatmul.mubr.bf16.gmra.mrb[100].mxu0 %v3859_v8  ;;  %1957 = vmatmul.mubr.bf16.gmra.mrb[100].mxu1 %v3860_v9 }
 0x17b   : > { %1675 = vmatprep.mubr.bf16.mxu0 %v3861_v10  ;;  %1964 = vmatprep.mubr.bf16.mxu1 %v3863_v11  ;;  %v3889_v10 = vld [vmem:[%s4234_s24 + $0x3c0] ss:$16 sps:$4 sm:$0xff]  }
 0x182   : > { %1676 = vmatmul.mubr.bf16.gmra.mrb[104].mxu0 %v3865_v12  ;;  %1965 = vmatmul.mubr.bf16.gmra.mrb[104].mxu1 %v3866_v13 }
 0x183   : > { %1683 = vmatprep.mubr.bf16.mxu0 %v3867_v14  ;;  %1972 = vmatprep.mubr.bf16.mxu1 %v3869_v15  ;;  %v3890_v14 = vld [vmem:[%s4234_s24 + $0x3c8] ss:$16 sps:$4 sm:$0xff]   ;;  %v3891_v15 = vld [vmem:[%s4234_s24 + $0x3e4] ss:$16 sps:$4 sm:$0xff]  }
 0x185   : > { %v1469_v16 = vpop.f32.mrb[0].mxu0  ;;  %v1758_v18 = vpop.f32.mrb[0].mxu1 }
 0x186   : > { %v1471_v19 = vpop.f32.mrb[1].mxu0  ;;  %v1759_v21 = vadd.f32 %v1758_v18, %v1469_v16  ;;  %v1760_v22 = vpop.f32.mrb[1].mxu1  ;;  %v354_v16 = vld [vmem:[#allocation2 + $0x38] sm:$0xff] }
 0x187   : > { %v1472_v23 = vpop.f32.mrb[2].mxu0  ;;  %v1761_v27 = vpop.f32.mrb[2].mxu1  ;;  %v3893_v19 = vld [vmem:[%s4234_s24 + $0x3ec] ss:$16 sps:$4 sm:$0xff]  }
 0x188   : > { %v1474_v28 = vpop.f32.mrb[3].mxu0  ;;  %v2013_v30 = vadd.f32 %v1759_v21, %v347_v17  ;;  %v1762_v31 = vadd.f32 %v1761_v27, %v1472_v23  ;;  %v1763_v32 = vpop.f32.mrb[3].mxu1 }
 0x189   : > { %v3895_v28 = vld [vmem:[%s4234_s24 + $0x3e0] ss:$16 sps:$4 sm:$0xff]   ;;  %v3896_v32 = vld [vmem:[%s4234_s24 + $0x3e8] ss:$16 sps:$4 sm:$0xff]  }
 0x18a   : > { %1684 = vmatmul.mubr.bf16.gmra.mrb[108].mxu0 %v3871_v20  ;;  %2078 = vst.msk [vmem:[#allocation2] sm:$0xff] %vm2077_vm1, %v2013_v30  ;;  %v2014_v33 = vadd.f32 %v1762_v31, %v348_v26  ;;  %1973 = vmatmul.mubr.bf16.gmra.mrb[108].mxu1 %v3872_v24 }
 0x18b   : > { %1691 = vmatprep.mubr.bf16.mxu0 %v3873_v25  ;;  %1980 = vmatprep.mubr.bf16.mxu1 %v3875_v29  ;;  %v355_v25 = vld [vmem:[#allocation2 + $0x40] sm:$0xff] }
 0x18c   : > { %2079 = vst.msk [vmem:[#allocation2 + $0x8] sm:$0xff] %vm2077_vm1, %v2014_v33  ;;  %v356_v33 = vld [vmem:[#allocation2 + $0x48] sm:$0xff] }
 0x18d   : > { %v1477_v34 = vpop.f32.mrb[4].mxu0  ;;  %v1766_v36 = vpop.f32.mrb[4].mxu1 }
 0x18e   : > { %v1479_v37 = vpop.f32.mrb[5].mxu0  ;;  %v1767_v39 = vadd.f32 %v1766_v36, %v1477_v34  ;;  %v1768_v40 = vpop.f32.mrb[5].mxu1 }
 0x18f   : > { %v1480_v41 = vpop.f32.mrb[6].mxu0  ;;  %v1769_v45 = vpop.f32.mrb[6].mxu1 }
 0x190   : > { %v1482_v46 = vpop.f32.mrb[7].mxu0  ;;  %v2015_v48 = vadd.f32 %v1767_v39, %v349_v35  ;;  %v1770_v49 = vadd.f32 %v1769_v45, %v1480_v41  ;;  %v1771_v50 = vpop.f32.mrb[7].mxu1  ;;  %v357_v41 = vld [vmem:[#allocation2 + $0x50] sm:$0xff] }
 0x192   : > { %1692 = vmatmul.mubr.bf16.gmra.mrb[112].mxu0 %v3877_v38  ;;  %2080 = vst.msk [vmem:[#allocation2 + $0x10] sm:$0xff] %vm2077_vm1, %v2015_v48  ;;  %v2016_v51 = vadd.f32 %v1770_v49, %v350_v44  ;;  %1981 = vmatmul.mubr.bf16.gmra.mrb[112].mxu1 %v3878_v42 }
 0x193   : > { %1699 = vmatprep.mubr.bf16.mxu0 %v3879_v43  ;;  %1988 = vmatprep.mubr.bf16.mxu1 %v3881_v47  ;;  %v358_v47 = vld [vmem:[#allocation2 + $0x58] sm:$0xff] }
 0x194   : > { %2081 = vst.msk [vmem:[#allocation2 + $0x18] sm:$0xff] %vm2077_vm1, %v2016_v51 }
 0x195   : > { %v1485_v52 = vpop.f32.mrb[8].mxu0  ;;  %v1774_v54 = vpop.f32.mrb[8].mxu1 }
 0x196   : > { %v1487_v55 = vpop.f32.mrb[9].mxu0  ;;  %v1775_v57 = vadd.f32 %v1774_v54, %v1485_v52  ;;  %v1776_v58 = vpop.f32.mrb[9].mxu1 }
 0x197   : > { %v1488_v59 = vpop.f32.mrb[10].mxu0  ;;  %v1777_v63 = vpop.f32.mrb[10].mxu1  ;;  %v359_v55 = vld [vmem:[#allocation2 + $0x60] sm:$0xff] }
 0x198   : > { %v1490_v0 = vpop.f32.mrb[11].mxu0  ;;  %v2017_v2 = vadd.f32 %v1775_v57, %v351_v53  ;;  %v1778_v3 = vadd.f32 %v1777_v63, %v1488_v59  ;;  %v1779_v4 = vpop.f32.mrb[11].mxu1 }
 0x19a   : > { %1700 = vmatmul.mubr.bf16.gmra.mrb[116].mxu0 %v3883_v56  ;;  %2082 = vst.msk [vmem:[#allocation2 + $0x20] sm:$0xff] %vm2077_vm1, %v2017_v2  ;;  %v2018_v5 = vadd.f32 %v1778_v3, %v352_v62  ;;  %1989 = vmatmul.mubr.bf16.gmra.mrb[116].mxu1 %v3884_v60 }
 0x19b   : > { %1707 = vmatprep.mubr.bf16.mxu0 %v3885_v61  ;;  %1996 = vmatprep.mubr.bf16.mxu1 %v3887_v1  ;;  %v360_v61 = vld [vmem:[#allocation2 + $0x68] sm:$0xff] }
 0x19c   : > { %2083 = vst.msk [vmem:[#allocation2 + $0x28] sm:$0xff] %vm2077_vm1, %v2018_v5  ;;  %v361_v5 = vld [vmem:[#allocation2 + $0x70] sm:$0xff] }
 0x19d   : > { %v1493_v6 = vpop.f32.mrb[12].mxu0  ;;  %v1782_v8 = vpop.f32.mrb[12].mxu1 }
 0x19e   : > { %v1495_v9 = vpop.f32.mrb[13].mxu0  ;;  %v1783_v11 = vadd.f32 %v1782_v8, %v1493_v6  ;;  %v1784_v12 = vpop.f32.mrb[13].mxu1 }
 0x19f   : > { %v1496_v13 = vpop.f32.mrb[14].mxu0  ;;  %v1785_v17 = vpop.f32.mrb[14].mxu1 }
 0x1a0   : > { %v1498_v18 = vpop.f32.mrb[15].mxu0  ;;  %v2019_v20 = vadd.f32 %v1783_v11, %v353_v7  ;;  %v1786_v21 = vadd.f32 %v1785_v17, %v1496_v13  ;;  %v1787_v22 = vpop.f32.mrb[15].mxu1  ;;  %v362_v11 = vld [vmem:[#allocation2 + $0x78] sm:$0xff] }
 0x1a2   : > { %1708 = vmatmul.mubr.bf16.gmra.mrb[120].mxu0 %v3889_v10  ;;  %2084 = vst.msk [vmem:[#allocation2 + $0x30] sm:$0xff] %vm2077_vm1, %v2019_v20  ;;  %v2020_v23 = vadd.f32 %v1786_v21, %v354_v16  ;;  %1997 = vmatmul.mubr.bf16.gmra.mrb[120].mxu1 %v3890_v14 }
 0x1a3   : > { %1715 = vmatprep.mubr.bf16.mxu0 %v3891_v15  ;;  %2004 = vmatprep.mubr.bf16.mxu1 %v3893_v19  ;;  %v363_v19 = vld [vmem:[#allocation2 + $0x80] sm:$0xff] }
 0x1a4   : > { %2085 = vst.msk [vmem:[#allocation2 + $0x38] sm:$0xff] %vm2077_vm1, %v2020_v23 }
 0x1a5   : > { %v1501_v24 = vpop.f32.mrb[16].mxu0  ;;  %v1790_v26 = vpop.f32.mrb[16].mxu1 }
 0x1a6   : > { %v1503_v27 = vpop.f32.mrb[17].mxu0  ;;  %v1791_v29 = vadd.f32 %v1790_v26, %v1501_v24  ;;  %v1792_v30 = vpop.f32.mrb[17].mxu1 }
 0x1a7   : > { %v1504_v31 = vpop.f32.mrb[18].mxu0  ;;  %v1793_v34 = vpop.f32.mrb[18].mxu1 }
 0x1a8   : > { %v1506_v35 = vpop.f32.mrb[19].mxu0  ;;  %v2021_v36 = vadd.f32 %v1791_v29, %v355_v25  ;;  %v1794_v37 = vadd.f32 %v1793_v34, %v1504_v31  ;;  %v1795_v38 = vpop.f32.mrb[19].mxu1  ;;  %v364_v25 = vld [vmem:[#allocation2 + $0x88] sm:$0xff] }
 0x1aa   : > { %1716 = vmatmul.mubr.bf16.gmra.mrb[124].mxu0 %v3895_v28  ;;  %2086 = vst.msk [vmem:[#allocation2 + $0x40] sm:$0xff] %vm2077_vm1, %v2021_v36  ;;  %v2022_v39 = vadd.f32 %v1794_v37, %v356_v33  ;;  %2005 = vmatmul.mubr.bf16.gmra.mrb[124].mxu1 %v3896_v32  ;;  %v365_v33 = vld [vmem:[#allocation2 + $0x90] sm:$0xff] }
 0x1ac   : > { %2087 = vst.msk [vmem:[#allocation2 + $0x48] sm:$0xff] %vm2077_vm1, %v2022_v39  ;;  %v366_v39 = vld [vmem:[#allocation2 + $0x98] sm:$0xff] }
 0x1ad   : > { %v1509_v40 = vpop.f32.mrb[20].mxu0  ;;  %v1798_v42 = vpop.f32.mrb[20].mxu1 }
 0x1ae   : > { %v1511_v43 = vpop.f32.mrb[21].mxu0  ;;  %v1799_v44 = vadd.f32 %v1798_v42, %v1509_v40  ;;  %v1800_v45 = vpop.f32.mrb[21].mxu1 }
 0x1af   : > { %v1512_v46 = vpop.f32.mrb[22].mxu0  ;;  %v1801_v48 = vpop.f32.mrb[22].mxu1 }
 0x1b0   : > { %v1514_v49 = vpop.f32.mrb[23].mxu0  ;;  %v2023_v50 = vadd.f32 %v1799_v44, %v357_v41  ;;  %v1802_v51 = vadd.f32 %v1801_v48, %v1512_v46  ;;  %v1803_v52 = vpop.f32.mrb[23].mxu1 }
 0x1b2   : > { %2088 = vst.msk [vmem:[#allocation2 + $0x50] sm:$0xff] %vm2077_vm1, %v2023_v50  ;;  %v2024_v53 = vadd.f32 %v1802_v51, %v358_v47  ;;  %v367_v47 = vld [vmem:[#allocation2 + $0xa0] sm:$0xff] }
 0x1b4   : > { %2089 = vst.msk [vmem:[#allocation2 + $0x58] sm:$0xff] %vm2077_vm1, %v2024_v53  ;;  %v368_v53 = vld [vmem:[#allocation2 + $0xa8] sm:$0xff] }
 0x1b5   : > { %v1517_v54 = vpop.f32.mrb[24].mxu0  ;;  %v1806_v56 = vpop.f32.mrb[24].mxu1 }
 0x1b6   : > { %v1519_v57 = vpop.f32.mrb[25].mxu0  ;;  %v1807_v58 = vadd.f32 %v1806_v56, %v1517_v54  ;;  %v1808_v59 = vpop.f32.mrb[25].mxu1 }
 0x1b7   : > { %v1520_v60 = vpop.f32.mrb[26].mxu0  ;;  %v1809_v62 = vpop.f32.mrb[26].mxu1 }
 0x1b8   : > { %v1522_v63 = vpop.f32.mrb[27].mxu0  ;;  %v2025_v0 = vadd.f32 %v1807_v58, %v359_v55  ;;  %v1810_v1 = vadd.f32 %v1809_v62, %v1520_v60  ;;  %v1811_v2 = vpop.f32.mrb[27].mxu1 }
 0x1ba   : > { %2090 = vst.msk [vmem:[#allocation2 + $0x60] sm:$0xff] %vm2077_vm1, %v2025_v0  ;;  %v2026_v3 = vadd.f32 %v1810_v1, %v360_v61  ;;  %v369_v61 = vld [vmem:[#allocation2 + $0xb0] sm:$0xff] }
 0x1bc   : > { %2091 = vst.msk [vmem:[#allocation2 + $0x68] sm:$0xff] %vm2077_vm1, %v2026_v3  ;;  %v370_v3 = vld [vmem:[#allocation2 + $0xb8] sm:$0xff] }
 0x1bd   : > { %v1525_v4 = vpop.f32.mrb[28].mxu0  ;;  %v1814_v6 = vpop.f32.mrb[28].mxu1 }
 0x1be   : > { %v1527_v7 = vpop.f32.mrb[29].mxu0  ;;  %v1815_v8 = vadd.f32 %v1814_v6, %v1525_v4  ;;  %v1816_v9 = vpop.f32.mrb[29].mxu1 }
 0x1bf   : > { %v1528_v10 = vpop.f32.mrb[30].mxu0  ;;  %v1817_v12 = vpop.f32.mrb[30].mxu1 }
 0x1c0   : > { %v1530_v13 = vpop.f32.mrb[31].mxu0  ;;  %v2027_v14 = vadd.f32 %v1815_v8, %v361_v5  ;;  %v1818_v15 = vadd.f32 %v1817_v12, %v1528_v10  ;;  %v1819_v16 = vpop.f32.mrb[31].mxu1 }
 0x1c2   : > { %2092 = vst.msk [vmem:[#allocation2 + $0x70] sm:$0xff] %vm2077_vm1, %v2027_v14  ;;  %v2028_v17 = vadd.f32 %v1818_v15, %v362_v11  ;;  %v371_v11 = vld [vmem:[#allocation2 + $0xc0] sm:$0xff] }
 0x1c4   : > { %2093 = vst.msk [vmem:[#allocation2 + $0x78] sm:$0xff] %vm2077_vm1, %v2028_v17  ;;  %v372_v17 = vld [vmem:[#allocation2 + $0xc8] sm:$0xff] }
 0x1c5   : > { %v1533_v18 = vpop.f32.mrb[32].mxu0  ;;  %v1822_v20 = vpop.f32.mrb[32].mxu1 }
 0x1c6   : > { %v1535_v21 = vpop.f32.mrb[33].mxu0  ;;  %v1823_v22 = vadd.f32 %v1822_v20, %v1533_v18  ;;  %v1824_v23 = vpop.f32.mrb[33].mxu1 }
 0x1c7   : > { %v1536_v24 = vpop.f32.mrb[34].mxu0  ;;  %v1825_v26 = vpop.f32.mrb[34].mxu1 }
 0x1c8   : > { %v1538_v27 = vpop.f32.mrb[35].mxu0  ;;  %v2029_v28 = vadd.f32 %v1823_v22, %v363_v19  ;;  %v1826_v29 = vadd.f32 %v1825_v26, %v1536_v24  ;;  %v1827_v30 = vpop.f32.mrb[35].mxu1 }
 0x1ca   : > { %2094 = vst.msk [vmem:[#allocation2 + $0x80] sm:$0xff] %vm2077_vm1, %v2029_v28  ;;  %v2030_v31 = vadd.f32 %v1826_v29, %v364_v25  ;;  %v373_v25 = vld [vmem:[#allocation2 + $0xd0] sm:$0xff] }
 0x1cc   : > { %2095 = vst.msk [vmem:[#allocation2 + $0x88] sm:$0xff] %vm2077_vm1, %v2030_v31  ;;  %v374_v31 = vld [vmem:[#allocation2 + $0xd8] sm:$0xff] }
 0x1cd   : > { %v1541_v32 = vpop.f32.mrb[36].mxu0  ;;  %v1830_v34 = vpop.f32.mrb[36].mxu1 }
 0x1ce   : > { %v1543_v35 = vpop.f32.mrb[37].mxu0  ;;  %v1831_v36 = vadd.f32 %v1830_v34, %v1541_v32  ;;  %v1832_v37 = vpop.f32.mrb[37].mxu1 }
 0x1cf   : > { %v1544_v38 = vpop.f32.mrb[38].mxu0  ;;  %v1833_v40 = vpop.f32.mrb[38].mxu1 }
 0x1d0   : > { %v1546_v41 = vpop.f32.mrb[39].mxu0  ;;  %v2031_v42 = vadd.f32 %v1831_v36, %v365_v33  ;;  %v1834_v43 = vadd.f32 %v1833_v40, %v1544_v38  ;;  %v1835_v44 = vpop.f32.mrb[39].mxu1 }
 0x1d2   : > { %2096 = vst.msk [vmem:[#allocation2 + $0x90] sm:$0xff] %vm2077_vm1, %v2031_v42  ;;  %v2032_v45 = vadd.f32 %v1834_v43, %v366_v39  ;;  %v375_v39 = vld [vmem:[#allocation2 + $0xe0] sm:$0xff] }
 0x1d4   : > { %2097 = vst.msk [vmem:[#allocation2 + $0x98] sm:$0xff] %vm2077_vm1, %v2032_v45  ;;  %v376_v45 = vld [vmem:[#allocation2 + $0xe8] sm:$0xff] }
 0x1d5   : > { %v1549_v46 = vpop.f32.mrb[40].mxu0  ;;  %v1838_v48 = vpop.f32.mrb[40].mxu1 }
 0x1d6   : > { %v1551_v49 = vpop.f32.mrb[41].mxu0  ;;  %v1839_v50 = vadd.f32 %v1838_v48, %v1549_v46  ;;  %v1840_v51 = vpop.f32.mrb[41].mxu1 }
 0x1d7   : > { %v1552_v52 = vpop.f32.mrb[42].mxu0  ;;  %v1841_v54 = vpop.f32.mrb[42].mxu1 }
 0x1d8   : > { %v1554_v55 = vpop.f32.mrb[43].mxu0  ;;  %v2033_v56 = vadd.f32 %v1839_v50, %v367_v47  ;;  %v1842_v57 = vadd.f32 %v1841_v54, %v1552_v52  ;;  %v1843_v58 = vpop.f32.mrb[43].mxu1 }
 0x1da   : > { %2098 = vst.msk [vmem:[#allocation2 + $0xa0] sm:$0xff] %vm2077_vm1, %v2033_v56  ;;  %v2034_v59 = vadd.f32 %v1842_v57, %v368_v53  ;;  %v377_v53 = vld [vmem:[#allocation2 + $0xf0] sm:$0xff] }
 0x1dc   : > { %2099 = vst.msk [vmem:[#allocation2 + $0xa8] sm:$0xff] %vm2077_vm1, %v2034_v59  ;;  %v378_v59 = vld [vmem:[#allocation2 + $0xf8] sm:$0xff] }
 0x1dd   : > { %v1557_v60 = vpop.f32.mrb[44].mxu0  ;;  %v1846_v62 = vpop.f32.mrb[44].mxu1 }
 0x1de   : > { %v1559_v63 = vpop.f32.mrb[45].mxu0  ;;  %v1847_v0 = vadd.f32 %v1846_v62, %v1557_v60  ;;  %v1848_v1 = vpop.f32.mrb[45].mxu1 }
 0x1df   : > { %v1560_v2 = vpop.f32.mrb[46].mxu0  ;;  %v1849_v4 = vpop.f32.mrb[46].mxu1 }
 0x1e0   : > { %v1562_v5 = vpop.f32.mrb[47].mxu0  ;;  %v2035_v6 = vadd.f32 %v1847_v0, %v369_v61  ;;  %v1850_v7 = vadd.f32 %v1849_v4, %v1560_v2  ;;  %v1851_v8 = vpop.f32.mrb[47].mxu1 }
 0x1e2   : > { %2100 = vst.msk [vmem:[#allocation2 + $0xb0] sm:$0xff] %vm2077_vm1, %v2035_v6  ;;  %v2036_v9 = vadd.f32 %v1850_v7, %v370_v3  ;;  %v379_v3 = vld [vmem:[#allocation2 + $0x100] sm:$0xff] }
 0x1e4   : > { %2101 = vst.msk [vmem:[#allocation2 + $0xb8] sm:$0xff] %vm2077_vm1, %v2036_v9  ;;  %v380_v9 = vld [vmem:[#allocation2 + $0x108] sm:$0xff] }
 0x1e5   : > { %v1565_v10 = vpop.f32.mrb[48].mxu0  ;;  %v1854_v12 = vpop.f32.mrb[48].mxu1 }
 0x1e6   : > { %v1567_v13 = vpop.f32.mrb[49].mxu0  ;;  %v1855_v14 = vadd.f32 %v1854_v12, %v1565_v10  ;;  %v1856_v15 = vpop.f32.mrb[49].mxu1 }
 0x1e7   : > { %v1568_v16 = vpop.f32.mrb[50].mxu0  ;;  %v1857_v18 = vpop.f32.mrb[50].mxu1 }
 0x1e8   : > { %v1570_v19 = vpop.f32.mrb[51].mxu0  ;;  %v2037_v20 = vadd.f32 %v1855_v14, %v371_v11  ;;  %v1858_v21 = vadd.f32 %v1857_v18, %v1568_v16  ;;  %v1859_v22 = vpop.f32.mrb[51].mxu1 }
 0x1ea   : > { %2102 = vst.msk [vmem:[#allocation2 + $0xc0] sm:$0xff] %vm2077_vm1, %v2037_v20  ;;  %v2038_v23 = vadd.f32 %v1858_v21, %v372_v17  ;;  %v381_v17 = vld [vmem:[#allocation2 + $0x110] sm:$0xff] }
 0x1ec   : > { %2103 = vst.msk [vmem:[#allocation2 + $0xc8] sm:$0xff] %vm2077_vm1, %v2038_v23  ;;  %v382_v23 = vld [vmem:[#allocation2 + $0x118] sm:$0xff] }
 0x1ed   : > { %v1573_v24 = vpop.f32.mrb[52].mxu0  ;;  %v1862_v26 = vpop.f32.mrb[52].mxu1 }
 0x1ee   : > { %v1575_v27 = vpop.f32.mrb[53].mxu0  ;;  %v1863_v28 = vadd.f32 %v1862_v26, %v1573_v24  ;;  %v1864_v29 = vpop.f32.mrb[53].mxu1 }
 0x1ef   : > { %v1576_v30 = vpop.f32.mrb[54].mxu0  ;;  %v1865_v32 = vpop.f32.mrb[54].mxu1 }
 0x1f0   : > { %v1578_v33 = vpop.f32.mrb[55].mxu0  ;;  %v2039_v34 = vadd.f32 %v1863_v28, %v373_v25  ;;  %v1866_v35 = vadd.f32 %v1865_v32, %v1576_v30  ;;  %v1867_v36 = vpop.f32.mrb[55].mxu1 }
 0x1f2   : > { %2104 = vst.msk [vmem:[#allocation2 + $0xd0] sm:$0xff] %vm2077_vm1, %v2039_v34  ;;  %v2040_v37 = vadd.f32 %v1866_v35, %v374_v31  ;;  %v383_v31 = vld [vmem:[#allocation2 + $0x120] sm:$0xff] }
 0x1f4   : > { %2105 = vst.msk [vmem:[#allocation2 + $0xd8] sm:$0xff] %vm2077_vm1, %v2040_v37  ;;  %v384_v37 = vld [vmem:[#allocation2 + $0x128] sm:$0xff] }
 0x1f5   : > { %v1581_v38 = vpop.f32.mrb[56].mxu0  ;;  %v1870_v40 = vpop.f32.mrb[56].mxu1 }
 0x1f6   : > { %v1583_v41 = vpop.f32.mrb[57].mxu0  ;;  %v1871_v42 = vadd.f32 %v1870_v40, %v1581_v38  ;;  %v1872_v43 = vpop.f32.mrb[57].mxu1 }
 0x1f7   : > { %v1584_v44 = vpop.f32.mrb[58].mxu0  ;;  %v1873_v46 = vpop.f32.mrb[58].mxu1 }
 0x1f8   : > { %v1586_v47 = vpop.f32.mrb[59].mxu0  ;;  %v2041_v48 = vadd.f32 %v1871_v42, %v375_v39  ;;  %v1874_v49 = vadd.f32 %v1873_v46, %v1584_v44  ;;  %v1875_v50 = vpop.f32.mrb[59].mxu1 }
 0x1fa   : > { %2106 = vst.msk [vmem:[#allocation2 + $0xe0] sm:$0xff] %vm2077_vm1, %v2041_v48  ;;  %v2042_v51 = vadd.f32 %v1874_v49, %v376_v45  ;;  %v385_v45 = vld [vmem:[#allocation2 + $0x130] sm:$0xff] }
 0x1fc   : > { %2107 = vst.msk [vmem:[#allocation2 + $0xe8] sm:$0xff] %vm2077_vm1, %v2042_v51  ;;  %v386_v51 = vld [vmem:[#allocation2 + $0x138] sm:$0xff] }
 0x1fd   : > { %v1589_v52 = vpop.f32.mrb[60].mxu0  ;;  %v1878_v54 = vpop.f32.mrb[60].mxu1 }
 0x1fe   : > { %v1591_v55 = vpop.f32.mrb[61].mxu0  ;;  %v1879_v56 = vadd.f32 %v1878_v54, %v1589_v52  ;;  %v1880_v57 = vpop.f32.mrb[61].mxu1 }
 0x1ff   : > { %v1592_v58 = vpop.f32.mrb[62].mxu0  ;;  %v1881_v60 = vpop.f32.mrb[62].mxu1 }
 0x200   : > { %v1594_v61 = vpop.f32.mrb[63].mxu0  ;;  %v2043_v62 = vadd.f32 %v1879_v56, %v377_v53  ;;  %v1882_v63 = vadd.f32 %v1881_v60, %v1592_v58  ;;  %v1883_v0 = vpop.f32.mrb[63].mxu1 }
 0x202   : > { %2108 = vst.msk [vmem:[#allocation2 + $0xf0] sm:$0xff] %vm2077_vm1, %v2043_v62  ;;  %v2044_v1 = vadd.f32 %v1882_v63, %v378_v59  ;;  %v387_v59 = vld [vmem:[#allocation2 + $0x140] sm:$0xff] }
 0x204   : > { %2109 = vst.msk [vmem:[#allocation2 + $0xf8] sm:$0xff] %vm2077_vm1, %v2044_v1  ;;  %v388_v1 = vld [vmem:[#allocation2 + $0x148] sm:$0xff] }
 0x205   : > { %v1597_v2 = vpop.f32.mrb[64].mxu0  ;;  %v1886_v4 = vpop.f32.mrb[64].mxu1 }
 0x206   : > { %v1599_v5 = vpop.f32.mrb[65].mxu0  ;;  %v1887_v6 = vadd.f32 %v1886_v4, %v1597_v2  ;;  %v1888_v7 = vpop.f32.mrb[65].mxu1 }
 0x207   : > { %v1600_v8 = vpop.f32.mrb[66].mxu0  ;;  %v1889_v10 = vpop.f32.mrb[66].mxu1 }
 0x208   : > { %v1602_v11 = vpop.f32.mrb[67].mxu0  ;;  %v2045_v12 = vadd.f32 %v1887_v6, %v379_v3  ;;  %v1890_v13 = vadd.f32 %v1889_v10, %v1600_v8  ;;  %v1891_v14 = vpop.f32.mrb[67].mxu1 }
 0x20a   : > { %2110 = vst.msk [vmem:[#allocation2 + $0x100] sm:$0xff] %vm2077_vm1, %v2045_v12  ;;  %v2046_v15 = vadd.f32 %v1890_v13, %v380_v9  ;;  %v389_v9 = vld [vmem:[#allocation2 + $0x150] sm:$0xff] }
 0x20c   : > { %2111 = vst.msk [vmem:[#allocation2 + $0x108] sm:$0xff] %vm2077_vm1, %v2046_v15  ;;  %v390_v15 = vld [vmem:[#allocation2 + $0x158] sm:$0xff] }
 0x20d   : > { %v1605_v16 = vpop.f32.mrb[68].mxu0  ;;  %v1894_v18 = vpop.f32.mrb[68].mxu1 }
 0x20e   : > { %v1607_v19 = vpop.f32.mrb[69].mxu0  ;;  %v1895_v20 = vadd.f32 %v1894_v18, %v1605_v16  ;;  %v1896_v21 = vpop.f32.mrb[69].mxu1 }
 0x20f   : > { %v1608_v22 = vpop.f32.mrb[70].mxu0  ;;  %v1897_v24 = vpop.f32.mrb[70].mxu1 }
 0x210   : > { %v1610_v25 = vpop.f32.mrb[71].mxu0  ;;  %v2047_v26 = vadd.f32 %v1895_v20, %v381_v17  ;;  %v1898_v27 = vadd.f32 %v1897_v24, %v1608_v22  ;;  %v1899_v28 = vpop.f32.mrb[71].mxu1 }
 0x212   : > { %2112 = vst.msk [vmem:[#allocation2 + $0x110] sm:$0xff] %vm2077_vm1, %v2047_v26  ;;  %v2048_v29 = vadd.f32 %v1898_v27, %v382_v23  ;;  %v391_v23 = vld [vmem:[#allocation2 + $0x160] sm:$0xff] }
 0x214   : > { %2113 = vst.msk [vmem:[#allocation2 + $0x118] sm:$0xff] %vm2077_vm1, %v2048_v29  ;;  %v392_v29 = vld [vmem:[#allocation2 + $0x168] sm:$0xff] }
 0x215   : > { %v1613_v30 = vpop.f32.mrb[72].mxu0  ;;  %v1902_v32 = vpop.f32.mrb[72].mxu1 }
 0x216   : > { %v1615_v33 = vpop.f32.mrb[73].mxu0  ;;  %v1903_v34 = vadd.f32 %v1902_v32, %v1613_v30  ;;  %v1904_v35 = vpop.f32.mrb[73].mxu1 }
 0x217   : > { %v1616_v36 = vpop.f32.mrb[74].mxu0  ;;  %v1905_v38 = vpop.f32.mrb[74].mxu1 }
 0x218   : > { %v1618_v39 = vpop.f32.mrb[75].mxu0  ;;  %v2049_v40 = vadd.f32 %v1903_v34, %v383_v31  ;;  %v1906_v41 = vadd.f32 %v1905_v38, %v1616_v36  ;;  %v1907_v42 = vpop.f32.mrb[75].mxu1 }
 0x21a   : > { %2114 = vst.msk [vmem:[#allocation2 + $0x120] sm:$0xff] %vm2077_vm1, %v2049_v40  ;;  %v2050_v43 = vadd.f32 %v1906_v41, %v384_v37  ;;  %v393_v37 = vld [vmem:[#allocation2 + $0x170] sm:$0xff] }
 0x21c   : > { %2115 = vst.msk [vmem:[#allocation2 + $0x128] sm:$0xff] %vm2077_vm1, %v2050_v43  ;;  %v394_v43 = vld [vmem:[#allocation2 + $0x178] sm:$0xff] }
 0x21d   : > { %v1621_v44 = vpop.f32.mrb[76].mxu0  ;;  %v1910_v46 = vpop.f32.mrb[76].mxu1 }
 0x21e   : > { %v1623_v47 = vpop.f32.mrb[77].mxu0  ;;  %v1911_v48 = vadd.f32 %v1910_v46, %v1621_v44  ;;  %v1912_v49 = vpop.f32.mrb[77].mxu1 }
 0x21f   : > { %v1624_v50 = vpop.f32.mrb[78].mxu0  ;;  %v1913_v52 = vpop.f32.mrb[78].mxu1 }
 0x220   : > { %v1626_v53 = vpop.f32.mrb[79].mxu0  ;;  %v2051_v54 = vadd.f32 %v1911_v48, %v385_v45  ;;  %v1914_v55 = vadd.f32 %v1913_v52, %v1624_v50  ;;  %v1915_v56 = vpop.f32.mrb[79].mxu1 }
 0x222   : > { %2116 = vst.msk [vmem:[#allocation2 + $0x130] sm:$0xff] %vm2077_vm1, %v2051_v54  ;;  %v2052_v57 = vadd.f32 %v1914_v55, %v386_v51  ;;  %v395_v51 = vld [vmem:[#allocation2 + $0x180] sm:$0xff] }
 0x224   : > { %2117 = vst.msk [vmem:[#allocation2 + $0x138] sm:$0xff] %vm2077_vm1, %v2052_v57  ;;  %v396_v57 = vld [vmem:[#allocation2 + $0x188] sm:$0xff] }
 0x225   : > { %v1629_v58 = vpop.f32.mrb[80].mxu0  ;;  %v1918_v60 = vpop.f32.mrb[80].mxu1 }
 0x226   : > { %v1631_v61 = vpop.f32.mrb[81].mxu0  ;;  %v1919_v62 = vadd.f32 %v1918_v60, %v1629_v58  ;;  %v1920_v63 = vpop.f32.mrb[81].mxu1 }
 0x227   : > { %v1632_v0 = vpop.f32.mrb[82].mxu0  ;;  %v1921_v2 = vpop.f32.mrb[82].mxu1 }
 0x228   : > { %v1634_v3 = vpop.f32.mrb[83].mxu0  ;;  %v2053_v4 = vadd.f32 %v1919_v62, %v387_v59  ;;  %v1922_v5 = vadd.f32 %v1921_v2, %v1632_v0  ;;  %v1923_v6 = vpop.f32.mrb[83].mxu1 }
 0x22a   : > { %2118 = vst.msk [vmem:[#allocation2 + $0x140] sm:$0xff] %vm2077_vm1, %v2053_v4  ;;  %v2054_v7 = vadd.f32 %v1922_v5, %v388_v1  ;;  %v397_v1 = vld [vmem:[#allocation2 + $0x190] sm:$0xff] }
 0x22c   : > { %2119 = vst.msk [vmem:[#allocation2 + $0x148] sm:$0xff] %vm2077_vm1, %v2054_v7  ;;  %v398_v7 = vld [vmem:[#allocation2 + $0x198] sm:$0xff] }
 0x22d   : > { %v1637_v8 = vpop.f32.mrb[84].mxu0  ;;  %v1926_v10 = vpop.f32.mrb[84].mxu1 }
 0x22e   : > { %v1639_v11 = vpop.f32.mrb[85].mxu0  ;;  %v1927_v12 = vadd.f32 %v1926_v10, %v1637_v8  ;;  %v1928_v13 = vpop.f32.mrb[85].mxu1 }
 0x22f   : > { %v1640_v14 = vpop.f32.mrb[86].mxu0  ;;  %v1929_v16 = vpop.f32.mrb[86].mxu1 }
 0x230   : > { %v1642_v17 = vpop.f32.mrb[87].mxu0  ;;  %v2055_v18 = vadd.f32 %v1927_v12, %v389_v9  ;;  %v1930_v19 = vadd.f32 %v1929_v16, %v1640_v14  ;;  %v1931_v20 = vpop.f32.mrb[87].mxu1 }
 0x232   : > { %2120 = vst.msk [vmem:[#allocation2 + $0x150] sm:$0xff] %vm2077_vm1, %v2055_v18  ;;  %v2056_v21 = vadd.f32 %v1930_v19, %v390_v15  ;;  %v399_v15 = vld [vmem:[#allocation2 + $0x1a0] sm:$0xff] }
 0x234   : > { %2121 = vst.msk [vmem:[#allocation2 + $0x158] sm:$0xff] %vm2077_vm1, %v2056_v21  ;;  %v400_v21 = vld [vmem:[#allocation2 + $0x1a8] sm:$0xff] }
 0x235   : > { %v1645_v22 = vpop.f32.mrb[88].mxu0  ;;  %v1934_v24 = vpop.f32.mrb[88].mxu1 }
 0x236   : > { %v1647_v25 = vpop.f32.mrb[89].mxu0  ;;  %v1935_v26 = vadd.f32 %v1934_v24, %v1645_v22  ;;  %v1936_v27 = vpop.f32.mrb[89].mxu1 }
 0x237   : > { %v1648_v28 = vpop.f32.mrb[90].mxu0  ;;  %v1937_v30 = vpop.f32.mrb[90].mxu1 }
 0x238   : > { %v1650_v31 = vpop.f32.mrb[91].mxu0  ;;  %v2057_v32 = vadd.f32 %v1935_v26, %v391_v23  ;;  %v1938_v33 = vadd.f32 %v1937_v30, %v1648_v28  ;;  %v1939_v34 = vpop.f32.mrb[91].mxu1 }
 0x23a   : > { %2122 = vst.msk [vmem:[#allocation2 + $0x160] sm:$0xff] %vm2077_vm1, %v2057_v32  ;;  %v2058_v35 = vadd.f32 %v1938_v33, %v392_v29  ;;  %v401_v29 = vld [vmem:[#allocation2 + $0x1b0] sm:$0xff] }
 0x23c   : > { %2123 = vst.msk [vmem:[#allocation2 + $0x168] sm:$0xff] %vm2077_vm1, %v2058_v35  ;;  %v402_v35 = vld [vmem:[#allocation2 + $0x1b8] sm:$0xff] }
 0x23d   : > { %v1653_v36 = vpop.f32.mrb[92].mxu0  ;;  %v1942_v38 = vpop.f32.mrb[92].mxu1 }
 0x23e   : > { %v1655_v39 = vpop.f32.mrb[93].mxu0  ;;  %v1943_v40 = vadd.f32 %v1942_v38, %v1653_v36  ;;  %v1944_v41 = vpop.f32.mrb[93].mxu1 }
 0x23f   : > { %v1656_v42 = vpop.f32.mrb[94].mxu0  ;;  %v1945_v44 = vpop.f32.mrb[94].mxu1 }
 0x240   : > { %v1658_v45 = vpop.f32.mrb[95].mxu0  ;;  %v2059_v46 = vadd.f32 %v1943_v40, %v393_v37  ;;  %v1946_v47 = vadd.f32 %v1945_v44, %v1656_v42  ;;  %v1947_v48 = vpop.f32.mrb[95].mxu1 }
 0x242   : > { %2124 = vst.msk [vmem:[#allocation2 + $0x170] sm:$0xff] %vm2077_vm1, %v2059_v46  ;;  %v2060_v49 = vadd.f32 %v1946_v47, %v394_v43  ;;  %v403_v43 = vld [vmem:[#allocation2 + $0x1c0] sm:$0xff] }
 0x244   : > { %2125 = vst.msk [vmem:[#allocation2 + $0x178] sm:$0xff] %vm2077_vm1, %v2060_v49  ;;  %v404_v49 = vld [vmem:[#allocation2 + $0x1c8] sm:$0xff] }
 0x245   : > { %v1661_v50 = vpop.f32.mrb[96].mxu0  ;;  %v1950_v52 = vpop.f32.mrb[96].mxu1 }
 0x246   : > { %v1663_v53 = vpop.f32.mrb[97].mxu0  ;;  %v1951_v54 = vadd.f32 %v1950_v52, %v1661_v50  ;;  %v1952_v55 = vpop.f32.mrb[97].mxu1 }
 0x247   : > { %v1664_v56 = vpop.f32.mrb[98].mxu0  ;;  %v1953_v58 = vpop.f32.mrb[98].mxu1 }
 0x248   : > { %v1666_v59 = vpop.f32.mrb[99].mxu0  ;;  %v2061_v60 = vadd.f32 %v1951_v54, %v395_v51  ;;  %v1954_v61 = vadd.f32 %v1953_v58, %v1664_v56  ;;  %v1955_v62 = vpop.f32.mrb[99].mxu1 }
 0x24a   : > { %2126 = vst.msk [vmem:[#allocation2 + $0x180] sm:$0xff] %vm2077_vm1, %v2061_v60  ;;  %v2062_v63 = vadd.f32 %v1954_v61, %v396_v57  ;;  %v405_v57 = vld [vmem:[#allocation2 + $0x1d0] sm:$0xff] }
 0x24c   : > { %2127 = vst.msk [vmem:[#allocation2 + $0x188] sm:$0xff] %vm2077_vm1, %v2062_v63  ;;  %v406_v63 = vld [vmem:[#allocation2 + $0x1d8] sm:$0xff] }
 0x24d   : > { %v1669_v0 = vpop.f32.mrb[100].mxu0  ;;  %v1958_v2 = vpop.f32.mrb[100].mxu1 }
 0x24e   : > { %v1671_v3 = vpop.f32.mrb[101].mxu0  ;;  %v1959_v4 = vadd.f32 %v1958_v2, %v1669_v0  ;;  %v1960_v5 = vpop.f32.mrb[101].mxu1 }
 0x24f   : > { %v1672_v6 = vpop.f32.mrb[102].mxu0  ;;  %v1961_v8 = vpop.f32.mrb[102].mxu1 }
 0x250   : > { %v1674_v9 = vpop.f32.mrb[103].mxu0  ;;  %v2063_v10 = vadd.f32 %v1959_v4, %v397_v1  ;;  %v1962_v11 = vadd.f32 %v1961_v8, %v1672_v6  ;;  %v1963_v12 = vpop.f32.mrb[103].mxu1 }
 0x252   : > { %2128 = vst.msk [vmem:[#allocation2 + $0x190] sm:$0xff] %vm2077_vm1, %v2063_v10  ;;  %v2064_v13 = vadd.f32 %v1962_v11, %v398_v7  ;;  %v407_v7 = vld [vmem:[#allocation2 + $0x1e0] sm:$0xff] }
 0x254   : > { %2129 = vst.msk [vmem:[#allocation2 + $0x198] sm:$0xff] %vm2077_vm1, %v2064_v13  ;;  %v408_v13 = vld [vmem:[#allocation2 + $0x1e8] sm:$0xff] }
 0x255   : > { %v1677_v14 = vpop.f32.mrb[104].mxu0  ;;  %v1966_v16 = vpop.f32.mrb[104].mxu1 }
 0x256   : > { %v1679_v17 = vpop.f32.mrb[105].mxu0  ;;  %v1967_v18 = vadd.f32 %v1966_v16, %v1677_v14  ;;  %v1968_v19 = vpop.f32.mrb[105].mxu1 }
 0x257   : > { %v1680_v20 = vpop.f32.mrb[106].mxu0  ;;  %v1969_v22 = vpop.f32.mrb[106].mxu1 }
 0x258   : > { %v1682_v23 = vpop.f32.mrb[107].mxu0  ;;  %v2065_v24 = vadd.f32 %v1967_v18, %v399_v15  ;;  %v1970_v25 = vadd.f32 %v1969_v22, %v1680_v20  ;;  %v1971_v26 = vpop.f32.mrb[107].mxu1 }
 0x25a   : > { %2130 = vst.msk [vmem:[#allocation2 + $0x1a0] sm:$0xff] %vm2077_vm1, %v2065_v24  ;;  %v2066_v27 = vadd.f32 %v1970_v25, %v400_v21  ;;  %v409_v21 = vld [vmem:[#allocation2 + $0x1f0] sm:$0xff] }
 0x25c   : > { %2131 = vst.msk [vmem:[#allocation2 + $0x1a8] sm:$0xff] %vm2077_vm1, %v2066_v27  ;;  %v410_v27 = vld [vmem:[#allocation2 + $0x1f8] sm:$0xff] }
 0x25d   : > { %v1685_v28 = vpop.f32.mrb[108].mxu0  ;;  %v1974_v30 = vpop.f32.mrb[108].mxu1 }
 0x25e   : > { %v1687_v31 = vpop.f32.mrb[109].mxu0  ;;  %v1975_v32 = vadd.f32 %v1974_v30, %v1685_v28  ;;  %v1976_v33 = vpop.f32.mrb[109].mxu1 }
 0x25f   : > { %v1688_v34 = vpop.f32.mrb[110].mxu0  ;;  %v1977_v36 = vpop.f32.mrb[110].mxu1 }
 0x260   : > { %v1690_v37 = vpop.f32.mrb[111].mxu0  ;;  %v2067_v38 = vadd.f32 %v1975_v32, %v401_v29  ;;  %v1978_v39 = vadd.f32 %v1977_v36, %v1688_v34  ;;  %v1979_v40 = vpop.f32.mrb[111].mxu1  ;;  %v2146_v34 = vld [vmem:[#allocation2] sm:$0xff] (!%p3371_p7)  ;;  %v2147_v36 = vld [vmem:[#allocation2 + $0x8] sm:$0xff] (!%p3371_p7) }
 0x261   : > { %v2149_v40 = vld [vmem:[#allocation2 + $0x18] sm:$0xff] (!%p3371_p7) }
 0x262   : > { %2132 = vst.msk [vmem:[#allocation2 + $0x1b0] sm:$0xff] %vm2077_vm1, %v2067_v38  ;;  %v2068_v41 = vadd.f32 %v1978_v39, %v402_v35  ;;  %v4638_v35 = vld [vmem:[%s5053_s2] ss:$0 sm:$0xff] (!%p3371_p7)  ;;  %v2148_v39 = vld [vmem:[#allocation2 + $0x10] sm:$0xff] (!%p3371_p7) }
 0x263   : > { %v2217_v37 = vadd.f32 (!%p3371_p7), %v4638_v35, %v2146_v34  ;;  %v2218_v38 = vadd.f32 (!%p3371_p7), %v4638_v35, %v2147_v36 }
 0x264   : > { %2133 = vst.msk [vmem:[#allocation2 + $0x1b8] sm:$0xff] %vm2077_vm1, %v2068_v41  ;;  %v2150_v41 = vld [vmem:[#allocation2 + $0x20] sm:$0xff] (!%p3371_p7) }
 0x265   : > { %v1693_v42 = vpop.f32.mrb[112].mxu0  ;;  %v1982_v44 = vpop.f32.mrb[112].mxu1 }
 0x266   : > { %v1695_v45 = vpop.f32.mrb[113].mxu0  ;;  %v1983_v46 = vadd.f32 %v1982_v44, %v1693_v42  ;;  %v1984_v47 = vpop.f32.mrb[113].mxu1  ;;  %v2219_v42 = vadd.f32 (!%p3371_p7), %v4638_v35, %v2148_v39  ;;  %v2221_v44 = vadd.f32 (!%p3371_p7), %v4638_v35, %v2150_v41  ;;  %v2168_v39 = vld [vmem:[#allocation2 + $0xb0] sm:$0xff] (!%p3371_p7) }
 0x267   : > { %v1696_v48 = vpop.f32.mrb[114].mxu0  ;;  %v1985_v50 = vpop.f32.mrb[114].mxu1  ;;  %v2151_v45 = vld [vmem:[#allocation2 + $0x28] sm:$0xff] (!%p3371_p7)  ;;  %v2153_v47 = vld [vmem:[#allocation2 + $0x38] sm:$0xff] (!%p3371_p7) }
 0x268   : > { %v1698_v51 = vpop.f32.mrb[115].mxu0  ;;  %v2069_v52 = vadd.f32 %v1983_v46, %v403_v43  ;;  %v1986_v53 = vadd.f32 %v1985_v50, %v1696_v48  ;;  %v1987_v54 = vpop.f32.mrb[115].mxu1  ;;  %v2220_v43 = vadd.f32 (!%p3371_p7), %v4638_v35, %v2149_v40  ;;  %v2152_v46 = vld [vmem:[#allocation2 + $0x30] sm:$0xff] (!%p3371_p7)  ;;  %v2281_v48 = vmax.f32 (!%p3371_p7), %v2217_v37, 0.0 }
 0x269   : > { %v2222_v50 = vadd.f32 (!%p3371_p7), %v4638_v35, %v2151_v45  ;;  %v2223_v51 = vadd.f32 (!%p3371_p7), %v4638_v35, %v2152_v46  ;;  %v2285_v54 = vmax.f32 (!%p3371_p7), %v2221_v44, 0.0  ;;  %v2169_v44 = vld [vmem:[#allocation2 + $0xb8] sm:$0xff] (!%p3371_p7) }
 0x26a   : > { %2134 = vst.msk [vmem:[#allocation2 + $0x1c0] sm:$0xff] %vm2077_vm1, %v2069_v52  ;;  %v2070_v55 = vadd.f32 %v1986_v53, %v404_v49  ;;  %v2282_v49 = vmax.f32 (!%p3371_p7), %v2218_v38, 0.0  ;;  %v2283_v52 = vmax.f32 (!%p3371_p7), %v2219_v42, 0.0  ;;  %v2284_v53 = vmax.f32 (!%p3371_p7), %v2220_v43, 0.0  ;;  %v2167_v38 = vld [vmem:[#allocation2 + $0xa8] sm:$0xff] (!%p3371_p7) }
 0x26c   : > { %2135 = vst.msk [vmem:[#allocation2 + $0x1c8] sm:$0xff] %vm2077_vm1, %v2070_v55  ;;  %v2224_v55 = vadd.f32 (!%p3371_p7), %v4638_v35, %v2153_v47 }
 0x26d   : > { %v1701_v56 = vpop.f32.mrb[116].mxu0  ;;  %v1990_v58 = vpop.f32.mrb[116].mxu1 }
 0x26e   : > { %v1703_v59 = vpop.f32.mrb[117].mxu0  ;;  %v1991_v60 = vadd.f32 %v1990_v58, %v1701_v56  ;;  %v1992_v61 = vpop.f32.mrb[117].mxu1  ;;  %v2154_v56 = vld [vmem:[#allocation2 + $0x40] sm:$0xff] (!%p3371_p7)  ;;  %v3456_v58 = vpack.c.bf16 (!%p3371_p7), %v2281_v48, %v2281_v48 }
 0x26f   : > { %v1704_v62 = vpop.f32.mrb[118].mxu0  ;;  %v1993_v0 = vpop.f32.mrb[118].mxu1  ;;  %v3457_v59 = vpack.c.bf16 (!%p3371_p7), %v2282_v49, %v2282_v49  ;;  %v2287_v61 = vmax.f32 (!%p3371_p7), %v2223_v51, 0.0  ;;  %v2238_v51 = vadd.f32 (!%p3371_p7), %v4638_v35, %v2167_v38 }
 0x270   : > { %v1706_v1 = vpop.f32.mrb[119].mxu0  ;;  %v2071_v2 = vadd.f32 %v1991_v60, %v405_v57  ;;  %v1994_v3 = vadd.f32 %v1993_v0, %v1704_v62  ;;  %v1995_v4 = vpop.f32.mrb[119].mxu1  ;;  %v2155_v57 = vld [vmem:[#allocation2 + $0x48] sm:$0xff] (!%p3371_p7)  ;;  %v2286_v60 = vmax.f32 (!%p3371_p7), %v2222_v50, 0.0  ;;  %v2156_v62 = vld [vmem:[#allocation2 + $0x50] sm:$0xff] (!%p3371_p7)  ;;  %v2158_v0 = vld [vmem:[#allocation2 + $0x60] sm:$0xff] (!%p3371_p7) }
 0x271   : > { %v3458_v1 = vpack.c.bf16 (!%p3371_p7), %v2283_v52, %v2283_v52  ;;  %v2288_v4 = vmax.f32 (!%p3371_p7), %v2224_v55, 0.0  ;;  %2602 = vst.msk [vmem:[%s4247_s8] sm:$0xf] (!%p3371_p7), %vm2601_vm2, %v3456_v58  ;;  %2603 = vst.msk [vmem:[%s4247_s8 + $0x4] sm:$0xf] (!%p3371_p7), %vm2601_vm2, %v3457_v59  ;;  %v2239_v52 = vadd.f32 (!%p3371_p7), %v4638_v35, %v2168_v39  ;;  %v2171_v58 = vld [vmem:[#allocation2 + $0xc8] sm:$0xff] (!%p3371_p7) }
 0x272   : > { %2136 = vst.msk [vmem:[#allocation2 + $0x1d0] sm:$0xff] %vm2077_vm1, %v2071_v2  ;;  %v2072_v5 = vadd.f32 %v1994_v3, %v406_v63  ;;  %v2157_v63 = vld [vmem:[#allocation2 + $0x58] sm:$0xff] (!%p3371_p7)  ;;  %v3459_v2 = vpack.c.bf16 (!%p3371_p7), %v2284_v53, %v2284_v53  ;;  %v3460_v3 = vpack.c.bf16 (!%p3371_p7), %v2285_v54, %v2285_v54  ;;  %v2183_v39 = vld [vmem:[#allocation2 + $0x128] sm:$0xff] (!%p3371_p7) }
 0x273   : > { %2604 = vst.msk [vmem:[%s4247_s8 + $0x8] sm:$0xf] (!%p3371_p7), %vm2601_vm2, %v3458_v1  ;;  %v2174_v1 = vld [vmem:[#allocation2 + $0xe0] sm:$0xff] (!%p3371_p7) }
 0x274   : > { %2137 = vst.msk [vmem:[#allocation2 + $0x1d8] sm:$0xff] %vm2077_vm1, %v2072_v5  ;;  %v2159_v5 = vld [vmem:[#allocation2 + $0x68] sm:$0xff] (!%p3371_p7) }
 0x275   : > { %v1709_v6 = vpop.f32.mrb[120].mxu0  ;;  %v1998_v8 = vpop.f32.mrb[120].mxu1  ;;  %2605 = vst.msk [vmem:[%s4247_s8 + $0xc] sm:$0xf] (!%p3371_p7), %vm2601_vm2, %v3459_v2  ;;  %2606 = vst.msk [vmem:[%s4247_s8 + $0x10] sm:$0xf] (!%p3371_p7), %vm2601_vm2, %v3460_v3 }
 0x276   : > { %v1711_v9 = vpop.f32.mrb[121].mxu0  ;;  %v1999_v10 = vadd.f32 %v1998_v8, %v1709_v6  ;;  %v2000_v11 = vpop.f32.mrb[121].mxu1  ;;  %v2160_v6 = vld [vmem:[#allocation2 + $0x70] sm:$0xff] (!%p3371_p7)  ;;  %v3462_v8 = vpack.c.bf16 (!%p3371_p7), %v2287_v61, %v2287_v61  ;;  %v2302_v61 = vmax.f32 (!%p3371_p7), %v2238_v51, 0.0 }
 0x277   : > { %v1712_v12 = vpop.f32.mrb[122].mxu0  ;;  %v2001_v14 = vpop.f32.mrb[122].mxu1  ;;  %v2225_v9 = vadd.f32 (!%p3371_p7), %v4638_v35, %v2154_v56  ;;  %v2161_v11 = vld [vmem:[#allocation2 + $0x78] sm:$0xff] (!%p3371_p7)  ;;  %v2240_v56 = vadd.f32 (!%p3371_p7), %v4638_v35, %v2169_v44 }
 0x278   : > { %v1714_v15 = vpop.f32.mrb[123].mxu0  ;;  %v2073_v16 = vadd.f32 %v1999_v10, %v407_v7  ;;  %v2002_v17 = vadd.f32 %v2001_v14, %v1712_v12  ;;  %v2003_v18 = vpop.f32.mrb[123].mxu1  ;;  %v3461_v7 = vpack.c.bf16 (!%p3371_p7), %v2286_v60, %v2286_v60  ;;  %v2226_v10 = vadd.f32 (!%p3371_p7), %v4638_v35, %v2155_v57  ;;  %2608 = vst.msk [vmem:[%s4247_s8 + $0x18] sm:$0xf] (!%p3371_p7), %vm2601_vm2, %v3462_v8  ;;  %v2170_v57 = vld [vmem:[#allocation2 + $0xc0] sm:$0xff] (!%p3371_p7) }
 0x279   : > { %v3463_v12 = vpack.c.bf16 (!%p3371_p7), %v2288_v4, %v2288_v4  ;;  %v2228_v14 = vadd.f32 (!%p3371_p7), %v4638_v35, %v2157_v63  ;;  %v2229_v15 = vadd.f32 (!%p3371_p7), %v4638_v35, %v2158_v0  ;;  %v2230_v18 = vadd.f32 (!%p3371_p7), %v4638_v35, %v2159_v5  ;;  %v2172_v63 = vld [vmem:[#allocation2 + $0xd0] sm:$0xff] (!%p3371_p7)  ;;  %v2173_v0 = vld [vmem:[#allocation2 + $0xd8] sm:$0xff] (!%p3371_p7) }
 0x27a   : > { %2138 = vst.msk [vmem:[#allocation2 + $0x1e0] sm:$0xff] %vm2077_vm1, %v2073_v16  ;;  %v2074_v19 = vadd.f32 %v2002_v17, %v408_v13  ;;  %v2227_v13 = vadd.f32 (!%p3371_p7), %v4638_v35, %v2156_v62  ;;  %v2289_v16 = vmax.f32 (!%p3371_p7), %v2225_v9, 0.0  ;;  %v2290_v17 = vmax.f32 (!%p3371_p7), %v2226_v10, 0.0 }
 0x27b   : > { %2607 = vst.msk [vmem:[%s4247_s8 + $0x14] sm:$0xf] (!%p3371_p7), %vm2601_vm2, %v3461_v7  ;;  %2609 = vst.msk [vmem:[%s4247_s8 + $0x1c] sm:$0xf] (!%p3371_p7), %vm2601_vm2, %v3463_v12  ;;  %v2303_v62 = vmax.f32 (!%p3371_p7), %v2239_v52, 0.0  ;;  %v2304_v5 = vmax.f32 (!%p3371_p7), %v2240_v56, 0.0  ;;  %v3477_v8 = vpack.c.bf16 (!%p3371_p7), %v2302_v61, %v2302_v61  ;;  %v2241_v10 = vadd.f32 (!%p3371_p7), %v4638_v35, %v2170_v57 }
 0x27c   : > { %2139 = vst.msk [vmem:[#allocation2 + $0x1e8] sm:$0xff] %vm2077_vm1, %v2074_v19  ;;  %v2231_v19 = vadd.f32 (!%p3371_p7), %v4638_v35, %v2160_v6  ;;  %v2175_v6 = vld [vmem:[#allocation2 + $0xe8] sm:$0xff] (!%p3371_p7)  ;;  %v2176_v7 = vld [vmem:[#allocation2 + $0xf0] sm:$0xff] (!%p3371_p7)  ;;  %v2177_v12 = vld [vmem:[#allocation2 + $0xf8] sm:$0xff] (!%p3371_p7)  ;;  %v2254_v52 = vadd.f32 (!%p3371_p7), %v4638_v35, %v2183_v39 }
 0x27d   : > { %v1717_v20 = vpop.f32.mrb[124].mxu0  ;;  %v2006_v22 = vpop.f32.mrb[124].mxu1  ;;  %v3478_v9 = vpack.c.bf16 (!%p3371_p7), %v2303_v62, %v2303_v62  ;;  %2623 = vst.msk [vmem:[%s4247_s8 + $0x54] sm:$0xf] (!%p3371_p7), %vm2601_vm2, %v3477_v8  ;;  %v2192_v8 = vld [vmem:[#allocation2 + $0x170] sm:$0xff] (!%p3371_p7) }
 0x27e   : > { %v1719_v23 = vpop.f32.mrb[125].mxu0  ;;  %v2007_v24 = vadd.f32 %v2006_v22, %v1717_v20  ;;  %v2008_v25 = vpop.f32.mrb[125].mxu1  ;;  %2145 = sbr.rel (%p3371_p7) target bundleno = 680 (0x2a8), region = 44  ;;  %v2291_v20 = vmax.f32 (!%p3371_p7), %v2227_v13, 0.0  ;;  %v2293_v22 = vmax.f32 (!%p3371_p7), %v2229_v15, 0.0  ;;  %v3479_v13 = vpack.c.bf16 (!%p3371_p7), %v2304_v5, %v2304_v5 }
 0x27f   : > { %v1720_v26 = vpop.f32.mrb[126].mxu0  ;;  %v2009_v28 = vpop.f32.mrb[126].mxu1  ;;  %v2232_v23 = vadd.f32 (!%p3371_p7), %v4638_v35, %v2161_v11  ;;  %v2163_v25 = vld [vmem:[#allocation2 + $0x88] sm:$0xff] (!%p3371_p7)  ;;  %v2242_v11 = vadd.f32 (!%p3371_p7), %v4638_v35, %v2171_v58  ;;  %v2244_v15 = vadd.f32 (!%p3371_p7), %v4638_v35, %v2173_v0  ;;  %2624 = vst.msk [vmem:[%s4247_s8 + $0x58] sm:$0xf] (!%p3371_p7), %vm2601_vm2, %v3478_v9  ;;  %v2186_v58 = vld [vmem:[#allocation2 + $0x140] sm:$0xff] (!%p3371_p7) }
 0x280   : > { %v1722_v29 = vpop.f32.mrb[127].mxu0  ;;  %v2075_v30 = vadd.f32 %v2007_v24, %v409_v21  ;;  %v2010_v31 = vadd.f32 %v2009_v28, %v1720_v26  ;;  %v2011_v32 = vpop.f32.mrb[127].mxu1  ;;  %v2292_v21 = vmax.f32 (!%p3371_p7), %v2228_v14, 0.0  ;;  %v2162_v24 = vld [vmem:[#allocation2 + $0x80] sm:$0xff] (!%p3371_p7)  ;;  %v3464_v26 = vpack.c.bf16 (!%p3371_p7), %v2289_v16, %v2289_v16  ;;  %2625 = vst.msk [vmem:[%s4247_s8 + $0x5c] sm:$0xf] (!%p3371_p7), %vm2601_vm2, %v3479_v13 }
 0x281   : > { %v2294_v28 = vmax.f32 (!%p3371_p7), %v2230_v18, 0.0  ;;  %v2295_v29 = vmax.f32 (!%p3371_p7), %v2231_v19, 0.0  ;;  %v2166_v32 = vld [vmem:[#allocation2 + $0xa0] sm:$0xff] (!%p3371_p7)  ;;  %v3468_v36 = vpack.c.bf16 (!%p3371_p7), %v2293_v22, %v2293_v22  ;;  %v2296_v37 = vmax.f32 (!%p3371_p7), %v2232_v23, 0.0  ;;  %v2188_v0 = vld [vmem:[#allocation2 + $0x150] sm:$0xff] (!%p3371_p7)  ;;  %v2193_v13 = vld [vmem:[#allocation2 + $0x178] sm:$0xff] (!%p3371_p7) }
 0x282   : > { %2140 = vst.msk [vmem:[#allocation2 + $0x1f0] sm:$0xff] %vm2077_vm1, %v2075_v30  ;;  %v2076_v33 = vadd.f32 %v2010_v31, %v410_v27  ;;  %v3465_v27 = vpack.c.bf16 (!%p3371_p7), %v2290_v17, %v2290_v17  ;;  %v2164_v30 = vld [vmem:[#allocation2 + $0x90] sm:$0xff] (!%p3371_p7)  ;;  %v2165_v31 = vld [vmem:[#allocation2 + $0x98] sm:$0xff] (!%p3371_p7)  ;;  %v3467_v34 = vpack.c.bf16 (!%p3371_p7), %v2292_v21, %v2292_v21  ;;  %v2233_v42 = vadd.f32 (!%p3371_p7), %v4638_v35, %v2162_v24 }
 0x283   : > { %2610 = vst.msk [vmem:[%s4247_s8 + $0x20] sm:$0xf] (!%p3371_p7), %vm2601_vm2, %v3464_v26  ;;  %v3469_v40 = vpack.c.bf16 (!%p3371_p7), %v2294_v28, %v2294_v28  ;;  %v3470_v41 = vpack.c.bf16 (!%p3371_p7), %v2295_v29, %v2295_v29  ;;  %v2234_v43 = vadd.f32 (!%p3371_p7), %v4638_v35, %v2163_v25  ;;  %2614 = vst.msk [vmem:[%s4247_s8 + $0x30] sm:$0xf] (!%p3371_p7), %vm2601_vm2, %v3468_v36  ;;  %v2305_v17 = vmax.f32 (!%p3371_p7), %v2241_v10, 0.0  ;;  %v2178_v25 = vld [vmem:[#allocation2 + $0x100] sm:$0xff] (!%p3371_p7) }
 0x284   : > { %2141 = vst.msk [vmem:[#allocation2 + $0x1f8] sm:$0xff] %vm2077_vm1, %v2076_v33  ;;  %v3466_v33 = vpack.c.bf16 (!%p3371_p7), %v2291_v20, %v2291_v20  ;;  %v3471_v45 = vpack.c.bf16 (!%p3371_p7), %v2296_v37, %v2296_v37  ;;  %v2235_v46 = vadd.f32 (!%p3371_p7), %v4638_v35, %v2164_v30  ;;  %v2236_v47 = vadd.f32 (!%p3371_p7), %v4638_v35, %v2165_v31  ;;  %v2179_v26 = vld [vmem:[#allocation2 + $0x108] sm:$0xff] (!%p3371_p7)  ;;  %v2180_v31 = vld [vmem:[#allocation2 + $0x110] sm:$0xff] (!%p3371_p7) }
 0x285   : > { %2611 = vst.msk [vmem:[%s4247_s8 + $0x24] sm:$0xf] %vm2601_vm2, %v3465_v27  ;;  %2613 = vst.msk [vmem:[%s4247_s8 + $0x2c] sm:$0xf] %vm2601_vm2, %v3467_v34  ;;  %v2237_v48 = vadd.f32 %v4638_v35, %v2166_v32  ;;  %v2297_v49 = vmax.f32 %v2233_v42, 0.0  ;;  %v2298_v50 = vmax.f32 %v2234_v43, 0.0  ;;  %v2243_v14 = vadd.f32 %v4638_v35, %v2172_v63 }
 0x286   : > { %2612 = vst.msk [vmem:[%s4247_s8 + $0x28] sm:$0xf] %vm2601_vm2, %v3466_v33  ;;  %2615 = vst.msk [vmem:[%s4247_s8 + $0x34] sm:$0xf] %vm2601_vm2, %v3469_v40  ;;  %v2299_v53 = vmax.f32 %v2235_v46, 0.0  ;;  %v2300_v54 = vmax.f32 %v2236_v47, 0.0  ;;  %v2245_v16 = vadd.f32 %v4638_v35, %v2174_v1  ;;  %v2246_v19 = vadd.f32 %v4638_v35, %v2175_v6 }
 0x287   : > { %2616 = vst.msk [vmem:[%s4247_s8 + $0x38] sm:$0xf] %vm2601_vm2, %v3470_v41  ;;  %2617 = vst.msk [vmem:[%s4247_s8 + $0x3c] sm:$0xf] %vm2601_vm2, %v3471_v45  ;;  %v2301_v55 = vmax.f32 %v2237_v48, 0.0  ;;  %v3472_v59 = vpack.c.bf16 %v2297_v49, %v2297_v49  ;;  %v3473_v60 = vpack.c.bf16 %v2298_v50, %v2298_v50  ;;  %v2306_v18 = vmax.f32 %v2242_v11, 0.0 }
 0x288   : > { %v3474_v2 = vpack.c.bf16 %v2299_v53, %v2299_v53  ;;  %v3475_v3 = vpack.c.bf16 %v2300_v54, %v2300_v54  ;;  %v2247_v20 = vadd.f32 %v4638_v35, %v2176_v7  ;;  %v2307_v21 = vmax.f32 %v2243_v14, 0.0  ;;  %v2181_v32 = vld [vmem:[#allocation2 + $0x118] sm:$0xff]  ;;  %v2182_v33 = vld [vmem:[#allocation2 + $0x120] sm:$0xff]  ;;  %v2184_v40 = vld [vmem:[#allocation2 + $0x130] sm:$0xff] }
 0x289   : > { %v3476_v4 = vpack.c.bf16 %v2301_v55, %v2301_v55  ;;  %2618 = vst.msk [vmem:[%s4247_s8 + $0x40] sm:$0xf] %vm2601_vm2, %v3472_v59  ;;  %2619 = vst.msk [vmem:[%s4247_s8 + $0x44] sm:$0xf] %vm2601_vm2, %v3473_v60  ;;  %v2308_v22 = vmax.f32 %v2244_v15, 0.0  ;;  %v2309_v23 = vmax.f32 %v2245_v16, 0.0  ;;  %v2248_v24 = vadd.f32 %v4638_v35, %v2177_v12 }
 0x28a   : > { %2620 = vst.msk [vmem:[%s4247_s8 + $0x48] sm:$0xf] %vm2601_vm2, %v3474_v2  ;;  %2621 = vst.msk [vmem:[%s4247_s8 + $0x4c] sm:$0xf] %vm2601_vm2, %v3475_v3  ;;  %v3480_v27 = vpack.c.bf16 %v2305_v17, %v2305_v17  ;;  %v3481_v28 = vpack.c.bf16 %v2306_v18, %v2306_v18  ;;  %v2310_v29 = vmax.f32 %v2246_v19, 0.0  ;;  %v2311_v30 = vmax.f32 %v2247_v20, 0.0 }
 0x28b   : > { %2622 = vst.msk [vmem:[%s4247_s8 + $0x50] sm:$0xf] %vm2601_vm2, %v3476_v4  ;;  %v3482_v34 = vpack.c.bf16 %v2307_v21, %v2307_v21  ;;  %v3483_v36 = vpack.c.bf16 %v2308_v22, %v2308_v22  ;;  %v3484_v37 = vpack.c.bf16 %v2309_v23, %v2309_v23  ;;  %v2312_v38 = vmax.f32 %v2248_v24, 0.0  ;;  %v2185_v45 = vld [vmem:[#allocation2 + $0x138] sm:$0xff]  ;;  %v2187_v59 = vld [vmem:[#allocation2 + $0x148] sm:$0xff]  ;;  %v2190_v2 = vld [vmem:[#allocation2 + $0x160] sm:$0xff] }
 0x28c   : > { %2626 = vst.msk [vmem:[%s4247_s8 + $0x60] sm:$0xf] %vm2601_vm2, %v3480_v27  ;;  %2627 = vst.msk [vmem:[%s4247_s8 + $0x64] sm:$0xf] %vm2601_vm2, %v3481_v28  ;;  %v3485_v41 = vpack.c.bf16 %v2310_v29, %v2310_v29  ;;  %v3486_v42 = vpack.c.bf16 %v2311_v30, %v2311_v30  ;;  %v2249_v43 = vadd.f32 %v4638_v35, %v2178_v25  ;;  %v2318_v62 = vmax.f32 %v2254_v52, 0.0  ;;  %v2189_v1 = vld [vmem:[#allocation2 + $0x158] sm:$0xff] }
 0x28d   : > { %v2250_v44 = vadd.f32 %v4638_v35, %v2179_v26  ;;  %2628 = vst.msk [vmem:[%s4247_s8 + $0x68] sm:$0xf] %vm2601_vm2, %v3482_v34  ;;  %2629 = vst.msk [vmem:[%s4247_s8 + $0x6c] sm:$0xf] %vm2601_vm2, %v3483_v36  ;;  %v3487_v46 = vpack.c.bf16 %v2312_v38, %v2312_v38  ;;  %v2251_v47 = vadd.f32 %v4638_v35, %v2180_v31  ;;  %v2191_v7 = vld [vmem:[#allocation2 + $0x168] sm:$0xff]  ;;  %v2194_v26 = vld [vmem:[#allocation2 + $0x180] sm:$0xff] }
 0x28e   : > { %2630 = vst.msk [vmem:[%s4247_s8 + $0x70] sm:$0xf] %vm2601_vm2, %v3484_v37  ;;  %v2252_v48 = vadd.f32 %v4638_v35, %v2181_v32  ;;  %v2253_v49 = vadd.f32 %v4638_v35, %v2182_v33  ;;  %2631 = vst.msk [vmem:[%s4247_s8 + $0x74] sm:$0xf] %vm2601_vm2, %v3485_v41  ;;  %v2313_v50 = vmax.f32 %v2249_v43, 0.0  ;;  %v2255_v53 = vadd.f32 %v4638_v35, %v2184_v40  ;;  %v2195_v27 = vld [vmem:[#allocation2 + $0x188] sm:$0xff] }
 0x28f   : > { %2632 = vst.msk [vmem:[%s4247_s8 + $0x78] sm:$0xf] %vm2601_vm2, %v3486_v42  ;;  %v2314_v51 = vmax.f32 %v2250_v44, 0.0  ;;  %2633 = vst.msk [vmem:[%s4247_s8 + $0x7c] sm:$0xf] %vm2601_vm2, %v3487_v46  ;;  %v2315_v54 = vmax.f32 %v2251_v47, 0.0  ;;  %v2256_v57 = vadd.f32 %v4638_v35, %v2185_v45  ;;  %v3493_v9 = vpack.c.bf16 %v2318_v62, %v2318_v62 }
 0x290   : > { %v2316_v55 = vmax.f32 %v2252_v48, 0.0  ;;  %v2317_v56 = vmax.f32 %v2253_v49, 0.0  ;;  %v3488_v60 = vpack.c.bf16 %v2313_v50, %v2313_v50  ;;  %v2319_v63 = vmax.f32 %v2255_v53, 0.0  ;;  %v2196_v32 = vld [vmem:[#allocation2 + $0x190] sm:$0xff]  ;;  %v2197_v33 = vld [vmem:[#allocation2 + $0x198] sm:$0xff]  ;;  %v2198_v34 = vld [vmem:[#allocation2 + $0x1a0] sm:$0xff] }
 0x291   : > { %v3489_v61 = vpack.c.bf16 %v2314_v51, %v2314_v51  ;;  %v3490_v3 = vpack.c.bf16 %v2315_v54, %v2315_v54  ;;  %v2320_v6 = vmax.f32 %v2256_v57, 0.0  ;;  %v2257_v11 = vadd.f32 %v4638_v35, %v2186_v58  ;;  %2639 = vst.msk [vmem:[%s4247_s8 + $0x94] sm:$0xf] %vm2601_vm2, %v3493_v9  ;;  %v2199_v40 = vld [vmem:[#allocation2 + $0x1a8] sm:$0xff]  ;;  %v2200_v41 = vld [vmem:[#allocation2 + $0x1b0] sm:$0xff]  ;;  %v2201_v46 = vld [vmem:[#allocation2 + $0x1b8] sm:$0xff] }
 0x292   : > { %v3491_v4 = vpack.c.bf16 %v2316_v55, %v2316_v55  ;;  %v3492_v5 = vpack.c.bf16 %v2317_v56, %v2317_v56  ;;  %2634 = vst.msk [vmem:[%s4247_s8 + $0x80] sm:$0xf] %vm2601_vm2, %v3488_v60  ;;  %v3494_v10 = vpack.c.bf16 %v2319_v63, %v2319_v63  ;;  %v2258_v12 = vadd.f32 %v4638_v35, %v2187_v59  ;;  %v2202_v59 = vld [vmem:[#allocation2 + $0x1c0] sm:$0xff]  ;;  %v2203_v60 = vld [vmem:[#allocation2 + $0x1c8] sm:$0xff]  ;;  %v2208_v9 = vld [vmem:[#allocation2 + $0x1f0] sm:$0xff] }
 0x293   : > { %2635 = vst.msk [vmem:[%s4247_s8 + $0x84] sm:$0xf] %vm2601_vm2, %v3489_v61  ;;  %2636 = vst.msk [vmem:[%s4247_s8 + $0x88] sm:$0xf] %vm2601_vm2, %v3490_v3  ;;  %v3495_v14 = vpack.c.bf16 %v2320_v6, %v2320_v6  ;;  %v2259_v15 = vadd.f32 %v4638_v35, %v2188_v0  ;;  %v2260_v16 = vadd.f32 %v4638_v35, %v2189_v1  ;;  %v2321_v18 = vmax.f32 %v2257_v11, 0.0  ;;  %v2204_v1 = vld [vmem:[#allocation2 + $0x1d0] sm:$0xff] }
 0x294   : > { %2637 = vst.msk [vmem:[%s4247_s8 + $0x8c] sm:$0xf] %vm2601_vm2, %v3491_v4  ;;  %2638 = vst.msk [vmem:[%s4247_s8 + $0x90] sm:$0xf] %vm2601_vm2, %v3492_v5  ;;  %v2261_v17 = vadd.f32 %v4638_v35, %v2190_v2  ;;  %v2322_v19 = vmax.f32 %v2258_v12, 0.0  ;;  %v2262_v20 = vadd.f32 %v4638_v35, %v2191_v7  ;;  %v2263_v21 = vadd.f32 %v4638_v35, %v2192_v8  ;;  %v2205_v2 = vld [vmem:[#allocation2 + $0x1d8] sm:$0xff] }
 0x295   : > { %2640 = vst.msk [vmem:[%s4247_s8 + $0x98] sm:$0xf] %vm2601_vm2, %v3494_v10  ;;  %2641 = vst.msk [vmem:[%s4247_s8 + $0x9c] sm:$0xf] %vm2601_vm2, %v3495_v14  ;;  %v2323_v22 = vmax.f32 %v2259_v15, 0.0  ;;  %v2324_v23 = vmax.f32 %v2260_v16, 0.0  ;;  %v2264_v25 = vadd.f32 %v4638_v35, %v2193_v13  ;;  %v3496_v28 = vpack.c.bf16 %v2321_v18, %v2321_v18 }
 0x296   : > { %v2325_v24 = vmax.f32 %v2261_v17, 0.0  ;;  %v3497_v29 = vpack.c.bf16 %v2322_v19, %v2322_v19  ;;  %v2326_v30 = vmax.f32 %v2262_v20, 0.0  ;;  %v2327_v31 = vmax.f32 %v2263_v21, 0.0  ;;  %v2206_v3 = vld [vmem:[#allocation2 + $0x1e0] sm:$0xff]  ;;  %v2207_v8 = vld [vmem:[#allocation2 + $0x1e8] sm:$0xff]  ;;  %v2209_v14 = vld [vmem:[#allocation2 + $0x1f8] sm:$0xff] }
 0x297   : > { %v3498_v36 = vpack.c.bf16 %v2323_v22, %v2323_v22  ;;  %v3499_v37 = vpack.c.bf16 %v2324_v23, %v2324_v23  ;;  %v2328_v39 = vmax.f32 %v2264_v25, 0.0  ;;  %2642 = vst.msk [vmem:[%s4247_s8 + $0xa0] sm:$0xf] %vm2601_vm2, %v3496_v28  ;;  %v2265_v44 = vadd.f32 %v4638_v35, %v2194_v26 }
 0x298   : > { %v3500_v38 = vpack.c.bf16 %v2325_v24, %v2325_v24  ;;  %2643 = vst.msk [vmem:[%s4247_s8 + $0xa4] sm:$0xf] %vm2601_vm2, %v3497_v29  ;;  %v3501_v42 = vpack.c.bf16 %v2326_v30, %v2326_v30  ;;  %v3502_v43 = vpack.c.bf16 %v2327_v31, %v2327_v31  ;;  %v2266_v45 = vadd.f32 %v4638_v35, %v2195_v27 }
 0x299   : > { %2644 = vst.msk [vmem:[%s4247_s8 + $0xa8] sm:$0xf] %vm2601_vm2, %v3498_v36  ;;  %2645 = vst.msk [vmem:[%s4247_s8 + $0xac] sm:$0xf] %vm2601_vm2, %v3499_v37  ;;  %v3503_v47 = vpack.c.bf16 %v2328_v39, %v2328_v39  ;;  %v2267_v48 = vadd.f32 %v4638_v35, %v2196_v32  ;;  %v2268_v49 = vadd.f32 %v4638_v35, %v2197_v33  ;;  %v2329_v51 = vmax.f32 %v2265_v44, 0.0 }
 0x29a   : > { %2646 = vst.msk [vmem:[%s4247_s8 + $0xb0] sm:$0xf] %vm2601_vm2, %v3500_v38  ;;  %v2269_v50 = vadd.f32 %v4638_v35, %v2198_v34  ;;  %2647 = vst.msk [vmem:[%s4247_s8 + $0xb4] sm:$0xf] %vm2601_vm2, %v3501_v42  ;;  %v2330_v52 = vmax.f32 %v2266_v45, 0.0  ;;  %v2270_v53 = vadd.f32 %v4638_v35, %v2199_v40  ;;  %v2271_v54 = vadd.f32 %v4638_v35, %v2200_v41 }
 0x29b   : > { %2648 = vst.msk [vmem:[%s4247_s8 + $0xb8] sm:$0xf] %vm2601_vm2, %v3502_v43  ;;  %2649 = vst.msk [vmem:[%s4247_s8 + $0xbc] sm:$0xf] %vm2601_vm2, %v3503_v47  ;;  %v2331_v55 = vmax.f32 %v2267_v48, 0.0  ;;  %v2332_v56 = vmax.f32 %v2268_v49, 0.0  ;;  %v2272_v58 = vadd.f32 %v4638_v35, %v2201_v46  ;;  %v3504_v61 = vpack.c.bf16 %v2329_v51, %v2329_v51 }
 0x29c   : > { %v2333_v57 = vmax.f32 %v2269_v50, 0.0  ;;  %v3505_v62 = vpack.c.bf16 %v2330_v52, %v2330_v52  ;;  %v2334_v63 = vmax.f32 %v2270_v53, 0.0  ;;  %v2335_v0 = vmax.f32 %v2271_v54, 0.0 }
 0x29d   : > { %v3506_v4 = vpack.c.bf16 %v2331_v55, %v2331_v55  ;;  %v3507_v5 = vpack.c.bf16 %v2332_v56, %v2332_v56  ;;  %v2336_v7 = vmax.f32 %v2272_v58, 0.0  ;;  %2650 = vst.msk [vmem:[%s4247_s8 + $0xc0] sm:$0xf] %vm2601_vm2, %v3504_v61  ;;  %v2273_v12 = vadd.f32 %v4638_v35, %v2202_v59 }
 0x29e   : > { %v3508_v6 = vpack.c.bf16 %v2333_v57, %v2333_v57  ;;  %2651 = vst.msk [vmem:[%s4247_s8 + $0xc4] sm:$0xf] %vm2601_vm2, %v3505_v62  ;;  %v3509_v10 = vpack.c.bf16 %v2334_v63, %v2334_v63  ;;  %v3510_v11 = vpack.c.bf16 %v2335_v0, %v2335_v0  ;;  %v2274_v13 = vadd.f32 %v4638_v35, %v2203_v60 }
 0x29f   : > { %2652 = vst.msk [vmem:[%s4247_s8 + $0xc8] sm:$0xf] %vm2601_vm2, %v3506_v4  ;;  %2653 = vst.msk [vmem:[%s4247_s8 + $0xcc] sm:$0xf] %vm2601_vm2, %v3507_v5  ;;  %v3511_v15 = vpack.c.bf16 %v2336_v7, %v2336_v7  ;;  %v2275_v16 = vadd.f32 %v4638_v35, %v2204_v1  ;;  %v2276_v17 = vadd.f32 %v4638_v35, %v2205_v2  ;;  %v2337_v19 = vmax.f32 %v2273_v12, 0.0 }
 0x2a0   : > { %2654 = vst.msk [vmem:[%s4247_s8 + $0xd0] sm:$0xf] %vm2601_vm2, %v3508_v6  ;;  %v2277_v18 = vadd.f32 %v4638_v35, %v2206_v3  ;;  %2655 = vst.msk [vmem:[%s4247_s8 + $0xd4] sm:$0xf] %vm2601_vm2, %v3509_v10  ;;  %v2338_v20 = vmax.f32 %v2274_v13, 0.0  ;;  %v2278_v21 = vadd.f32 %v4638_v35, %v2207_v8  ;;  %v2279_v22 = vadd.f32 %v4638_v35, %v2208_v9 }
 0x2a1   : > { %2656 = vst.msk [vmem:[%s4247_s8 + $0xd8] sm:$0xf] %vm2601_vm2, %v3510_v11  ;;  %2657 = vst.msk [vmem:[%s4247_s8 + $0xdc] sm:$0xf] %vm2601_vm2, %v3511_v15  ;;  %v2339_v23 = vmax.f32 %v2275_v16, 0.0  ;;  %v2340_v24 = vmax.f32 %v2276_v17, 0.0  ;;  %v2280_v26 = vadd.f32 %v4638_v35, %v2209_v14  ;;  %v3512_v27 = vpack.c.bf16 %v2337_v19, %v2337_v19 }
 0x2a2   : > { %v2341_v25 = vmax.f32 %v2277_v18, 0.0  ;;  %v3513_v28 = vpack.c.bf16 %v2338_v20, %v2338_v20  ;;  %v2342_v29 = vmax.f32 %v2278_v21, 0.0  ;;  %v2343_v30 = vmax.f32 %v2279_v22, 0.0 }
 0x2a3   : > { %v3514_v31 = vpack.c.bf16 %v2339_v23, %v2339_v23  ;;  %v3515_v32 = vpack.c.bf16 %v2340_v24, %v2340_v24  ;;  %v2344_v34 = vmax.f32 %v2280_v26, 0.0  ;;  %2658 = vst.msk [vmem:[%s4247_s8 + $0xe0] sm:$0xf] %vm2601_vm2, %v3512_v27 }
 0x2a4   : > { %v3516_v33 = vpack.c.bf16 %v2341_v25, %v2341_v25  ;;  %2659 = vst.msk [vmem:[%s4247_s8 + $0xe4] sm:$0xf] %vm2601_vm2, %v3513_v28  ;;  %v3517_v36 = vpack.c.bf16 %v2342_v29, %v2342_v29  ;;  %v3518_v37 = vpack.c.bf16 %v2343_v30, %v2343_v30 }
 0x2a5   : > { %2660 = vst.msk [vmem:[%s4247_s8 + $0xe8] sm:$0xf] %vm2601_vm2, %v3514_v31  ;;  %2661 = vst.msk [vmem:[%s4247_s8 + $0xec] sm:$0xf] %vm2601_vm2, %v3515_v32  ;;  %v3519_v35 = vpack.c.bf16 %v2344_v34, %v2344_v34 }
 0x2a6   : > { %2662 = vst.msk [vmem:[%s4247_s8 + $0xf0] sm:$0xf] %vm2601_vm2, %v3516_v33  ;;  %2663 = vst.msk [vmem:[%s4247_s8 + $0xf4] sm:$0xf] %vm2601_vm2, %v3517_v36 }
 0x2a7   : > { %2664 = vst.msk [vmem:[%s4247_s8 + $0xf8] sm:$0xf] %vm2601_vm2, %v3518_v37  ;;  %2665 = vst.msk [vmem:[%s4247_s8 + $0xfc] sm:$0xf] %vm2601_vm2, %v3519_v35 }
 0x2a8 PF: > { %2672 = sbr.rel (!%p4181_p12) target bundleno = 778 (0x30a), region = 48  ;;  %s3438_s17 = sshll.u32 (%p4181_p12), %s4027_s18, 6 }
 0x2a9   : > { %s3520_s10 = sshll.u32 (%p4181_p12), %s4027_s18, 8  ;;  %s2674_s11 = ssub.s32 (%p4181_p12), 961, %s3438_s17 }
 0x2aa   : > { %s4839_s27 = scalar_lea.vmem (%p4181_p12), %s5054_s3, %s3520_s10   ;;  %p2675_p13 = scmp.lt.s32.totalorder (%p4181_p12), %s2674_s11, 64 }
 0x2af   : > { %s5087_s11 = smov (!%p2675_p13, %s2674_s11), 64 }
 0x2b0   : > { %s3439_s24 = sshll.u32 %s5087_s11, 6 }
 0x2b1   : > { %p3442_p0 = scmp.eq.s32.totalorder %s3439_s24, 0 }
 0x2b2   : > { %s4845_s7 = sshrl.u32 (!%p3442_p0), %s5087_s11, 6 }
 0x2b3   : > { %2684 = sbr.rel (%p3442_p0) target bundleno = 778 (0x30a), region = 52  ;;  %p3443_p12 = scmp.le.s32.totalorder (!%p3442_p0), %s4845_s7, 0 }
 0x2ba   : > { %3114 = sbr.rel (%p3443_p12) target bundleno = 757 (0x2f5), region = 136  ;;  %s5062_s18 = smov (!%p3443_p12), %s4839_s27 }
 0x2bb   : > { %s5063_s23 = smov (!%p3443_p12), %s4247_s8  ;;  %s4854_s22 = smov (!%p3443_p12), 0  }
 0x2bc   : > { %s4856_s26 = smov (!%p3443_p12), 0  }
 0x2c1 LB: >> { %v2700_v38 = vld [vmem:[%s4047_s23] sm:$0xf]  ;;  %v2702_v39 = vld [vmem:[%s4047_s23 + $0x4] sm:$0xf]  ;;  %v2704_v40 = vld [vmem:[%s4047_s23 + $0x8] sm:$0xf]  ;;  %s4055_s26 = sphi %s4856_s26, %s2694_s26   ;;  %s4051_s22 = sphi %s4854_s22, %s5064_s22   ;;  %s4047_s23 = sphi %s5063_s23, %s2833_s23   ;;  %s4043_s18 = sphi %s5062_s18, %s2834_s18  }
 0x2c2   : >> { %2701 = vst [vmem:[%s4043_s18] sm:$0xf] %v2700_v38  ;;  %2703 = vst [vmem:[%s4043_s18 + $0x4] sm:$0xf] %v2702_v39  ;;  %v2706_v41 = vld [vmem:[%s4047_s23 + $0xc] sm:$0xf]  ;;  %s2828_s4 = sadd.s32 1, %s4051_s22 }
 0x2c3   : >> { %2705 = vst [vmem:[%s4043_s18 + $0x8] sm:$0xf] %v2704_v40  ;;  %v2708_v42 = vld [vmem:[%s4047_s23 + $0x10] sm:$0xf]  ;;  %v2710_v43 = vld [vmem:[%s4047_s23 + $0x14] sm:$0xf]  ;;  %p2829_p2 = scmp.ge.s32.totalorder %s2828_s4, %s4845_s7 }
 0x2c4   : >> { %2707 = vst [vmem:[%s4043_s18 + $0xc] sm:$0xf] %v2706_v41  ;;  %2709 = vst [vmem:[%s4043_s18 + $0x10] sm:$0xf] %v2708_v42  ;;  %v2712_v44 = vld [vmem:[%s4047_s23 + $0x18] sm:$0xf] }
 0x2c5   : >> { %2711 = vst [vmem:[%s4043_s18 + $0x14] sm:$0xf] %v2710_v43  ;;  %v2714_v45 = vld [vmem:[%s4047_s23 + $0x1c] sm:$0xf]  ;;  %v2716_v46 = vld [vmem:[%s4047_s23 + $0x20] sm:$0xf] }
 0x2c6   : >> { %2713 = vst [vmem:[%s4043_s18 + $0x18] sm:$0xf] %v2712_v44  ;;  %2715 = vst [vmem:[%s4043_s18 + $0x1c] sm:$0xf] %v2714_v45  ;;  %v2718_v47 = vld [vmem:[%s4047_s23 + $0x24] sm:$0xf] }
 0x2c7   : >> { %2717 = vst [vmem:[%s4043_s18 + $0x20] sm:$0xf] %v2716_v46  ;;  %v2720_v48 = vld [vmem:[%s4047_s23 + $0x28] sm:$0xf]  ;;  %v2722_v49 = vld [vmem:[%s4047_s23 + $0x2c] sm:$0xf] }
 0x2c8   : >> { %2719 = vst [vmem:[%s4043_s18 + $0x24] sm:$0xf] %v2718_v47  ;;  %2721 = vst [vmem:[%s4043_s18 + $0x28] sm:$0xf] %v2720_v48  ;;  %v2724_v50 = vld [vmem:[%s4047_s23 + $0x30] sm:$0xf] }
 0x2c9   : >> { %2723 = vst [vmem:[%s4043_s18 + $0x2c] sm:$0xf] %v2722_v49  ;;  %v2726_v51 = vld [vmem:[%s4047_s23 + $0x34] sm:$0xf]  ;;  %v2728_v52 = vld [vmem:[%s4047_s23 + $0x38] sm:$0xf] }
 0x2ca   : >> { %2725 = vst [vmem:[%s4043_s18 + $0x30] sm:$0xf] %v2724_v50  ;;  %2727 = vst [vmem:[%s4043_s18 + $0x34] sm:$0xf] %v2726_v51  ;;  %v2730_v53 = vld [vmem:[%s4047_s23 + $0x3c] sm:$0xf] }
 0x2cb   : >> { %2729 = vst [vmem:[%s4043_s18 + $0x38] sm:$0xf] %v2728_v52  ;;  %v2732_v54 = vld [vmem:[%s4047_s23 + $0x40] sm:$0xf]  ;;  %v2734_v55 = vld [vmem:[%s4047_s23 + $0x44] sm:$0xf] }
 0x2cc   : >> { %2731 = vst [vmem:[%s4043_s18 + $0x3c] sm:$0xf] %v2730_v53  ;;  %2733 = vst [vmem:[%s4043_s18 + $0x40] sm:$0xf] %v2732_v54  ;;  %v2736_v56 = vld [vmem:[%s4047_s23 + $0x48] sm:$0xf] }
 0x2cd   : >> { %2735 = vst [vmem:[%s4043_s18 + $0x44] sm:$0xf] %v2734_v55  ;;  %v2738_v57 = vld [vmem:[%s4047_s23 + $0x4c] sm:$0xf]  ;;  %v2740_v58 = vld [vmem:[%s4047_s23 + $0x50] sm:$0xf] }
 0x2ce   : >> { %2737 = vst [vmem:[%s4043_s18 + $0x48] sm:$0xf] %v2736_v56  ;;  %2739 = vst [vmem:[%s4043_s18 + $0x4c] sm:$0xf] %v2738_v57  ;;  %v2742_v59 = vld [vmem:[%s4047_s23 + $0x54] sm:$0xf] }
 0x2cf   : >> { %2741 = vst [vmem:[%s4043_s18 + $0x50] sm:$0xf] %v2740_v58  ;;  %v2744_v60 = vld [vmem:[%s4047_s23 + $0x58] sm:$0xf]  ;;  %v2746_v61 = vld [vmem:[%s4047_s23 + $0x5c] sm:$0xf] }
 0x2d0   : >> { %2743 = vst [vmem:[%s4043_s18 + $0x54] sm:$0xf] %v2742_v59  ;;  %2745 = vst [vmem:[%s4043_s18 + $0x58] sm:$0xf] %v2744_v60  ;;  %v2748_v62 = vld [vmem:[%s4047_s23 + $0x60] sm:$0xf] }
 0x2d1   : >> { %2747 = vst [vmem:[%s4043_s18 + $0x5c] sm:$0xf] %v2746_v61  ;;  %v2750_v63 = vld [vmem:[%s4047_s23 + $0x64] sm:$0xf]  ;;  %v2752_v0 = vld [vmem:[%s4047_s23 + $0x68] sm:$0xf] }
 0x2d2   : >> { %2749 = vst [vmem:[%s4043_s18 + $0x60] sm:$0xf] %v2748_v62  ;;  %2751 = vst [vmem:[%s4043_s18 + $0x64] sm:$0xf] %v2750_v63  ;;  %v2754_v1 = vld [vmem:[%s4047_s23 + $0x6c] sm:$0xf] }
 0x2d3   : >> { %2753 = vst [vmem:[%s4043_s18 + $0x68] sm:$0xf] %v2752_v0  ;;  %v2756_v2 = vld [vmem:[%s4047_s23 + $0x70] sm:$0xf]  ;;  %v2758_v3 = vld [vmem:[%s4047_s23 + $0x74] sm:$0xf] }
 0x2d4   : >> { %2755 = vst [vmem:[%s4043_s18 + $0x6c] sm:$0xf] %v2754_v1  ;;  %2757 = vst [vmem:[%s4043_s18 + $0x70] sm:$0xf] %v2756_v2  ;;  %v2760_v4 = vld [vmem:[%s4047_s23 + $0x78] sm:$0xf] }
 0x2d5   : >> { %2759 = vst [vmem:[%s4043_s18 + $0x74] sm:$0xf] %v2758_v3  ;;  %v2762_v5 = vld [vmem:[%s4047_s23 + $0x7c] sm:$0xf]  ;;  %v2764_v6 = vld [vmem:[%s4047_s23 + $0x80] sm:$0xf] }
 0x2d6   : >> { %2761 = vst [vmem:[%s4043_s18 + $0x78] sm:$0xf] %v2760_v4  ;;  %2763 = vst [vmem:[%s4043_s18 + $0x7c] sm:$0xf] %v2762_v5  ;;  %v2766_v7 = vld [vmem:[%s4047_s23 + $0x84] sm:$0xf] }
 0x2d7   : >> { %2765 = vst [vmem:[%s4043_s18 + $0x80] sm:$0xf] %v2764_v6  ;;  %v2768_v8 = vld [vmem:[%s4047_s23 + $0x88] sm:$0xf]  ;;  %v2770_v9 = vld [vmem:[%s4047_s23 + $0x8c] sm:$0xf] }
 0x2d8   : >> { %2767 = vst [vmem:[%s4043_s18 + $0x84] sm:$0xf] %v2766_v7  ;;  %2769 = vst [vmem:[%s4043_s18 + $0x88] sm:$0xf] %v2768_v8  ;;  %v2772_v10 = vld [vmem:[%s4047_s23 + $0x90] sm:$0xf] }
 0x2d9   : >> { %2771 = vst [vmem:[%s4043_s18 + $0x8c] sm:$0xf] %v2770_v9  ;;  %v2774_v11 = vld [vmem:[%s4047_s23 + $0x94] sm:$0xf]  ;;  %v2776_v12 = vld [vmem:[%s4047_s23 + $0x98] sm:$0xf] }
 0x2da   : >> { %2773 = vst [vmem:[%s4043_s18 + $0x90] sm:$0xf] %v2772_v10  ;;  %2775 = vst [vmem:[%s4043_s18 + $0x94] sm:$0xf] %v2774_v11  ;;  %v2778_v13 = vld [vmem:[%s4047_s23 + $0x9c] sm:$0xf] }
 0x2db   : >> { %2777 = vst [vmem:[%s4043_s18 + $0x98] sm:$0xf] %v2776_v12  ;;  %v2780_v14 = vld [vmem:[%s4047_s23 + $0xa0] sm:$0xf]  ;;  %v2782_v15 = vld [vmem:[%s4047_s23 + $0xa4] sm:$0xf] }
 0x2dc   : >> { %2779 = vst [vmem:[%s4043_s18 + $0x9c] sm:$0xf] %v2778_v13  ;;  %2781 = vst [vmem:[%s4043_s18 + $0xa0] sm:$0xf] %v2780_v14  ;;  %v2784_v16 = vld [vmem:[%s4047_s23 + $0xa8] sm:$0xf] }
 0x2dd   : >> { %2783 = vst [vmem:[%s4043_s18 + $0xa4] sm:$0xf] %v2782_v15  ;;  %v2786_v17 = vld [vmem:[%s4047_s23 + $0xac] sm:$0xf]  ;;  %v2788_v18 = vld [vmem:[%s4047_s23 + $0xb0] sm:$0xf] }
 0x2de   : >> { %2785 = vst [vmem:[%s4043_s18 + $0xa8] sm:$0xf] %v2784_v16  ;;  %2787 = vst [vmem:[%s4043_s18 + $0xac] sm:$0xf] %v2786_v17  ;;  %v2790_v19 = vld [vmem:[%s4047_s23 + $0xb4] sm:$0xf] }
 0x2df   : >> { %2789 = vst [vmem:[%s4043_s18 + $0xb0] sm:$0xf] %v2788_v18  ;;  %v2792_v20 = vld [vmem:[%s4047_s23 + $0xb8] sm:$0xf]  ;;  %v2794_v21 = vld [vmem:[%s4047_s23 + $0xbc] sm:$0xf] }
 0x2e0   : >> { %2791 = vst [vmem:[%s4043_s18 + $0xb4] sm:$0xf] %v2790_v19  ;;  %2793 = vst [vmem:[%s4043_s18 + $0xb8] sm:$0xf] %v2792_v20  ;;  %v2796_v22 = vld [vmem:[%s4047_s23 + $0xc0] sm:$0xf] }
 0x2e1   : >> { %2795 = vst [vmem:[%s4043_s18 + $0xbc] sm:$0xf] %v2794_v21  ;;  %v2798_v23 = vld [vmem:[%s4047_s23 + $0xc4] sm:$0xf]  ;;  %v2800_v24 = vld [vmem:[%s4047_s23 + $0xc8] sm:$0xf] }
 0x2e2   : >> { %2797 = vst [vmem:[%s4043_s18 + $0xc0] sm:$0xf] %v2796_v22  ;;  %2799 = vst [vmem:[%s4043_s18 + $0xc4] sm:$0xf] %v2798_v23  ;;  %v2802_v25 = vld [vmem:[%s4047_s23 + $0xcc] sm:$0xf] }
 0x2e3   : >> { %2801 = vst [vmem:[%s4043_s18 + $0xc8] sm:$0xf] %v2800_v24  ;;  %v2804_v26 = vld [vmem:[%s4047_s23 + $0xd0] sm:$0xf]  ;;  %v2806_v27 = vld [vmem:[%s4047_s23 + $0xd4] sm:$0xf] }
 0x2e4   : >> { %2803 = vst [vmem:[%s4043_s18 + $0xcc] sm:$0xf] %v2802_v25  ;;  %2805 = vst [vmem:[%s4043_s18 + $0xd0] sm:$0xf] %v2804_v26  ;;  %v2808_v28 = vld [vmem:[%s4047_s23 + $0xd8] sm:$0xf] }
 0x2e5   : >> { %2807 = vst [vmem:[%s4043_s18 + $0xd4] sm:$0xf] %v2806_v27  ;;  %v2810_v29 = vld [vmem:[%s4047_s23 + $0xdc] sm:$0xf]  ;;  %v2812_v30 = vld [vmem:[%s4047_s23 + $0xe0] sm:$0xf] }
 0x2e6   : >> { %2809 = vst [vmem:[%s4043_s18 + $0xd8] sm:$0xf] %v2808_v28  ;;  %2811 = vst [vmem:[%s4043_s18 + $0xdc] sm:$0xf] %v2810_v29  ;;  %v2814_v31 = vld [vmem:[%s4047_s23 + $0xe4] sm:$0xf] }
 0x2e7   : >> { %2813 = vst [vmem:[%s4043_s18 + $0xe0] sm:$0xf] %v2812_v30  ;;  %v2816_v32 = vld [vmem:[%s4047_s23 + $0xe8] sm:$0xf]  ;;  %v2818_v33 = vld [vmem:[%s4047_s23 + $0xec] sm:$0xf] }
 0x2e8   : >> { %2815 = vst [vmem:[%s4043_s18 + $0xe4] sm:$0xf] %v2814_v31  ;;  %2817 = vst [vmem:[%s4043_s18 + $0xe8] sm:$0xf] %v2816_v32  ;;  %v2820_v34 = vld [vmem:[%s4047_s23 + $0xf0] sm:$0xf] }
 0x2e9   : >> { %2819 = vst [vmem:[%s4043_s18 + $0xec] sm:$0xf] %v2818_v33  ;;  %v2822_v36 = vld [vmem:[%s4047_s23 + $0xf4] sm:$0xf]  ;;  %v2824_v37 = vld [vmem:[%s4047_s23 + $0xf8] sm:$0xf] }
 0x2ea   : >> { %2821 = vst [vmem:[%s4043_s18 + $0xf0] sm:$0xf] %v2820_v34  ;;  %2823 = vst [vmem:[%s4043_s18 + $0xf4] sm:$0xf] %v2822_v36  ;;  %v2826_v35 = vld [vmem:[%s4047_s23 + $0xfc] sm:$0xf] }
 0x2eb   : >> { %2825 = vst [vmem:[%s4043_s18 + $0xf8] sm:$0xf] %v2824_v37  ;;  %2827 = vst [vmem:[%s4043_s18 + $0xfc] sm:$0xf] %v2826_v35  ;;  %s5089_s4 = smov (%p2829_p2, %s2828_s4), 0  ;;  %s2694_s26 = sadd.s32 1, %s4055_s26  }
 0x2ec   : >> { %s3444_s30 = sshll.u32 %s5089_s4, 8  ;;  %p2693_p3 = scmp.ge.s32.totalorder %s2694_s26, %s4845_s7 }
 0x2ed   : >> { %s2833_s23 = scalar_lea.vmem %s4247_s8, %s3444_s30 [#allocation5]   ;;  %s2834_s18 = scalar_lea.vmem %s4839_s27, %s3444_s30  }
 0x2ee   : >> { %s5064_s22 = smov %s5089_s4  ;;  %2696 = sbr.rel (!%p2693_p3) target bundleno = 705 (0x2c1), region = 142 }
 0x2f5 PF: > { %s5013_s9 = sand.u32 63, %s5087_s11   ;;  %s3521_s14 = sshll.u32 %s4845_s7, 8 }
 0x2f6   : > { %s2839_s12 = scalar_lea.vmem %s4247_s8, %s3521_s14 [#allocation5]   ;;  %s2841_s28 = scalar_lea.vmem %s4839_s27, %s3521_s14  }
 0x2f7   : > { %p3449_p5 = scmp.le.s32.totalorder %s5013_s9, 0 }
 0x2f8   : > { %s4057_s17 = smov (!%p3449_p5), %s2841_s28   ;;  %s4061_s10 = smov (!%p3449_p5), %s2839_s12  }
 0x2f9   : > { %3128 = sbr.rel (%p3449_p5) target bundleno = 778 (0x30a), region = 147  ;;  %s4065_s25 = smov (!%p3449_p5), 0  }
 0x2fa   : > { %s4069_s29 = smov (!%p3449_p5), 0  }
 0x300 LB: >> { %v2851_v38 = vld [vmem:[%s4063_s10] sm:$0xf]  ;;  %s2853_s11 = sadd.s32 1, %s4067_s25  ;;  %s2845_s29 = sadd.s32 1, %s4071_s29   ;;  %s4071_s29 = sphi %s4069_s29, %s2845_s29   ;;  %s4067_s25 = sphi %s4065_s25, %s4066_s25   ;;  %s4063_s10 = sphi %s4061_s10, %s2858_s10   ;;  %s4059_s17 = sphi %s4057_s17, %s2859_s17  }
 0x301   : >> { %2852 = vst [vmem:[%s4059_s17] sm:$0xf] %v2851_v38  ;;  %p2854_p6 = scmp.ge.s32.totalorder %s2853_s11, %s5013_s9  ;;  %p2844_p8 = scmp.ge.s32.totalorder %s2845_s29, %s5013_s9 }
 0x303   : >> { %s5091_s11 = smov (%p2854_p6, %s2853_s11), 0  ;;  %2847 = sbr.rel (!%p2844_p8) target bundleno = 768 (0x300), region = 153 }
 0x304   : >> { %s3450_s8 = sshll.u32 %s5091_s11, 2  ;;  %s4066_s25 = smov %s5091_s11  }
 0x305   : >> { %s2858_s10 = scalar_lea.vmem %s2839_s12, %s3450_s8 [#allocation5]   ;;  %s2859_s17 = scalar_lea.vmem %s2841_s28, %s3450_s8  }
 0x30a PF: > { %s16_s21 = sadd.s32 1, %s4039_s21   ;;  %s5065_s27 = sld [smem:[#allocation7_spill]] }
 0x30b   : > { %p13_p4 = scmp.ge.s32.totalorder %s16_s21, 66   ;;  %s5066_s24 = sld [smem:[#allocation8_spill]] }
 0x30c   : > { %s5067_s12 = smov %s4007_s13  ;;  %s5068_s13 = smov %s4176_s5 }
 0x30d   : > { %s5069_s14 = smov %s4015_s15  ;;  %s5070_s15 = smov %s4019_s16 }
 0x30e   : > { %s5071_s16 = smov %s4179_s6  ;;  %s5072_s17 = smov %s4031_s19 }
 0x30f   : > { %s5073_s18 = smov %s4035_s20  ;;  %15 = sbr.rel (!%p13_p4) target bundleno = 6 (0x6), region = 164 }
 0x310   : > { %s5074_s19 = smov %s5065_s27 }
 0x311   : > { %s5075_s20 = smov %s5066_s24 }
 0x316   :  { %3046 = vsyncpa [#allocation4], 1 }
 0x317   :  { %3048 = vsyncpa [#allocation4 + $0x1], 1 }

// kernel: net_forward.8
= control target key start
LH: loop header
LB: loop body
LE: loop exit
PB: predicated region body
PF: predicated region fallthrough
CT: control target
= control target key end

     0   :  { %s5412_s0 = inlined_call_operand.vmem [shape: bf16[1800,1024], index: 0, kind: input, shape index: {}]   ;;  %s5413_s1 = inlined_call_operand.vmem [shape: bf16[1024,32], index: 1, kind: input, shape index: {}]   ;;  %s5414_s2 = inlined_call_operand.vmem [shape: f32[1,32], index: 2, kind: input, shape index: {}]   ;;  %s5415_s3 = inlined_call_operand.vmem [shape: bf16[1800,32], index: 3, kind: output, shape index: {}]  }
   0x1   :  { %5418 = sst [smem:[#allocation7_spill]] %s5412_s0 }
   0x2   :  { %s4311_s12 = smov 0   ;;  %s4313_s13 = smov 0  }
   0x3   :  { %s4315_s14 = smov 0   ;;  %s4317_s15 = smov 0  }
   0x4   :  { %s4319_s16 = smov 0   ;;  %s4321_s17 = smov 0  }
   0x5   :  { %s4323_s18 = smov 0   ;;  %s4325_s19 = smov 0  }
   0x6   :  { %s4327_s20 = smov 0  }
   0x7 LB: > { %s25_s21 = sadd.s32 1, %s4215_s18  ;;  %s32_s22 = sadd.s32 1, %s4219_s19  ;;  %s4223_s20 = sphi %s4327_s20, %s13_s20   ;;  %s4219_s19 = sphi %s4325_s19, %s5441_s19   ;;  %s4215_s18 = sphi %s4323_s18, %s5440_s18   ;;  %s4211_s17 = sphi %s4321_s17, %s5439_s17   ;;  %s4207_s16 = sphi %s4319_s16, %s5438_s16   ;;  %s4203_s15 = sphi %s4317_s15, %s5437_s15   ;;  %s4199_s14 = sphi %s4315_s14, %s5436_s14   ;;  %s4195_s13 = sphi %s4313_s13, %s5435_s13   ;;  %s4191_s12 = sphi %s4311_s12, %s5434_s12  }
   0x8   : > { %p26_p0 = scmp.ge.s32.totalorder %s25_s21, 2  ;;  %p48_p1 = scmp.ne.s32.totalorder %s4203_s15, %s4199_s14 }
   0x9   : > { %s3319_s23 = sadd.s32 4294967295, %s4223_s20   ;;  %p49_p2 = scmp.eq.s32.totalorder %s4223_s20, 0 }
   0xa   : > { %s5443_s21 = smov (%p26_p0, %s25_s21), 0  ;;  %s5445_s22 = smov (!%p26_p0, %s32_s22), %s4219_s19 }
   0xb   : > { %5419 = sst [smem:[#allocation5_spill]] %s5443_s21  ;;  %p34_p3 = scmp.ge.s32.totalorder %s5445_s22, 4 }
   0xc   : > { %s37_s24 = ssub.s32 %s4215_s18, %s5443_s21  ;;  %p4367_p4 = por %p49_p2, %p48_p1 }
   0xd   : > { %p133_p5 = scmp.ne.s32.totalorder %s4195_s13, %s4191_s12  ;;  %s5447_s22 = smov (%p34_p3, %s5445_s22), 0 }
   0xe   : > { %5421 = sst [smem:[#allocation6_spill]] %s5447_s22  ;;  %s41_s26 = sadd.s32 1, %s4203_s15 }
   0xf   : > { %p134_p6 = scmp.eq.s32.totalorder %s3319_s23, 7  ;;  %s36_s27 = ssub.s32 %s4219_s19, %s5447_s22 }
  0x10   : > { %s123_s28 = sadd.s32 1, %s4195_s13  ;;  %s38_s29 = sor.u32 %s37_s24, %s36_s27 }
  0x11   : > { %p121_p7 = scmp.eq.s32.totalorder %s36_s27, 0  ;;  %p39_p8 = scmp.eq.s32.totalorder %s38_s29, 0 }
  0x12   : > { %p4379_p9 = por %p134_p6, %p133_p5  ;;  %p3323_p10 = scmp.ge.s32.totalorder %s4223_s20, 8 }
  0x13   : > { %s4384_s4 = scalar_select %p121_p7, %s4195_s13, %s123_s28  }
  0x14   : > { %s4387_s5 = scalar_select %p39_p8, %s4203_s15, %s41_s26  }
  0x15   : > { %162 = sbr.rel (%p3323_p10) target bundleno = 96 (0x60), region = 20 }
  0x1c   : > { %165 = sbr.rel (!%p4367_p4) target bundleno = 96 (0x60), region = 24  ;;  %s167_s6 = sand.u32 (%p4367_p4), 1, %s4203_s15  }
  0x1d   : > { %s3325_s7 = sshll.u32 (%p4367_p4), %s4219_s19, 6  ;;  %s3324_s8 = sshll.u32 (%p4367_p4), %s167_s6, 10 }
  0x1e   : > { %s3326_s9 = sshll.u32 (%p4367_p4), %s4215_s18, 2  ;;  %s172_s10 = ssub.s32 (%p4367_p4), 225, %s3325_s7 }
  0x1f   : > { %p173_p11 = scmp.lt.s32.totalorder (%p4367_p4), %s172_s10, 64  ;;  %s3592_s11 = sshll.u32 (%p4367_p4), %s4219_s19, 9 }
  0x20   : > { %s179_s23 = sadd.s32 (%p4367_p4), %s3592_s11, %s3326_s9  ;;  %s5423_s0 = sld [smem:[#allocation7_spill]] (%p4367_p4) }
  0x21   : > { %s3331_s24 = sshll.u32 (%p4367_p4), %s179_s23, 2  ;;  %s4404_s29 = scalar_lea.vmem (%p4367_p4), [#allocation3], %s3324_s8  }
  0x23   : > { %s5449_s10 = smov (!%p173_p11, %s172_s10), 64 }
  0x24   : > { %s3591_s26 = sshll.u32 %s5449_s10, 8 }
  0x25   : > { %p3332_p12 = scmp.eq.s32.totalorder %s3591_s26, 0 }
  0x26   : > { %s4402_s28 = scalar_lea.vmem %s5423_s0, %s3331_s24   ;;  %s4407_s6 = sshrl.u32 (!%p3332_p12), %s5449_s10, 5 }
  0x27   : > { %184 = sbr.rel (%p3332_p12) target bundleno = 96 (0x60), region = 28  ;;  %s5424_s7 = smov (!%p3332_p12), %s4404_s29 }
  0x28   : > { %s5425_s9 = smov (!%p3332_p12), %s4402_s28  ;;  %s4415_s11 = smov (!%p3332_p12), 0  }
  0x29   : > { %s4417_s23 = smov (!%p3332_p12), 0  }
  0x2e LB: >> { %v197_v0 = vld [vmem:[%s4231_s9] sm:$0xff]  ;;  %s325_s8 = sadd.s32 1, %s4235_s11  ;;  %v261_v32 = vld [vmem:[%s4231_s9 + $0x8] sm:$0xff]  ;;  %s191_s23 = sadd.s32 1, %s4239_s23   ;;  %s4239_s23 = sphi %s4417_s23, %s191_s23   ;;  %s4235_s11 = sphi %s4415_s11, %s5428_s11   ;;  %s4231_s9 = sphi %s5425_s9, %s5427_s9   ;;  %s4227_s7 = sphi %s5424_s7, %s5426_s7  }
  0x2f   : >> { %v199_v1 = vld [vmem:[%s4231_s9 + $0x20] sm:$0xff]  ;;  %198 = vst [vmem:[%s4227_s7] sm:$0xff] %v197_v0  ;;  %p326_p13 = scmp.ge.s32.totalorder %s325_s8, %s4407_s6  ;;  %262 = vst [vmem:[%s4227_s7 + $0x8] sm:$0xff] %v261_v32  ;;  %v263_v33 = vld [vmem:[%s4231_s9 + $0x28] sm:$0xff]  ;;  %p190_p0 = scmp.ge.s32.totalorder %s191_s23, %s4407_s6 }
  0x30   : >> { %v201_v2 = vld [vmem:[%s4231_s9 + $0x40] sm:$0xff]  ;;  %200 = vst [vmem:[%s4227_s7 + $0x10] sm:$0xff] %v199_v1  ;;  %v265_v34 = vld [vmem:[%s4231_s9 + $0x48] sm:$0xff]  ;;  %264 = vst [vmem:[%s4227_s7 + $0x18] sm:$0xff] %v263_v33  ;;  %s3594_s22 = sshll.u32 (%p190_p0), %s4407_s6, 9 }
  0x31   : >> { %202 = vst [vmem:[%s4227_s7 + $0x20] sm:$0xff] %v201_v2  ;;  %v203_v3 = vld [vmem:[%s4231_s9 + $0x60] sm:$0xff]  ;;  %s5451_s8 = smov (%p326_p13, %s325_s8), 0  ;;  %v267_v35 = vld [vmem:[%s4231_s9 + $0x68] sm:$0xff]  ;;  %266 = vst [vmem:[%s4227_s7 + $0x28] sm:$0xff] %v265_v34  ;;  %s4590_s21 = scalar_lea.vmem (%p190_p0), %s4404_s29, %s3594_s22 [#allocation3]  }
  0x32   : >> { %v205_v4 = vld [vmem:[%s4231_s9 + $0x80] sm:$0xff]  ;;  %204 = vst [vmem:[%s4227_s7 + $0x30] sm:$0xff] %v203_v3  ;;  %s3334_s24 = sshll.u32 %s5451_s8, 10  ;;  %s3335_s26 = sshll.u32 %s5451_s8, 9  ;;  %268 = vst [vmem:[%s4227_s7 + $0x38] sm:$0xff] %v267_v35  ;;  %v269_v36 = vld [vmem:[%s4231_s9 + $0x88] sm:$0xff] }
  0x33   : >> { %v207_v5 = vld [vmem:[%s4231_s9 + $0xa0] sm:$0xff]  ;;  %206 = vst [vmem:[%s4227_s7 + $0x40] sm:$0xff] %v205_v4  ;;  %s4474_s27 = scalar_lea.vmem %s4402_s28, %s3334_s24   ;;  %s4477_s25 = scalar_lea.vmem %s4404_s29, %s3335_s26 [#allocation3]   ;;  %v271_v37 = vld [vmem:[%s4231_s9 + $0xa8] sm:$0xff]  ;;  %270 = vst [vmem:[%s4227_s7 + $0x48] sm:$0xff] %v269_v36 }
  0x34   : >> { %208 = vst [vmem:[%s4227_s7 + $0x50] sm:$0xff] %v207_v5  ;;  %v209_v6 = vld [vmem:[%s4231_s9 + $0xc0] sm:$0xff]  ;;  %v273_v38 = vld [vmem:[%s4231_s9 + $0xc8] sm:$0xff]  ;;  %272 = vst [vmem:[%s4227_s7 + $0x58] sm:$0xff] %v271_v37  ;;  %s5428_s11 = smov %s5451_s8  ;;  %s4582_s24 = sand.u32 (%p190_p0), 31, %s5449_s10  }
  0x35   : >> { %v211_v7 = vld [vmem:[%s4231_s9 + $0xe0] sm:$0xff]  ;;  %210 = vst [vmem:[%s4227_s7 + $0x60] sm:$0xff] %v209_v6  ;;  %274 = vst [vmem:[%s4227_s7 + $0x68] sm:$0xff] %v273_v38  ;;  %v275_v39 = vld [vmem:[%s4231_s9 + $0xe8] sm:$0xff]  ;;  %s3593_s26 = sshll.u32 (%p190_p0), %s4407_s6, 10  ;;  %p3339_p1 = scmp.le.s32.totalorder (%p190_p0), %s4582_s24, 0 }
  0x36   : >> { %v213_v8 = vld [vmem:[%s4231_s9 + $0x100] sm:$0xff]  ;;  %212 = vst [vmem:[%s4227_s7 + $0x70] sm:$0xff] %v211_v7  ;;  %v277_v40 = vld [vmem:[%s4231_s9 + $0x108] sm:$0xff]  ;;  %276 = vst [vmem:[%s4227_s7 + $0x78] sm:$0xff] %v275_v39  ;;  %s4586_s0 = scalar_lea.vmem (%p190_p0), %s4402_s28, %s3593_s26  }
  0x37   : >> { %214 = vst [vmem:[%s4227_s7 + $0x80] sm:$0xff] %v213_v8  ;;  %v215_v9 = vld [vmem:[%s4231_s9 + $0x120] sm:$0xff]  ;;  %v279_v41 = vld [vmem:[%s4231_s9 + $0x128] sm:$0xff]  ;;  %278 = vst [vmem:[%s4227_s7 + $0x88] sm:$0xff] %v277_v40 }
  0x38   : >> { %v217_v10 = vld [vmem:[%s4231_s9 + $0x140] sm:$0xff]  ;;  %216 = vst [vmem:[%s4227_s7 + $0x90] sm:$0xff] %v215_v9  ;;  %280 = vst [vmem:[%s4227_s7 + $0x98] sm:$0xff] %v279_v41  ;;  %v281_v42 = vld [vmem:[%s4231_s9 + $0x148] sm:$0xff] }
  0x39   : >> { %v219_v11 = vld [vmem:[%s4231_s9 + $0x160] sm:$0xff]  ;;  %218 = vst [vmem:[%s4227_s7 + $0xa0] sm:$0xff] %v217_v10  ;;  %v283_v43 = vld [vmem:[%s4231_s9 + $0x168] sm:$0xff]  ;;  %282 = vst [vmem:[%s4227_s7 + $0xa8] sm:$0xff] %v281_v42 }
  0x3a   : >> { %220 = vst [vmem:[%s4227_s7 + $0xb0] sm:$0xff] %v219_v11  ;;  %v221_v12 = vld [vmem:[%s4231_s9 + $0x180] sm:$0xff]  ;;  %v285_v44 = vld [vmem:[%s4231_s9 + $0x188] sm:$0xff]  ;;  %284 = vst [vmem:[%s4227_s7 + $0xb8] sm:$0xff] %v283_v43 }
  0x3b   : >> { %v223_v13 = vld [vmem:[%s4231_s9 + $0x1a0] sm:$0xff]  ;;  %222 = vst [vmem:[%s4227_s7 + $0xc0] sm:$0xff] %v221_v12  ;;  %286 = vst [vmem:[%s4227_s7 + $0xc8] sm:$0xff] %v285_v44  ;;  %v287_v45 = vld [vmem:[%s4231_s9 + $0x1a8] sm:$0xff] }
  0x3c   : >> { %v225_v14 = vld [vmem:[%s4231_s9 + $0x1c0] sm:$0xff]  ;;  %224 = vst [vmem:[%s4227_s7 + $0xd0] sm:$0xff] %v223_v13  ;;  %v289_v46 = vld [vmem:[%s4231_s9 + $0x1c8] sm:$0xff]  ;;  %288 = vst [vmem:[%s4227_s7 + $0xd8] sm:$0xff] %v287_v45 }
  0x3d   : >> { %226 = vst [vmem:[%s4227_s7 + $0xe0] sm:$0xff] %v225_v14  ;;  %v227_v15 = vld [vmem:[%s4231_s9 + $0x1e0] sm:$0xff]  ;;  %v291_v47 = vld [vmem:[%s4231_s9 + $0x1e8] sm:$0xff]  ;;  %290 = vst [vmem:[%s4227_s7 + $0xe8] sm:$0xff] %v289_v46 }
  0x3e   : >> { %v229_v16 = vld [vmem:[%s4231_s9 + $0x200] sm:$0xff]  ;;  %228 = vst [vmem:[%s4227_s7 + $0xf0] sm:$0xff] %v227_v15  ;;  %292 = vst [vmem:[%s4227_s7 + $0xf8] sm:$0xff] %v291_v47  ;;  %v293_v48 = vld [vmem:[%s4231_s9 + $0x208] sm:$0xff] }
  0x3f   : >> { %v231_v17 = vld [vmem:[%s4231_s9 + $0x220] sm:$0xff]  ;;  %230 = vst [vmem:[%s4227_s7 + $0x100] sm:$0xff] %v229_v16  ;;  %v295_v49 = vld [vmem:[%s4231_s9 + $0x228] sm:$0xff]  ;;  %294 = vst [vmem:[%s4227_s7 + $0x108] sm:$0xff] %v293_v48 }
  0x40   : >> { %232 = vst [vmem:[%s4227_s7 + $0x110] sm:$0xff] %v231_v17  ;;  %v233_v18 = vld [vmem:[%s4231_s9 + $0x240] sm:$0xff]  ;;  %v297_v50 = vld [vmem:[%s4231_s9 + $0x248] sm:$0xff]  ;;  %296 = vst [vmem:[%s4227_s7 + $0x118] sm:$0xff] %v295_v49 }
  0x41   : >> { %v235_v19 = vld [vmem:[%s4231_s9 + $0x260] sm:$0xff]  ;;  %234 = vst [vmem:[%s4227_s7 + $0x120] sm:$0xff] %v233_v18  ;;  %298 = vst [vmem:[%s4227_s7 + $0x128] sm:$0xff] %v297_v50  ;;  %v299_v51 = vld [vmem:[%s4231_s9 + $0x268] sm:$0xff] }
  0x42   : >> { %v237_v20 = vld [vmem:[%s4231_s9 + $0x280] sm:$0xff]  ;;  %236 = vst [vmem:[%s4227_s7 + $0x130] sm:$0xff] %v235_v19  ;;  %v301_v52 = vld [vmem:[%s4231_s9 + $0x288] sm:$0xff]  ;;  %300 = vst [vmem:[%s4227_s7 + $0x138] sm:$0xff] %v299_v51 }
  0x43   : >> { %238 = vst [vmem:[%s4227_s7 + $0x140] sm:$0xff] %v237_v20  ;;  %v239_v21 = vld [vmem:[%s4231_s9 + $0x2a0] sm:$0xff]  ;;  %v303_v53 = vld [vmem:[%s4231_s9 + $0x2a8] sm:$0xff]  ;;  %302 = vst [vmem:[%s4227_s7 + $0x148] sm:$0xff] %v301_v52 }
  0x44   : >> { %v241_v22 = vld [vmem:[%s4231_s9 + $0x2c0] sm:$0xff]  ;;  %240 = vst [vmem:[%s4227_s7 + $0x150] sm:$0xff] %v239_v21  ;;  %304 = vst [vmem:[%s4227_s7 + $0x158] sm:$0xff] %v303_v53  ;;  %v305_v54 = vld [vmem:[%s4231_s9 + $0x2c8] sm:$0xff] }
  0x45   : >> { %v243_v23 = vld [vmem:[%s4231_s9 + $0x2e0] sm:$0xff]  ;;  %242 = vst [vmem:[%s4227_s7 + $0x160] sm:$0xff] %v241_v22  ;;  %v307_v55 = vld [vmem:[%s4231_s9 + $0x2e8] sm:$0xff]  ;;  %306 = vst [vmem:[%s4227_s7 + $0x168] sm:$0xff] %v305_v54 }
  0x46   : >> { %244 = vst [vmem:[%s4227_s7 + $0x170] sm:$0xff] %v243_v23  ;;  %v245_v24 = vld [vmem:[%s4231_s9 + $0x300] sm:$0xff]  ;;  %v309_v56 = vld [vmem:[%s4231_s9 + $0x308] sm:$0xff]  ;;  %308 = vst [vmem:[%s4227_s7 + $0x178] sm:$0xff] %v307_v55 }
  0x47   : >> { %v247_v25 = vld [vmem:[%s4231_s9 + $0x320] sm:$0xff]  ;;  %246 = vst [vmem:[%s4227_s7 + $0x180] sm:$0xff] %v245_v24  ;;  %310 = vst [vmem:[%s4227_s7 + $0x188] sm:$0xff] %v309_v56  ;;  %v311_v57 = vld [vmem:[%s4231_s9 + $0x328] sm:$0xff] }
  0x48   : >> { %v249_v26 = vld [vmem:[%s4231_s9 + $0x340] sm:$0xff]  ;;  %248 = vst [vmem:[%s4227_s7 + $0x190] sm:$0xff] %v247_v25  ;;  %v313_v58 = vld [vmem:[%s4231_s9 + $0x348] sm:$0xff]  ;;  %312 = vst [vmem:[%s4227_s7 + $0x198] sm:$0xff] %v311_v57  ;;  %193 = sbr.rel (!%p190_p0) target bundleno = 46 (0x2e), region = 169 }
  0x49   : >> { %250 = vst [vmem:[%s4227_s7 + $0x1a0] sm:$0xff] %v249_v26  ;;  %v251_v27 = vld [vmem:[%s4231_s9 + $0x360] sm:$0xff]  ;;  %v315_v59 = vld [vmem:[%s4231_s9 + $0x368] sm:$0xff]  ;;  %314 = vst [vmem:[%s4227_s7 + $0x1a8] sm:$0xff] %v313_v58 }
  0x4a   : >> { %v253_v28 = vld [vmem:[%s4231_s9 + $0x380] sm:$0xff]  ;;  %252 = vst [vmem:[%s4227_s7 + $0x1b0] sm:$0xff] %v251_v27  ;;  %316 = vst [vmem:[%s4227_s7 + $0x1b8] sm:$0xff] %v315_v59  ;;  %v317_v60 = vld [vmem:[%s4231_s9 + $0x388] sm:$0xff] }
  0x4b   : >> { %v255_v29 = vld [vmem:[%s4231_s9 + $0x3a0] sm:$0xff]  ;;  %254 = vst [vmem:[%s4227_s7 + $0x1c0] sm:$0xff] %v253_v28  ;;  %v319_v61 = vld [vmem:[%s4231_s9 + $0x3a8] sm:$0xff]  ;;  %318 = vst [vmem:[%s4227_s7 + $0x1c8] sm:$0xff] %v317_v60 }
  0x4c   : >> { %256 = vst [vmem:[%s4227_s7 + $0x1d0] sm:$0xff] %v255_v29  ;;  %v257_v30 = vld [vmem:[%s4231_s9 + $0x3c0] sm:$0xff]  ;;  %v321_v62 = vld [vmem:[%s4231_s9 + $0x3c8] sm:$0xff]  ;;  %320 = vst [vmem:[%s4227_s7 + $0x1d8] sm:$0xff] %v319_v61 }
  0x4d   : >> { %v259_v31 = vld [vmem:[%s4231_s9 + $0x3e0] sm:$0xff]  ;;  %258 = vst [vmem:[%s4227_s7 + $0x1e0] sm:$0xff] %v257_v30  ;;  %322 = vst [vmem:[%s4227_s7 + $0x1e8] sm:$0xff] %v321_v62  ;;  %v323_v63 = vld [vmem:[%s4231_s9 + $0x3e8] sm:$0xff]  ;;  %s5427_s9 = smov %s4474_s27 }
  0x4e   : >> { %260 = vst [vmem:[%s4227_s7 + $0x1f0] sm:$0xff] %v259_v31  ;;  %324 = vst [vmem:[%s4227_s7 + $0x1f8] sm:$0xff] %v323_v63  ;;  %s5426_s7 = smov %s4477_s25 }
  0x4f   : > { %3232 = sbr.rel (%p3339_p1) target bundleno = 96 (0x60), region = 174  ;;  %s4241_s23 = smov (!%p3339_p1), %s4590_s21  }
  0x50   : > { %s4245_s8 = smov (!%p3339_p1), %s4586_s0   ;;  %s4249_s7 = smov (!%p3339_p1), 0  }
  0x51   : > { %s4253_s9 = smov (!%p3339_p1), 0  }
  0x56 LB: >> { %v348_v0 = vld [vmem:[%s4247_s8] sm:$0xff]  ;;  %v350_v1 = vld [vmem:[%s4247_s8 + $0x8] sm:$0xff]  ;;  %s352_s22 = sadd.s32 1, %s4251_s7  ;;  %s342_s9 = sadd.s32 1, %s4255_s9   ;;  %s4255_s9 = sphi %s4253_s9, %s342_s9   ;;  %s4251_s7 = sphi %s4249_s7, %s4250_s7   ;;  %s4247_s8 = sphi %s4245_s8, %s357_s8   ;;  %s4243_s23 = sphi %s4241_s23, %s358_s23  }
  0x57   : >> { %349 = vst [vmem:[%s4243_s23] sm:$0xff] %v348_v0  ;;  %351 = vst [vmem:[%s4243_s23 + $0x8] sm:$0xff] %v350_v1  ;;  %p353_p2 = scmp.ge.s32.totalorder %s352_s22, %s4582_s24  ;;  %p341_p3 = scmp.ge.s32.totalorder %s342_s9, %s4582_s24 }
  0x59   : >> { %s5453_s22 = smov (%p353_p2, %s352_s22), 0  ;;  %344 = sbr.rel (!%p341_p3) target bundleno = 86 (0x56), region = 180 }
  0x5a   : >> { %s3340_s10 = sshll.u32 %s5453_s22, 5  ;;  %s3341_s28 = sshll.u32 %s5453_s22, 4 }
  0x5b   : >> { %s357_s8 = scalar_lea.vmem %s4586_s0, %s3340_s10   ;;  %s358_s23 = scalar_lea.vmem %s4590_s21, %s3341_s28 [#allocation3]  }
  0x5c   : >> { %s4250_s7 = smov %s5453_s22  }
  0x60 PF: > { %p3342_p4 = scmp.ge.s32.totalorder %s4223_s20, 1  ;;  %p375_p5 = scmp.lt.s32.totalorder %s4223_s20, 9 }
  0x62   : > { %p376_p6 = pnand %p3342_p4, %p375_p5 }
  0x63   : > { %s382_s29 = sand.u32 (!%p376_p6), 1, %s4199_s14   ;;  %s412_s6 = sand.u32 (!%p376_p6), 1, %s4191_s12  }
  0x64   : > { %379 = sbr.rel (%p376_p6) target bundleno = 796 (0x31c), region = 58  ;;  %s3343_s11 = sshll.u32 (!%p376_p6), %s382_s29, 10 }
  0x65   : > { %s3344_s27 = sshll.u32 (!%p376_p6), %s412_s6, 8  ;;  %s3345_s25 = sshll.u32 (!%p376_p6), %s4207_s16, 6 }
  0x66   : > { %p423_p7 = scmp.lt.s32.totalorder (!%p376_p6), %s3345_s25, 127  ;;  %s4609_s23 = scalar_lea.vmem (!%p376_p6), [#allocation3], %s3343_s11 }
  0x67   : > { %s4611_s8 = scalar_lea.vmem (!%p376_p6), [#allocation4], %s3344_s27   ;;  %p3347_p8 = scmp.ne.s32.totalorder (!%p376_p6), %s4207_s16, 0 }
  0x6b   : > { %s5455_s25 = smov (!%p423_p7, %s3345_s25), 127  ;;  %443 = sbr.rel (%p3347_p8) target bundleno = 141 (0x8d), region = 66 }
  0x6c   : > { %s3346_s0 = sshll.u32 %s5455_s25, 2  ;;  %vm444_vm0 = vcmask (!%p3347_p8), 261120   ;;  %v4289_v2 = vmov (!%p3347_p8), 0.0  }
  0x6d   : > { %s4607_s26 = scalar_lea.vmem %s5413_s1, %s3346_s0  ;;  %445 = vst.msk [vmem:[#allocation2] sm:$0xff] (!%p3347_p8), %vm444_vm0, %v4289_v2  ;;  %446 = vst.msk [vmem:[#allocation2 + $0x8] sm:$0xff] (!%p3347_p8), %vm444_vm0, %v4289_v2 }
  0x6e   : > { %447 = vst.msk [vmem:[#allocation2 + $0x10] sm:$0xff] (!%p3347_p8), %vm444_vm0, %v4289_v2  ;;  %448 = vst.msk [vmem:[#allocation2 + $0x18] sm:$0xff] (!%p3347_p8), %vm444_vm0, %v4289_v2 }
  0x6f   : > { %449 = vst.msk [vmem:[#allocation2 + $0x20] sm:$0xff] (!%p3347_p8), %vm444_vm0, %v4289_v2  ;;  %450 = vst.msk [vmem:[#allocation2 + $0x28] sm:$0xff] (!%p3347_p8), %vm444_vm0, %v4289_v2 }
  0x70   : > { %451 = vst.msk [vmem:[#allocation2 + $0x30] sm:$0xff] (!%p3347_p8), %vm444_vm0, %v4289_v2  ;;  %452 = vst.msk [vmem:[#allocation2 + $0x38] sm:$0xff] (!%p3347_p8), %vm444_vm0, %v4289_v2 }
  0x71   : > { %453 = vst.msk [vmem:[#allocation2 + $0x40] sm:$0xff] (!%p3347_p8), %vm444_vm0, %v4289_v2  ;;  %454 = vst.msk [vmem:[#allocation2 + $0x48] sm:$0xff] (!%p3347_p8), %vm444_vm0, %v4289_v2 }
  0x72   : > { %455 = vst.msk [vmem:[#allocation2 + $0x50] sm:$0xff] %vm444_vm0, %v4289_v2  ;;  %456 = vst.msk [vmem:[#allocation2 + $0x58] sm:$0xff] %vm444_vm0, %v4289_v2 }
  0x73   : > { %457 = vst.msk [vmem:[#allocation2 + $0x60] sm:$0xff] %vm444_vm0, %v4289_v2  ;;  %458 = vst.msk [vmem:[#allocation2 + $0x68] sm:$0xff] %vm444_vm0, %v4289_v2 }
  0x74   : > { %459 = vst.msk [vmem:[#allocation2 + $0x70] sm:$0xff] %vm444_vm0, %v4289_v2  ;;  %460 = vst.msk [vmem:[#allocation2 + $0x78] sm:$0xff] %vm444_vm0, %v4289_v2 }
  0x75   : > { %461 = vst.msk [vmem:[#allocation2 + $0x80] sm:$0xff] %vm444_vm0, %v4289_v2  ;;  %462 = vst.msk [vmem:[#allocation2 + $0x88] sm:$0xff] %vm444_vm0, %v4289_v2 }
  0x76   : > { %463 = vst.msk [vmem:[#allocation2 + $0x90] sm:$0xff] %vm444_vm0, %v4289_v2  ;;  %464 = vst.msk [vmem:[#allocation2 + $0x98] sm:$0xff] %vm444_vm0, %v4289_v2 }
  0x77   : > { %465 = vst.msk [vmem:[#allocation2 + $0xa0] sm:$0xff] %vm444_vm0, %v4289_v2  ;;  %466 = vst.msk [vmem:[#allocation2 + $0xa8] sm:$0xff] %vm444_vm0, %v4289_v2 }
  0x78   : > { %467 = vst.msk [vmem:[#allocation2 + $0xb0] sm:$0xff] %vm444_vm0, %v4289_v2  ;;  %468 = vst.msk [vmem:[#allocation2 + $0xb8] sm:$0xff] %vm444_vm0, %v4289_v2 }
  0x79   : > { %469 = vst.msk [vmem:[#allocation2 + $0xc0] sm:$0xff] %vm444_vm0, %v4289_v2  ;;  %470 = vst.msk [vmem:[#allocation2 + $0xc8] sm:$0xff] %vm444_vm0, %v4289_v2 }
  0x7a   : > { %471 = vst.msk [vmem:[#allocation2 + $0xd0] sm:$0xff] %vm444_vm0, %v4289_v2  ;;  %472 = vst.msk [vmem:[#allocation2 + $0xd8] sm:$0xff] %vm444_vm0, %v4289_v2 }
  0x7b   : > { %473 = vst.msk [vmem:[#allocation2 + $0xe0] sm:$0xff] %vm444_vm0, %v4289_v2  ;;  %474 = vst.msk [vmem:[#allocation2 + $0xe8] sm:$0xff] %vm444_vm0, %v4289_v2 }
  0x7c   : > { %475 = vst.msk [vmem:[#allocation2 + $0xf0] sm:$0xff] %vm444_vm0, %v4289_v2  ;;  %476 = vst.msk [vmem:[#allocation2 + $0xf8] sm:$0xff] %vm444_vm0, %v4289_v2 }
  0x7d   : > { %477 = vst.msk [vmem:[#allocation2 + $0x100] sm:$0xff] %vm444_vm0, %v4289_v2  ;;  %478 = vst.msk [vmem:[#allocation2 + $0x108] sm:$0xff] %vm444_vm0, %v4289_v2 }
  0x7e   : > { %479 = vst.msk [vmem:[#allocation2 + $0x110] sm:$0xff] %vm444_vm0, %v4289_v2  ;;  %480 = vst.msk [vmem:[#allocation2 + $0x118] sm:$0xff] %vm444_vm0, %v4289_v2 }
  0x7f   : > { %481 = vst.msk [vmem:[#allocation2 + $0x120] sm:$0xff] %vm444_vm0, %v4289_v2  ;;  %482 = vst.msk [vmem:[#allocation2 + $0x128] sm:$0xff] %vm444_vm0, %v4289_v2 }
  0x80   : > { %483 = vst.msk [vmem:[#allocation2 + $0x130] sm:$0xff] %vm444_vm0, %v4289_v2  ;;  %484 = vst.msk [vmem:[#allocation2 + $0x138] sm:$0xff] %vm444_vm0, %v4289_v2 }
  0x81   : > { %485 = vst.msk [vmem:[#allocation2 + $0x140] sm:$0xff] %vm444_vm0, %v4289_v2  ;;  %486 = vst.msk [vmem:[#allocation2 + $0x148] sm:$0xff] %vm444_vm0, %v4289_v2 }
  0x82   : > { %487 = vst.msk [vmem:[#allocation2 + $0x150] sm:$0xff] %vm444_vm0, %v4289_v2  ;;  %488 = vst.msk [vmem:[#allocation2 + $0x158] sm:$0xff] %vm444_vm0, %v4289_v2 }
  0x83   : > { %489 = vst.msk [vmem:[#allocation2 + $0x160] sm:$0xff] %vm444_vm0, %v4289_v2  ;;  %490 = vst.msk [vmem:[#allocation2 + $0x168] sm:$0xff] %vm444_vm0, %v4289_v2 }
  0x84   : > { %491 = vst.msk [vmem:[#allocation2 + $0x170] sm:$0xff] %vm444_vm0, %v4289_v2  ;;  %492 = vst.msk [vmem:[#allocation2 + $0x178] sm:$0xff] %vm444_vm0, %v4289_v2 }
  0x85   : > { %493 = vst.msk [vmem:[#allocation2 + $0x180] sm:$0xff] %vm444_vm0, %v4289_v2  ;;  %494 = vst.msk [vmem:[#allocation2 + $0x188] sm:$0xff] %vm444_vm0, %v4289_v2 }
  0x86   : > { %495 = vst.msk [vmem:[#allocation2 + $0x190] sm:$0xff] %vm444_vm0, %v4289_v2  ;;  %496 = vst.msk [vmem:[#allocation2 + $0x198] sm:$0xff] %vm444_vm0, %v4289_v2 }
  0x87   : > { %497 = vst.msk [vmem:[#allocation2 + $0x1a0] sm:$0xff] %vm444_vm0, %v4289_v2  ;;  %498 = vst.msk [vmem:[#allocation2 + $0x1a8] sm:$0xff] %vm444_vm0, %v4289_v2 }
  0x88   : > { %499 = vst.msk [vmem:[#allocation2 + $0x1b0] sm:$0xff] %vm444_vm0, %v4289_v2  ;;  %500 = vst.msk [vmem:[#allocation2 + $0x1b8] sm:$0xff] %vm444_vm0, %v4289_v2 }
  0x89   : > { %501 = vst.msk [vmem:[#allocation2 + $0x1c0] sm:$0xff] %vm444_vm0, %v4289_v2  ;;  %502 = vst.msk [vmem:[#allocation2 + $0x1c8] sm:$0xff] %vm444_vm0, %v4289_v2 }
  0x8a   : > { %503 = vst.msk [vmem:[#allocation2 + $0x1d0] sm:$0xff] %vm444_vm0, %v4289_v2  ;;  %504 = vst.msk [vmem:[#allocation2 + $0x1d8] sm:$0xff] %vm444_vm0, %v4289_v2 }
  0x8b   : > { %505 = vst.msk [vmem:[#allocation2 + $0x1e0] sm:$0xff] %vm444_vm0, %v4289_v2  ;;  %506 = vst.msk [vmem:[#allocation2 + $0x1e8] sm:$0xff] %vm444_vm0, %v4289_v2 }
  0x8c   : > { %507 = vst.msk [vmem:[#allocation2 + $0x1f0] sm:$0xff] %vm444_vm0, %v4289_v2  ;;  %508 = vst.msk [vmem:[#allocation2 + $0x1f8] sm:$0xff] %vm444_vm0, %v4289_v2 }
  0x8d PF: > { %v3864_v3 = vld [vmem:[%s4607_s26] sm:$0xff]   ;;  %v4290_v4 = vmov 0   ;;  %v3866_v6 = vld [vmem:[%s4607_s26 + $0x8] sm:$0xff]   ;;  %v3868_v8 = vld [vmem:[%s4607_s26 + $0x10] sm:$0xff]   ;;  %vm2239_vm1 = vcmask 261120   ;;  %p3508_p10 = scmp.ne.s32.totalorder %s4207_s16, 1 }
  0x8e   : > { %1597 = vmatprep.subr.bf16.mxu0 %v4290_v4  ;;  %1886 = vmatprep.subr.bf16.mxu1 %v4290_v4  ;;  %v3865_v5 = vld [vmem:[%s4607_s26 + $0x80] sm:$0xff]   ;;  %v3867_v7 = vld [vmem:[%s4607_s26 + $0x88] sm:$0xff]   ;;  %v3869_v9 = vld [vmem:[%s4607_s26 + $0x90] sm:$0xff]   ;;  %vm2699_vm2 = vcmask (!%p3508_p10), 257024  }
  0x8f   : > { %1598 = vmatpush1.bf16.msra.mxu0 %v3864_v3  ;;  %1887 = vmatpush1.bf16.msra.mxu1 %v3865_v5  ;;  %v3870_v10 = vld [vmem:[%s4607_s26 + $0x18] sm:$0xff]   ;;  %v3872_v12 = vld [vmem:[%s4607_s26 + $0x20] sm:$0xff]   ;;  %v3874_v14 = vld [vmem:[%s4607_s26 + $0x28] sm:$0xff]  }
  0x90   : > { %1599 = vmatprep.subr.bf16.mxu0 %v4290_v4  ;;  %1888 = vmatprep.subr.bf16.mxu1 %v4290_v4  ;;  %v3871_v11 = vld [vmem:[%s4607_s26 + $0x98] sm:$0xff]   ;;  %v3873_v13 = vld [vmem:[%s4607_s26 + $0xa0] sm:$0xff]   ;;  %v3875_v15 = vld [vmem:[%s4607_s26 + $0xa8] sm:$0xff]  }
  0x91   : > { %v3876_v16 = vld [vmem:[%s4607_s26 + $0x30] sm:$0xff]   ;;  %v3878_v18 = vld [vmem:[%s4607_s26 + $0x38] sm:$0xff]   ;;  %v3880_v20 = vld [vmem:[%s4607_s26 + $0x40] sm:$0xff]  }
  0x92   : > { %v3877_v17 = vld [vmem:[%s4607_s26 + $0xb0] sm:$0xff]   ;;  %v3879_v19 = vld [vmem:[%s4607_s26 + $0xb8] sm:$0xff]   ;;  %v3881_v21 = vld [vmem:[%s4607_s26 + $0xc0] sm:$0xff]  }
  0x93   : > { %1600 = vmatpush1.bf16.msra.mxu0 %v3866_v6  ;;  %1889 = vmatpush1.bf16.msra.mxu1 %v3867_v7  ;;  %v3898_v22 = vld [vmem:[%s4609_s23 + $0x4] ss:$16 sps:$4 sm:$0xff]   ;;  %v3882_v23 = vld [vmem:[%s4607_s26 + $0x48] sm:$0xff]   ;;  %v3886_v28 = vld [vmem:[%s4607_s26 + $0x58] sm:$0xff]  }
  0x94   : > { %1601 = vmatprep.subr.bf16.mxu0 %v4290_v4  ;;  %1890 = vmatprep.subr.bf16.mxu1 %v4290_v4  ;;  %v3901_v24 = vld [vmem:[%s4609_s23 + $0xc] ss:$16 sps:$4 sm:$0xff]   ;;  %v3884_v26 = vld [vmem:[%s4607_s26 + $0x50] sm:$0xff]   ;;  %v3888_v30 = vld [vmem:[%s4607_s26 + $0x60] sm:$0xff]  }
  0x95   : > { %v3883_v25 = vld [vmem:[%s4607_s26 + $0xc8] sm:$0xff]   ;;  %1629 = vmatprep.mubr.bf16.mxu0 %v3898_v22  ;;  %1918 = vmatprep.mubr.bf16.mxu1 %v3901_v24  ;;  %v3885_v27 = vld [vmem:[%s4607_s26 + $0xd0] sm:$0xff]   ;;  %v3887_v29 = vld [vmem:[%s4607_s26 + $0xd8] sm:$0xff]  }
  0x96   : > { %v3889_v31 = vld [vmem:[%s4607_s26 + $0xe0] sm:$0xff]   ;;  %v3890_v32 = vld [vmem:[%s4607_s26 + $0x68] sm:$0xff]   ;;  %v3892_v34 = vld [vmem:[%s4607_s26 + $0x70] sm:$0xff]  }
  0x97   : > { %1602 = vmatpush1.bf16.msra.mxu0 %v3868_v8  ;;  %1891 = vmatpush1.bf16.msra.mxu1 %v3869_v9  ;;  %v3891_v33 = vld [vmem:[%s4607_s26 + $0xe8] sm:$0xff]   ;;  %v3893_v35 = vld [vmem:[%s4607_s26 + $0xf0] sm:$0xff]   ;;  %v3894_v36 = vld [vmem:[%s4607_s26 + $0x78] sm:$0xff]  }
  0x98   : > { %1603 = vmatprep.subr.bf16.mxu0 %v4290_v4  ;;  %1892 = vmatprep.subr.bf16.mxu1 %v4290_v4  ;;  %v3895_v37 = vld [vmem:[%s4607_s26 + $0xf8] sm:$0xff]   ;;  %v3896_v38 = vld [vmem:[%s4609_s23] ss:$16 sps:$4 sm:$0xff]   ;;  %v3902_v40 = vld [vmem:[%s4609_s23 + $0x24] ss:$16 sps:$4 sm:$0xff]  }
  0x99   : > { %v3899_v39 = vld [vmem:[%s4609_s23 + $0x8] ss:$16 sps:$4 sm:$0xff]   ;;  %v3904_v41 = vld [vmem:[%s4609_s23 + $0x2c] ss:$16 sps:$4 sm:$0xff]   ;;  %v3906_v42 = vld [vmem:[%s4609_s23 + $0x20] ss:$16 sps:$4 sm:$0xff]  }
  0x9a   : > { %v3907_v43 = vld [vmem:[%s4609_s23 + $0x28] ss:$16 sps:$4 sm:$0xff]   ;;  %v3908_v44 = vld [vmem:[%s4609_s23 + $0x44] ss:$16 sps:$4 sm:$0xff]   ;;  %v3910_v45 = vld [vmem:[%s4609_s23 + $0x4c] ss:$16 sps:$4 sm:$0xff]  }
  0x9b   : > { %1604 = vmatpush1.bf16.msra.mxu0 %v3870_v10  ;;  %1893 = vmatpush1.bf16.msra.mxu1 %v3871_v11  ;;  %v3912_v46 = vld [vmem:[%s4609_s23 + $0x40] ss:$16 sps:$4 sm:$0xff]   ;;  %v3913_v47 = vld [vmem:[%s4609_s23 + $0x48] ss:$16 sps:$4 sm:$0xff]   ;;  %v3914_v48 = vld [vmem:[%s4609_s23 + $0x64] ss:$16 sps:$4 sm:$0xff]  }
  0x9c   : > { %1605 = vmatprep.subr.bf16.mxu0 %v4290_v4  ;;  %1894 = vmatprep.subr.bf16.mxu1 %v4290_v4  ;;  %v3916_v49 = vld [vmem:[%s4609_s23 + $0x6c] ss:$16 sps:$4 sm:$0xff]   ;;  %v3918_v50 = vld [vmem:[%s4609_s23 + $0x60] ss:$16 sps:$4 sm:$0xff]   ;;  %v3919_v51 = vld [vmem:[%s4609_s23 + $0x68] ss:$16 sps:$4 sm:$0xff]  }
  0x9d   : > { %v3920_v52 = vld [vmem:[%s4609_s23 + $0x84] ss:$16 sps:$4 sm:$0xff]   ;;  %v3922_v53 = vld [vmem:[%s4609_s23 + $0x8c] ss:$16 sps:$4 sm:$0xff]   ;;  %v3924_v54 = vld [vmem:[%s4609_s23 + $0x80] ss:$16 sps:$4 sm:$0xff]  }
  0x9e   : > { %v3925_v55 = vld [vmem:[%s4609_s23 + $0x88] ss:$16 sps:$4 sm:$0xff]   ;;  %v3926_v56 = vld [vmem:[%s4609_s23 + $0xa4] ss:$16 sps:$4 sm:$0xff]   ;;  %v3928_v57 = vld [vmem:[%s4609_s23 + $0xac] ss:$16 sps:$4 sm:$0xff]  }
  0x9f   : > { %1606 = vmatpush1.bf16.msra.mxu0 %v3872_v12  ;;  %1895 = vmatpush1.bf16.msra.mxu1 %v3873_v13  ;;  %v3930_v58 = vld [vmem:[%s4609_s23 + $0xa0] ss:$16 sps:$4 sm:$0xff]   ;;  %v3931_v59 = vld [vmem:[%s4609_s23 + $0xa8] ss:$16 sps:$4 sm:$0xff]   ;;  %v3932_v60 = vld [vmem:[%s4609_s23 + $0xc4] ss:$16 sps:$4 sm:$0xff]  }
  0xa0   : > { %1607 = vmatprep.subr.bf16.mxu0 %v4290_v4  ;;  %1896 = vmatprep.subr.bf16.mxu1 %v4290_v4  ;;  %v3934_v61 = vld [vmem:[%s4609_s23 + $0xcc] ss:$16 sps:$4 sm:$0xff]   ;;  %v3936_v62 = vld [vmem:[%s4609_s23 + $0xc0] ss:$16 sps:$4 sm:$0xff]   ;;  %v3937_v63 = vld [vmem:[%s4609_s23 + $0xc8] ss:$16 sps:$4 sm:$0xff]  }
  0xa1   : > { %v3938_v0 = vld [vmem:[%s4609_s23 + $0xe4] ss:$16 sps:$4 sm:$0xff]   ;;  %v3940_v1 = vld [vmem:[%s4609_s23 + $0xec] ss:$16 sps:$4 sm:$0xff]   ;;  %v3942_v2 = vld [vmem:[%s4609_s23 + $0xe0] ss:$16 sps:$4 sm:$0xff]  }
  0xa2   : > { %v3943_v3 = vld [vmem:[%s4609_s23 + $0xe8] ss:$16 sps:$4 sm:$0xff]   ;;  %v3946_v5 = vld [vmem:[%s4609_s23 + $0x10c] ss:$16 sps:$4 sm:$0xff]   ;;  %v3948_v6 = vld [vmem:[%s4609_s23 + $0x100] ss:$16 sps:$4 sm:$0xff]  }
  0xa3   : > { %1608 = vmatpush1.bf16.msra.mxu0 %v3874_v14  ;;  %1897 = vmatpush1.bf16.msra.mxu1 %v3875_v15  ;;  %v3949_v7 = vld [vmem:[%s4609_s23 + $0x108] ss:$16 sps:$4 sm:$0xff]   ;;  %v3950_v8 = vld [vmem:[%s4609_s23 + $0x124] ss:$16 sps:$4 sm:$0xff]   ;;  %v3952_v9 = vld [vmem:[%s4609_s23 + $0x12c] ss:$16 sps:$4 sm:$0xff]  }
  0xa4   : > { %1609 = vmatprep.subr.bf16.mxu0 %v4290_v4  ;;  %1898 = vmatprep.subr.bf16.mxu1 %v4290_v4  ;;  %v3954_v10 = vld [vmem:[%s4609_s23 + $0x120] ss:$16 sps:$4 sm:$0xff]   ;;  %v3955_v11 = vld [vmem:[%s4609_s23 + $0x128] ss:$16 sps:$4 sm:$0xff]   ;;  %v3956_v12 = vld [vmem:[%s4609_s23 + $0x144] ss:$16 sps:$4 sm:$0xff]  }
  0xa5   : > { %v3958_v13 = vld [vmem:[%s4609_s23 + $0x14c] ss:$16 sps:$4 sm:$0xff]   ;;  %v3960_v14 = vld [vmem:[%s4609_s23 + $0x140] ss:$16 sps:$4 sm:$0xff]   ;;  %v3961_v15 = vld [vmem:[%s4609_s23 + $0x148] ss:$16 sps:$4 sm:$0xff]  }
  0xa6   : > { %v3972_v22 = vld [vmem:[%s4609_s23 + $0x180] ss:$16 sps:$4 sm:$0xff]   ;;  %v3974_v24 = vld [vmem:[%s4609_s23 + $0x1a4] ss:$16 sps:$4 sm:$0xff]  }
  0xa7   : > { %1610 = vmatpush1.bf16.msra.mxu0 %v3876_v16  ;;  %1899 = vmatpush1.bf16.msra.mxu1 %v3877_v17  ;;  %v3962_v16 = vld [vmem:[%s4609_s23 + $0x164] ss:$16 sps:$4 sm:$0xff]   ;;  %v3964_v17 = vld [vmem:[%s4609_s23 + $0x16c] ss:$16 sps:$4 sm:$0xff]  }
  0xa8   : > { %1611 = vmatprep.subr.bf16.mxu0 %v4290_v4  ;;  %1900 = vmatprep.subr.bf16.mxu1 %v4290_v4 }
  0xab   : > { %1612 = vmatpush1.bf16.msra.mxu0 %v3878_v18  ;;  %1901 = vmatpush1.bf16.msra.mxu1 %v3879_v19  ;;  %v3966_v18 = vld [vmem:[%s4609_s23 + $0x160] ss:$16 sps:$4 sm:$0xff]   ;;  %v3967_v19 = vld [vmem:[%s4609_s23 + $0x168] ss:$16 sps:$4 sm:$0xff]  }
  0xac   : > { %1613 = vmatprep.subr.bf16.mxu0 %v4290_v4  ;;  %1902 = vmatprep.subr.bf16.mxu1 %v4290_v4 }
  0xaf   : > { %1614 = vmatpush1.bf16.msra.mxu0 %v3880_v20  ;;  %1903 = vmatpush1.bf16.msra.mxu1 %v3881_v21  ;;  %v3968_v20 = vld [vmem:[%s4609_s23 + $0x184] ss:$16 sps:$4 sm:$0xff]   ;;  %v3970_v21 = vld [vmem:[%s4609_s23 + $0x18c] ss:$16 sps:$4 sm:$0xff]  }
  0xb0   : > { %1615 = vmatprep.subr.bf16.mxu0 %v4290_v4  ;;  %1904 = vmatprep.subr.bf16.mxu1 %v4290_v4 }
  0xb3   : > { %1616 = vmatpush1.bf16.msra.mxu0 %v3882_v23  ;;  %1905 = vmatpush1.bf16.msra.mxu1 %v3883_v25  ;;  %v3973_v23 = vld [vmem:[%s4609_s23 + $0x188] ss:$16 sps:$4 sm:$0xff]   ;;  %v3976_v25 = vld [vmem:[%s4609_s23 + $0x1ac] ss:$16 sps:$4 sm:$0xff]  }
  0xb4   : > { %1617 = vmatprep.subr.bf16.mxu0 %v4290_v4  ;;  %1906 = vmatprep.subr.bf16.mxu1 %v4290_v4 }
  0xb7   : > { %1618 = vmatpush1.bf16.msra.mxu0 %v3884_v26  ;;  %1907 = vmatpush1.bf16.msra.mxu1 %v3885_v27  ;;  %v3978_v26 = vld [vmem:[%s4609_s23 + $0x1a0] ss:$16 sps:$4 sm:$0xff]   ;;  %v3979_v27 = vld [vmem:[%s4609_s23 + $0x1a8] ss:$16 sps:$4 sm:$0xff]  }
  0xb8   : > { %1619 = vmatprep.subr.bf16.mxu0 %v4290_v4  ;;  %1908 = vmatprep.subr.bf16.mxu1 %v4290_v4 }
  0xbb   : > { %1620 = vmatpush1.bf16.msra.mxu0 %v3886_v28  ;;  %1909 = vmatpush1.bf16.msra.mxu1 %v3887_v29  ;;  %v3980_v28 = vld [vmem:[%s4609_s23 + $0x1c4] ss:$16 sps:$4 sm:$0xff]   ;;  %v3982_v29 = vld [vmem:[%s4609_s23 + $0x1cc] ss:$16 sps:$4 sm:$0xff]  }
  0xbc   : > { %1621 = vmatprep.subr.bf16.mxu0 %v4290_v4  ;;  %1910 = vmatprep.subr.bf16.mxu1 %v4290_v4 }
  0xbf   : > { %1622 = vmatpush1.bf16.msra.mxu0 %v3888_v30  ;;  %1911 = vmatpush1.bf16.msra.mxu1 %v3889_v31  ;;  %v3984_v30 = vld [vmem:[%s4609_s23 + $0x1c0] ss:$16 sps:$4 sm:$0xff]   ;;  %v3985_v31 = vld [vmem:[%s4609_s23 + $0x1c8] ss:$16 sps:$4 sm:$0xff]  }
  0xc0   : > { %1623 = vmatprep.subr.bf16.mxu0 %v4290_v4  ;;  %1912 = vmatprep.subr.bf16.mxu1 %v4290_v4 }
  0xc3   : > { %1624 = vmatpush1.bf16.msra.mxu0 %v3890_v32  ;;  %1913 = vmatpush1.bf16.msra.mxu1 %v3891_v33  ;;  %v3986_v32 = vld [vmem:[%s4609_s23 + $0x1e4] ss:$16 sps:$4 sm:$0xff]   ;;  %v3988_v33 = vld [vmem:[%s4609_s23 + $0x1ec] ss:$16 sps:$4 sm:$0xff]  }
  0xc4   : > { %1625 = vmatprep.subr.bf16.mxu0 %v4290_v4  ;;  %1914 = vmatprep.subr.bf16.mxu1 %v4290_v4 }
  0xc7   : > { %1626 = vmatpush1.bf16.msra.mxu0 %v3892_v34  ;;  %1915 = vmatpush1.bf16.msra.mxu1 %v3893_v35  ;;  %v3990_v34 = vld [vmem:[%s4609_s23 + $0x1e0] ss:$16 sps:$4 sm:$0xff]   ;;  %v3991_v35 = vld [vmem:[%s4609_s23 + $0x1e8] ss:$16 sps:$4 sm:$0xff]  }
  0xc8   : > { %1627 = vmatprep.subr.bf16.mxu0 %v4290_v4  ;;  %1916 = vmatprep.subr.bf16.mxu1 %v4290_v4  ;;  %v3944_v4 = vld [vmem:[%s4609_s23 + $0x104] ss:$16 sps:$4 sm:$0xff]  }
  0xcb   : > { %1628 = vmatpush1.bf16.msra.mxu0 %v3894_v36  ;;  %1917 = vmatpush1.bf16.msra.mxu1 %v3895_v37  ;;  %v3992_v36 = vld [vmem:[%s4609_s23 + $0x204] ss:$16 sps:$4 sm:$0xff]   ;;  %v3994_v37 = vld [vmem:[%s4609_s23 + $0x20c] ss:$16 sps:$4 sm:$0xff]  }
  0xce   : > { %1630 = vmatmul.mubr.bf16.vlgmr.msra.gmra.mrb[0].mxu0 %v3896_v38  ;;  %1919 = vmatmul.mubr.bf16.vlgmr.msra.gmra.mrb[0].mxu1 %v3899_v39  ;;  %v3996_v38 = vld [vmem:[%s4609_s23 + $0x200] ss:$16 sps:$4 sm:$0xff]   ;;  %v3997_v39 = vld [vmem:[%s4609_s23 + $0x208] ss:$16 sps:$4 sm:$0xff]  }
  0xcf   : > { %1637 = vmatprep.mubr.bf16.mxu0 %v3902_v40  ;;  %1926 = vmatprep.mubr.bf16.mxu1 %v3904_v41  ;;  %v3998_v40 = vld [vmem:[%s4609_s23 + $0x224] ss:$16 sps:$4 sm:$0xff]   ;;  %v4000_v41 = vld [vmem:[%s4609_s23 + $0x22c] ss:$16 sps:$4 sm:$0xff]  }
  0xd6   : > { %1638 = vmatmul.mubr.bf16.gmra.mrb[4].mxu0 %v3906_v42  ;;  %1927 = vmatmul.mubr.bf16.gmra.mrb[4].mxu1 %v3907_v43  ;;  %v4002_v42 = vld [vmem:[%s4609_s23 + $0x220] ss:$16 sps:$4 sm:$0xff]   ;;  %v4003_v43 = vld [vmem:[%s4609_s23 + $0x228] ss:$16 sps:$4 sm:$0xff]  }
  0xd7   : > { %1645 = vmatprep.mubr.bf16.mxu0 %v3908_v44  ;;  %1934 = vmatprep.mubr.bf16.mxu1 %v3910_v45  ;;  %v4004_v44 = vld [vmem:[%s4609_s23 + $0x244] ss:$16 sps:$4 sm:$0xff]   ;;  %v4006_v45 = vld [vmem:[%s4609_s23 + $0x24c] ss:$16 sps:$4 sm:$0xff]  }
  0xde   : > { %1646 = vmatmul.mubr.bf16.gmra.mrb[8].mxu0 %v3912_v46  ;;  %1935 = vmatmul.mubr.bf16.gmra.mrb[8].mxu1 %v3913_v47  ;;  %v4008_v46 = vld [vmem:[%s4609_s23 + $0x240] ss:$16 sps:$4 sm:$0xff]   ;;  %v4009_v47 = vld [vmem:[%s4609_s23 + $0x248] ss:$16 sps:$4 sm:$0xff]  }
  0xdf   : > { %1653 = vmatprep.mubr.bf16.mxu0 %v3914_v48  ;;  %1942 = vmatprep.mubr.bf16.mxu1 %v3916_v49  ;;  %v4010_v48 = vld [vmem:[%s4609_s23 + $0x264] ss:$16 sps:$4 sm:$0xff]   ;;  %v4012_v49 = vld [vmem:[%s4609_s23 + $0x26c] ss:$16 sps:$4 sm:$0xff]  }
  0xe6   : > { %1654 = vmatmul.mubr.bf16.gmra.mrb[12].mxu0 %v3918_v50  ;;  %1943 = vmatmul.mubr.bf16.gmra.mrb[12].mxu1 %v3919_v51  ;;  %v4014_v50 = vld [vmem:[%s4609_s23 + $0x260] ss:$16 sps:$4 sm:$0xff]   ;;  %v4015_v51 = vld [vmem:[%s4609_s23 + $0x268] ss:$16 sps:$4 sm:$0xff]  }
  0xe7   : > { %1661 = vmatprep.mubr.bf16.mxu0 %v3920_v52  ;;  %1950 = vmatprep.mubr.bf16.mxu1 %v3922_v53  ;;  %v4016_v52 = vld [vmem:[%s4609_s23 + $0x284] ss:$16 sps:$4 sm:$0xff]   ;;  %v4018_v53 = vld [vmem:[%s4609_s23 + $0x28c] ss:$16 sps:$4 sm:$0xff]  }
  0xee   : > { %1662 = vmatmul.mubr.bf16.gmra.mrb[16].mxu0 %v3924_v54  ;;  %1951 = vmatmul.mubr.bf16.gmra.mrb[16].mxu1 %v3925_v55  ;;  %v4020_v54 = vld [vmem:[%s4609_s23 + $0x280] ss:$16 sps:$4 sm:$0xff]   ;;  %v4021_v55 = vld [vmem:[%s4609_s23 + $0x288] ss:$16 sps:$4 sm:$0xff]  }
  0xef   : > { %1669 = vmatprep.mubr.bf16.mxu0 %v3926_v56  ;;  %1958 = vmatprep.mubr.bf16.mxu1 %v3928_v57  ;;  %v4022_v56 = vld [vmem:[%s4609_s23 + $0x2a4] ss:$16 sps:$4 sm:$0xff]   ;;  %v4024_v57 = vld [vmem:[%s4609_s23 + $0x2ac] ss:$16 sps:$4 sm:$0xff]  }
  0xf6   : > { %1670 = vmatmul.mubr.bf16.gmra.mrb[20].mxu0 %v3930_v58  ;;  %1959 = vmatmul.mubr.bf16.gmra.mrb[20].mxu1 %v3931_v59  ;;  %v4026_v58 = vld [vmem:[%s4609_s23 + $0x2a0] ss:$16 sps:$4 sm:$0xff]   ;;  %v4027_v59 = vld [vmem:[%s4609_s23 + $0x2a8] ss:$16 sps:$4 sm:$0xff]  }
  0xf7   : > { %1677 = vmatprep.mubr.bf16.mxu0 %v3932_v60  ;;  %1966 = vmatprep.mubr.bf16.mxu1 %v3934_v61  ;;  %v4028_v60 = vld [vmem:[%s4609_s23 + $0x2c4] ss:$16 sps:$4 sm:$0xff]   ;;  %v4030_v61 = vld [vmem:[%s4609_s23 + $0x2cc] ss:$16 sps:$4 sm:$0xff]  }
  0xfe   : > { %1678 = vmatmul.mubr.bf16.gmra.mrb[24].mxu0 %v3936_v62  ;;  %1967 = vmatmul.mubr.bf16.gmra.mrb[24].mxu1 %v3937_v63  ;;  %v4032_v62 = vld [vmem:[%s4609_s23 + $0x2c0] ss:$16 sps:$4 sm:$0xff]   ;;  %v4033_v63 = vld [vmem:[%s4609_s23 + $0x2c8] ss:$16 sps:$4 sm:$0xff]  }
  0xff   : > { %1685 = vmatprep.mubr.bf16.mxu0 %v3938_v0  ;;  %1974 = vmatprep.mubr.bf16.mxu1 %v3940_v1  ;;  %v4034_v0 = vld [vmem:[%s4609_s23 + $0x2e4] ss:$16 sps:$4 sm:$0xff]   ;;  %v4036_v1 = vld [vmem:[%s4609_s23 + $0x2ec] ss:$16 sps:$4 sm:$0xff]  }
 0x106   : > { %1686 = vmatmul.mubr.bf16.gmra.mrb[28].mxu0 %v3942_v2  ;;  %1975 = vmatmul.mubr.bf16.gmra.mrb[28].mxu1 %v3943_v3  ;;  %v4038_v2 = vld [vmem:[%s4609_s23 + $0x2e0] ss:$16 sps:$4 sm:$0xff]   ;;  %v4039_v3 = vld [vmem:[%s4609_s23 + $0x2e8] ss:$16 sps:$4 sm:$0xff]  }
 0x107   : > { %1693 = vmatprep.mubr.bf16.mxu0 %v3944_v4  ;;  %1982 = vmatprep.mubr.bf16.mxu1 %v3946_v5  ;;  %v4040_v4 = vld [vmem:[%s4609_s23 + $0x304] ss:$16 sps:$4 sm:$0xff]   ;;  %v4042_v5 = vld [vmem:[%s4609_s23 + $0x30c] ss:$16 sps:$4 sm:$0xff]  }
 0x10e   : > { %1694 = vmatmul.mubr.bf16.gmra.mrb[32].mxu0 %v3948_v6  ;;  %1983 = vmatmul.mubr.bf16.gmra.mrb[32].mxu1 %v3949_v7  ;;  %v4044_v6 = vld [vmem:[%s4609_s23 + $0x300] ss:$16 sps:$4 sm:$0xff]   ;;  %v4045_v7 = vld [vmem:[%s4609_s23 + $0x308] ss:$16 sps:$4 sm:$0xff]  }
 0x10f   : > { %1701 = vmatprep.mubr.bf16.mxu0 %v3950_v8  ;;  %1990 = vmatprep.mubr.bf16.mxu1 %v3952_v9  ;;  %v4046_v8 = vld [vmem:[%s4609_s23 + $0x324] ss:$16 sps:$4 sm:$0xff]   ;;  %v4048_v9 = vld [vmem:[%s4609_s23 + $0x32c] ss:$16 sps:$4 sm:$0xff]  }
 0x116   : > { %1702 = vmatmul.mubr.bf16.gmra.mrb[36].mxu0 %v3954_v10  ;;  %1991 = vmatmul.mubr.bf16.gmra.mrb[36].mxu1 %v3955_v11  ;;  %v4050_v10 = vld [vmem:[%s4609_s23 + $0x320] ss:$16 sps:$4 sm:$0xff]   ;;  %v4051_v11 = vld [vmem:[%s4609_s23 + $0x328] ss:$16 sps:$4 sm:$0xff]  }
 0x117   : > { %1709 = vmatprep.mubr.bf16.mxu0 %v3956_v12  ;;  %1998 = vmatprep.mubr.bf16.mxu1 %v3958_v13  ;;  %v4052_v12 = vld [vmem:[%s4609_s23 + $0x344] ss:$16 sps:$4 sm:$0xff]   ;;  %v4054_v13 = vld [vmem:[%s4609_s23 + $0x34c] ss:$16 sps:$4 sm:$0xff]  }
 0x11e   : > { %1710 = vmatmul.mubr.bf16.gmra.mrb[40].mxu0 %v3960_v14  ;;  %1999 = vmatmul.mubr.bf16.gmra.mrb[40].mxu1 %v3961_v15  ;;  %v4056_v14 = vld [vmem:[%s4609_s23 + $0x340] ss:$16 sps:$4 sm:$0xff]   ;;  %v4057_v15 = vld [vmem:[%s4609_s23 + $0x348] ss:$16 sps:$4 sm:$0xff]  }
 0x11f   : > { %1717 = vmatprep.mubr.bf16.mxu0 %v3962_v16  ;;  %2006 = vmatprep.mubr.bf16.mxu1 %v3964_v17  ;;  %v4058_v16 = vld [vmem:[%s4609_s23 + $0x364] ss:$16 sps:$4 sm:$0xff]   ;;  %v4060_v17 = vld [vmem:[%s4609_s23 + $0x36c] ss:$16 sps:$4 sm:$0xff]  }
 0x126   : > { %1718 = vmatmul.mubr.bf16.gmra.mrb[44].mxu0 %v3966_v18  ;;  %2007 = vmatmul.mubr.bf16.gmra.mrb[44].mxu1 %v3967_v19  ;;  %v509_v19 = vld [vmem:[#allocation2] sm:$0xff] }
 0x127   : > { %1725 = vmatprep.mubr.bf16.mxu0 %v3968_v20  ;;  %2014 = vmatprep.mubr.bf16.mxu1 %v3970_v21 }
 0x12e   : > { %1726 = vmatmul.mubr.bf16.gmra.mrb[48].mxu0 %v3972_v22  ;;  %2015 = vmatmul.mubr.bf16.gmra.mrb[48].mxu1 %v3973_v23  ;;  %v4062_v22 = vld [vmem:[%s4609_s23 + $0x360] ss:$16 sps:$4 sm:$0xff]  }
 0x12f   : > { %1733 = vmatprep.mubr.bf16.mxu0 %v3974_v24  ;;  %2022 = vmatprep.mubr.bf16.mxu1 %v3976_v25 }
 0x136   : > { %1734 = vmatmul.mubr.bf16.gmra.mrb[52].mxu0 %v3978_v26  ;;  %2023 = vmatmul.mubr.bf16.gmra.mrb[52].mxu1 %v3979_v27  ;;  %v4063_v26 = vld [vmem:[%s4609_s23 + $0x368] ss:$16 sps:$4 sm:$0xff]   ;;  %v4064_v27 = vld [vmem:[%s4609_s23 + $0x384] ss:$16 sps:$4 sm:$0xff]  }
 0x137   : > { %1741 = vmatprep.mubr.bf16.mxu0 %v3980_v28  ;;  %2030 = vmatprep.mubr.bf16.mxu1 %v3982_v29  ;;  %v510_v28 = vld [vmem:[#allocation2 + $0x8] sm:$0xff] }
 0x13e   : > { %1742 = vmatmul.mubr.bf16.gmra.mrb[56].mxu0 %v3984_v30  ;;  %2031 = vmatmul.mubr.bf16.gmra.mrb[56].mxu1 %v3985_v31  ;;  %v4066_v31 = vld [vmem:[%s4609_s23 + $0x38c] ss:$16 sps:$4 sm:$0xff]  }
 0x13f   : > { %1749 = vmatprep.mubr.bf16.mxu0 %v3986_v32  ;;  %2038 = vmatprep.mubr.bf16.mxu1 %v3988_v33 }
 0x146   : > { %1750 = vmatmul.mubr.bf16.gmra.mrb[60].mxu0 %v3990_v34  ;;  %2039 = vmatmul.mubr.bf16.gmra.mrb[60].mxu1 %v3991_v35 }
 0x147   : > { %1757 = vmatprep.mubr.bf16.mxu0 %v3992_v36  ;;  %2046 = vmatprep.mubr.bf16.mxu1 %v3994_v37  ;;  %v511_v37 = vld [vmem:[#allocation2 + $0x10] sm:$0xff] }
 0x14e   : > { %1758 = vmatmul.mubr.bf16.gmra.mrb[64].mxu0 %v3996_v38  ;;  %2047 = vmatmul.mubr.bf16.gmra.mrb[64].mxu1 %v3997_v39 }
 0x14f   : > { %1765 = vmatprep.mubr.bf16.mxu0 %v3998_v40  ;;  %2054 = vmatprep.mubr.bf16.mxu1 %v4000_v41  ;;  %v4068_v40 = vld [vmem:[%s4609_s23 + $0x380] ss:$16 sps:$4 sm:$0xff]  }
 0x156   : > { %1766 = vmatmul.mubr.bf16.gmra.mrb[68].mxu0 %v4002_v42  ;;  %2055 = vmatmul.mubr.bf16.gmra.mrb[68].mxu1 %v4003_v43 }
 0x157   : > { %1773 = vmatprep.mubr.bf16.mxu0 %v4004_v44  ;;  %2062 = vmatprep.mubr.bf16.mxu1 %v4006_v45  ;;  %v4069_v44 = vld [vmem:[%s4609_s23 + $0x388] ss:$16 sps:$4 sm:$0xff]   ;;  %v4070_v45 = vld [vmem:[%s4609_s23 + $0x3a4] ss:$16 sps:$4 sm:$0xff]  }
 0x15e   : > { %1774 = vmatmul.mubr.bf16.gmra.mrb[72].mxu0 %v4008_v46  ;;  %2063 = vmatmul.mubr.bf16.gmra.mrb[72].mxu1 %v4009_v47  ;;  %v512_v46 = vld [vmem:[#allocation2 + $0x18] sm:$0xff] }
 0x15f   : > { %1781 = vmatprep.mubr.bf16.mxu0 %v4010_v48  ;;  %2070 = vmatprep.mubr.bf16.mxu1 %v4012_v49  ;;  %v4072_v49 = vld [vmem:[%s4609_s23 + $0x3ac] ss:$16 sps:$4 sm:$0xff]  }
 0x166   : > { %1782 = vmatmul.mubr.bf16.gmra.mrb[76].mxu0 %v4014_v50  ;;  %2071 = vmatmul.mubr.bf16.gmra.mrb[76].mxu1 %v4015_v51 }
 0x167   : > { %1789 = vmatprep.mubr.bf16.mxu0 %v4016_v52  ;;  %2078 = vmatprep.mubr.bf16.mxu1 %v4018_v53 }
 0x16e   : > { %1790 = vmatmul.mubr.bf16.gmra.mrb[80].mxu0 %v4020_v54  ;;  %2079 = vmatmul.mubr.bf16.gmra.mrb[80].mxu1 %v4021_v55  ;;  %v513_v55 = vld [vmem:[#allocation2 + $0x20] sm:$0xff] }
 0x16f   : > { %1797 = vmatprep.mubr.bf16.mxu0 %v4022_v56  ;;  %2086 = vmatprep.mubr.bf16.mxu1 %v4024_v57 }
 0x176   : > { %1798 = vmatmul.mubr.bf16.gmra.mrb[84].mxu0 %v4026_v58  ;;  %2087 = vmatmul.mubr.bf16.gmra.mrb[84].mxu1 %v4027_v59  ;;  %v4074_v58 = vld [vmem:[%s4609_s23 + $0x3a0] ss:$16 sps:$4 sm:$0xff]  }
 0x177   : > { %1805 = vmatprep.mubr.bf16.mxu0 %v4028_v60  ;;  %2094 = vmatprep.mubr.bf16.mxu1 %v4030_v61 }
 0x17e   : > { %1806 = vmatmul.mubr.bf16.gmra.mrb[88].mxu0 %v4032_v62  ;;  %2095 = vmatmul.mubr.bf16.gmra.mrb[88].mxu1 %v4033_v63  ;;  %v4075_v62 = vld [vmem:[%s4609_s23 + $0x3a8] ss:$16 sps:$4 sm:$0xff]   ;;  %v4076_v63 = vld [vmem:[%s4609_s23 + $0x3c4] ss:$16 sps:$4 sm:$0xff]  }
 0x17f   : > { %1813 = vmatprep.mubr.bf16.mxu0 %v4034_v0  ;;  %2102 = vmatprep.mubr.bf16.mxu1 %v4036_v1  ;;  %v514_v0 = vld [vmem:[#allocation2 + $0x28] sm:$0xff] }
 0x186   : > { %1814 = vmatmul.mubr.bf16.gmra.mrb[92].mxu0 %v4038_v2  ;;  %2103 = vmatmul.mubr.bf16.gmra.mrb[92].mxu1 %v4039_v3  ;;  %v4078_v3 = vld [vmem:[%s4609_s23 + $0x3cc] ss:$16 sps:$4 sm:$0xff]  }
 0x187   : > { %1821 = vmatprep.mubr.bf16.mxu0 %v4040_v4  ;;  %2110 = vmatprep.mubr.bf16.mxu1 %v4042_v5 }
 0x18e   : > { %1822 = vmatmul.mubr.bf16.gmra.mrb[96].mxu0 %v4044_v6  ;;  %2111 = vmatmul.mubr.bf16.gmra.mrb[96].mxu1 %v4045_v7 }
 0x18f   : > { %1829 = vmatprep.mubr.bf16.mxu0 %v4046_v8  ;;  %2118 = vmatprep.mubr.bf16.mxu1 %v4048_v9  ;;  %v515_v9 = vld [vmem:[#allocation2 + $0x30] sm:$0xff] }
 0x196   : > { %1830 = vmatmul.mubr.bf16.gmra.mrb[100].mxu0 %v4050_v10  ;;  %2119 = vmatmul.mubr.bf16.gmra.mrb[100].mxu1 %v4051_v11 }
 0x197   : > { %1837 = vmatprep.mubr.bf16.mxu0 %v4052_v12  ;;  %2126 = vmatprep.mubr.bf16.mxu1 %v4054_v13  ;;  %v4080_v12 = vld [vmem:[%s4609_s23 + $0x3c0] ss:$16 sps:$4 sm:$0xff]  }
 0x19e   : > { %1838 = vmatmul.mubr.bf16.gmra.mrb[104].mxu0 %v4056_v14  ;;  %2127 = vmatmul.mubr.bf16.gmra.mrb[104].mxu1 %v4057_v15 }
 0x19f   : > { %1845 = vmatprep.mubr.bf16.mxu0 %v4058_v16  ;;  %2134 = vmatprep.mubr.bf16.mxu1 %v4060_v17  ;;  %v4081_v16 = vld [vmem:[%s4609_s23 + $0x3c8] ss:$16 sps:$4 sm:$0xff]   ;;  %v4082_v17 = vld [vmem:[%s4609_s23 + $0x3e4] ss:$16 sps:$4 sm:$0xff]  }
 0x1a1   : > { %v1631_v18 = vpop.f32.mrb[0].mxu0  ;;  %v1920_v20 = vpop.f32.mrb[0].mxu1 }
 0x1a2   : > { %v1633_v21 = vpop.f32.mrb[1].mxu0  ;;  %v1921_v23 = vadd.f32 %v1920_v20, %v1631_v18  ;;  %v1922_v24 = vpop.f32.mrb[1].mxu1  ;;  %v516_v18 = vld [vmem:[#allocation2 + $0x38] sm:$0xff] }
 0x1a3   : > { %v1634_v25 = vpop.f32.mrb[2].mxu0  ;;  %v1923_v29 = vpop.f32.mrb[2].mxu1  ;;  %v4084_v21 = vld [vmem:[%s4609_s23 + $0x3ec] ss:$16 sps:$4 sm:$0xff]  }
 0x1a4   : > { %v1636_v30 = vpop.f32.mrb[3].mxu0  ;;  %v2175_v32 = vadd.f32 %v1921_v23, %v509_v19  ;;  %v1924_v33 = vadd.f32 %v1923_v29, %v1634_v25  ;;  %v1925_v34 = vpop.f32.mrb[3].mxu1 }
 0x1a5   : > { %v4086_v30 = vld [vmem:[%s4609_s23 + $0x3e0] ss:$16 sps:$4 sm:$0xff]   ;;  %v4087_v34 = vld [vmem:[%s4609_s23 + $0x3e8] ss:$16 sps:$4 sm:$0xff]  }
 0x1a6   : > { %1846 = vmatmul.mubr.bf16.gmra.mrb[108].mxu0 %v4062_v22  ;;  %2240 = vst.msk [vmem:[#allocation2] sm:$0xff] %vm2239_vm1, %v2175_v32  ;;  %v2176_v35 = vadd.f32 %v1924_v33, %v510_v28  ;;  %2135 = vmatmul.mubr.bf16.gmra.mrb[108].mxu1 %v4063_v26 }
 0x1a7   : > { %1853 = vmatprep.mubr.bf16.mxu0 %v4064_v27  ;;  %2142 = vmatprep.mubr.bf16.mxu1 %v4066_v31  ;;  %v517_v27 = vld [vmem:[#allocation2 + $0x40] sm:$0xff] }
 0x1a8   : > { %2241 = vst.msk [vmem:[#allocation2 + $0x8] sm:$0xff] %vm2239_vm1, %v2176_v35  ;;  %v518_v35 = vld [vmem:[#allocation2 + $0x48] sm:$0xff] }
 0x1a9   : > { %v1639_v36 = vpop.f32.mrb[4].mxu0  ;;  %v1928_v38 = vpop.f32.mrb[4].mxu1 }
 0x1aa   : > { %v1641_v39 = vpop.f32.mrb[5].mxu0  ;;  %v1929_v41 = vadd.f32 %v1928_v38, %v1639_v36  ;;  %v1930_v42 = vpop.f32.mrb[5].mxu1 }
 0x1ab   : > { %v1642_v43 = vpop.f32.mrb[6].mxu0  ;;  %v1931_v47 = vpop.f32.mrb[6].mxu1 }
 0x1ac   : > { %v1644_v48 = vpop.f32.mrb[7].mxu0  ;;  %v2177_v50 = vadd.f32 %v1929_v41, %v511_v37  ;;  %v1932_v51 = vadd.f32 %v1931_v47, %v1642_v43  ;;  %v1933_v52 = vpop.f32.mrb[7].mxu1  ;;  %v519_v43 = vld [vmem:[#allocation2 + $0x50] sm:$0xff] }
 0x1ae   : > { %1854 = vmatmul.mubr.bf16.gmra.mrb[112].mxu0 %v4068_v40  ;;  %2242 = vst.msk [vmem:[#allocation2 + $0x10] sm:$0xff] %vm2239_vm1, %v2177_v50  ;;  %v2178_v53 = vadd.f32 %v1932_v51, %v512_v46  ;;  %2143 = vmatmul.mubr.bf16.gmra.mrb[112].mxu1 %v4069_v44 }
 0x1af   : > { %1861 = vmatprep.mubr.bf16.mxu0 %v4070_v45  ;;  %2150 = vmatprep.mubr.bf16.mxu1 %v4072_v49  ;;  %v520_v49 = vld [vmem:[#allocation2 + $0x58] sm:$0xff] }
 0x1b0   : > { %2243 = vst.msk [vmem:[#allocation2 + $0x18] sm:$0xff] %vm2239_vm1, %v2178_v53 }
 0x1b1   : > { %v1647_v54 = vpop.f32.mrb[8].mxu0  ;;  %v1936_v56 = vpop.f32.mrb[8].mxu1 }
 0x1b2   : > { %v1649_v57 = vpop.f32.mrb[9].mxu0  ;;  %v1937_v59 = vadd.f32 %v1936_v56, %v1647_v54  ;;  %v1938_v60 = vpop.f32.mrb[9].mxu1 }
 0x1b3   : > { %v1650_v61 = vpop.f32.mrb[10].mxu0  ;;  %v1939_v1 = vpop.f32.mrb[10].mxu1  ;;  %v521_v57 = vld [vmem:[#allocation2 + $0x60] sm:$0xff] }
 0x1b4   : > { %v1652_v2 = vpop.f32.mrb[11].mxu0  ;;  %v2179_v4 = vadd.f32 %v1937_v59, %v513_v55  ;;  %v1940_v5 = vadd.f32 %v1939_v1, %v1650_v61  ;;  %v1941_v6 = vpop.f32.mrb[11].mxu1 }
 0x1b6   : > { %1862 = vmatmul.mubr.bf16.gmra.mrb[116].mxu0 %v4074_v58  ;;  %2244 = vst.msk [vmem:[#allocation2 + $0x20] sm:$0xff] %vm2239_vm1, %v2179_v4  ;;  %v2180_v7 = vadd.f32 %v1940_v5, %v514_v0  ;;  %2151 = vmatmul.mubr.bf16.gmra.mrb[116].mxu1 %v4075_v62 }
 0x1b7   : > { %1869 = vmatprep.mubr.bf16.mxu0 %v4076_v63  ;;  %2158 = vmatprep.mubr.bf16.mxu1 %v4078_v3  ;;  %v522_v63 = vld [vmem:[#allocation2 + $0x68] sm:$0xff] }
 0x1b8   : > { %2245 = vst.msk [vmem:[#allocation2 + $0x28] sm:$0xff] %vm2239_vm1, %v2180_v7  ;;  %v523_v7 = vld [vmem:[#allocation2 + $0x70] sm:$0xff] }
 0x1b9   : > { %v1655_v8 = vpop.f32.mrb[12].mxu0  ;;  %v1944_v10 = vpop.f32.mrb[12].mxu1 }
 0x1ba   : > { %v1657_v11 = vpop.f32.mrb[13].mxu0  ;;  %v1945_v13 = vadd.f32 %v1944_v10, %v1655_v8  ;;  %v1946_v14 = vpop.f32.mrb[13].mxu1 }
 0x1bb   : > { %v1658_v15 = vpop.f32.mrb[14].mxu0  ;;  %v1947_v19 = vpop.f32.mrb[14].mxu1 }
 0x1bc   : > { %v1660_v20 = vpop.f32.mrb[15].mxu0  ;;  %v2181_v22 = vadd.f32 %v1945_v13, %v515_v9  ;;  %v1948_v23 = vadd.f32 %v1947_v19, %v1658_v15  ;;  %v1949_v24 = vpop.f32.mrb[15].mxu1  ;;  %v524_v13 = vld [vmem:[#allocation2 + $0x78] sm:$0xff] }
 0x1be   : > { %1870 = vmatmul.mubr.bf16.gmra.mrb[120].mxu0 %v4080_v12  ;;  %2246 = vst.msk [vmem:[#allocation2 + $0x30] sm:$0xff] %vm2239_vm1, %v2181_v22  ;;  %v2182_v25 = vadd.f32 %v1948_v23, %v516_v18  ;;  %2159 = vmatmul.mubr.bf16.gmra.mrb[120].mxu1 %v4081_v16 }
 0x1bf   : > { %1877 = vmatprep.mubr.bf16.mxu0 %v4082_v17  ;;  %2166 = vmatprep.mubr.bf16.mxu1 %v4084_v21  ;;  %v525_v21 = vld [vmem:[#allocation2 + $0x80] sm:$0xff] }
 0x1c0   : > { %2247 = vst.msk [vmem:[#allocation2 + $0x38] sm:$0xff] %vm2239_vm1, %v2182_v25 }
 0x1c1   : > { %v1663_v26 = vpop.f32.mrb[16].mxu0  ;;  %v1952_v28 = vpop.f32.mrb[16].mxu1 }
 0x1c2   : > { %v1665_v29 = vpop.f32.mrb[17].mxu0  ;;  %v1953_v31 = vadd.f32 %v1952_v28, %v1663_v26  ;;  %v1954_v32 = vpop.f32.mrb[17].mxu1 }
 0x1c3   : > { %v1666_v33 = vpop.f32.mrb[18].mxu0  ;;  %v1955_v36 = vpop.f32.mrb[18].mxu1 }
 0x1c4   : > { %v1668_v37 = vpop.f32.mrb[19].mxu0  ;;  %v2183_v38 = vadd.f32 %v1953_v31, %v517_v27  ;;  %v1956_v39 = vadd.f32 %v1955_v36, %v1666_v33  ;;  %v1957_v40 = vpop.f32.mrb[19].mxu1  ;;  %v526_v27 = vld [vmem:[#allocation2 + $0x88] sm:$0xff] }
 0x1c6   : > { %1878 = vmatmul.mubr.bf16.gmra.mrb[124].mxu0 %v4086_v30  ;;  %2248 = vst.msk [vmem:[#allocation2 + $0x40] sm:$0xff] %vm2239_vm1, %v2183_v38  ;;  %v2184_v41 = vadd.f32 %v1956_v39, %v518_v35  ;;  %2167 = vmatmul.mubr.bf16.gmra.mrb[124].mxu1 %v4087_v34  ;;  %v527_v35 = vld [vmem:[#allocation2 + $0x90] sm:$0xff] }
 0x1c8   : > { %2249 = vst.msk [vmem:[#allocation2 + $0x48] sm:$0xff] %vm2239_vm1, %v2184_v41  ;;  %v528_v41 = vld [vmem:[#allocation2 + $0x98] sm:$0xff] }
 0x1c9   : > { %v1671_v42 = vpop.f32.mrb[20].mxu0  ;;  %v1960_v44 = vpop.f32.mrb[20].mxu1 }
 0x1ca   : > { %v1673_v45 = vpop.f32.mrb[21].mxu0  ;;  %v1961_v46 = vadd.f32 %v1960_v44, %v1671_v42  ;;  %v1962_v47 = vpop.f32.mrb[21].mxu1 }
 0x1cb   : > { %v1674_v48 = vpop.f32.mrb[22].mxu0  ;;  %v1963_v50 = vpop.f32.mrb[22].mxu1 }
 0x1cc   : > { %v1676_v51 = vpop.f32.mrb[23].mxu0  ;;  %v2185_v52 = vadd.f32 %v1961_v46, %v519_v43  ;;  %v1964_v53 = vadd.f32 %v1963_v50, %v1674_v48  ;;  %v1965_v54 = vpop.f32.mrb[23].mxu1 }
 0x1ce   : > { %2250 = vst.msk [vmem:[#allocation2 + $0x50] sm:$0xff] %vm2239_vm1, %v2185_v52  ;;  %v2186_v55 = vadd.f32 %v1964_v53, %v520_v49  ;;  %v529_v49 = vld [vmem:[#allocation2 + $0xa0] sm:$0xff] }
 0x1d0   : > { %2251 = vst.msk [vmem:[#allocation2 + $0x58] sm:$0xff] %vm2239_vm1, %v2186_v55  ;;  %v530_v55 = vld [vmem:[#allocation2 + $0xa8] sm:$0xff] }
 0x1d1   : > { %v1679_v56 = vpop.f32.mrb[24].mxu0  ;;  %v1968_v58 = vpop.f32.mrb[24].mxu1 }
 0x1d2   : > { %v1681_v59 = vpop.f32.mrb[25].mxu0  ;;  %v1969_v60 = vadd.f32 %v1968_v58, %v1679_v56  ;;  %v1970_v61 = vpop.f32.mrb[25].mxu1 }
 0x1d3   : > { %v1682_v62 = vpop.f32.mrb[26].mxu0  ;;  %v1971_v0 = vpop.f32.mrb[26].mxu1 }
 0x1d4   : > { %v1684_v1 = vpop.f32.mrb[27].mxu0  ;;  %v2187_v2 = vadd.f32 %v1969_v60, %v521_v57  ;;  %v1972_v3 = vadd.f32 %v1971_v0, %v1682_v62  ;;  %v1973_v4 = vpop.f32.mrb[27].mxu1 }
 0x1d6   : > { %2252 = vst.msk [vmem:[#allocation2 + $0x60] sm:$0xff] %vm2239_vm1, %v2187_v2  ;;  %v2188_v5 = vadd.f32 %v1972_v3, %v522_v63  ;;  %v531_v63 = vld [vmem:[#allocation2 + $0xb0] sm:$0xff] }
 0x1d8   : > { %2253 = vst.msk [vmem:[#allocation2 + $0x68] sm:$0xff] %vm2239_vm1, %v2188_v5  ;;  %v532_v5 = vld [vmem:[#allocation2 + $0xb8] sm:$0xff] }
 0x1d9   : > { %v1687_v6 = vpop.f32.mrb[28].mxu0  ;;  %v1976_v8 = vpop.f32.mrb[28].mxu1 }
 0x1da   : > { %v1689_v9 = vpop.f32.mrb[29].mxu0  ;;  %v1977_v10 = vadd.f32 %v1976_v8, %v1687_v6  ;;  %v1978_v11 = vpop.f32.mrb[29].mxu1 }
 0x1db   : > { %v1690_v12 = vpop.f32.mrb[30].mxu0  ;;  %v1979_v14 = vpop.f32.mrb[30].mxu1 }
 0x1dc   : > { %v1692_v15 = vpop.f32.mrb[31].mxu0  ;;  %v2189_v16 = vadd.f32 %v1977_v10, %v523_v7  ;;  %v1980_v17 = vadd.f32 %v1979_v14, %v1690_v12  ;;  %v1981_v18 = vpop.f32.mrb[31].mxu1 }
 0x1de   : > { %2254 = vst.msk [vmem:[#allocation2 + $0x70] sm:$0xff] %vm2239_vm1, %v2189_v16  ;;  %v2190_v19 = vadd.f32 %v1980_v17, %v524_v13  ;;  %v533_v13 = vld [vmem:[#allocation2 + $0xc0] sm:$0xff] }
 0x1e0   : > { %2255 = vst.msk [vmem:[#allocation2 + $0x78] sm:$0xff] %vm2239_vm1, %v2190_v19  ;;  %v534_v19 = vld [vmem:[#allocation2 + $0xc8] sm:$0xff] }
 0x1e1   : > { %v1695_v20 = vpop.f32.mrb[32].mxu0  ;;  %v1984_v22 = vpop.f32.mrb[32].mxu1 }
 0x1e2   : > { %v1697_v23 = vpop.f32.mrb[33].mxu0  ;;  %v1985_v24 = vadd.f32 %v1984_v22, %v1695_v20  ;;  %v1986_v25 = vpop.f32.mrb[33].mxu1 }
 0x1e3   : > { %v1698_v26 = vpop.f32.mrb[34].mxu0  ;;  %v1987_v28 = vpop.f32.mrb[34].mxu1 }
 0x1e4   : > { %v1700_v29 = vpop.f32.mrb[35].mxu0  ;;  %v2191_v30 = vadd.f32 %v1985_v24, %v525_v21  ;;  %v1988_v31 = vadd.f32 %v1987_v28, %v1698_v26  ;;  %v1989_v32 = vpop.f32.mrb[35].mxu1 }
 0x1e6   : > { %2256 = vst.msk [vmem:[#allocation2 + $0x80] sm:$0xff] %vm2239_vm1, %v2191_v30  ;;  %v2192_v33 = vadd.f32 %v1988_v31, %v526_v27  ;;  %v535_v27 = vld [vmem:[#allocation2 + $0xd0] sm:$0xff] }
 0x1e8   : > { %2257 = vst.msk [vmem:[#allocation2 + $0x88] sm:$0xff] %vm2239_vm1, %v2192_v33  ;;  %v536_v33 = vld [vmem:[#allocation2 + $0xd8] sm:$0xff] }
 0x1e9   : > { %v1703_v34 = vpop.f32.mrb[36].mxu0  ;;  %v1992_v36 = vpop.f32.mrb[36].mxu1 }
 0x1ea   : > { %v1705_v37 = vpop.f32.mrb[37].mxu0  ;;  %v1993_v38 = vadd.f32 %v1992_v36, %v1703_v34  ;;  %v1994_v39 = vpop.f32.mrb[37].mxu1 }
 0x1eb   : > { %v1706_v40 = vpop.f32.mrb[38].mxu0  ;;  %v1995_v42 = vpop.f32.mrb[38].mxu1 }
 0x1ec   : > { %v1708_v43 = vpop.f32.mrb[39].mxu0  ;;  %v2193_v44 = vadd.f32 %v1993_v38, %v527_v35  ;;  %v1996_v45 = vadd.f32 %v1995_v42, %v1706_v40  ;;  %v1997_v46 = vpop.f32.mrb[39].mxu1 }
 0x1ee   : > { %2258 = vst.msk [vmem:[#allocation2 + $0x90] sm:$0xff] %vm2239_vm1, %v2193_v44  ;;  %v2194_v47 = vadd.f32 %v1996_v45, %v528_v41  ;;  %v537_v41 = vld [vmem:[#allocation2 + $0xe0] sm:$0xff] }
 0x1f0   : > { %2259 = vst.msk [vmem:[#allocation2 + $0x98] sm:$0xff] %vm2239_vm1, %v2194_v47  ;;  %v538_v47 = vld [vmem:[#allocation2 + $0xe8] sm:$0xff] }
 0x1f1   : > { %v1711_v48 = vpop.f32.mrb[40].mxu0  ;;  %v2000_v50 = vpop.f32.mrb[40].mxu1 }
 0x1f2   : > { %v1713_v51 = vpop.f32.mrb[41].mxu0  ;;  %v2001_v52 = vadd.f32 %v2000_v50, %v1711_v48  ;;  %v2002_v53 = vpop.f32.mrb[41].mxu1 }
 0x1f3   : > { %v1714_v54 = vpop.f32.mrb[42].mxu0  ;;  %v2003_v56 = vpop.f32.mrb[42].mxu1 }
 0x1f4   : > { %v1716_v57 = vpop.f32.mrb[43].mxu0  ;;  %v2195_v58 = vadd.f32 %v2001_v52, %v529_v49  ;;  %v2004_v59 = vadd.f32 %v2003_v56, %v1714_v54  ;;  %v2005_v60 = vpop.f32.mrb[43].mxu1 }
 0x1f6   : > { %2260 = vst.msk [vmem:[#allocation2 + $0xa0] sm:$0xff] %vm2239_vm1, %v2195_v58  ;;  %v2196_v61 = vadd.f32 %v2004_v59, %v530_v55  ;;  %v539_v55 = vld [vmem:[#allocation2 + $0xf0] sm:$0xff] }
 0x1f8   : > { %2261 = vst.msk [vmem:[#allocation2 + $0xa8] sm:$0xff] %vm2239_vm1, %v2196_v61  ;;  %v540_v61 = vld [vmem:[#allocation2 + $0xf8] sm:$0xff] }
 0x1f9   : > { %v1719_v62 = vpop.f32.mrb[44].mxu0  ;;  %v2008_v0 = vpop.f32.mrb[44].mxu1 }
 0x1fa   : > { %v1721_v1 = vpop.f32.mrb[45].mxu0  ;;  %v2009_v2 = vadd.f32 %v2008_v0, %v1719_v62  ;;  %v2010_v3 = vpop.f32.mrb[45].mxu1 }
 0x1fb   : > { %v1722_v4 = vpop.f32.mrb[46].mxu0  ;;  %v2011_v6 = vpop.f32.mrb[46].mxu1 }
 0x1fc   : > { %v1724_v7 = vpop.f32.mrb[47].mxu0  ;;  %v2197_v8 = vadd.f32 %v2009_v2, %v531_v63  ;;  %v2012_v9 = vadd.f32 %v2011_v6, %v1722_v4  ;;  %v2013_v10 = vpop.f32.mrb[47].mxu1 }
 0x1fe   : > { %2262 = vst.msk [vmem:[#allocation2 + $0xb0] sm:$0xff] %vm2239_vm1, %v2197_v8  ;;  %v2198_v11 = vadd.f32 %v2012_v9, %v532_v5  ;;  %v541_v5 = vld [vmem:[#allocation2 + $0x100] sm:$0xff] }
 0x200   : > { %2263 = vst.msk [vmem:[#allocation2 + $0xb8] sm:$0xff] %vm2239_vm1, %v2198_v11  ;;  %v542_v11 = vld [vmem:[#allocation2 + $0x108] sm:$0xff] }
 0x201   : > { %v1727_v12 = vpop.f32.mrb[48].mxu0  ;;  %v2016_v14 = vpop.f32.mrb[48].mxu1 }
 0x202   : > { %v1729_v15 = vpop.f32.mrb[49].mxu0  ;;  %v2017_v16 = vadd.f32 %v2016_v14, %v1727_v12  ;;  %v2018_v17 = vpop.f32.mrb[49].mxu1 }
 0x203   : > { %v1730_v18 = vpop.f32.mrb[50].mxu0  ;;  %v2019_v20 = vpop.f32.mrb[50].mxu1 }
 0x204   : > { %v1732_v21 = vpop.f32.mrb[51].mxu0  ;;  %v2199_v22 = vadd.f32 %v2017_v16, %v533_v13  ;;  %v2020_v23 = vadd.f32 %v2019_v20, %v1730_v18  ;;  %v2021_v24 = vpop.f32.mrb[51].mxu1 }
 0x206   : > { %2264 = vst.msk [vmem:[#allocation2 + $0xc0] sm:$0xff] %vm2239_vm1, %v2199_v22  ;;  %v2200_v25 = vadd.f32 %v2020_v23, %v534_v19  ;;  %v543_v19 = vld [vmem:[#allocation2 + $0x110] sm:$0xff] }
 0x208   : > { %2265 = vst.msk [vmem:[#allocation2 + $0xc8] sm:$0xff] %vm2239_vm1, %v2200_v25  ;;  %v544_v25 = vld [vmem:[#allocation2 + $0x118] sm:$0xff] }
 0x209   : > { %v1735_v26 = vpop.f32.mrb[52].mxu0  ;;  %v2024_v28 = vpop.f32.mrb[52].mxu1 }
 0x20a   : > { %v1737_v29 = vpop.f32.mrb[53].mxu0  ;;  %v2025_v30 = vadd.f32 %v2024_v28, %v1735_v26  ;;  %v2026_v31 = vpop.f32.mrb[53].mxu1 }
 0x20b   : > { %v1738_v32 = vpop.f32.mrb[54].mxu0  ;;  %v2027_v34 = vpop.f32.mrb[54].mxu1 }
 0x20c   : > { %v1740_v35 = vpop.f32.mrb[55].mxu0  ;;  %v2201_v36 = vadd.f32 %v2025_v30, %v535_v27  ;;  %v2028_v37 = vadd.f32 %v2027_v34, %v1738_v32  ;;  %v2029_v38 = vpop.f32.mrb[55].mxu1 }
 0x20e   : > { %2266 = vst.msk [vmem:[#allocation2 + $0xd0] sm:$0xff] %vm2239_vm1, %v2201_v36  ;;  %v2202_v39 = vadd.f32 %v2028_v37, %v536_v33  ;;  %v545_v33 = vld [vmem:[#allocation2 + $0x120] sm:$0xff] }
 0x210   : > { %2267 = vst.msk [vmem:[#allocation2 + $0xd8] sm:$0xff] %vm2239_vm1, %v2202_v39  ;;  %v546_v39 = vld [vmem:[#allocation2 + $0x128] sm:$0xff] }
 0x211   : > { %v1743_v40 = vpop.f32.mrb[56].mxu0  ;;  %v2032_v42 = vpop.f32.mrb[56].mxu1 }
 0x212   : > { %v1745_v43 = vpop.f32.mrb[57].mxu0  ;;  %v2033_v44 = vadd.f32 %v2032_v42, %v1743_v40  ;;  %v2034_v45 = vpop.f32.mrb[57].mxu1 }
 0x213   : > { %v1746_v46 = vpop.f32.mrb[58].mxu0  ;;  %v2035_v48 = vpop.f32.mrb[58].mxu1 }
 0x214   : > { %v1748_v49 = vpop.f32.mrb[59].mxu0  ;;  %v2203_v50 = vadd.f32 %v2033_v44, %v537_v41  ;;  %v2036_v51 = vadd.f32 %v2035_v48, %v1746_v46  ;;  %v2037_v52 = vpop.f32.mrb[59].mxu1 }
 0x216   : > { %2268 = vst.msk [vmem:[#allocation2 + $0xe0] sm:$0xff] %vm2239_vm1, %v2203_v50  ;;  %v2204_v53 = vadd.f32 %v2036_v51, %v538_v47  ;;  %v547_v47 = vld [vmem:[#allocation2 + $0x130] sm:$0xff] }
 0x218   : > { %2269 = vst.msk [vmem:[#allocation2 + $0xe8] sm:$0xff] %vm2239_vm1, %v2204_v53  ;;  %v548_v53 = vld [vmem:[#allocation2 + $0x138] sm:$0xff] }
 0x219   : > { %v1751_v54 = vpop.f32.mrb[60].mxu0  ;;  %v2040_v56 = vpop.f32.mrb[60].mxu1 }
 0x21a   : > { %v1753_v57 = vpop.f32.mrb[61].mxu0  ;;  %v2041_v58 = vadd.f32 %v2040_v56, %v1751_v54  ;;  %v2042_v59 = vpop.f32.mrb[61].mxu1 }
 0x21b   : > { %v1754_v60 = vpop.f32.mrb[62].mxu0  ;;  %v2043_v62 = vpop.f32.mrb[62].mxu1 }
 0x21c   : > { %v1756_v63 = vpop.f32.mrb[63].mxu0  ;;  %v2205_v0 = vadd.f32 %v2041_v58, %v539_v55  ;;  %v2044_v1 = vadd.f32 %v2043_v62, %v1754_v60  ;;  %v2045_v2 = vpop.f32.mrb[63].mxu1 }
 0x21e   : > { %2270 = vst.msk [vmem:[#allocation2 + $0xf0] sm:$0xff] %vm2239_vm1, %v2205_v0  ;;  %v2206_v3 = vadd.f32 %v2044_v1, %v540_v61  ;;  %v549_v61 = vld [vmem:[#allocation2 + $0x140] sm:$0xff] }
 0x220   : > { %2271 = vst.msk [vmem:[#allocation2 + $0xf8] sm:$0xff] %vm2239_vm1, %v2206_v3  ;;  %v550_v3 = vld [vmem:[#allocation2 + $0x148] sm:$0xff] }
 0x221   : > { %v1759_v4 = vpop.f32.mrb[64].mxu0  ;;  %v2048_v6 = vpop.f32.mrb[64].mxu1 }
 0x222   : > { %v1761_v7 = vpop.f32.mrb[65].mxu0  ;;  %v2049_v8 = vadd.f32 %v2048_v6, %v1759_v4  ;;  %v2050_v9 = vpop.f32.mrb[65].mxu1 }
 0x223   : > { %v1762_v10 = vpop.f32.mrb[66].mxu0  ;;  %v2051_v12 = vpop.f32.mrb[66].mxu1 }
 0x224   : > { %v1764_v13 = vpop.f32.mrb[67].mxu0  ;;  %v2207_v14 = vadd.f32 %v2049_v8, %v541_v5  ;;  %v2052_v15 = vadd.f32 %v2051_v12, %v1762_v10  ;;  %v2053_v16 = vpop.f32.mrb[67].mxu1 }
 0x226   : > { %2272 = vst.msk [vmem:[#allocation2 + $0x100] sm:$0xff] %vm2239_vm1, %v2207_v14  ;;  %v2208_v17 = vadd.f32 %v2052_v15, %v542_v11  ;;  %v551_v11 = vld [vmem:[#allocation2 + $0x150] sm:$0xff] }
 0x228   : > { %2273 = vst.msk [vmem:[#allocation2 + $0x108] sm:$0xff] %vm2239_vm1, %v2208_v17  ;;  %v552_v17 = vld [vmem:[#allocation2 + $0x158] sm:$0xff] }
 0x229   : > { %v1767_v18 = vpop.f32.mrb[68].mxu0  ;;  %v2056_v20 = vpop.f32.mrb[68].mxu1 }
 0x22a   : > { %v1769_v21 = vpop.f32.mrb[69].mxu0  ;;  %v2057_v22 = vadd.f32 %v2056_v20, %v1767_v18  ;;  %v2058_v23 = vpop.f32.mrb[69].mxu1 }
 0x22b   : > { %v1770_v24 = vpop.f32.mrb[70].mxu0  ;;  %v2059_v26 = vpop.f32.mrb[70].mxu1 }
 0x22c   : > { %v1772_v27 = vpop.f32.mrb[71].mxu0  ;;  %v2209_v28 = vadd.f32 %v2057_v22, %v543_v19  ;;  %v2060_v29 = vadd.f32 %v2059_v26, %v1770_v24  ;;  %v2061_v30 = vpop.f32.mrb[71].mxu1 }
 0x22e   : > { %2274 = vst.msk [vmem:[#allocation2 + $0x110] sm:$0xff] %vm2239_vm1, %v2209_v28  ;;  %v2210_v31 = vadd.f32 %v2060_v29, %v544_v25  ;;  %v553_v25 = vld [vmem:[#allocation2 + $0x160] sm:$0xff] }
 0x230   : > { %2275 = vst.msk [vmem:[#allocation2 + $0x118] sm:$0xff] %vm2239_vm1, %v2210_v31  ;;  %v554_v31 = vld [vmem:[#allocation2 + $0x168] sm:$0xff] }
 0x231   : > { %v1775_v32 = vpop.f32.mrb[72].mxu0  ;;  %v2064_v34 = vpop.f32.mrb[72].mxu1 }
 0x232   : > { %v1777_v35 = vpop.f32.mrb[73].mxu0  ;;  %v2065_v36 = vadd.f32 %v2064_v34, %v1775_v32  ;;  %v2066_v37 = vpop.f32.mrb[73].mxu1 }
 0x233   : > { %v1778_v38 = vpop.f32.mrb[74].mxu0  ;;  %v2067_v40 = vpop.f32.mrb[74].mxu1 }
 0x234   : > { %v1780_v41 = vpop.f32.mrb[75].mxu0  ;;  %v2211_v42 = vadd.f32 %v2065_v36, %v545_v33  ;;  %v2068_v43 = vadd.f32 %v2067_v40, %v1778_v38  ;;  %v2069_v44 = vpop.f32.mrb[75].mxu1 }
 0x236   : > { %2276 = vst.msk [vmem:[#allocation2 + $0x120] sm:$0xff] %vm2239_vm1, %v2211_v42  ;;  %v2212_v45 = vadd.f32 %v2068_v43, %v546_v39  ;;  %v555_v39 = vld [vmem:[#allocation2 + $0x170] sm:$0xff] }
 0x238   : > { %2277 = vst.msk [vmem:[#allocation2 + $0x128] sm:$0xff] %vm2239_vm1, %v2212_v45  ;;  %v556_v45 = vld [vmem:[#allocation2 + $0x178] sm:$0xff] }
 0x239   : > { %v1783_v46 = vpop.f32.mrb[76].mxu0  ;;  %v2072_v48 = vpop.f32.mrb[76].mxu1 }
 0x23a   : > { %v1785_v49 = vpop.f32.mrb[77].mxu0  ;;  %v2073_v50 = vadd.f32 %v2072_v48, %v1783_v46  ;;  %v2074_v51 = vpop.f32.mrb[77].mxu1 }
 0x23b   : > { %v1786_v52 = vpop.f32.mrb[78].mxu0  ;;  %v2075_v54 = vpop.f32.mrb[78].mxu1 }
 0x23c   : > { %v1788_v55 = vpop.f32.mrb[79].mxu0  ;;  %v2213_v56 = vadd.f32 %v2073_v50, %v547_v47  ;;  %v2076_v57 = vadd.f32 %v2075_v54, %v1786_v52  ;;  %v2077_v58 = vpop.f32.mrb[79].mxu1 }
 0x23e   : > { %2278 = vst.msk [vmem:[#allocation2 + $0x130] sm:$0xff] %vm2239_vm1, %v2213_v56  ;;  %v2214_v59 = vadd.f32 %v2076_v57, %v548_v53  ;;  %v557_v53 = vld [vmem:[#allocation2 + $0x180] sm:$0xff] }
 0x240   : > { %2279 = vst.msk [vmem:[#allocation2 + $0x138] sm:$0xff] %vm2239_vm1, %v2214_v59  ;;  %v558_v59 = vld [vmem:[#allocation2 + $0x188] sm:$0xff] }
 0x241   : > { %v1791_v60 = vpop.f32.mrb[80].mxu0  ;;  %v2080_v62 = vpop.f32.mrb[80].mxu1 }
 0x242   : > { %v1793_v63 = vpop.f32.mrb[81].mxu0  ;;  %v2081_v0 = vadd.f32 %v2080_v62, %v1791_v60  ;;  %v2082_v1 = vpop.f32.mrb[81].mxu1 }
 0x243   : > { %v1794_v2 = vpop.f32.mrb[82].mxu0  ;;  %v2083_v4 = vpop.f32.mrb[82].mxu1 }
 0x244   : > { %v1796_v5 = vpop.f32.mrb[83].mxu0  ;;  %v2215_v6 = vadd.f32 %v2081_v0, %v549_v61  ;;  %v2084_v7 = vadd.f32 %v2083_v4, %v1794_v2  ;;  %v2085_v8 = vpop.f32.mrb[83].mxu1 }
 0x246   : > { %2280 = vst.msk [vmem:[#allocation2 + $0x140] sm:$0xff] %vm2239_vm1, %v2215_v6  ;;  %v2216_v9 = vadd.f32 %v2084_v7, %v550_v3  ;;  %v559_v3 = vld [vmem:[#allocation2 + $0x190] sm:$0xff] }
 0x248   : > { %2281 = vst.msk [vmem:[#allocation2 + $0x148] sm:$0xff] %vm2239_vm1, %v2216_v9  ;;  %v560_v9 = vld [vmem:[#allocation2 + $0x198] sm:$0xff] }
 0x249   : > { %v1799_v10 = vpop.f32.mrb[84].mxu0  ;;  %v2088_v12 = vpop.f32.mrb[84].mxu1 }
 0x24a   : > { %v1801_v13 = vpop.f32.mrb[85].mxu0  ;;  %v2089_v14 = vadd.f32 %v2088_v12, %v1799_v10  ;;  %v2090_v15 = vpop.f32.mrb[85].mxu1 }
 0x24b   : > { %v1802_v16 = vpop.f32.mrb[86].mxu0  ;;  %v2091_v18 = vpop.f32.mrb[86].mxu1 }
 0x24c   : > { %v1804_v19 = vpop.f32.mrb[87].mxu0  ;;  %v2217_v20 = vadd.f32 %v2089_v14, %v551_v11  ;;  %v2092_v21 = vadd.f32 %v2091_v18, %v1802_v16  ;;  %v2093_v22 = vpop.f32.mrb[87].mxu1 }
 0x24e   : > { %2282 = vst.msk [vmem:[#allocation2 + $0x150] sm:$0xff] %vm2239_vm1, %v2217_v20  ;;  %v2218_v23 = vadd.f32 %v2092_v21, %v552_v17  ;;  %v561_v17 = vld [vmem:[#allocation2 + $0x1a0] sm:$0xff] }
 0x250   : > { %2283 = vst.msk [vmem:[#allocation2 + $0x158] sm:$0xff] %vm2239_vm1, %v2218_v23  ;;  %v562_v23 = vld [vmem:[#allocation2 + $0x1a8] sm:$0xff] }
 0x251   : > { %v1807_v24 = vpop.f32.mrb[88].mxu0  ;;  %v2096_v26 = vpop.f32.mrb[88].mxu1 }
 0x252   : > { %v1809_v27 = vpop.f32.mrb[89].mxu0  ;;  %v2097_v28 = vadd.f32 %v2096_v26, %v1807_v24  ;;  %v2098_v29 = vpop.f32.mrb[89].mxu1 }
 0x253   : > { %v1810_v30 = vpop.f32.mrb[90].mxu0  ;;  %v2099_v32 = vpop.f32.mrb[90].mxu1 }
 0x254   : > { %v1812_v33 = vpop.f32.mrb[91].mxu0  ;;  %v2219_v34 = vadd.f32 %v2097_v28, %v553_v25  ;;  %v2100_v35 = vadd.f32 %v2099_v32, %v1810_v30  ;;  %v2101_v36 = vpop.f32.mrb[91].mxu1 }
 0x256   : > { %2284 = vst.msk [vmem:[#allocation2 + $0x160] sm:$0xff] %vm2239_vm1, %v2219_v34  ;;  %v2220_v37 = vadd.f32 %v2100_v35, %v554_v31  ;;  %v563_v31 = vld [vmem:[#allocation2 + $0x1b0] sm:$0xff] }
 0x258   : > { %2285 = vst.msk [vmem:[#allocation2 + $0x168] sm:$0xff] %vm2239_vm1, %v2220_v37  ;;  %v564_v37 = vld [vmem:[#allocation2 + $0x1b8] sm:$0xff] }
 0x259   : > { %v1815_v38 = vpop.f32.mrb[92].mxu0  ;;  %v2104_v40 = vpop.f32.mrb[92].mxu1 }
 0x25a   : > { %v1817_v41 = vpop.f32.mrb[93].mxu0  ;;  %v2105_v42 = vadd.f32 %v2104_v40, %v1815_v38  ;;  %v2106_v43 = vpop.f32.mrb[93].mxu1 }
 0x25b   : > { %v1818_v44 = vpop.f32.mrb[94].mxu0  ;;  %v2107_v46 = vpop.f32.mrb[94].mxu1 }
 0x25c   : > { %v1820_v47 = vpop.f32.mrb[95].mxu0  ;;  %v2221_v48 = vadd.f32 %v2105_v42, %v555_v39  ;;  %v2108_v49 = vadd.f32 %v2107_v46, %v1818_v44  ;;  %v2109_v50 = vpop.f32.mrb[95].mxu1 }
 0x25e   : > { %2286 = vst.msk [vmem:[#allocation2 + $0x170] sm:$0xff] %vm2239_vm1, %v2221_v48  ;;  %v2222_v51 = vadd.f32 %v2108_v49, %v556_v45  ;;  %v565_v45 = vld [vmem:[#allocation2 + $0x1c0] sm:$0xff] }
 0x260   : > { %2287 = vst.msk [vmem:[#allocation2 + $0x178] sm:$0xff] %vm2239_vm1, %v2222_v51  ;;  %v566_v51 = vld [vmem:[#allocation2 + $0x1c8] sm:$0xff] }
 0x261   : > { %v1823_v52 = vpop.f32.mrb[96].mxu0  ;;  %v2112_v54 = vpop.f32.mrb[96].mxu1 }
 0x262   : > { %v1825_v55 = vpop.f32.mrb[97].mxu0  ;;  %v2113_v56 = vadd.f32 %v2112_v54, %v1823_v52  ;;  %v2114_v57 = vpop.f32.mrb[97].mxu1 }
 0x263   : > { %v1826_v58 = vpop.f32.mrb[98].mxu0  ;;  %v2115_v60 = vpop.f32.mrb[98].mxu1 }
 0x264   : > { %v1828_v61 = vpop.f32.mrb[99].mxu0  ;;  %v2223_v62 = vadd.f32 %v2113_v56, %v557_v53  ;;  %v2116_v63 = vadd.f32 %v2115_v60, %v1826_v58  ;;  %v2117_v0 = vpop.f32.mrb[99].mxu1 }
 0x266   : > { %2288 = vst.msk [vmem:[#allocation2 + $0x180] sm:$0xff] %vm2239_vm1, %v2223_v62  ;;  %v2224_v1 = vadd.f32 %v2116_v63, %v558_v59  ;;  %v567_v59 = vld [vmem:[#allocation2 + $0x1d0] sm:$0xff] }
 0x268   : > { %2289 = vst.msk [vmem:[#allocation2 + $0x188] sm:$0xff] %vm2239_vm1, %v2224_v1  ;;  %v568_v1 = vld [vmem:[#allocation2 + $0x1d8] sm:$0xff] }
 0x269   : > { %v1831_v2 = vpop.f32.mrb[100].mxu0  ;;  %v2120_v4 = vpop.f32.mrb[100].mxu1 }
 0x26a   : > { %v1833_v5 = vpop.f32.mrb[101].mxu0  ;;  %v2121_v6 = vadd.f32 %v2120_v4, %v1831_v2  ;;  %v2122_v7 = vpop.f32.mrb[101].mxu1 }
 0x26b   : > { %v1834_v8 = vpop.f32.mrb[102].mxu0  ;;  %v2123_v10 = vpop.f32.mrb[102].mxu1 }
 0x26c   : > { %v1836_v11 = vpop.f32.mrb[103].mxu0  ;;  %v2225_v12 = vadd.f32 %v2121_v6, %v559_v3  ;;  %v2124_v13 = vadd.f32 %v2123_v10, %v1834_v8  ;;  %v2125_v14 = vpop.f32.mrb[103].mxu1 }
 0x26e   : > { %2290 = vst.msk [vmem:[#allocation2 + $0x190] sm:$0xff] %vm2239_vm1, %v2225_v12  ;;  %v2226_v15 = vadd.f32 %v2124_v13, %v560_v9  ;;  %v569_v9 = vld [vmem:[#allocation2 + $0x1e0] sm:$0xff] }
 0x270   : > { %2291 = vst.msk [vmem:[#allocation2 + $0x198] sm:$0xff] %vm2239_vm1, %v2226_v15  ;;  %v570_v15 = vld [vmem:[#allocation2 + $0x1e8] sm:$0xff] }
 0x271   : > { %v1839_v16 = vpop.f32.mrb[104].mxu0  ;;  %v2128_v18 = vpop.f32.mrb[104].mxu1 }
 0x272   : > { %v1841_v19 = vpop.f32.mrb[105].mxu0  ;;  %v2129_v20 = vadd.f32 %v2128_v18, %v1839_v16  ;;  %v2130_v21 = vpop.f32.mrb[105].mxu1 }
 0x273   : > { %v1842_v22 = vpop.f32.mrb[106].mxu0  ;;  %v2131_v24 = vpop.f32.mrb[106].mxu1 }
 0x274   : > { %v1844_v25 = vpop.f32.mrb[107].mxu0  ;;  %v2227_v26 = vadd.f32 %v2129_v20, %v561_v17  ;;  %v2132_v27 = vadd.f32 %v2131_v24, %v1842_v22  ;;  %v2133_v28 = vpop.f32.mrb[107].mxu1 }
 0x276   : > { %2292 = vst.msk [vmem:[#allocation2 + $0x1a0] sm:$0xff] %vm2239_vm1, %v2227_v26  ;;  %v2228_v29 = vadd.f32 %v2132_v27, %v562_v23  ;;  %v571_v23 = vld [vmem:[#allocation2 + $0x1f0] sm:$0xff] }
 0x278   : > { %2293 = vst.msk [vmem:[#allocation2 + $0x1a8] sm:$0xff] %vm2239_vm1, %v2228_v29  ;;  %v572_v29 = vld [vmem:[#allocation2 + $0x1f8] sm:$0xff] }
 0x279   : > { %v1847_v30 = vpop.f32.mrb[108].mxu0  ;;  %v2136_v32 = vpop.f32.mrb[108].mxu1 }
 0x27a   : > { %v1849_v33 = vpop.f32.mrb[109].mxu0  ;;  %v2137_v34 = vadd.f32 %v2136_v32, %v1847_v30  ;;  %v2138_v35 = vpop.f32.mrb[109].mxu1 }
 0x27b   : > { %v1850_v36 = vpop.f32.mrb[110].mxu0  ;;  %v2139_v38 = vpop.f32.mrb[110].mxu1 }
 0x27c   : > { %v1852_v39 = vpop.f32.mrb[111].mxu0  ;;  %v2229_v40 = vadd.f32 %v2137_v34, %v563_v31  ;;  %v2140_v41 = vadd.f32 %v2139_v38, %v1850_v36  ;;  %v2141_v42 = vpop.f32.mrb[111].mxu1  ;;  %v2308_v36 = vld [vmem:[#allocation2] sm:$0xff] (!%p3508_p10)  ;;  %v2309_v38 = vld [vmem:[#allocation2 + $0x8] sm:$0xff] (!%p3508_p10) }
 0x27d   : > { %v2311_v42 = vld [vmem:[#allocation2 + $0x18] sm:$0xff] (!%p3508_p10) }
 0x27e   : > { %2294 = vst.msk [vmem:[#allocation2 + $0x1b0] sm:$0xff] %vm2239_vm1, %v2229_v40  ;;  %v2230_v43 = vadd.f32 %v2140_v41, %v564_v37  ;;  %v5002_v37 = vld [vmem:[%s5414_s2] ss:$0 sm:$0xff] (!%p3508_p10)  ;;  %v2310_v41 = vld [vmem:[#allocation2 + $0x10] sm:$0xff] (!%p3508_p10) }
 0x27f   : > { %v2379_v39 = vadd.f32 (!%p3508_p10), %v5002_v37, %v2308_v36  ;;  %v2380_v40 = vadd.f32 (!%p3508_p10), %v5002_v37, %v2309_v38 }
 0x280   : > { %2295 = vst.msk [vmem:[#allocation2 + $0x1b8] sm:$0xff] %vm2239_vm1, %v2230_v43  ;;  %v2312_v43 = vld [vmem:[#allocation2 + $0x20] sm:$0xff] (!%p3508_p10) }
 0x281   : > { %v1855_v44 = vpop.f32.mrb[112].mxu0  ;;  %v2144_v46 = vpop.f32.mrb[112].mxu1 }
 0x282   : > { %v1857_v47 = vpop.f32.mrb[113].mxu0  ;;  %v2145_v48 = vadd.f32 %v2144_v46, %v1855_v44  ;;  %v2146_v49 = vpop.f32.mrb[113].mxu1  ;;  %v2381_v44 = vadd.f32 (!%p3508_p10), %v5002_v37, %v2310_v41  ;;  %v2383_v46 = vadd.f32 (!%p3508_p10), %v5002_v37, %v2312_v43  ;;  %v2334_v41 = vld [vmem:[#allocation2 + $0xd0] sm:$0xff] (!%p3508_p10)  ;;  %v2336_v43 = vld [vmem:[#allocation2 + $0xe0] sm:$0xff] (!%p3508_p10) }
 0x283   : > { %v1858_v50 = vpop.f32.mrb[114].mxu0  ;;  %v2147_v52 = vpop.f32.mrb[114].mxu1  ;;  %v2313_v47 = vld [vmem:[#allocation2 + $0x28] sm:$0xff] (!%p3508_p10)  ;;  %v2315_v49 = vld [vmem:[#allocation2 + $0x38] sm:$0xff] (!%p3508_p10) }
 0x284   : > { %v1860_v53 = vpop.f32.mrb[115].mxu0  ;;  %v2231_v54 = vadd.f32 %v2145_v48, %v565_v45  ;;  %v2148_v55 = vadd.f32 %v2147_v52, %v1858_v50  ;;  %v2149_v56 = vpop.f32.mrb[115].mxu1  ;;  %v2382_v45 = vadd.f32 (!%p3508_p10), %v5002_v37, %v2311_v42  ;;  %v2314_v48 = vld [vmem:[#allocation2 + $0x30] sm:$0xff] (!%p3508_p10)  ;;  %v3595_v50 = vpack.c.bf16 (!%p3508_p10), %v2379_v39, %v2379_v39  ;;  %v2335_v42 = vld [vmem:[#allocation2 + $0xd8] sm:$0xff] (!%p3508_p10) }
 0x285   : > { %v2384_v52 = vadd.f32 (!%p3508_p10), %v5002_v37, %v2313_v47  ;;  %v2385_v53 = vadd.f32 (!%p3508_p10), %v5002_v37, %v2314_v48  ;;  %v2318_v56 = vld [vmem:[#allocation2 + $0x50] sm:$0xff] (!%p3508_p10)  ;;  %v2337_v48 = vld [vmem:[#allocation2 + $0xe8] sm:$0xff] (!%p3508_p10) }
 0x286   : > { %2296 = vst.msk [vmem:[#allocation2 + $0x1c0] sm:$0xff] %vm2239_vm1, %v2231_v54  ;;  %v2232_v57 = vadd.f32 %v2148_v55, %v566_v51  ;;  %v3596_v51 = vpack.c.bf16 (!%p3508_p10), %v2380_v40, %v2380_v40  ;;  %v2316_v54 = vld [vmem:[#allocation2 + $0x40] sm:$0xff] (!%p3508_p10)  ;;  %v2317_v55 = vld [vmem:[#allocation2 + $0x48] sm:$0xff] (!%p3508_p10) }
 0x287   : > { %2700 = vst.msk [vmem:[%s4611_s8] sm:$0xf] (!%p3508_p10), %vm2699_vm2, %v3595_v50 }
 0x288   : > { %2297 = vst.msk [vmem:[#allocation2 + $0x1c8] sm:$0xff] %vm2239_vm1, %v2232_v57  ;;  %v3597_v57 = vpack.c.bf16 (!%p3508_p10), %v2381_v44, %v2381_v44 }
 0x289   : > { %v1863_v58 = vpop.f32.mrb[116].mxu0  ;;  %v2152_v60 = vpop.f32.mrb[116].mxu1  ;;  %2701 = vst.msk [vmem:[%s4611_s8 + $0x4] sm:$0xf] (!%p3508_p10), %vm2699_vm2, %v3596_v51 }
 0x28a   : > { %v1865_v61 = vpop.f32.mrb[117].mxu0  ;;  %v2153_v62 = vadd.f32 %v2152_v60, %v1863_v58  ;;  %v2154_v63 = vpop.f32.mrb[117].mxu1  ;;  %v3598_v58 = vpack.c.bf16 (!%p3508_p10), %v2382_v45, %v2382_v45  ;;  %v2386_v60 = vadd.f32 (!%p3508_p10), %v5002_v37, %v2315_v49  ;;  %2702 = vst.msk [vmem:[%s4611_s8 + $0x8] sm:$0xf] (!%p3508_p10), %vm2699_vm2, %v3597_v57  ;;  %v2338_v49 = vld [vmem:[#allocation2 + $0xf0] sm:$0xff] (!%p3508_p10)  ;;  %v2406_v57 = vadd.f32 (!%p3508_p10), %v5002_v37, %v2335_v42 }
 0x28b   : > { %v1866_v0 = vpop.f32.mrb[118].mxu0  ;;  %v2155_v2 = vpop.f32.mrb[118].mxu1  ;;  %v2319_v61 = vld [vmem:[#allocation2 + $0x58] sm:$0xff] (!%p3508_p10)  ;;  %v2321_v63 = vld [vmem:[#allocation2 + $0x68] sm:$0xff] (!%p3508_p10) }
 0x28c   : > { %v1868_v3 = vpop.f32.mrb[119].mxu0  ;;  %v2233_v4 = vadd.f32 %v2153_v62, %v567_v59  ;;  %v2156_v5 = vadd.f32 %v2155_v2, %v1866_v0  ;;  %v2157_v6 = vpop.f32.mrb[119].mxu1  ;;  %v3599_v59 = vpack.c.bf16 (!%p3508_p10), %v2383_v46, %v2383_v46  ;;  %v2320_v62 = vld [vmem:[#allocation2 + $0x60] sm:$0xff] (!%p3508_p10)  ;;  %v3600_v0 = vpack.c.bf16 (!%p3508_p10), %v2384_v52, %v2384_v52  ;;  %2703 = vst.msk [vmem:[%s4611_s8 + $0xc] sm:$0xf] (!%p3508_p10), %vm2699_vm2, %v3598_v58 }
 0x28d   : > { %v2387_v2 = vadd.f32 (!%p3508_p10), %v5002_v37, %v2316_v54  ;;  %v2388_v3 = vadd.f32 (!%p3508_p10), %v5002_v37, %v2317_v55  ;;  %v3602_v6 = vpack.c.bf16 (!%p3508_p10), %v2386_v60, %v2386_v60  ;;  %v2339_v54 = vld [vmem:[#allocation2 + $0xf8] sm:$0xff] (!%p3508_p10)  ;;  %v2407_v58 = vadd.f32 (!%p3508_p10), %v5002_v37, %v2336_v43  ;;  %v2341_v60 = vld [vmem:[#allocation2 + $0x108] sm:$0xff] (!%p3508_p10) }
 0x28e   : > { %2298 = vst.msk [vmem:[#allocation2 + $0x1d0] sm:$0xff] %vm2239_vm1, %v2233_v4  ;;  %v2234_v7 = vadd.f32 %v2156_v5, %v568_v1  ;;  %v3601_v1 = vpack.c.bf16 (!%p3508_p10), %v2385_v53, %v2385_v53  ;;  %v2322_v4 = vld [vmem:[#allocation2 + $0x70] sm:$0xff] (!%p3508_p10)  ;;  %v2323_v5 = vld [vmem:[#allocation2 + $0x78] sm:$0xff] (!%p3508_p10) }
 0x28f   : > { %2704 = vst.msk [vmem:[%s4611_s8 + $0x10] sm:$0xf] (!%p3508_p10), %vm2699_vm2, %v3599_v59  ;;  %2705 = vst.msk [vmem:[%s4611_s8 + $0x14] sm:$0xf] (!%p3508_p10), %vm2699_vm2, %v3600_v0  ;;  %v2340_v59 = vld [vmem:[#allocation2 + $0x100] sm:$0xff] (!%p3508_p10)  ;;  %v2409_v0 = vadd.f32 (!%p3508_p10), %v5002_v37, %v2338_v49 }
 0x290   : > { %2299 = vst.msk [vmem:[#allocation2 + $0x1d8] sm:$0xff] %vm2239_vm1, %v2234_v7  ;;  %v2389_v7 = vadd.f32 (!%p3508_p10), %v5002_v37, %v2318_v56  ;;  %v2405_v56 = vadd.f32 (!%p3508_p10), %v5002_v37, %v2334_v41 }
 0x291   : > { %v1871_v8 = vpop.f32.mrb[120].mxu0  ;;  %v2160_v10 = vpop.f32.mrb[120].mxu1  ;;  %2706 = vst.msk [vmem:[%s4611_s8 + $0x18] sm:$0xf] (!%p3508_p10), %vm2699_vm2, %v3601_v1  ;;  %2707 = vst.msk [vmem:[%s4611_s8 + $0x1c] sm:$0xf] (!%p3508_p10), %vm2699_vm2, %v3602_v6  ;;  %v3623_v6 = vpack.c.bf16 (!%p3508_p10), %v2407_v58, %v2407_v58 }
 0x292   : > { %v1873_v11 = vpop.f32.mrb[121].mxu0  ;;  %v2161_v12 = vadd.f32 %v2160_v10, %v1871_v8  ;;  %v2162_v13 = vpop.f32.mrb[121].mxu1  ;;  %v2390_v8 = vadd.f32 (!%p3508_p10), %v5002_v37, %v2319_v61  ;;  %v2324_v10 = vld [vmem:[#allocation2 + $0x80] sm:$0xff] (!%p3508_p10)  ;;  %v2342_v1 = vld [vmem:[#allocation2 + $0x110] sm:$0xff] (!%p3508_p10) }
 0x293   : > { %v1874_v14 = vpop.f32.mrb[122].mxu0  ;;  %v2163_v16 = vpop.f32.mrb[122].mxu1  ;;  %v2325_v11 = vld [vmem:[#allocation2 + $0x88] sm:$0xff] (!%p3508_p10)  ;;  %v3604_v13 = vpack.c.bf16 (!%p3508_p10), %v2388_v3, %v2388_v3  ;;  %v2344_v3 = vld [vmem:[#allocation2 + $0x120] sm:$0xff] (!%p3508_p10)  ;;  %2728 = vst.msk [vmem:[%s4611_s8 + $0x70] sm:$0xf] (!%p3508_p10), %vm2699_vm2, %v3623_v6 }
 0x294   : > { %v1876_v17 = vpop.f32.mrb[123].mxu0  ;;  %v2235_v18 = vadd.f32 %v2161_v12, %v569_v9  ;;  %v2164_v19 = vadd.f32 %v2163_v16, %v1874_v14  ;;  %v2165_v20 = vpop.f32.mrb[123].mxu1  ;;  %v2391_v9 = vadd.f32 (!%p3508_p10), %v5002_v37, %v2320_v62  ;;  %v3603_v12 = vpack.c.bf16 (!%p3508_p10), %v2387_v2, %v2387_v2  ;;  %v2326_v16 = vld [vmem:[#allocation2 + $0x90] sm:$0xff] (!%p3508_p10)  ;;  %v2343_v2 = vld [vmem:[#allocation2 + $0x118] sm:$0xff] (!%p3508_p10) }
 0x295   : > { %v2392_v14 = vadd.f32 (!%p3508_p10), %v5002_v37, %v2321_v63  ;;  %v2327_v17 = vld [vmem:[#allocation2 + $0x98] sm:$0xff] (!%p3508_p10)  ;;  %v3606_v20 = vpack.c.bf16 (!%p3508_p10), %v2390_v8, %v2390_v8  ;;  %2709 = vst.msk [vmem:[%s4611_s8 + $0x24] sm:$0xf] (!%p3508_p10), %vm2699_vm2, %v3604_v13  ;;  %v2408_v63 = vadd.f32 (!%p3508_p10), %v5002_v37, %v2337_v48  ;;  %v2345_v8 = vld [vmem:[#allocation2 + $0x128] sm:$0xff] (!%p3508_p10)  ;;  %v2412_v13 = vadd.f32 (!%p3508_p10), %v5002_v37, %v2341_v60  ;;  %v2362_v58 = vld [vmem:[#allocation2 + $0x1b0] sm:$0xff] (!%p3508_p10) }
 0x296   : > { %2300 = vst.msk [vmem:[#allocation2 + $0x1e0] sm:$0xff] %vm2239_vm1, %v2235_v18  ;;  %v2236_v21 = vadd.f32 %v2164_v19, %v570_v15  ;;  %v2393_v15 = vadd.f32 (!%p3508_p10), %v5002_v37, %v2322_v4  ;;  %v2328_v18 = vld [vmem:[#allocation2 + $0xa0] sm:$0xff] (!%p3508_p10)  ;;  %v3605_v19 = vpack.c.bf16 (!%p3508_p10), %v2389_v7, %v2389_v7  ;;  %v3621_v4 = vpack.c.bf16 (!%p3508_p10), %v2405_v56, %v2405_v56 }
 0x297   : > { %2708 = vst.msk [vmem:[%s4611_s8 + $0x20] sm:$0xf] (!%p3508_p10), %vm2699_vm2, %v3603_v12  ;;  %2711 = vst.msk [vmem:[%s4611_s8 + $0x2c] sm:$0xf] (!%p3508_p10), %vm2699_vm2, %v3606_v20  ;;  %v2410_v7 = vadd.f32 (!%p3508_p10), %v5002_v37, %v2339_v54  ;;  %v2411_v12 = vadd.f32 (!%p3508_p10), %v5002_v37, %v2340_v59  ;;  %v2349_v20 = vld [vmem:[#allocation2 + $0x148] sm:$0xff] (!%p3508_p10) }
 0x298   : > { %2301 = vst.msk [vmem:[#allocation2 + $0x1e8] sm:$0xff] %vm2239_vm1, %v2236_v21  ;;  %v3607_v21 = vpack.c.bf16 (!%p3508_p10), %v2391_v9, %v2391_v9  ;;  %v2346_v9 = vld [vmem:[#allocation2 + $0x130] sm:$0xff] (!%p3508_p10) }
 0x299   : > { %v1879_v22 = vpop.f32.mrb[124].mxu0  ;;  %v2168_v24 = vpop.f32.mrb[124].mxu1  ;;  %2710 = vst.msk [vmem:[%s4611_s8 + $0x28] sm:$0xf] (!%p3508_p10), %vm2699_vm2, %v3605_v19  ;;  %2726 = vst.msk [vmem:[%s4611_s8 + $0x68] sm:$0xf] (!%p3508_p10), %vm2699_vm2, %v3621_v4 }
 0x29a   : > { %v1881_v25 = vpop.f32.mrb[125].mxu0  ;;  %v2169_v26 = vadd.f32 %v2168_v24, %v1879_v22  ;;  %v2170_v27 = vpop.f32.mrb[125].mxu1  ;;  %2307 = sbr.rel (%p3508_p10) target bundleno = 698 (0x2ba), region = 70  ;;  %v2394_v22 = vadd.f32 (!%p3508_p10), %v5002_v37, %v2323_v5  ;;  %v2330_v24 = vld [vmem:[#allocation2 + $0xb0] sm:$0xff] (!%p3508_p10)  ;;  %2712 = vst.msk [vmem:[%s4611_s8 + $0x30] sm:$0xf] (!%p3508_p10), %vm2699_vm2, %v3607_v21  ;;  %v3622_v5 = vpack.c.bf16 (!%p3508_p10), %v2406_v57, %v2406_v57  ;;  %v3627_v21 = vpack.c.bf16 (!%p3508_p10), %v2411_v12, %v2411_v12 }
 0x29b   : > { %v1882_v28 = vpop.f32.mrb[126].mxu0  ;;  %v2171_v30 = vpop.f32.mrb[126].mxu1  ;;  %v3608_v25 = vpack.c.bf16 (!%p3508_p10), %v2392_v14, %v2392_v14  ;;  %v2395_v27 = vadd.f32 (!%p3508_p10), %v5002_v37, %v2324_v10  ;;  %v2401_v40 = vadd.f32 (!%p3508_p10), %v5002_v37, %v2330_v24  ;;  %v3624_v10 = vpack.c.bf16 (!%p3508_p10), %v2408_v63, %v2408_v63  ;;  %v2347_v14 = vld [vmem:[#allocation2 + $0x138] sm:$0xff] (!%p3508_p10)  ;;  %v2348_v19 = vld [vmem:[#allocation2 + $0x140] sm:$0xff] (!%p3508_p10)  ;;  %v2361_v57 = vld [vmem:[#allocation2 + $0x1a8] sm:$0xff] (!%p3508_p10) }
 0x29c   : > { %v1884_v31 = vpop.f32.mrb[127].mxu0  ;;  %v2237_v32 = vadd.f32 %v2169_v26, %v571_v23  ;;  %v2172_v33 = vadd.f32 %v2171_v30, %v1882_v28  ;;  %v2173_v34 = vpop.f32.mrb[127].mxu1  ;;  %v2329_v23 = vld [vmem:[#allocation2 + $0xa8] sm:$0xff] (!%p3508_p10)  ;;  %v3609_v26 = vpack.c.bf16 (!%p3508_p10), %v2393_v15, %v2393_v15  ;;  %v2396_v28 = vadd.f32 (!%p3508_p10), %v5002_v37, %v2325_v11  ;;  %2727 = vst.msk [vmem:[%s4611_s8 + $0x6c] sm:$0xf] (!%p3508_p10), %vm2699_vm2, %v3622_v5  ;;  %v2363_v63 = vld [vmem:[#allocation2 + $0x1b8] sm:$0xff] (!%p3508_p10) }
 0x29d   : > { %v3610_v30 = vpack.c.bf16 (!%p3508_p10), %v2394_v22, %v2394_v22  ;;  %v2397_v31 = vadd.f32 (!%p3508_p10), %v5002_v37, %v2326_v16  ;;  %v2332_v34 = vld [vmem:[#allocation2 + $0xc0] sm:$0xff] (!%p3508_p10)  ;;  %2713 = vst.msk [vmem:[%s4611_s8 + $0x34] sm:$0xf] (!%p3508_p10), %vm2699_vm2, %v3608_v25  ;;  %v3611_v36 = vpack.c.bf16 (!%p3508_p10), %v2395_v27, %v2395_v27  ;;  %v2400_v39 = vadd.f32 (!%p3508_p10), %v5002_v37, %v2329_v23  ;;  %v2350_v25 = vld [vmem:[#allocation2 + $0x150] sm:$0xff] (!%p3508_p10)  ;;  %v2365_v5 = vld [vmem:[#allocation2 + $0x1c8] sm:$0xff] (!%p3508_p10) }
 0x29e   : > { %2302 = vst.msk [vmem:[#allocation2 + $0x1f0] sm:$0xff] %vm2239_vm1, %v2237_v32  ;;  %v2238_v35 = vadd.f32 %v2172_v33, %v572_v29  ;;  %v2331_v29 = vld [vmem:[#allocation2 + $0xb8] sm:$0xff] (!%p3508_p10)  ;;  %v2398_v32 = vadd.f32 (!%p3508_p10), %v5002_v37, %v2327_v17  ;;  %v2399_v33 = vadd.f32 (!%p3508_p10), %v5002_v37, %v2328_v18  ;;  %v3612_v38 = vpack.c.bf16 (!%p3508_p10), %v2396_v28, %v2396_v28  ;;  %v2352_v27 = vld [vmem:[#allocation2 + $0x160] sm:$0xff] (!%p3508_p10) }
 0x29f   : > { %2714 = vst.msk [vmem:[%s4611_s8 + $0x38] sm:$0xf] (!%p3508_p10), %vm2699_vm2, %v3609_v26  ;;  %2715 = vst.msk [vmem:[%s4611_s8 + $0x3c] sm:$0xf] (!%p3508_p10), %vm2699_vm2, %v3610_v30  ;;  %v3613_v44 = vpack.c.bf16 (!%p3508_p10), %v2397_v31, %v2397_v31  ;;  %v2402_v47 = vadd.f32 (!%p3508_p10), %v5002_v37, %v2331_v29  ;;  %v3616_v50 = vpack.c.bf16 (!%p3508_p10), %v2400_v39, %v2400_v39  ;;  %v2351_v26 = vld [vmem:[#allocation2 + $0x158] sm:$0xff] (!%p3508_p10)  ;;  %v2364_v4 = vld [vmem:[#allocation2 + $0x1c0] sm:$0xff] (!%p3508_p10) }
 0x2a0   : > { %2303 = vst.msk [vmem:[#allocation2 + $0x1f8] sm:$0xff] %vm2239_vm1, %v2238_v35  ;;  %v2333_v35 = vld [vmem:[#allocation2 + $0xc8] sm:$0xff] (!%p3508_p10)  ;;  %v3614_v45 = vpack.c.bf16 (!%p3508_p10), %v2398_v32, %v2398_v32  ;;  %v3615_v46 = vpack.c.bf16 (!%p3508_p10), %v2399_v33, %v2399_v33  ;;  %v3617_v51 = vpack.c.bf16 (!%p3508_p10), %v2401_v40, %v2401_v40  ;;  %v2403_v52 = vadd.f32 (!%p3508_p10), %v5002_v37, %v2332_v34  ;;  %v2354_v33 = vld [vmem:[#allocation2 + $0x170] sm:$0xff] (!%p3508_p10)  ;;  %v2355_v39 = vld [vmem:[#allocation2 + $0x178] sm:$0xff] (!%p3508_p10) }
 0x2a1   : > { %2716 = vst.msk [vmem:[%s4611_s8 + $0x40] sm:$0xf] %vm2699_vm2, %v3611_v36  ;;  %2717 = vst.msk [vmem:[%s4611_s8 + $0x44] sm:$0xf] %vm2699_vm2, %v3612_v38  ;;  %v2404_v53 = vadd.f32 %v5002_v37, %v2333_v35  ;;  %v3618_v55 = vpack.c.bf16 %v2402_v47, %v2402_v47  ;;  %v3625_v11 = vpack.c.bf16 %v2409_v0, %v2409_v0  ;;  %v2353_v32 = vld [vmem:[#allocation2 + $0x168] sm:$0xff]  ;;  %v2368_v12 = vld [vmem:[#allocation2 + $0x1e0] sm:$0xff] }
 0x2a2   : > { %2718 = vst.msk [vmem:[%s4611_s8 + $0x48] sm:$0xf] %vm2699_vm2, %v3613_v44  ;;  %2719 = vst.msk [vmem:[%s4611_s8 + $0x4c] sm:$0xf] %vm2699_vm2, %v3614_v45  ;;  %v3619_v61 = vpack.c.bf16 %v2403_v52, %v2403_v52  ;;  %v3626_v15 = vpack.c.bf16 %v2410_v7, %v2410_v7  ;;  %v2413_v16 = vadd.f32 %v5002_v37, %v2342_v1  ;;  %v2356_v44 = vld [vmem:[#allocation2 + $0x180] sm:$0xff]  ;;  %v2357_v45 = vld [vmem:[#allocation2 + $0x188] sm:$0xff] }
 0x2a3   : > { %2720 = vst.msk [vmem:[%s4611_s8 + $0x50] sm:$0xf] %vm2699_vm2, %v3615_v46  ;;  %2721 = vst.msk [vmem:[%s4611_s8 + $0x54] sm:$0xf] %vm2699_vm2, %v3616_v50  ;;  %v3620_v62 = vpack.c.bf16 %v2404_v53, %v2404_v53  ;;  %v2414_v17 = vadd.f32 %v5002_v37, %v2343_v2  ;;  %v2415_v18 = vadd.f32 %v5002_v37, %v2344_v3  ;;  %v2358_v50 = vld [vmem:[#allocation2 + $0x190] sm:$0xff]  ;;  %v2360_v52 = vld [vmem:[#allocation2 + $0x1a0] sm:$0xff] }
 0x2a4   : > { %2722 = vst.msk [vmem:[%s4611_s8 + $0x58] sm:$0xf] %vm2699_vm2, %v3617_v51  ;;  %2723 = vst.msk [vmem:[%s4611_s8 + $0x5c] sm:$0xf] %vm2699_vm2, %v3618_v55  ;;  %v3628_v22 = vpack.c.bf16 %v2412_v13, %v2412_v13  ;;  %v2416_v23 = vadd.f32 %v5002_v37, %v2345_v8  ;;  %v2417_v24 = vadd.f32 %v5002_v37, %v2346_v9  ;;  %v2359_v51 = vld [vmem:[#allocation2 + $0x198] sm:$0xff] }
 0x2a5   : > { %2724 = vst.msk [vmem:[%s4611_s8 + $0x60] sm:$0xf] %vm2699_vm2, %v3619_v61  ;;  %2725 = vst.msk [vmem:[%s4611_s8 + $0x64] sm:$0xf] %vm2699_vm2, %v3620_v62  ;;  %v3629_v28 = vpack.c.bf16 %v2413_v16, %v2413_v16  ;;  %v3630_v29 = vpack.c.bf16 %v2414_v17, %v2414_v17  ;;  %v3631_v30 = vpack.c.bf16 %v2415_v18, %v2415_v18  ;;  %v2369_v17 = vld [vmem:[#allocation2 + $0x1e8] sm:$0xff]  ;;  %v2370_v18 = vld [vmem:[#allocation2 + $0x1f0] sm:$0xff] }
 0x2a6   : > { %2729 = vst.msk [vmem:[%s4611_s8 + $0x74] sm:$0xf] %vm2699_vm2, %v3624_v10  ;;  %2730 = vst.msk [vmem:[%s4611_s8 + $0x78] sm:$0xf] %vm2699_vm2, %v3625_v11  ;;  %v2418_v31 = vadd.f32 %v5002_v37, %v2347_v14  ;;  %v3632_v34 = vpack.c.bf16 %v2416_v23, %v2416_v23  ;;  %v3633_v35 = vpack.c.bf16 %v2417_v24, %v2417_v24  ;;  %v2366_v10 = vld [vmem:[#allocation2 + $0x1d0] sm:$0xff]  ;;  %v2367_v11 = vld [vmem:[#allocation2 + $0x1d8] sm:$0xff] }
 0x2a7   : > { %2731 = vst.msk [vmem:[%s4611_s8 + $0x7c] sm:$0xf] %vm2699_vm2, %v3626_v15  ;;  %2732 = vst.msk [vmem:[%s4611_s8 + $0x80] sm:$0xf] %vm2699_vm2, %v3627_v21  ;;  %v2419_v36 = vadd.f32 %v5002_v37, %v2348_v19  ;;  %v2420_v38 = vadd.f32 %v5002_v37, %v2349_v20  ;;  %v2421_v41 = vadd.f32 %v5002_v37, %v2350_v25  ;;  %v2371_v23 = vld [vmem:[#allocation2 + $0x1f8] sm:$0xff] }
 0x2a8   : > { %2733 = vst.msk [vmem:[%s4611_s8 + $0x84] sm:$0xf] %vm2699_vm2, %v3628_v22  ;;  %2734 = vst.msk [vmem:[%s4611_s8 + $0x88] sm:$0xf] %vm2699_vm2, %v3629_v28  ;;  %v3634_v40 = vpack.c.bf16 %v2418_v31, %v2418_v31  ;;  %v2422_v42 = vadd.f32 %v5002_v37, %v2351_v26  ;;  %v2423_v43 = vadd.f32 %v5002_v37, %v2352_v27 }
 0x2a9   : > { %2735 = vst.msk [vmem:[%s4611_s8 + $0x8c] sm:$0xf] %vm2699_vm2, %v3630_v29  ;;  %2736 = vst.msk [vmem:[%s4611_s8 + $0x90] sm:$0xf] %vm2699_vm2, %v3631_v30  ;;  %v3635_v46 = vpack.c.bf16 %v2419_v36, %v2419_v36  ;;  %v3636_v47 = vpack.c.bf16 %v2420_v38, %v2420_v38  ;;  %v2424_v48 = vadd.f32 %v5002_v37, %v2353_v32 }
 0x2aa   : > { %2737 = vst.msk [vmem:[%s4611_s8 + $0x94] sm:$0xf] %vm2699_vm2, %v3632_v34  ;;  %2738 = vst.msk [vmem:[%s4611_s8 + $0x98] sm:$0xf] %vm2699_vm2, %v3633_v35  ;;  %v2425_v49 = vadd.f32 %v5002_v37, %v2354_v33  ;;  %v3637_v53 = vpack.c.bf16 %v2421_v41, %v2421_v41  ;;  %v3638_v54 = vpack.c.bf16 %v2422_v42, %v2422_v42 }
 0x2ab   : > { %2739 = vst.msk [vmem:[%s4611_s8 + $0x9c] sm:$0xf] %vm2699_vm2, %v3634_v40  ;;  %v3639_v55 = vpack.c.bf16 %v2423_v43, %v2423_v43  ;;  %v2426_v56 = vadd.f32 %v5002_v37, %v2355_v39  ;;  %2740 = vst.msk [vmem:[%s4611_s8 + $0xa0] sm:$0xf] %vm2699_vm2, %v3635_v46  ;;  %v3640_v59 = vpack.c.bf16 %v2424_v48, %v2424_v48 }
 0x2ac   : > { %2741 = vst.msk [vmem:[%s4611_s8 + $0xa4] sm:$0xf] %vm2699_vm2, %v3636_v47  ;;  %v3641_v60 = vpack.c.bf16 %v2425_v49, %v2425_v49  ;;  %v2427_v61 = vadd.f32 %v5002_v37, %v2356_v44  ;;  %v2428_v62 = vadd.f32 %v5002_v37, %v2357_v45  ;;  %2742 = vst.msk [vmem:[%s4611_s8 + $0xa8] sm:$0xf] %vm2699_vm2, %v3637_v53 }
 0x2ad   : > { %2743 = vst.msk [vmem:[%s4611_s8 + $0xac] sm:$0xf] %vm2699_vm2, %v3638_v54  ;;  %2744 = vst.msk [vmem:[%s4611_s8 + $0xb0] sm:$0xf] %vm2699_vm2, %v3639_v55  ;;  %v3642_v0 = vpack.c.bf16 %v2426_v56, %v2426_v56  ;;  %v2429_v1 = vadd.f32 %v5002_v37, %v2358_v50  ;;  %v2430_v2 = vadd.f32 %v5002_v37, %v2359_v51 }
 0x2ae   : > { %v2431_v3 = vadd.f32 %v5002_v37, %v2360_v52  ;;  %2745 = vst.msk [vmem:[%s4611_s8 + $0xb4] sm:$0xf] %vm2699_vm2, %v3640_v59  ;;  %2746 = vst.msk [vmem:[%s4611_s8 + $0xb8] sm:$0xf] %vm2699_vm2, %v3641_v60  ;;  %v3643_v6 = vpack.c.bf16 %v2427_v61, %v2427_v61  ;;  %v3644_v7 = vpack.c.bf16 %v2428_v62, %v2428_v62 }
 0x2af   : > { %v2432_v8 = vadd.f32 %v5002_v37, %v2361_v57  ;;  %v2433_v9 = vadd.f32 %v5002_v37, %v2362_v58  ;;  %2747 = vst.msk [vmem:[%s4611_s8 + $0xbc] sm:$0xf] %vm2699_vm2, %v3642_v0  ;;  %v3645_v13 = vpack.c.bf16 %v2429_v1, %v2429_v1  ;;  %v3646_v14 = vpack.c.bf16 %v2430_v2, %v2430_v2 }
 0x2b0   : > { %v3647_v15 = vpack.c.bf16 %v2431_v3, %v2431_v3  ;;  %v2434_v16 = vadd.f32 %v5002_v37, %v2363_v63  ;;  %2748 = vst.msk [vmem:[%s4611_s8 + $0xc0] sm:$0xf] %vm2699_vm2, %v3643_v6  ;;  %2749 = vst.msk [vmem:[%s4611_s8 + $0xc4] sm:$0xf] %vm2699_vm2, %v3644_v7  ;;  %v2435_v21 = vadd.f32 %v5002_v37, %v2364_v4 }
 0x2b1   : > { %v3648_v19 = vpack.c.bf16 %v2432_v8, %v2432_v8  ;;  %v3649_v20 = vpack.c.bf16 %v2433_v9, %v2433_v9  ;;  %v2436_v22 = vadd.f32 %v5002_v37, %v2365_v5  ;;  %2750 = vst.msk [vmem:[%s4611_s8 + $0xc8] sm:$0xf] %vm2699_vm2, %v3645_v13  ;;  %2751 = vst.msk [vmem:[%s4611_s8 + $0xcc] sm:$0xf] %vm2699_vm2, %v3646_v14 }
 0x2b2   : > { %2752 = vst.msk [vmem:[%s4611_s8 + $0xd0] sm:$0xf] %vm2699_vm2, %v3647_v15  ;;  %v3650_v24 = vpack.c.bf16 %v2434_v16, %v2434_v16  ;;  %v2437_v25 = vadd.f32 %v5002_v37, %v2366_v10  ;;  %v2438_v26 = vadd.f32 %v5002_v37, %v2367_v11  ;;  %v2439_v27 = vadd.f32 %v5002_v37, %v2368_v12 }
 0x2b3   : > { %2753 = vst.msk [vmem:[%s4611_s8 + $0xd4] sm:$0xf] %vm2699_vm2, %v3648_v19  ;;  %2754 = vst.msk [vmem:[%s4611_s8 + $0xd8] sm:$0xf] %vm2699_vm2, %v3649_v20  ;;  %v3651_v28 = vpack.c.bf16 %v2435_v21, %v2435_v21  ;;  %v3652_v29 = vpack.c.bf16 %v2436_v22, %v2436_v22  ;;  %v2440_v30 = vadd.f32 %v5002_v37, %v2369_v17 }
 0x2b4   : > { %v2441_v31 = vadd.f32 %v5002_v37, %v2370_v18  ;;  %2755 = vst.msk [vmem:[%s4611_s8 + $0xdc] sm:$0xf] %vm2699_vm2, %v3650_v24  ;;  %v3653_v32 = vpack.c.bf16 %v2437_v25, %v2437_v25  ;;  %v3654_v33 = vpack.c.bf16 %v2438_v26, %v2438_v26  ;;  %v3655_v34 = vpack.c.bf16 %v2439_v27, %v2439_v27 }
 0x2b5   : > { %v2442_v35 = vadd.f32 %v5002_v37, %v2371_v23  ;;  %2756 = vst.msk [vmem:[%s4611_s8 + $0xe0] sm:$0xf] %vm2699_vm2, %v3651_v28  ;;  %2757 = vst.msk [vmem:[%s4611_s8 + $0xe4] sm:$0xf] %vm2699_vm2, %v3652_v29  ;;  %v3656_v36 = vpack.c.bf16 %v2440_v30, %v2440_v30 }
 0x2b6   : > { %v3657_v38 = vpack.c.bf16 %v2441_v31, %v2441_v31  ;;  %2758 = vst.msk [vmem:[%s4611_s8 + $0xe8] sm:$0xf] %vm2699_vm2, %v3653_v32  ;;  %2759 = vst.msk [vmem:[%s4611_s8 + $0xec] sm:$0xf] %vm2699_vm2, %v3654_v33 }
 0x2b7   : > { %2760 = vst.msk [vmem:[%s4611_s8 + $0xf0] sm:$0xf] %vm2699_vm2, %v3655_v34  ;;  %v3658_v39 = vpack.c.bf16 %v2442_v35, %v2442_v35  ;;  %2761 = vst.msk [vmem:[%s4611_s8 + $0xf4] sm:$0xf] %vm2699_vm2, %v3656_v36 }
 0x2b8   : > { %2762 = vst.msk [vmem:[%s4611_s8 + $0xf8] sm:$0xf] %vm2699_vm2, %v3657_v38 }
 0x2b9   : > { %2763 = vst.msk [vmem:[%s4611_s8 + $0xfc] sm:$0xf] %vm2699_vm2, %v3658_v39 }
 0x2ba PF: > { %2770 = sbr.rel (!%p4379_p9) target bundleno = 796 (0x31c), region = 74  ;;  %s3575_s16 = sshll.u32 (%p4379_p9), %s4211_s17, 6 }
 0x2bb   : > { %s3659_s7 = sshll.u32 (%p4379_p9), %s4211_s17, 8  ;;  %s2772_s9 = ssub.s32 (%p4379_p9), 225, %s3575_s16 }
 0x2bc   : > { %s5203_s28 = scalar_lea.vmem (%p4379_p9), %s5415_s3, %s3659_s7   ;;  %p2773_p11 = scmp.lt.s32.totalorder (%p4379_p9), %s2772_s9, 64 }
 0x2c1   : > { %s5457_s9 = smov (!%p2773_p11, %s2772_s9), 64 }
 0x2c2   : > { %s3576_s29 = sshll.u32 %s5457_s9, 6 }
 0x2c3   : > { %p3579_p12 = scmp.eq.s32.totalorder %s3576_s29, 0 }
 0x2c4   : > { %s5209_s30 = sshrl.u32 (!%p3579_p12), %s5457_s9, 6 }
 0x2c5   : > { %2782 = sbr.rel (%p3579_p12) target bundleno = 796 (0x31c), region = 78  ;;  %p3580_p9 = scmp.le.s32.totalorder (!%p3579_p12), %s5209_s30, 0 }
 0x2cc   : > { %3246 = sbr.rel (%p3580_p9) target bundleno = 775 (0x307), region = 185  ;;  %s5429_s17 = smov (!%p3580_p9), %s5203_s28 }
 0x2cd   : > { %s5430_s6 = smov (!%p3580_p9), %s4611_s8  ;;  %s5218_s11 = smov (!%p3580_p9), 0  }
 0x2ce   : > { %s5220_s27 = smov (!%p3580_p9), 0  }
 0x2d3 LB: >> { %v2798_v37 = vld [vmem:[%s4263_s6] sm:$0xf]  ;;  %v2800_v40 = vld [vmem:[%s4263_s6 + $0x4] sm:$0xf]  ;;  %v2802_v41 = vld [vmem:[%s4263_s6 + $0x8] sm:$0xf]  ;;  %s4271_s27 = sphi %s5220_s27, %s2792_s27   ;;  %s4267_s11 = sphi %s5218_s11, %s5431_s11   ;;  %s4263_s6 = sphi %s5430_s6, %s2931_s6   ;;  %s4259_s17 = sphi %s5429_s17, %s2932_s17  }
 0x2d4   : >> { %2799 = vst [vmem:[%s4259_s17] sm:$0xf] %v2798_v37  ;;  %2801 = vst [vmem:[%s4259_s17 + $0x4] sm:$0xf] %v2800_v40  ;;  %v2804_v42 = vld [vmem:[%s4263_s6 + $0xc] sm:$0xf]  ;;  %s2926_s25 = sadd.s32 1, %s4267_s11 }
 0x2d5   : >> { %2803 = vst [vmem:[%s4259_s17 + $0x8] sm:$0xf] %v2802_v41  ;;  %v2806_v43 = vld [vmem:[%s4263_s6 + $0x10] sm:$0xf]  ;;  %v2808_v44 = vld [vmem:[%s4263_s6 + $0x14] sm:$0xf]  ;;  %p2927_p13 = scmp.ge.s32.totalorder %s2926_s25, %s5209_s30 }
 0x2d6   : >> { %2805 = vst [vmem:[%s4259_s17 + $0xc] sm:$0xf] %v2804_v42  ;;  %2807 = vst [vmem:[%s4259_s17 + $0x10] sm:$0xf] %v2806_v43  ;;  %v2810_v45 = vld [vmem:[%s4263_s6 + $0x18] sm:$0xf] }
 0x2d7   : >> { %2809 = vst [vmem:[%s4259_s17 + $0x14] sm:$0xf] %v2808_v44  ;;  %v2812_v46 = vld [vmem:[%s4263_s6 + $0x1c] sm:$0xf]  ;;  %v2814_v47 = vld [vmem:[%s4263_s6 + $0x20] sm:$0xf] }
 0x2d8   : >> { %2811 = vst [vmem:[%s4259_s17 + $0x18] sm:$0xf] %v2810_v45  ;;  %2813 = vst [vmem:[%s4259_s17 + $0x1c] sm:$0xf] %v2812_v46  ;;  %v2816_v48 = vld [vmem:[%s4263_s6 + $0x24] sm:$0xf] }
 0x2d9   : >> { %2815 = vst [vmem:[%s4259_s17 + $0x20] sm:$0xf] %v2814_v47  ;;  %v2818_v49 = vld [vmem:[%s4263_s6 + $0x28] sm:$0xf]  ;;  %v2820_v50 = vld [vmem:[%s4263_s6 + $0x2c] sm:$0xf] }
 0x2da   : >> { %2817 = vst [vmem:[%s4259_s17 + $0x24] sm:$0xf] %v2816_v48  ;;  %2819 = vst [vmem:[%s4259_s17 + $0x28] sm:$0xf] %v2818_v49  ;;  %v2822_v51 = vld [vmem:[%s4263_s6 + $0x30] sm:$0xf] }
 0x2db   : >> { %2821 = vst [vmem:[%s4259_s17 + $0x2c] sm:$0xf] %v2820_v50  ;;  %v2824_v52 = vld [vmem:[%s4263_s6 + $0x34] sm:$0xf]  ;;  %v2826_v53 = vld [vmem:[%s4263_s6 + $0x38] sm:$0xf] }
 0x2dc   : >> { %2823 = vst [vmem:[%s4259_s17 + $0x30] sm:$0xf] %v2822_v51  ;;  %2825 = vst [vmem:[%s4259_s17 + $0x34] sm:$0xf] %v2824_v52  ;;  %v2828_v54 = vld [vmem:[%s4263_s6 + $0x3c] sm:$0xf] }
 0x2dd   : >> { %2827 = vst [vmem:[%s4259_s17 + $0x38] sm:$0xf] %v2826_v53  ;;  %v2830_v55 = vld [vmem:[%s4263_s6 + $0x40] sm:$0xf]  ;;  %v2832_v56 = vld [vmem:[%s4263_s6 + $0x44] sm:$0xf] }
 0x2de   : >> { %2829 = vst [vmem:[%s4259_s17 + $0x3c] sm:$0xf] %v2828_v54  ;;  %2831 = vst [vmem:[%s4259_s17 + $0x40] sm:$0xf] %v2830_v55  ;;  %v2834_v57 = vld [vmem:[%s4263_s6 + $0x48] sm:$0xf] }
 0x2df   : >> { %2833 = vst [vmem:[%s4259_s17 + $0x44] sm:$0xf] %v2832_v56  ;;  %v2836_v58 = vld [vmem:[%s4263_s6 + $0x4c] sm:$0xf]  ;;  %v2838_v59 = vld [vmem:[%s4263_s6 + $0x50] sm:$0xf] }
 0x2e0   : >> { %2835 = vst [vmem:[%s4259_s17 + $0x48] sm:$0xf] %v2834_v57  ;;  %2837 = vst [vmem:[%s4259_s17 + $0x4c] sm:$0xf] %v2836_v58  ;;  %v2840_v60 = vld [vmem:[%s4263_s6 + $0x54] sm:$0xf] }
 0x2e1   : >> { %2839 = vst [vmem:[%s4259_s17 + $0x50] sm:$0xf] %v2838_v59  ;;  %v2842_v61 = vld [vmem:[%s4263_s6 + $0x58] sm:$0xf]  ;;  %v2844_v62 = vld [vmem:[%s4263_s6 + $0x5c] sm:$0xf] }
 0x2e2   : >> { %2841 = vst [vmem:[%s4259_s17 + $0x54] sm:$0xf] %v2840_v60  ;;  %2843 = vst [vmem:[%s4259_s17 + $0x58] sm:$0xf] %v2842_v61  ;;  %v2846_v63 = vld [vmem:[%s4263_s6 + $0x60] sm:$0xf] }
 0x2e3   : >> { %2845 = vst [vmem:[%s4259_s17 + $0x5c] sm:$0xf] %v2844_v62  ;;  %v2848_v0 = vld [vmem:[%s4263_s6 + $0x64] sm:$0xf]  ;;  %v2850_v1 = vld [vmem:[%s4263_s6 + $0x68] sm:$0xf] }
 0x2e4   : >> { %2847 = vst [vmem:[%s4259_s17 + $0x60] sm:$0xf] %v2846_v63  ;;  %2849 = vst [vmem:[%s4259_s17 + $0x64] sm:$0xf] %v2848_v0  ;;  %v2852_v2 = vld [vmem:[%s4263_s6 + $0x6c] sm:$0xf] }
 0x2e5   : >> { %2851 = vst [vmem:[%s4259_s17 + $0x68] sm:$0xf] %v2850_v1  ;;  %v2854_v3 = vld [vmem:[%s4263_s6 + $0x70] sm:$0xf]  ;;  %v2856_v4 = vld [vmem:[%s4263_s6 + $0x74] sm:$0xf] }
 0x2e6   : >> { %2853 = vst [vmem:[%s4259_s17 + $0x6c] sm:$0xf] %v2852_v2  ;;  %2855 = vst [vmem:[%s4259_s17 + $0x70] sm:$0xf] %v2854_v3  ;;  %v2858_v5 = vld [vmem:[%s4263_s6 + $0x78] sm:$0xf] }
 0x2e7   : >> { %2857 = vst [vmem:[%s4259_s17 + $0x74] sm:$0xf] %v2856_v4  ;;  %v2860_v6 = vld [vmem:[%s4263_s6 + $0x7c] sm:$0xf]  ;;  %v2862_v7 = vld [vmem:[%s4263_s6 + $0x80] sm:$0xf] }
 0x2e8   : >> { %2859 = vst [vmem:[%s4259_s17 + $0x78] sm:$0xf] %v2858_v5  ;;  %2861 = vst [vmem:[%s4259_s17 + $0x7c] sm:$0xf] %v2860_v6  ;;  %v2864_v8 = vld [vmem:[%s4263_s6 + $0x84] sm:$0xf] }
 0x2e9   : >> { %2863 = vst [vmem:[%s4259_s17 + $0x80] sm:$0xf] %v2862_v7  ;;  %v2866_v9 = vld [vmem:[%s4263_s6 + $0x88] sm:$0xf]  ;;  %v2868_v10 = vld [vmem:[%s4263_s6 + $0x8c] sm:$0xf] }
 0x2ea   : >> { %2865 = vst [vmem:[%s4259_s17 + $0x84] sm:$0xf] %v2864_v8  ;;  %2867 = vst [vmem:[%s4259_s17 + $0x88] sm:$0xf] %v2866_v9  ;;  %v2870_v11 = vld [vmem:[%s4263_s6 + $0x90] sm:$0xf] }
 0x2eb   : >> { %2869 = vst [vmem:[%s4259_s17 + $0x8c] sm:$0xf] %v2868_v10  ;;  %v2872_v12 = vld [vmem:[%s4263_s6 + $0x94] sm:$0xf]  ;;  %v2874_v13 = vld [vmem:[%s4263_s6 + $0x98] sm:$0xf] }
 0x2ec   : >> { %2871 = vst [vmem:[%s4259_s17 + $0x90] sm:$0xf] %v2870_v11  ;;  %2873 = vst [vmem:[%s4259_s17 + $0x94] sm:$0xf] %v2872_v12  ;;  %v2876_v14 = vld [vmem:[%s4263_s6 + $0x9c] sm:$0xf] }
 0x2ed   : >> { %2875 = vst [vmem:[%s4259_s17 + $0x98] sm:$0xf] %v2874_v13  ;;  %v2878_v15 = vld [vmem:[%s4263_s6 + $0xa0] sm:$0xf]  ;;  %v2880_v16 = vld [vmem:[%s4263_s6 + $0xa4] sm:$0xf] }
 0x2ee   : >> { %2877 = vst [vmem:[%s4259_s17 + $0x9c] sm:$0xf] %v2876_v14  ;;  %2879 = vst [vmem:[%s4259_s17 + $0xa0] sm:$0xf] %v2878_v15  ;;  %v2882_v17 = vld [vmem:[%s4263_s6 + $0xa8] sm:$0xf] }
 0x2ef   : >> { %2881 = vst [vmem:[%s4259_s17 + $0xa4] sm:$0xf] %v2880_v16  ;;  %v2884_v18 = vld [vmem:[%s4263_s6 + $0xac] sm:$0xf]  ;;  %v2886_v19 = vld [vmem:[%s4263_s6 + $0xb0] sm:$0xf] }
 0x2f0   : >> { %2883 = vst [vmem:[%s4259_s17 + $0xa8] sm:$0xf] %v2882_v17  ;;  %2885 = vst [vmem:[%s4259_s17 + $0xac] sm:$0xf] %v2884_v18  ;;  %v2888_v20 = vld [vmem:[%s4263_s6 + $0xb4] sm:$0xf] }
 0x2f1   : >> { %2887 = vst [vmem:[%s4259_s17 + $0xb0] sm:$0xf] %v2886_v19  ;;  %v2890_v21 = vld [vmem:[%s4263_s6 + $0xb8] sm:$0xf]  ;;  %v2892_v22 = vld [vmem:[%s4263_s6 + $0xbc] sm:$0xf] }
 0x2f2   : >> { %2889 = vst [vmem:[%s4259_s17 + $0xb4] sm:$0xf] %v2888_v20  ;;  %2891 = vst [vmem:[%s4259_s17 + $0xb8] sm:$0xf] %v2890_v21  ;;  %v2894_v23 = vld [vmem:[%s4263_s6 + $0xc0] sm:$0xf] }
 0x2f3   : >> { %2893 = vst [vmem:[%s4259_s17 + $0xbc] sm:$0xf] %v2892_v22  ;;  %v2896_v24 = vld [vmem:[%s4263_s6 + $0xc4] sm:$0xf]  ;;  %v2898_v25 = vld [vmem:[%s4263_s6 + $0xc8] sm:$0xf] }
 0x2f4   : >> { %2895 = vst [vmem:[%s4259_s17 + $0xc0] sm:$0xf] %v2894_v23  ;;  %2897 = vst [vmem:[%s4259_s17 + $0xc4] sm:$0xf] %v2896_v24  ;;  %v2900_v26 = vld [vmem:[%s4263_s6 + $0xcc] sm:$0xf] }
 0x2f5   : >> { %2899 = vst [vmem:[%s4259_s17 + $0xc8] sm:$0xf] %v2898_v25  ;;  %v2902_v27 = vld [vmem:[%s4263_s6 + $0xd0] sm:$0xf]  ;;  %v2904_v28 = vld [vmem:[%s4263_s6 + $0xd4] sm:$0xf] }
 0x2f6   : >> { %2901 = vst [vmem:[%s4259_s17 + $0xcc] sm:$0xf] %v2900_v26  ;;  %2903 = vst [vmem:[%s4259_s17 + $0xd0] sm:$0xf] %v2902_v27  ;;  %v2906_v29 = vld [vmem:[%s4263_s6 + $0xd8] sm:$0xf] }
 0x2f7   : >> { %2905 = vst [vmem:[%s4259_s17 + $0xd4] sm:$0xf] %v2904_v28  ;;  %v2908_v30 = vld [vmem:[%s4263_s6 + $0xdc] sm:$0xf]  ;;  %v2910_v31 = vld [vmem:[%s4263_s6 + $0xe0] sm:$0xf] }
 0x2f8   : >> { %2907 = vst [vmem:[%s4259_s17 + $0xd8] sm:$0xf] %v2906_v29  ;;  %2909 = vst [vmem:[%s4259_s17 + $0xdc] sm:$0xf] %v2908_v30  ;;  %v2912_v32 = vld [vmem:[%s4263_s6 + $0xe4] sm:$0xf] }
 0x2f9   : >> { %2911 = vst [vmem:[%s4259_s17 + $0xe0] sm:$0xf] %v2910_v31  ;;  %v2914_v33 = vld [vmem:[%s4263_s6 + $0xe8] sm:$0xf]  ;;  %v2916_v34 = vld [vmem:[%s4263_s6 + $0xec] sm:$0xf] }
 0x2fa   : >> { %2913 = vst [vmem:[%s4259_s17 + $0xe4] sm:$0xf] %v2912_v32  ;;  %2915 = vst [vmem:[%s4259_s17 + $0xe8] sm:$0xf] %v2914_v33  ;;  %v2918_v35 = vld [vmem:[%s4263_s6 + $0xf0] sm:$0xf] }
 0x2fb   : >> { %2917 = vst [vmem:[%s4259_s17 + $0xec] sm:$0xf] %v2916_v34  ;;  %v2920_v36 = vld [vmem:[%s4263_s6 + $0xf4] sm:$0xf]  ;;  %v2922_v38 = vld [vmem:[%s4263_s6 + $0xf8] sm:$0xf] }
 0x2fc   : >> { %2919 = vst [vmem:[%s4259_s17 + $0xf0] sm:$0xf] %v2918_v35  ;;  %2921 = vst [vmem:[%s4259_s17 + $0xf4] sm:$0xf] %v2920_v36  ;;  %v2924_v39 = vld [vmem:[%s4263_s6 + $0xfc] sm:$0xf] }
 0x2fd   : >> { %2923 = vst [vmem:[%s4259_s17 + $0xf8] sm:$0xf] %v2922_v38  ;;  %2925 = vst [vmem:[%s4259_s17 + $0xfc] sm:$0xf] %v2924_v39  ;;  %s5459_s25 = smov (%p2927_p13, %s2926_s25), 0  ;;  %s2792_s27 = sadd.s32 1, %s4271_s27  }
 0x2fe   : >> { %s3581_s0 = sshll.u32 %s5459_s25, 8  ;;  %p2791_p0 = scmp.ge.s32.totalorder %s2792_s27, %s5209_s30 }
 0x2ff   : >> { %s2931_s6 = scalar_lea.vmem %s4611_s8, %s3581_s0 [#allocation4]   ;;  %s2932_s17 = scalar_lea.vmem %s5203_s28, %s3581_s0  }
 0x300   : >> { %s5431_s11 = smov %s5459_s25  ;;  %2794 = sbr.rel (!%p2791_p0) target bundleno = 723 (0x2d3), region = 191 }
 0x307 PF: > { %s5377_s21 = sand.u32 63, %s5457_s9   ;;  %s3660_s24 = sshll.u32 %s5209_s30, 8 }
 0x308   : > { %s2937_s26 = scalar_lea.vmem %s4611_s8, %s3660_s24 [#allocation4]   ;;  %s2939_s23 = scalar_lea.vmem %s5203_s28, %s3660_s24  }
 0x309   : > { %p3586_p1 = scmp.le.s32.totalorder %s5377_s21, 0 }
 0x30a   : > { %s4273_s12 = smov (!%p3586_p1), %s2939_s23   ;;  %s4277_s14 = smov (!%p3586_p1), %s2937_s26  }
 0x30b   : > { %3260 = sbr.rel (%p3586_p1) target bundleno = 796 (0x31c), region = 196  ;;  %s4281_s16 = smov (!%p3586_p1), 0  }
 0x30c   : > { %s4285_s7 = smov (!%p3586_p1), 0  }
 0x312 LB: >> { %v2949_v37 = vld [vmem:[%s4279_s14] sm:$0xf]  ;;  %s2951_s9 = sadd.s32 1, %s4283_s16  ;;  %s2943_s7 = sadd.s32 1, %s4287_s7   ;;  %s4287_s7 = sphi %s4285_s7, %s2943_s7   ;;  %s4283_s16 = sphi %s4281_s16, %s4282_s16   ;;  %s4279_s14 = sphi %s4277_s14, %s2956_s14   ;;  %s4275_s12 = sphi %s4273_s12, %s2957_s12  }
 0x313   : >> { %2950 = vst [vmem:[%s4275_s12] sm:$0xf] %v2949_v37  ;;  %p2952_p2 = scmp.ge.s32.totalorder %s2951_s9, %s5377_s21  ;;  %p2942_p3 = scmp.ge.s32.totalorder %s2943_s7, %s5377_s21 }
 0x315   : >> { %s5461_s9 = smov (%p2952_p2, %s2951_s9), 0  ;;  %2945 = sbr.rel (!%p2942_p3) target bundleno = 786 (0x312), region = 202 }
 0x316   : >> { %s3587_s8 = sshll.u32 %s5461_s9, 2  ;;  %s4282_s16 = smov %s5461_s9  }
 0x317   : >> { %s2956_s14 = scalar_lea.vmem %s2937_s26, %s3587_s8 [#allocation4]   ;;  %s2957_s12 = scalar_lea.vmem %s2939_s23, %s3587_s8  }
 0x31c PF: > { %s13_s20 = sadd.s32 1, %s4223_s20   ;;  %s5432_s22 = sld [smem:[#allocation5_spill]] }
 0x31d   : > { %p10_p4 = scmp.ge.s32.totalorder %s13_s20, 10   ;;  %s5433_s10 = sld [smem:[#allocation6_spill]] }
 0x31e   : > { %s5434_s12 = smov %s4195_s13  ;;  %s5435_s13 = smov %s4384_s4 }
 0x31f   : > { %s5436_s14 = smov %s4203_s15  ;;  %s5437_s15 = smov %s4387_s5 }
 0x320   : > { %s5438_s16 = smov %s4215_s18  ;;  %s5439_s17 = smov %s4219_s19 }
 0x321   :  { %12 = sbr.rel (!%p10_p4) target bundleno = 7 (0x7), region = 213 }
 0x322   : > { %s5440_s18 = smov %s5432_s22 }
 0x323   : > { %s5441_s19 = smov %s5433_s10 }

// kernel: net_forward.9
= control target key start
LH: loop header
LB: loop body
LE: loop exit
PB: predicated region body
PF: predicated region fallthrough
CT: control target
= control target key end

     0   :  { %vm310_vm0 = vcmask 1044480   ;;  %vm311_vm1 = vsmask.f32 4352  ;;  %vm1279_vm3 = vcmask 1040384   ;;  %vm1280_vm4 = vsmask.f32 256  ;;  %s2321_s0 = inlined_call_operand.vmem [shape: bf16[9,6400], index: 0, kind: input, shape index: {}]   ;;  %s2322_s1 = inlined_call_operand.vmem [shape: bf16[1,6400], index: 1, kind: output, shape index: {}]  }
   0x1   :  { %v1386_v0 = vld [vmem:[%s2321_s0] ss:$200 sps:$4 sm:$0x1f]   ;;  %v1388_v1 = vld [vmem:[%s2321_s0 + $0x4] ss:$200 sps:$4 sm:$0x1f]   ;;  %vm1483_vm2 = vmand %vm310_vm0, %vm311_vm1 }
   0x2   :  { %v1389_v2 = vld [vmem:[%s2321_s0 + $0x8] ss:$200 sps:$4 sm:$0x1f]   ;;  %v1391_v4 = vld [vmem:[%s2321_s0 + $0xc] ss:$200 sps:$4 sm:$0x1f]   ;;  %vm2229_vm5 = vmand %vm1279_vm3, %vm1280_vm4 }
   0x3   :  { %v1392_v5 = vld [vmem:[%s2321_s0 + $0x10] ss:$200 sps:$4 sm:$0x1f]   ;;  %v1394_v6 = vld [vmem:[%s2321_s0 + $0x14] ss:$200 sps:$4 sm:$0x1f]  }
   0x4   :  { %v313_v7 = vsel %vm1483_vm2, %v1386_v0, 4286644096  ;;  %v324_v8 = vsel %vm1483_vm2, %v1388_v1, 4286644096  ;;  %v335_v9 = vsel %vm1483_vm2, %v1389_v2, 4286644096 }
   0x5   :  { %v1395_v10 = vld [vmem:[%s2321_s0 + $0x18] ss:$200 sps:$4 sm:$0x1f]   ;;  %v314_v11 = vunpack.i.l.bf16 %v313_v7  ;;  %v315_v12 = vunpack.i.h.bf16 %v313_v7  ;;  %v325_v13 = vunpack.i.l.bf16 %v324_v8  ;;  %v326_v14 = vunpack.i.h.bf16 %v324_v8  ;;  %v1397_v27 = vld [vmem:[%s2321_s0 + $0x1c] ss:$200 sps:$4 sm:$0x1f]  }
   0x6   :  { %v336_v15 = vunpack.i.l.bf16 %v335_v9  ;;  %v337_v16 = vunpack.i.h.bf16 %v335_v9  ;;  %v346_v17 = vsel %vm1483_vm2, %v1391_v4, 4286644096  ;;  %v357_v18 = vsel %vm1483_vm2, %v1392_v5, 4286644096 }
   0x7   :  { %v316_v19 = vmax.f32 %v314_v11, %v315_v12  ;;  %v327_v20 = vmax.f32 %v325_v13, %v326_v14  ;;  %v347_v21 = vunpack.i.l.bf16 %v346_v17  ;;  %v348_v22 = vunpack.i.h.bf16 %v346_v17  ;;  %v1398_v52 = vld [vmem:[%s2321_s0 + $0x20] ss:$200 sps:$4 sm:$0x1f]   ;;  %v1400_v55 = vld [vmem:[%s2321_s0 + $0x24] ss:$200 sps:$4 sm:$0x1f]  }
   0x8   :  { %v338_v23 = vmax.f32 %v336_v15, %v337_v16  ;;  %v358_v24 = vunpack.i.l.bf16 %v357_v18  ;;  %v359_v25 = vunpack.i.h.bf16 %v357_v18  ;;  %v368_v26 = vsel %vm1483_vm2, %v1394_v6, 4286644096  ;;  %v1401_v60 = vld [vmem:[%s2321_s0 + $0x28] ss:$200 sps:$4 sm:$0x1f]  }
   0x9   :  { %v317_v28 = vrot.slane %v316_v19, 4  ;;  %v328_v29 = vrot.slane %v327_v20, 4  ;;  %v349_v30 = vmax.f32 %v347_v21, %v348_v22  ;;  %v369_v31 = vunpack.i.l.bf16 %v368_v26  ;;  %v1403_v2 = vld [vmem:[%s2321_s0 + $0x2c] ss:$200 sps:$4 sm:$0x1f]  }
   0xa   :  { %v370_v32 = vunpack.i.h.bf16 %v368_v26  ;;  %v379_v33 = vsel %vm1483_vm2, %v1395_v10, 4286644096  ;;  %v339_v35 = vrot.slane %v338_v23, 4  ;;  %v360_v36 = vmax.f32 %v358_v24, %v359_v25  ;;  %v1404_v8 = vld [vmem:[%s2321_s0 + $0x30] ss:$200 sps:$4 sm:$0x1f]  }
   0xb   :  { %v380_v34 = vunpack.i.l.bf16 %v379_v33  ;;  %v381_v37 = vunpack.i.h.bf16 %v379_v33  ;;  %v318_v38 = vmax.f32 %v316_v19, %v317_v28  ;;  %v390_v39 = vsel %vm1483_vm2, %v1397_v27, 4286644096  ;;  %v1406_v16 = vld [vmem:[%s2321_s0 + $0x34] ss:$200 sps:$4 sm:$0x1f]  }
   0xc   :  { %v329_v40 = vmax.f32 %v327_v20, %v328_v29  ;;  %v350_v41 = vrot.slane %v349_v30, 4  ;;  %v371_v42 = vmax.f32 %v369_v31, %v370_v32  ;;  %v391_v44 = vunpack.i.l.bf16 %v390_v39  ;;  %v1407_v28 = vld [vmem:[%s2321_s0 + $0x38] ss:$200 sps:$4 sm:$0x1f]  }
   0xd   :  { %v382_v43 = vmax.f32 %v380_v34, %v381_v37  ;;  %v340_v45 = vmax.f32 %v338_v23, %v339_v35  ;;  %v361_v46 = vrot.slane %v360_v36, 4  ;;  %v319_v47 = vrot.slane %v318_v38, 2 }
   0xe   :  { %v392_v48 = vunpack.i.h.bf16 %v390_v39  ;;  %v330_v49 = vrot.slane %v329_v40, 2  ;;  %v351_v50 = vmax.f32 %v349_v30, %v350_v41  ;;  %v372_v51 = vrot.slane %v371_v42, 4  ;;  %v1409_v41 = vld [vmem:[%s2321_s0 + $0x3c] ss:$200 sps:$4 sm:$0x1f]  }
   0xf   :  { %v383_v53 = vrot.slane %v382_v43, 4  ;;  %v341_v56 = vrot.slane %v340_v45, 2  ;;  %v362_v57 = vmax.f32 %v360_v36, %v361_v46  ;;  %v320_v58 = vmax.f32 %v318_v38, %v319_v47 }
  0x10   :  { %v393_v54 = vmax.f32 %v391_v44, %v392_v48  ;;  %v331_v61 = vmax.f32 %v329_v40, %v330_v49  ;;  %v352_v62 = vrot.slane %v351_v50, 2  ;;  %v373_v63 = vmax.f32 %v371_v42, %v372_v51 }
  0x11   :  { %v384_v0 = vmax.f32 %v382_v43, %v383_v53  ;;  %v401_v1 = vsel %vm1483_vm2, %v1398_v52, 4286644096  ;;  %v342_v4 = vmax.f32 %v340_v45, %v341_v56  ;;  %v363_v5 = vrot.slane %v362_v57, 2 }
  0x12   :  { %v394_v59 = vrot.slane %v393_v54, 4  ;;  %v402_v6 = vunpack.i.l.bf16 %v401_v1  ;;  %v412_v7 = vsel %vm1483_vm2, %v1400_v55, 4286644096  ;;  %v321_v9 = vrot.slane %v320_v58, 1 }
  0x13   :  { %v403_v11 = vunpack.i.h.bf16 %v401_v1  ;;  %v332_v12 = vrot.slane %v331_v61, 1  ;;  %v353_v13 = vmax.f32 %v351_v50, %v352_v62  ;;  %v374_v14 = vrot.slane %v373_v63, 2 }
  0x14   :  { %v395_v10 = vmax.f32 %v393_v54, %v394_v59  ;;  %v423_v15 = vsel %vm1483_vm2, %v1401_v60, 4286644096  ;;  %v385_v17 = vrot.slane %v384_v0, 2  ;;  %v413_v18 = vunpack.i.l.bf16 %v412_v7 }
  0x15   :  { %v414_v19 = vunpack.i.h.bf16 %v412_v7  ;;  %v343_v20 = vrot.slane %v342_v4, 1  ;;  %v364_v21 = vmax.f32 %v362_v57, %v363_v5  ;;  %v404_v22 = vmax.f32 %v402_v6, %v403_v11 }
  0x16   :  { %v434_v23 = vsel %vm1483_vm2, %v1403_v2, 4286644096  ;;  %v396_v24 = vrot.slane %v395_v10, 2  ;;  %v424_v25 = vunpack.i.l.bf16 %v423_v15  ;;  %v425_v26 = vunpack.i.h.bf16 %v423_v15  ;;  %v1410_v2 = vld [vmem:[%s2321_s0 + $0x40] ss:$200 sps:$4 sm:$0x1f]  }
  0x17   :  { %v445_v27 = vsel %vm1483_vm2, %v1404_v8, 4286644096  ;;  %v1549_v29 = vmax.f32 %v320_v58, %v321_v9  ;;  %v1551_v30 = vmax.f32 %v331_v61, %v332_v12  ;;  %v354_v31 = vrot.slane %v353_v13, 1 }
  0x18   :  { %v375_v32 = vmax.f32 %v373_v63, %v374_v14  ;;  %v386_v33 = vmax.f32 %v384_v0, %v385_v17  ;;  %v415_v34 = vmax.f32 %v413_v18, %v414_v19  ;;  %v435_v35 = vunpack.i.l.bf16 %v434_v23  ;;  %v1413_v17 = vld [vmem:[%s2321_s0 + $0x48] ss:$200 sps:$4 sm:$0x1f]  }
  0x19   :  { %v456_v36 = vsel %vm1483_vm2, %v1406_v16, 4286644096  ;;  %v405_v37 = vrot.slane %v404_v22, 4  ;;  %v436_v38 = vunpack.i.h.bf16 %v434_v23  ;;  %v446_v39 = vunpack.i.l.bf16 %v445_v27 }
  0x1a   :  { %v447_v40 = vunpack.i.h.bf16 %v445_v27  ;;  %v1558_v42 = vmax.f32 %v342_v4, %v343_v20  ;;  %v365_v43 = vrot.slane %v364_v21, 1  ;;  %v397_v44 = vmax.f32 %v395_v10, %v396_v24  ;;  %v1412_v4 = vld [vmem:[%s2321_s0 + $0x44] ss:$200 sps:$4 sm:$0x1f]  }
  0x1b   :  { %v426_v45 = vmax.f32 %v424_v25, %v425_v26  ;;  %v376_v46 = vrot.slane %v375_v32, 1  ;;  %v457_v47 = vunpack.i.l.bf16 %v456_v36  ;;  %v458_v48 = vunpack.i.h.bf16 %v456_v36 }
  0x1c   :  { %v467_v49 = vsel %vm1483_vm2, %v1407_v28, 4286644096  ;;  %v387_v51 = vrot.slane %v386_v33, 1  ;;  %v416_v52 = vrot.slane %v415_v34, 4  ;;  %v406_v54 = vmax.f32 %v404_v22, %v405_v37 }
  0x1d   :  { %v468_v53 = vunpack.i.l.bf16 %v467_v49  ;;  %v437_v55 = vmax.f32 %v435_v35, %v436_v38  ;;  %v448_v56 = vmax.f32 %v446_v39, %v447_v40  ;;  %v469_v57 = vunpack.i.h.bf16 %v467_v49 }
  0x1e   :  { %v1564_v58 = vmax.f32 %v353_v13, %v354_v31  ;;  %v398_v59 = vrot.slane %v397_v44, 1  ;;  %v427_v60 = vrot.slane %v426_v45, 4  ;;  %v478_v61 = vsel %vm1483_vm2, %v1409_v41, 4286644096 }
  0x1f   :  { %v1568_v62 = vmax.f32 %v364_v21, %v365_v43  ;;  %v1570_v63 = vmax.f32 %v375_v32, %v376_v46  ;;  %v459_v0 = vmax.f32 %v457_v47, %v458_v48  ;;  %v470_v1 = vmax.f32 %v468_v53, %v469_v57  ;;  %v1415_v32 = vld [vmem:[%s2321_s0 + $0x4c] ss:$200 sps:$4 sm:$0x1f]   ;;  %v1416_v41 = vld [vmem:[%s2321_s0 + $0x50] ss:$200 sps:$4 sm:$0x1f]  }
  0x20   :  { %v417_v7 = vmax.f32 %v415_v34, %v416_v52  ;;  %v479_v8 = vunpack.i.l.bf16 %v478_v61  ;;  %v1582_v9 = vmax.f32 %v386_v33, %v387_v51  ;;  %v407_v10 = vrot.slane %v406_v54, 2 }
  0x21   :  { %v438_v11 = vrot.slane %v437_v55, 4  ;;  %v449_v12 = vrot.slane %v448_v56, 4  ;;  %v1586_v14 = vmax.f32 %v397_v44, %v398_v59  ;;  %v428_v15 = vmax.f32 %v426_v45, %v427_v60 }
  0x22   :  { %v480_v16 = vunpack.i.h.bf16 %v478_v61  ;;  %v460_v20 = vrot.slane %v459_v0, 4  ;;  %v471_v21 = vrot.slane %v470_v1, 4  ;;  %v418_v22 = vrot.slane %v417_v7, 2 }
  0x23   :  { %v489_v24 = vsel %vm1483_vm2, %v1410_v2, 4286644096  ;;  %v500_v25 = vsel %vm1483_vm2, %v1412_v4, 4286644096  ;;  %v408_v27 = vmax.f32 %v406_v54, %v407_v10  ;;  %v439_v28 = vmax.f32 %v437_v55, %v438_v11 }
  0x24   :  { %v481_v23 = vmax.f32 %v479_v8, %v480_v16  ;;  %v450_v31 = vmax.f32 %v448_v56, %v449_v12  ;;  %v429_v34 = vrot.slane %v428_v15, 2  ;;  %v490_v35 = vunpack.i.l.bf16 %v489_v24  ;;  %v1418_v56 = vld [vmem:[%s2321_s0 + $0x54] ss:$200 sps:$4 sm:$0x1f]  }
  0x25   :  { %v491_v36 = vunpack.i.h.bf16 %v489_v24  ;;  %v461_v37 = vmax.f32 %v459_v0, %v460_v20  ;;  %v472_v38 = vmax.f32 %v470_v1, %v471_v21  ;;  %v501_v39 = vunpack.i.l.bf16 %v500_v25  ;;  %v1419_v0 = vld [vmem:[%s2321_s0 + $0x58] ss:$200 sps:$4 sm:$0x1f]  }
  0x26   :  { %v502_v40 = vunpack.i.h.bf16 %v500_v25  ;;  %v419_v43 = vmax.f32 %v417_v7, %v418_v22  ;;  %v482_v44 = vrot.slane %v481_v23, 4  ;;  %v511_v46 = vsel %vm1483_vm2, %v1413_v17, 4286644096 }
  0x27   :  { %v492_v45 = vmax.f32 %v490_v35, %v491_v36  ;;  %v409_v47 = vrot.slane %v408_v27, 1  ;;  %v440_v48 = vrot.slane %v439_v28, 2  ;;  %v451_v49 = vrot.slane %v450_v31, 2 }
  0x28   :  { %v503_v51 = vmax.f32 %v501_v39, %v502_v40  ;;  %v512_v53 = vunpack.i.l.bf16 %v511_v46  ;;  %v513_v54 = vunpack.i.h.bf16 %v511_v46  ;;  %v522_v55 = vsel %vm1483_vm2, %v1415_v32, 4286644096 }
  0x29   :  { %v493_v52 = vrot.slane %v492_v45, 4  ;;  %v430_v57 = vmax.f32 %v428_v15, %v429_v34  ;;  %v462_v59 = vrot.slane %v461_v37, 2  ;;  %v473_v60 = vrot.slane %v472_v38, 2 }
  0x2a   :  { %v523_v61 = vunpack.i.l.bf16 %v522_v55  ;;  %v483_v1 = vmax.f32 %v481_v23, %v482_v44  ;;  %v504_v2 = vrot.slane %v503_v51, 4  ;;  %v524_v4 = vunpack.i.h.bf16 %v522_v55 }
  0x2b   :  { %v533_v7 = vsel %vm1483_vm2, %v1416_v41, 4286644096  ;;  %v1621_v8 = vmax.f32 %v408_v27, %v409_v47  ;;  %v420_v10 = vrot.slane %v419_v43, 1  ;;  %v441_v11 = vmax.f32 %v439_v28, %v440_v48 }
  0x2c   :  { %v534_v12 = vunpack.i.l.bf16 %v533_v7  ;;  %v452_v16 = vmax.f32 %v450_v31, %v451_v49  ;;  %v494_v15 = vmax.f32 %v492_v45, %v493_v52  ;;  %v514_v17 = vmax.f32 %v512_v53, %v513_v54  ;;  %v1421_v31 = vld [vmem:[%s2321_s0 + $0x5c] ss:$200 sps:$4 sm:$0x1f]  }
  0x2d   :  { %v535_v20 = vunpack.i.h.bf16 %v533_v7  ;;  %v431_v21 = vrot.slane %v430_v57, 1  ;;  %v463_v22 = vmax.f32 %v461_v37, %v462_v59  ;;  %v525_v24 = vmax.f32 %v523_v61, %v524_v4  ;;  %v1422_v61 = vld [vmem:[%s2321_s0 + $0x60] ss:$200 sps:$4 sm:$0x1f]  }
  0x2e   :  { %v544_v23 = vsel %vm1483_vm2, %v1418_v56, 4286644096  ;;  %v474_v25 = vmax.f32 %v472_v38, %v473_v60  ;;  %v484_v32 = vrot.slane %v483_v1, 2  ;;  %v505_v34 = vmax.f32 %v503_v51, %v504_v2  ;;  %v1424_v7 = vld [vmem:[%s2321_s0 + $0x64] ss:$200 sps:$4 sm:$0x1f]  }
  0x2f   :  { %v555_v27 = vsel %vm1483_vm2, %v1419_v0, 4286644096  ;;  %v442_v35 = vrot.slane %v441_v11, 1  ;;  %v536_v36 = vmax.f32 %v534_v12, %v535_v20  ;;  %v545_v28 = vunpack.i.l.bf16 %v544_v23 }
  0x30   :  { %v546_v39 = vunpack.i.h.bf16 %v544_v23  ;;  %v1630_v40 = vmax.f32 %v419_v43, %v420_v10  ;;  %v453_v37 = vrot.slane %v452_v16, 1  ;;  %v495_v41 = vrot.slane %v494_v15, 2  ;;  %v1433_v10 = vld [vmem:[%s2321_s0 + $0x7c] ss:$200 sps:$4 sm:$0x1f]  }
  0x31   :  { %v515_v44 = vrot.slane %v514_v17, 4  ;;  %v1632_v45 = vmax.f32 %v430_v57, %v431_v21  ;;  %v464_v38 = vrot.slane %v463_v22, 1  ;;  %v526_v46 = vrot.slane %v525_v24, 4 }
  0x32   :  { %v556_v47 = vunpack.i.l.bf16 %v555_v27  ;;  %v475_v48 = vrot.slane %v474_v25, 1  ;;  %v485_v49 = vmax.f32 %v483_v1, %v484_v32  ;;  %v506_v51 = vrot.slane %v505_v34, 2 }
  0x33   :  { %v557_v52 = vunpack.i.h.bf16 %v555_v27  ;;  %v1636_v54 = vmax.f32 %v441_v11, %v442_v35  ;;  %v537_v55 = vrot.slane %v536_v36, 4  ;;  %v547_v43 = vmax.f32 %v545_v28, %v546_v39  ;;  %v1428_v39 = vld [vmem:[%s2321_s0 + $0x70] ss:$200 sps:$4 sm:$0x1f]  }
  0x34   :  { %v1638_v56 = vmax.f32 %v452_v16, %v453_v37  ;;  %v496_v59 = vmax.f32 %v494_v15, %v495_v41  ;;  %v516_v60 = vmax.f32 %v514_v17, %v515_v44  ;;  %v566_v57 = vsel %vm1483_vm2, %v1421_v31, 4286644096  ;;  %v1425_v15 = vld [vmem:[%s2321_s0 + $0x68] ss:$200 sps:$4 sm:$0x1f]  }
  0x35   :  { %v1647_v1 = vmax.f32 %v463_v22, %v464_v38  ;;  %v527_v2 = vmax.f32 %v525_v24, %v526_v46  ;;  %v558_v4 = vmax.f32 %v556_v47, %v557_v52  ;;  %v1654_v11 = vmax.f32 %v474_v25, %v475_v48  ;;  %v1427_v24 = vld [vmem:[%s2321_s0 + $0x6c] ss:$200 sps:$4 sm:$0x1f]  }
  0x36   :  { %v486_v12 = vrot.slane %v485_v49, 1  ;;  %v507_v16 = vmax.f32 %v505_v34, %v506_v51  ;;  %v538_v17 = vmax.f32 %v536_v36, %v537_v55  ;;  %v548_v20 = vrot.slane %v547_v43, 4 }
  0x37   :  { %v567_v21 = vunpack.i.l.bf16 %v566_v57  ;;  %v568_v22 = vunpack.i.h.bf16 %v566_v57  ;;  %v497_v32 = vrot.slane %v496_v59, 1  ;;  %v517_v34 = vrot.slane %v516_v60, 2 }
  0x38   :  { %v528_v35 = vrot.slane %v527_v2, 2  ;;  %v559_v36 = vrot.slane %v558_v4, 4  ;;  %v577_v28 = vsel %vm1483_vm2, %v1422_v61, 4286644096  ;;  %v1675_v37 = vmax.f32 %v485_v49, %v486_v12 }
  0x39   :  { %v508_v41 = vrot.slane %v507_v16, 1  ;;  %v588_v44 = vsel %vm1483_vm2, %v1424_v7, 4286644096  ;;  %v539_v38 = vrot.slane %v538_v17, 2  ;;  %v549_v46 = vmax.f32 %v547_v43, %v548_v20 }
  0x3a   :  { %v569_v47 = vmax.f32 %v567_v21, %v568_v22  ;;  %v599_v48 = vsel %vm1483_vm2, %v1425_v15, 4286644096  ;;  %v1681_v51 = vmax.f32 %v496_v59, %v497_v32  ;;  %v518_v52 = vmax.f32 %v516_v60, %v517_v34  ;;  %v1430_v59 = vld [vmem:[%s2321_s0 + $0x74] ss:$200 sps:$4 sm:$0x1f]  }
  0x3b   :  { %v578_v55 = vunpack.i.l.bf16 %v577_v28  ;;  %v579_v57 = vunpack.i.h.bf16 %v577_v28  ;;  %v529_v61 = vmax.f32 %v527_v2, %v528_v35  ;;  %v560_v27 = vmax.f32 %v558_v4, %v559_v36  ;;  %v1431_v28 = vld [vmem:[%s2321_s0 + $0x78] ss:$200 sps:$4 sm:$0x1f]  }
  0x3c   :  { %v589_v31 = vunpack.i.l.bf16 %v588_v44  ;;  %v590_v49 = vunpack.i.h.bf16 %v588_v44  ;;  %v600_v12 = vunpack.i.l.bf16 %v599_v48  ;;  %v601_v25 = vunpack.i.h.bf16 %v599_v48 }
  0x3d   :  { %v610_v7 = vsel %vm1483_vm2, %v1427_v24, 4286644096  ;;  %v621_v43 = vsel %vm1483_vm2, %v1428_v39, 4286644096  ;;  %v540_v15 = vmax.f32 %v538_v17, %v539_v38  ;;  %v550_v2 = vrot.slane %v549_v46, 2 }
  0x3e   :  { %v570_v4 = vrot.slane %v569_v47, 4  ;;  %v519_v20 = vrot.slane %v518_v52, 1  ;;  %v580_v21 = vmax.f32 %v578_v55, %v579_v57  ;;  %v611_v22 = vunpack.i.l.bf16 %v610_v7 }
  0x3f   :  { %v612_v32 = vunpack.i.h.bf16 %v610_v7  ;;  %v1692_v34 = vmax.f32 %v507_v16, %v508_v41  ;;  %v530_v24 = vrot.slane %v529_v61, 1  ;;  %v561_v35 = vrot.slane %v560_v27, 2 }
  0x40   :  { %v622_v36 = vunpack.i.l.bf16 %v621_v43  ;;  %v591_v44 = vmax.f32 %v589_v31, %v590_v49  ;;  %v602_v17 = vmax.f32 %v600_v12, %v601_v25  ;;  %v623_v38 = vunpack.i.h.bf16 %v621_v43 }
  0x41   :  { %v541_v48 = vrot.slane %v540_v15, 1  ;;  %v551_v60 = vmax.f32 %v549_v46, %v550_v2  ;;  %v571_v55 = vmax.f32 %v569_v47, %v570_v4  ;;  %v632_v16 = vsel %vm1483_vm2, %v1430_v59, 4286644096 }
  0x42   :  { %v1701_v41 = vmax.f32 %v518_v52, %v519_v20  ;;  %v581_v57 = vrot.slane %v580_v21, 4  ;;  %v613_v7 = vmax.f32 %v611_v22, %v612_v32  ;;  %v633_v23 = vunpack.i.l.bf16 %v632_v16 }
  0x43   :  { %v1706_v0 = vmax.f32 %v529_v61, %v530_v24  ;;  %v562_v31 = vmax.f32 %v560_v27, %v561_v35  ;;  %v624_v25 = vmax.f32 %v622_v36, %v623_v38  ;;  %v634_v49 = vunpack.i.h.bf16 %v632_v16  ;;  %v1434_v61 = vld [vmem:[%s2321_s0 + $0x80] ss:$200 sps:$4 sm:$0x1f]   ;;  %v1436_v24 = vld [vmem:[%s2321_s0 + $0x84] ss:$200 sps:$4 sm:$0x1f]  }
  0x44   :  { %v592_v47 = vrot.slane %v591_v44, 4  ;;  %v603_v12 = vrot.slane %v602_v17, 4  ;;  %v643_v52 = vsel %vm1483_vm2, %v1431_v28, 4286644096  ;;  %v1712_v43 = vmax.f32 %v540_v15, %v541_v48 }
  0x45   :  { %v552_v59 = vrot.slane %v551_v60, 1  ;;  %v572_v2 = vrot.slane %v571_v55, 2  ;;  %v635_v4 = vmax.f32 %v633_v23, %v634_v49  ;;  %v582_v27 = vmax.f32 %v580_v21, %v581_v57  ;;  %v1437_v35 = vld [vmem:[%s2321_s0 + $0x88] ss:$200 sps:$4 sm:$0x1f]  }
  0x46   :  { %2355 = vst [vmem:[#allocation2_spill] sm:$0xff] %v1712_v43  ;;  %v614_v20 = vrot.slane %v613_v7, 4  ;;  %v644_v22 = vunpack.i.l.bf16 %v643_v52  ;;  %v645_v32 = vunpack.i.h.bf16 %v643_v52  ;;  %v563_v36 = vrot.slane %v562_v31, 1 }
  0x47   :  { %v625_v23 = vrot.slane %v624_v25, 4  ;;  %v593_v28 = vmax.f32 %v591_v44, %v592_v47  ;;  %v604_v38 = vmax.f32 %v602_v17, %v603_v12  ;;  %v636_v48 = vrot.slane %v635_v4, 4 }
  0x48   :  { %v654_v21 = vsel %vm1483_vm2, %v1433_v10, 4286644096  ;;  %v1728_v57 = vmax.f32 %v551_v60, %v552_v59  ;;  %v646_v49 = vmax.f32 %v644_v22, %v645_v32  ;;  %v573_v15 = vmax.f32 %v571_v55, %v572_v2 }
  0x49   :  { %v655_v52 = vunpack.i.l.bf16 %v654_v21  ;;  %v583_v46 = vrot.slane %v582_v27, 2  ;;  %v615_v39 = vmax.f32 %v613_v7, %v614_v20  ;;  %v656_v44 = vunpack.i.h.bf16 %v654_v21  ;;  %v1439_v7 = vld [vmem:[%s2321_s0 + $0x8c] ss:$200 sps:$4 sm:$0x1f]  }
  0x4a   :  { %2356 = vst [vmem:[#allocation3_spill] sm:$0xff] %v1728_v57  ;;  %v1733_v17 = vmax.f32 %v562_v31, %v563_v36  ;;  %v626_v47 = vmax.f32 %v624_v25, %v625_v23  ;;  %v665_v10 = vsel %vm1483_vm2, %v1434_v61, 4286644096  ;;  %v676_v60 = vsel %vm1483_vm2, %v1436_v24, 4286644096 }
  0x4b   :  { %v594_v12 = vrot.slane %v593_v28, 2  ;;  %v605_v59 = vrot.slane %v604_v38, 2  ;;  %v637_v22 = vmax.f32 %v635_v4, %v636_v48  ;;  %v657_v32 = vmax.f32 %v655_v52, %v656_v44 }
  0x4c   :  { %2357 = vst [vmem:[#allocation4_spill] sm:$0xff] %v1733_v17  ;;  %v647_v16 = vrot.slane %v646_v49, 4  ;;  %v666_v53 = vunpack.i.l.bf16 %v665_v10  ;;  %v667_v33 = vunpack.i.h.bf16 %v665_v10  ;;  %v677_v55 = vunpack.i.l.bf16 %v676_v60 }
  0x4d   :  { %v574_v31 = vrot.slane %v573_v15, 1  ;;  %v584_v25 = vmax.f32 %v582_v27, %v583_v46  ;;  %v616_v2 = vrot.slane %v615_v39, 2  ;;  %v658_v20 = vrot.slane %v657_v32, 4 }
  0x4e   :  { %v627_v61 = vrot.slane %v626_v47, 2  ;;  %v668_v36 = vmax.f32 %v666_v53, %v667_v33  ;;  %v678_v23 = vunpack.i.h.bf16 %v676_v60  ;;  %v687_v24 = vsel %vm1483_vm2, %v1437_v35, 4286644096  ;;  %v1440_v33 = vld [vmem:[%s2321_s0 + $0x90] ss:$200 sps:$4 sm:$0x1f]  }
  0x4f   :  { %v595_v4 = vmax.f32 %v593_v28, %v594_v12  ;;  %v606_v48 = vmax.f32 %v604_v38, %v605_v59  ;;  %v638_v21 = vrot.slane %v637_v22, 2  ;;  %v688_v52 = vunpack.i.l.bf16 %v687_v24 }
  0x50   :  { %v648_v44 = vmax.f32 %v646_v49, %v647_v16  ;;  %v669_v10 = vrot.slane %v668_v36, 4  ;;  %v679_v26 = vmax.f32 %v677_v55, %v678_v23  ;;  %v689_v19 = vunpack.i.h.bf16 %v687_v24 }
  0x51   :  { %v1744_v18 = vmax.f32 %v573_v15, %v574_v31  ;;  %v617_v13 = vmax.f32 %v615_v39, %v616_v2  ;;  %v659_v46 = vmax.f32 %v657_v32, %v658_v20  ;;  %v698_v27 = vsel %vm1483_vm2, %v1439_v7, 4286644096  ;;  %v1442_v39 = vld [vmem:[%s2321_s0 + $0x94] ss:$200 sps:$4 sm:$0x1f]  }
  0x52   :  { %v628_v53 = vmax.f32 %v626_v47, %v627_v61  ;;  %v670_v35 = vmax.f32 %v668_v36, %v669_v10  ;;  %v680_v28 = vrot.slane %v679_v26, 4  ;;  %v690_v38 = vmax.f32 %v688_v52, %v689_v19 }
  0x53   :  { %2358 = vst [vmem:[#allocation5_spill] sm:$0xff] %v1744_v18  ;;  %v585_v60 = vrot.slane %v584_v25, 1  ;;  %v639_v16 = vmax.f32 %v637_v22, %v638_v21  ;;  %v699_v49 = vunpack.i.l.bf16 %v698_v27  ;;  %v700_v12 = vunpack.i.h.bf16 %v698_v27 }
  0x54   :  { %v596_v59 = vrot.slane %v595_v4, 1  ;;  %v607_v32 = vrot.slane %v606_v48, 1  ;;  %v649_v55 = vrot.slane %v648_v44, 2  ;;  %v618_v7 = vrot.slane %v617_v13, 1 }
  0x55   :  { %v660_v31 = vrot.slane %v659_v46, 2  ;;  %v671_v19 = vrot.slane %v670_v35, 2  ;;  %v629_v2 = vrot.slane %v628_v53, 1  ;;  %v681_v22 = vmax.f32 %v679_v26, %v680_v28  ;;  %v1443_v26 = vld [vmem:[%s2321_s0 + $0x98] ss:$200 sps:$4 sm:$0x1f]  }
  0x56   :  { %v691_v20 = vrot.slane %v690_v38, 4  ;;  %v709_v61 = vsel %vm1483_vm2, %v1440_v33, 4286644096  ;;  %v1762_v23 = vmax.f32 %v584_v25, %v585_v60  ;;  %v640_v24 = vrot.slane %v639_v16, 1 }
  0x57   :  { %v701_v21 = vmax.f32 %v699_v49, %v700_v12  ;;  %v1764_v52 = vmax.f32 %v595_v4, %v596_v59  ;;  %v1766_v10 = vmax.f32 %v606_v48, %v607_v32  ;;  %v650_v27 = vmax.f32 %v648_v44, %v649_v55  ;;  %v1445_v25 = vld [vmem:[%s2321_s0 + $0x9c] ss:$200 sps:$4 sm:$0x1f]   ;;  %v1446_v49 = vld [vmem:[%s2321_s0 + $0xa0] ss:$200 sps:$4 sm:$0x1f]  }
  0x58   :  { %2359 = vst [vmem:[#allocation6_spill] sm:$0xff] %v1762_v23  ;;  %v720_v47 = vsel %vm1483_vm2, %v1442_v39, 4286644096  ;;  %v661_v33 = vmax.f32 %v659_v46, %v660_v31  ;;  %v672_v28 = vmax.f32 %v670_v35, %v671_v19  ;;  %v710_v15 = vunpack.i.l.bf16 %v709_v61  ;;  %v1448_v59 = vld [vmem:[%s2321_s0 + $0xa4] ss:$200 sps:$4 sm:$0x1f]  }
  0x59   :  { %2360 = vst [vmem:[#allocation7_spill] sm:$0xff] %v1764_v52  ;;  %2361 = vst [vmem:[#allocation8_spill] sm:$0xff] %v1766_v10  ;;  %v711_v36 = vunpack.i.h.bf16 %v709_v61  ;;  %v1776_v4 = vmax.f32 %v617_v13, %v618_v7  ;;  %v1778_v48 = vmax.f32 %v628_v53, %v629_v2  ;;  %v682_v44 = vrot.slane %v681_v22, 2 }
  0x5a   :  { %v692_v60 = vmax.f32 %v690_v38, %v691_v20  ;;  %v1783_v12 = vmax.f32 %v639_v16, %v640_v24  ;;  %v702_v46 = vrot.slane %v701_v21, 4  ;;  %v721_v35 = vunpack.i.l.bf16 %v720_v47 }
  0x5b   :  { %2362 = vst [vmem:[#allocation9_spill] sm:$0xff] %v1776_v4  ;;  %2363 = vst [vmem:[#allocation10_spill] sm:$0xff] %v1778_v48  ;;  %v722_v39 = vunpack.i.h.bf16 %v720_v47  ;;  %v651_v32 = vrot.slane %v650_v27, 1  ;;  %v662_v55 = vrot.slane %v661_v33, 1  ;;  %v673_v16 = vrot.slane %v672_v28, 1 }
  0x5c   :  { %2364 = vst [vmem:[#allocation11_spill] sm:$0xff] %v1783_v12  ;;  %v712_v7 = vmax.f32 %v710_v15, %v711_v36  ;;  %v731_v47 = vsel %vm1483_vm2, %v1443_v26, 4286644096  ;;  %v683_v2 = vmax.f32 %v681_v22, %v682_v44  ;;  %v693_v20 = vrot.slane %v692_v60, 2 }
  0x5d   :  { %v703_v24 = vmax.f32 %v701_v21, %v702_v46  ;;  %v723_v38 = vmax.f32 %v721_v35, %v722_v39  ;;  %v742_v53 = vsel %vm1483_vm2, %v1445_v25, 4286644096  ;;  %v1449_v15 = vld [vmem:[%s2321_s0 + $0xa8] ss:$200 sps:$4 sm:$0x1f]   ;;  %v1807_v36 = vmax.f32 %v650_v27, %v651_v32 }
  0x5e   :  { %v732_v26 = vunpack.i.l.bf16 %v731_v47  ;;  %v733_v31 = vunpack.i.h.bf16 %v731_v47  ;;  %v753_v22 = vsel %vm1483_vm2, %v1446_v49, 4286644096  ;;  %v1811_v44 = vmax.f32 %v661_v33, %v662_v55  ;;  %v1451_v25 = vld [vmem:[%s2321_s0 + $0xac] ss:$200 sps:$4 sm:$0x1f]  }
  0x5f   :  { %2365 = vst [vmem:[#allocation12_spill] sm:$0xff] %v1807_v36  ;;  %v1813_v19 = vmax.f32 %v672_v28, %v673_v16  ;;  %v713_v21 = vrot.slane %v712_v7, 4  ;;  %v764_v46 = vsel %vm1483_vm2, %v1448_v59, 4286644096  ;;  %v684_v35 = vrot.slane %v683_v2, 1 }
  0x60   :  { %2366 = vst [vmem:[#allocation13_spill] sm:$0xff] %v1811_v44  ;;  %v694_v27 = vmax.f32 %v692_v60, %v693_v20  ;;  %v743_v39 = vunpack.i.l.bf16 %v742_v53  ;;  %v744_v32 = vunpack.i.h.bf16 %v742_v53  ;;  %v1452_v49 = vld [vmem:[%s2321_s0 + $0xb0] ss:$200 sps:$4 sm:$0x1f]   ;;  %v704_v33 = vrot.slane %v703_v24, 2 }
  0x61   :  { %2367 = vst [vmem:[#allocation14_spill] sm:$0xff] %v1813_v19  ;;  %v724_v55 = vrot.slane %v723_v38, 4  ;;  %v754_v28 = vunpack.i.l.bf16 %v753_v22  ;;  %v755_v16 = vunpack.i.h.bf16 %v753_v22  ;;  %v734_v47 = vmax.f32 %v732_v26, %v733_v31 }
  0x62   :  { %v765_v61 = vunpack.i.l.bf16 %v764_v46  ;;  %v766_v13 = vunpack.i.h.bf16 %v764_v46  ;;  %v775_v59 = vsel %vm1483_vm2, %v1449_v15, 4286644096  ;;  %v714_v53 = vmax.f32 %v712_v7, %v713_v21  ;;  %v1454_v46 = vld [vmem:[%s2321_s0 + $0xb4] ss:$200 sps:$4 sm:$0x1f]  }
  0x63   :  { %v776_v20 = vunpack.i.l.bf16 %v775_v59  ;;  %v1829_v5 = vmax.f32 %v683_v2, %v684_v35  ;;  %v695_v50 = vrot.slane %v694_v27, 1  ;;  %v745_v12 = vmax.f32 %v743_v39, %v744_v32 }
  0x64   :  { %v777_v48 = vunpack.i.h.bf16 %v775_v59  ;;  %v725_v22 = vmax.f32 %v723_v38, %v724_v55  ;;  %v756_v31 = vmax.f32 %v754_v28, %v755_v16  ;;  %v786_v26 = vsel %vm1483_vm2, %v1451_v25, 4286644096  ;;  %v1455_v59 = vld [vmem:[%s2321_s0 + $0xb8] ss:$200 sps:$4 sm:$0x1f]  }
  0x65   :  { %2368 = vst [vmem:[#allocation15_spill] sm:$0xff] %v1829_v5  ;;  %v797_v15 = vsel %vm1483_vm2, %v1452_v49, 4286644096  ;;  %v705_v2 = vmax.f32 %v703_v24, %v704_v33  ;;  %v735_v21 = vrot.slane %v734_v47, 4  ;;  %v767_v35 = vmax.f32 %v765_v61, %v766_v13 }
  0x66   :  { %v715_v39 = vrot.slane %v714_v53, 2  ;;  %v778_v32 = vmax.f32 %v776_v20, %v777_v48  ;;  %v787_v38 = vunpack.i.l.bf16 %v786_v26  ;;  %v788_v55 = vunpack.i.h.bf16 %v786_v26 }
  0x67   :  { %v1842_v28 = vmax.f32 %v694_v27, %v695_v50  ;;  %v746_v49 = vrot.slane %v745_v12, 4  ;;  %v798_v16 = vunpack.i.l.bf16 %v797_v15  ;;  %v726_v60 = vrot.slane %v725_v22, 2 }
  0x68   :  { %v757_v7 = vrot.slane %v756_v31, 4  ;;  %v789_v24 = vmax.f32 %v787_v38, %v788_v55  ;;  %v799_v33 = vunpack.i.h.bf16 %v797_v15  ;;  %v706_v13 = vrot.slane %v705_v2, 1  ;;  %v1457_v15 = vld [vmem:[%s2321_s0 + $0xbc] ss:$200 sps:$4 sm:$0x1f]  }
  0x69   :  { %2369 = vst [vmem:[#allocation16_spill] sm:$0xff] %v1842_v28  ;;  %v736_v61 = vmax.f32 %v734_v47, %v735_v21  ;;  %v768_v48 = vrot.slane %v767_v35, 4  ;;  %v808_v20 = vsel %vm1483_vm2, %v1454_v46, 4286644096  ;;  %v779_v26 = vrot.slane %v778_v32, 4 }
  0x6a   :  { %v790_v25 = vrot.slane %v789_v24, 4  ;;  %v800_v50 = vmax.f32 %v798_v16, %v799_v33  ;;  %v809_v27 = vunpack.i.l.bf16 %v808_v20  ;;  %v716_v5 = vmax.f32 %v714_v53, %v715_v39 }
  0x6b   :  { %v747_v19 = vmax.f32 %v745_v12, %v746_v49  ;;  %v810_v44 = vunpack.i.h.bf16 %v808_v20  ;;  %v727_v38 = vmax.f32 %v725_v22, %v726_v60  ;;  %v758_v47 = vmax.f32 %v756_v31, %v757_v7  ;;  %v1458_v12 = vld [vmem:[%s2321_s0 + $0xc0] ss:$200 sps:$4 sm:$0x1f]   ;;  %v1460_v60 = vld [vmem:[%s2321_s0 + $0xc4] ss:$200 sps:$4 sm:$0x1f]  }
  0x6c   :  { %v801_v21 = vrot.slane %v800_v50, 4  ;;  %v819_v46 = vsel %vm1483_vm2, %v1455_v59, 4286644096  ;;  %v1856_v55 = vmax.f32 %v705_v2, %v706_v13  ;;  %v737_v16 = vrot.slane %v736_v61, 2 }
  0x6d   :  { %v769_v33 = vmax.f32 %v767_v35, %v768_v48  ;;  %v811_v36 = vmax.f32 %v809_v27, %v810_v44  ;;  %v780_v53 = vmax.f32 %v778_v32, %v779_v26  ;;  %v791_v39 = vmax.f32 %v789_v24, %v790_v25 }
  0x6e   :  { %v820_v49 = vunpack.i.l.bf16 %v819_v46  ;;  %v821_v20 = vunpack.i.h.bf16 %v819_v46  ;;  %v717_v22 = vrot.slane %v716_v5, 1  ;;  %v748_v31 = vrot.slane %v747_v19, 2 }
  0x6f   :  { %v802_v7 = vmax.f32 %v800_v50, %v801_v21  ;;  %v812_v2 = vrot.slane %v811_v36, 4  ;;  %v728_v59 = vrot.slane %v727_v38, 1  ;;  %v759_v13 = vrot.slane %v758_v47, 2 }
  0x70   :  { %v822_v35 = vmax.f32 %v820_v49, %v821_v20  ;;  %v830_v44 = vsel %vm1483_vm2, %v1457_v15, 4286644096  ;;  %v738_v48 = vmax.f32 %v736_v61, %v737_v16  ;;  %v770_v27 = vrot.slane %v769_v33, 2 }
  0x71   :  { %v813_v32 = vmax.f32 %v811_v36, %v812_v2  ;;  %v831_v25 = vunpack.i.l.bf16 %v830_v44  ;;  %v781_v24 = vrot.slane %v780_v53, 2  ;;  %v792_v26 = vrot.slane %v791_v39, 2 }
  0x72   :  { %v823_v46 = vrot.slane %v822_v35, 4  ;;  %v832_v6 = vunpack.i.h.bf16 %v830_v44  ;;  %v749_v28 = vmax.f32 %v747_v19, %v748_v31  ;;  %v803_v4 = vrot.slane %v802_v7, 2 }
  0x73   :  { %v841_v50 = vsel %vm1483_vm2, %v1458_v12, 4286644096  ;;  %v852_v21 = vsel %vm1483_vm2, %v1460_v60, 4286644096  ;;  %v760_v49 = vmax.f32 %v758_v47, %v759_v13  ;;  %v814_v20 = vrot.slane %v813_v32, 2 }
  0x74   :  { %v824_v10 = vmax.f32 %v822_v35, %v823_v46  ;;  %v833_v15 = vmax.f32 %v831_v25, %v832_v6  ;;  %v771_v61 = vmax.f32 %v769_v33, %v770_v27  ;;  %v842_v16 = vunpack.i.l.bf16 %v841_v50 }
  0x75   :  { %v843_v36 = vunpack.i.h.bf16 %v841_v50  ;;  %v853_v2 = vunpack.i.l.bf16 %v852_v21  ;;  %v782_v52 = vmax.f32 %v780_v53, %v781_v24  ;;  %v793_v23 = vmax.f32 %v791_v39, %v792_v26 }
  0x76   :  { %v825_v18 = vrot.slane %v824_v10, 2  ;;  %v834_v44 = vrot.slane %v833_v15, 4  ;;  %v739_v19 = vrot.slane %v738_v48, 1  ;;  %v804_v31 = vmax.f32 %v802_v7, %v803_v4 }
  0x77   :  { %v844_v17 = vmax.f32 %v842_v16, %v843_v36  ;;  %v854_v57 = vunpack.i.h.bf16 %v852_v21  ;;  %v750_v12 = vrot.slane %v749_v28, 1  ;;  %v761_v43 = vrot.slane %v760_v49, 1 }
  0x78   :  { %v815_v3 = vmax.f32 %v813_v32, %v814_v20  ;;  %v835_v60 = vmax.f32 %v833_v15, %v834_v44  ;;  %v1870_v47 = vmax.f32 %v716_v5, %v717_v22  ;;  %v772_v13 = vrot.slane %v771_v61, 1 }
  0x79   :  { %v845_v6 = vrot.slane %v844_v17, 4  ;;  %v855_v33 = vmax.f32 %v853_v2, %v854_v57  ;;  %v783_v35 = vrot.slane %v782_v52, 1  ;;  %v794_v27 = vrot.slane %v793_v23, 1 }
  0x7a   :  { %v826_v25 = vmax.f32 %v824_v10, %v825_v18  ;;  %v836_v53 = vrot.slane %v835_v60, 2  ;;  %v1872_v39 = vmax.f32 %v727_v38, %v728_v59  ;;  %v805_v24 = vrot.slane %v804_v31, 1 }
  0x7b   :  { %v846_v26 = vmax.f32 %v844_v17, %v845_v6  ;;  %v856_v4 = vrot.slane %v855_v33, 4  ;;  %v1874_v7 = vmax.f32 %v738_v48, %v739_v19  ;;  %v1876_v46 = vmax.f32 %v749_v28, %v750_v12 }
  0x7c   :  { %v1878_v32 = vmax.f32 %v760_v49, %v761_v43  ;;  %v816_v5 = vrot.slane %v815_v3, 1  ;;  %v1880_v22 = vmax.f32 %v771_v61, %v772_v13  ;;  %v837_v50 = vmax.f32 %v835_v60, %v836_v53  ;;  %v2412_v61 = vld [vmem:[#allocation13_spill] sm:$0xff]  ;;  %v2418_v49 = vld [vmem:[#allocation16_spill] sm:$0xff] }
  0x7d   :  { %v847_v57 = vrot.slane %v846_v26, 2  ;;  %v857_v21 = vmax.f32 %v855_v33, %v856_v4  ;;  %v708_v18 = vpack.i.bf16 %v1856_v55, %v1856_v55  ;;  %v1884_v10 = vmax.f32 %v782_v52, %v783_v35  ;;  %v2414_v52 = vld [vmem:[#allocation14_spill] sm:$0xff] }
  0x7e   :  { %v1886_v38 = vmax.f32 %v793_v23, %v794_v27  ;;  %v827_v17 = vrot.slane %v826_v25, 1  ;;  %v719_v28 = vpack.i.bf16 %v1870_v47, %v1870_v47  ;;  %v730_v43 = vpack.i.bf16 %v1872_v39, %v1872_v39  ;;  %v2416_v23 = vld [vmem:[#allocation15_spill] sm:$0xff] }
  0x7f   :  { %v1892_v59 = vmax.f32 %v804_v31, %v805_v24  ;;  %v858_v48 = vrot.slane %v857_v21, 2  ;;  %v1896_v20 = vmax.f32 %v815_v3, %v816_v5  ;;  %v848_v15 = vmax.f32 %v846_v26, %v847_v57 }
  0x80   :  { %v838_v16 = vrot.slane %v837_v50, 1  ;;  %v1908_v44 = vmax.f32 %v826_v25, %v827_v17  ;;  %v1461_v12 = vmov 0   ;;  %v2370_v3 = vpack.i.bf16 %v1549_v29, %v1549_v29 }
  0x81   :  { %v859_v19 = vmax.f32 %v857_v21, %v858_v48  ;;  %v807_v31 = vpack.i.bf16 %v1892_v59, %v1892_v59  ;;  %v2371_v13 = vpack.i.bf16 %v1551_v30, %v1551_v30  ;;  %v2372_v33 = vpack.i.bf16 %v1558_v42, %v1558_v42 }
  0x82   :  { %v1916_v60 = vmax.bf16 %v1461_v12, %v2370_v3  ;;  %v818_v27 = vpack.i.bf16 %v1896_v20, %v1896_v20  ;;  %v849_v25 = vrot.slane %v848_v15, 1  ;;  %v2373_v29 = vpack.i.bf16 %v1564_v58, %v1564_v58 }
  0x83   :  { %v1922_v6 = vmax.bf16 %v1461_v12, %v2371_v13  ;;  %v1928_v35 = vmax.bf16 %v1461_v12, %v2372_v33  ;;  %v2374_v30 = vpack.i.bf16 %v1568_v62, %v1568_v62  ;;  %v839_v42 = vmax.f32 %v837_v50, %v838_v16 }
  0x84   :  { %v1936_v53 = vmax.bf16 %v1461_v12, %v2373_v29  ;;  %v2375_v26 = vpack.i.bf16 %v1570_v63, %v1570_v63  ;;  %v2376_v5 = vpack.i.bf16 %v1582_v9, %v1582_v9  ;;  %v2377_v57 = vpack.i.bf16 %v1586_v14, %v1586_v14 }
  0x85   :  { %v1942_v24 = vmax.bf16 %v1461_v12, %v2374_v30  ;;  %v829_v50 = vpack.i.bf16 %v1908_v44, %v1908_v44  ;;  %v860_v21 = vrot.slane %v859_v19, 1  ;;  %v2378_v63 = vpack.i.bf16 %v1621_v8, %v1621_v8 }
  0x86   :  { %v1948_v4 = vmax.bf16 %v1461_v12, %v2375_v26  ;;  %v1954_v58 = vmax.bf16 %v1461_v12, %v2376_v5  ;;  %v1960_v62 = vmax.bf16 %v1461_v12, %v2377_v57  ;;  %v2379_v9 = vpack.i.bf16 %v1630_v40, %v1630_v40 }
  0x87   :  { %v1968_v17 = vmax.bf16 %v1461_v12, %v2378_v63  ;;  %v2380_v14 = vpack.i.bf16 %v1632_v45, %v1632_v45  ;;  %v2381_v20 = vpack.i.bf16 %v1636_v54, %v1636_v54  ;;  %v2382_v16 = vpack.i.bf16 %v1638_v56, %v1638_v56  ;;  %v2392_v63 = vld [vmem:[#allocation3_spill] sm:$0xff] }
  0x88   :  { %v1974_v59 = vmax.bf16 %v1461_v12, %v2379_v9  ;;  %v2383_v44 = vpack.i.bf16 %v1647_v1, %v1647_v1  ;;  %v850_v3 = vmax.f32 %v848_v15, %v849_v25  ;;  %v2384_v13 = vpack.i.bf16 %v1654_v11, %v1654_v11 }
  0x89   :  { %v1980_v48 = vmax.bf16 %v1461_v12, %v2380_v14  ;;  %v1986_v8 = vmax.bf16 %v1461_v12, %v2381_v20  ;;  %v1992_v40 = vmax.bf16 %v1461_v12, %v2382_v16  ;;  %v2385_v33 = vpack.i.bf16 %v1675_v37, %v1675_v37  ;;  %v2394_v14 = vld [vmem:[#allocation4_spill] sm:$0xff]  ;;  %v2396_v16 = vld [vmem:[#allocation5_spill] sm:$0xff] }
  0x8a   :  { %v1998_v45 = vmax.bf16 %v1461_v12, %v2383_v44  ;;  %v2004_v54 = vmax.bf16 %v1461_v12, %v2384_v13  ;;  %v2386_v29 = vpack.i.bf16 %v1681_v51, %v1681_v51  ;;  %v840_v30 = vpack.i.bf16 %v839_v42, %v839_v42  ;;  %v2390_v42 = vld [vmem:[#allocation2_spill] sm:$0xff] }
  0x8b   :  { %v2010_v56 = vmax.bf16 %v1461_v12, %v2385_v33  ;;  %v2387_v15 = vpack.i.bf16 %v1692_v34, %v1692_v34  ;;  %v2388_v25 = vpack.i.bf16 %v1701_v41, %v1701_v41  ;;  %v2389_v26 = vpack.i.bf16 %v1706_v0, %v1706_v0  ;;  %v2398_v44 = vld [vmem:[#allocation6_spill] sm:$0xff] }
  0x8c   :  { %v2016_v1 = vmax.bf16 %v1461_v12, %v2386_v29  ;;  %v861_v5 = vmax.f32 %v859_v19, %v860_v21  ;;  %v2391_v57 = vpack.i.bf16 %v2390_v42, %v2390_v42  ;;  %v2393_v9 = vpack.i.bf16 %v2392_v63, %v2392_v63  ;;  %v2400_v29 = vld [vmem:[#allocation7_spill] sm:$0xff] }
  0x8d   :  { %v2022_v11 = vmax.bf16 %v1461_v12, %v2387_v15  ;;  %v2028_v37 = vmax.bf16 %v1461_v12, %v2388_v25  ;;  %v2034_v51 = vmax.bf16 %v1461_v12, %v2389_v26  ;;  %v2395_v20 = vpack.i.bf16 %v2394_v14, %v2394_v14  ;;  %v2402_v26 = vld [vmem:[#allocation8_spill] sm:$0xff] }
  0x8e   :  { %v2040_v34 = vmax.bf16 %v1461_v12, %v2391_v57  ;;  %v2046_v41 = vmax.bf16 %v1461_v12, %v2393_v9  ;;  %v2397_v19 = vpack.i.bf16 %v2396_v16, %v2396_v16  ;;  %v2399_v13 = vpack.i.bf16 %v2398_v44, %v2398_v44  ;;  %v2404_v9 = vld [vmem:[#allocation9_spill] sm:$0xff] }
  0x8f   :  { %v2052_v0 = vmax.bf16 %v1461_v12, %v2395_v20  ;;  %v2401_v15 = vpack.i.bf16 %v2400_v29, %v2400_v29  ;;  %v2403_v42 = vpack.i.bf16 %v2402_v26, %v2402_v26  ;;  %v851_v63 = vpack.i.bf16 %v850_v3, %v850_v3  ;;  %v2408_v29 = vld [vmem:[#allocation11_spill] sm:$0xff]  ;;  %v2410_v3 = vld [vmem:[#allocation12_spill] sm:$0xff] }
  0x90   :  { %v2058_v21 = vmax.bf16 %v1461_v12, %v2397_v19  ;;  %v2064_v33 = vmax.bf16 %v1461_v12, %v2399_v13  ;;  %v2405_v14 = vpack.i.bf16 %v2404_v9, %v2404_v9  ;;  %v970_v16 = vlaneseq  ;;  %v2406_v19 = vld [vmem:[#allocation10_spill] sm:$0xff] }
  0x91   :  { %v2070_v25 = vmax.bf16 %v1461_v12, %v2401_v15  ;;  %v2076_v57 = vmax.bf16 %v1461_v12, %v2403_v42  ;;  %v2407_v44 = vpack.i.bf16 %v2406_v19, %v2406_v19  ;;  %v2409_v15 = vpack.i.bf16 %v2408_v29, %v2408_v29 }
  0x92   :  { %v2082_v20 = vmax.bf16 %v1461_v12, %v2405_v14  ;;  %v2411_v42 = vpack.i.bf16 %v2410_v3, %v2410_v3  ;;  %v1462_v14 = vmov 1966171168   ;;  %v862_v36 = vpack.i.bf16 %v861_v5, %v861_v5 }
  0x93   :  { %v2088_v13 = vmax.bf16 %v1461_v12, %v2407_v44  ;;  %v2094_v26 = vmax.bf16 %v1461_v12, %v2409_v15  ;;  %v968_v2 = vunpack.c.l.s4 %v1462_v14  ;;  %v2413_v19 = vpack.i.bf16 %v2412_v61, %v2412_v61 }
  0x94   :  { %v2100_v9 = vmax.bf16 %v1461_v12, %v2411_v42  ;;  %v2415_v29 = vpack.i.bf16 %v2414_v52, %v2414_v52  ;;  %v2417_v3 = vpack.i.bf16 %v2416_v23, %v2416_v23  ;;  %v2419_v5 = vpack.i.bf16 %v2418_v49, %v2418_v49 }
  0x95   :  { %v2106_v44 = vmax.bf16 %v1461_v12, %v2413_v19  ;;  %v898_v61 = vmax.bf16 %v1461_v12, %v708_v18  ;;  %v969_v19 = vunpack.c.0.s8 %v968_v2  ;;  %v971_v52 = vshrl.u32 %v970_v16, 7 }
  0x96   :  { %v2112_v15 = vmax.bf16 %v1461_v12, %v2415_v29  ;;  %v896_v42 = vmax.bf16 %v1461_v12, %v2417_v3  ;;  %v897_v14 = vmax.bf16 %v1461_v12, %v2419_v5  ;;  %v899_v29 = vmax.bf16 %v1461_v12, %v719_v28 }
  0x97   :  { %v900_v23 = vmax.bf16 %v1461_v12, %v730_v43  ;;  %v2420_v49 = vpack.i.bf16 %v1874_v7, %v1874_v7  ;;  %v2421_v55 = vpack.i.bf16 %v1876_v46, %v1876_v46  ;;  %v2422_v47 = vpack.i.bf16 %v1878_v32, %v1878_v32 }
  0x98   :  { %v2423_v39 = vpack.i.bf16 %v1880_v22, %v1880_v22  ;;  %v2424_v7 = vpack.i.bf16 %v1884_v10, %v1884_v10  ;;  %v2425_v46 = vpack.i.bf16 %v1886_v38, %v1886_v38  ;;  %v907_v5 = vmax.bf16 %v1461_v12, %v807_v31 }
  0x99   :  { %v901_v3 = vmax.bf16 %v1461_v12, %v2420_v49  ;;  %v902_v18 = vmax.bf16 %v1461_v12, %v2421_v55  ;;  %v903_v28 = vmax.bf16 %v1461_v12, %v2422_v47  ;;  %v908_v32 = vmax.bf16 %v1461_v12, %v818_v27 }
  0x9a   :  { %v904_v43 = vmax.bf16 %v1461_v12, %v2423_v39  ;;  %v905_v2 = vmax.bf16 %v1461_v12, %v2424_v7  ;;  %v906_v16 = vmax.bf16 %v1461_v12, %v2425_v46  ;;  %v909_v49 = vmax.bf16 %v1461_v12, %v829_v50 }
  0x9b   :  { %v910_v22 = vmax.bf16 %v1461_v12, %v840_v30  ;;  %v911_v55 = vmax.bf16 %v1461_v12, %v851_v63  ;;  %v963_v10 = vcombine.low %v1916_v60, %v1922_v6  ;;  %v964_v47 = vcombine.low %v1928_v35, %v1936_v53 }
  0x9c   :  { %v2167_v39 = vsub.s32 %v969_v19, %v971_v52  ;;  %v912_v38 = vmax.bf16 %v1461_v12, %v862_v36  ;;  %v965_v31 = vcombine.low %v1942_v24, %v1948_v4  ;;  %v966_v27 = vcombine.low %v1954_v58, %v1960_v62 }
  0x9d   :  { %v1012_v50 = vcombine.low %v1968_v17, %v1974_v59  ;;  %v1013_v30 = vcombine.low %v1980_v48, %v1986_v8  ;;  %v1014_v60 = vcombine.low %v1992_v40, %v1998_v45  ;;  %v1015_v6 = vcombine.low %v2004_v54, %v2010_v56 }
  0x9e   :  { %v1061_v36 = vcombine.low %v2016_v1, %v2022_v11  ;;  %v1062_v12 = vcombine.low %v2028_v37, %v2034_v51  ;;  %v1063_v35 = vcombine.low %v2040_v34, %v2046_v41  ;;  %v1064_v53 = vcombine.low %v2052_v0, %v2058_v21 }
  0x9f   :  { %v1110_v24 = vcombine.low %v2064_v33, %v2070_v25  ;;  %v2193_v4 = vrot.slane %v963_v10, %v2167_v39  ;;  %v2196_v58 = vrot.slane %v964_v47, %v2167_v39  ;;  %v1111_v62 = vcombine.low %v2076_v57, %v2082_v20 }
  0xa0   :  { %v1112_v17 = vcombine.low %v2088_v13, %v2094_v26  ;;  %v1113_v59 = vcombine.low %v2100_v9, %v2106_v44  ;;  %v1159_v48 = vcombine.low %v2112_v15, %v896_v42  ;;  %v1160_v8 = vcombine.low %v897_v14, %v898_v61 }
  0xa1   :  { %v1161_v40 = vcombine.low %v899_v29, %v900_v23  ;;  %v1162_v45 = vcombine.low %v901_v3, %v902_v18  ;;  %v1208_v54 = vcombine.low %v903_v28, %v904_v43  ;;  %v1209_v56 = vcombine.low %v905_v2, %v906_v16 }
  0xa2   :  { %v1210_v1 = vcombine.low %v907_v5, %v908_v32  ;;  %v987_v11 = vrot.slane %v965_v31, %v2167_v39  ;;  %v994_v37 = vrot.slane %v966_v27, %v2167_v39  ;;  %v1022_v51 = vrot.slane %v1012_v50, %v2167_v39  ;;  %v1327_v5 = vld [vmem:[%s2322_s1 + $0x30] sm:$0x3] }
  0xa3   :  { %v1211_v34 = vcombine.low %v909_v49, %v910_v22  ;;  %v995_v41 = vcombine.low %v2193_v4, %v2196_v58  ;;  %v1029_v0 = vrot.slane %v1013_v30, %v2167_v39  ;;  %v1036_v21 = vrot.slane %v1014_v60, %v2167_v39 }
  0xa4   :  { %v1043_v33 = vrot.slane %v1015_v6, %v2167_v39  ;;  %v1071_v25 = vrot.slane %v1061_v36, %v2167_v39  ;;  %v1078_v57 = vrot.slane %v1062_v12, %v2167_v39  ;;  %v1085_v63 = vrot.slane %v1063_v35, %v2167_v39 }
  0xa5   :  { %v1092_v20 = vrot.slane %v1064_v53, %v2167_v39  ;;  %v1120_v13 = vrot.slane %v1110_v24, %v2167_v39  ;;  %v1127_v26 = vrot.slane %v1111_v62, %v2167_v39  ;;  %v1134_v9 = vrot.slane %v1112_v17, %v2167_v39 }
  0xa6   :  { %v1141_v44 = vrot.slane %v1113_v59, %v2167_v39  ;;  %v1169_v15 = vrot.slane %v1159_v48, %v2167_v39  ;;  %v1176_v42 = vrot.slane %v1160_v8, %v2167_v39  ;;  %v1257_v14 = vcombine.low %v911_v55, %v912_v38 }
  0xa7   :  { %v1183_v61 = vrot.slane %v1161_v40, %v2167_v39  ;;  %v1190_v19 = vrot.slane %v1162_v45, %v2167_v39  ;;  %v1218_v52 = vrot.slane %v1208_v54, %v2167_v39  ;;  %v1225_v29 = vrot.slane %v1209_v56, %v2167_v39  ;;  %v1312_v56 = vld [vmem:[%s2322_s1 + $0x8] sm:$0xff] }
  0xa8   :  { %v1232_v23 = vrot.slane %v1210_v1, %v2167_v39  ;;  %v1264_v3 = vrot.slane %v1257_v14, %v2167_v39  ;;  %vm1282_vm6 = vcmask 1041409   ;;  %v1239_v28 = vrot.slane %v1211_v34, %v2167_v39  ;;  %v1321_v34 = vld [vmem:[%s2322_s1 + $0x20] sm:$0xff] }
  0xa9   :  { %vm1283_vm7 = vsmask.f32 1280  ;;  %vm1286_vm8 = vcmask 1042434   ;;  %vm1287_vm9 = vsmask.f32 2304  ;;  %v996_v43 = vcombine.low %v987_v11, %v994_v37  ;;  %v1315_v37 = vld [vmem:[%s2322_s1 + $0x10] sm:$0xff] }
  0xaa   :  { %v1044_v7 = vcombine.low %v1022_v51, %v1029_v0  ;;  %v1045_v2 = vcombine.low %v1036_v21, %v1043_v33  ;;  %v1271_v46 = vrot.slane %v1264_v3, %v2167_v39  ;;  %vm2235_vm10 = vmand %vm1282_vm6, %vm1283_vm7  ;;  %v1093_v32 = vcombine.low %v1071_v25, %v1078_v57  ;;  %v1318_v51 = vld [vmem:[%s2322_s1 + $0x18] sm:$0xff] }
  0xab   :  { %v1094_v49 = vcombine.low %v1085_v63, %v1092_v20  ;;  %vm1285_vm11 = vmor %vm2235_vm10, %vm2229_vm5  ;;  %vm1290_vm12 = vcmask 1043459   ;;  %vm1291_vm13 = vsmask.f32 3328  ;;  %v1142_v22 = vcombine.low %v1120_v13, %v1127_v26 }
  0xac   :  { %v1143_v55 = vcombine.low %v1134_v9, %v1141_v44  ;;  %v1191_v10 = vcombine.low %v1169_v15, %v1176_v42  ;;  %v1192_v47 = vcombine.low %v1183_v61, %v1190_v19  ;;  %vm1288_vm14 = vmand %vm1286_vm8, %vm1287_vm9  ;;  %v1240_v38 = vcombine.low %v1218_v52, %v1225_v29 }
  0xad   :  { %v1241_v31 = vcombine.low %v1232_v23, %v1239_v28  ;;  %vm2248_vm15 = vmor %vm1288_vm14, %vm1285_vm11  ;;  %vm1294_vm0 = vcmask 1044484   ;;  %v1328_v50 = vsel %vm1285_vm11, %v1271_v46, %v1327_v5  ;;  %v1003_v30 = vrot.slane %v995_v41, %v2167_v39  ;;  %v1324_v41 = vld [vmem:[%s2322_s1 + $0x28] sm:$0xff] }
  0xae   :  { %v1010_v60 = vrot.slane %v996_v43, %v2167_v39  ;;  %v1052_v6 = vrot.slane %v1044_v7, %v2167_v39  ;;  %v1059_v36 = vrot.slane %v1045_v2, %v2167_v39  ;;  %vm2258_vm2 = vmand %vm1290_vm12, %vm1291_vm13  ;;  %1329 = vst [vmem:[%s2322_s1 + $0x30] sm:$0x3] %v1328_v50  ;;  %v1101_v35 = vrot.slane %v1093_v32, %v2167_v39 }
  0xaf   :  { %v1108_v53 = vrot.slane %v1094_v49, %v2167_v39  ;;  %vm1293_vm3 = vmor %vm2258_vm2, %vm2248_vm15  ;;  %vm1297_vm4 = vcmask 1045509   ;;  %vm1298_vm5 = vsmask.f32 5376  ;;  %v1150_v24 = vrot.slane %v1142_v22, %v2167_v39 }
  0xb0   :  { %v1157_v4 = vrot.slane %v1143_v55, %v2167_v39  ;;  %v1199_v58 = vrot.slane %v1191_v10, %v2167_v39  ;;  %v1206_v62 = vrot.slane %v1192_v47, %v2167_v39  ;;  %vm1295_vm6 = vmand %vm1294_vm0, %vm311_vm1  ;;  %v1248_v17 = vrot.slane %v1240_v38, %v2167_v39 }
  0xb1   :  { %v1255_v59 = vrot.slane %v1241_v31, %v2167_v39  ;;  %vm2279_vm7 = vmor %vm1295_vm6, %vm1293_vm3  ;;  %vm1301_vm8 = vcmask 1046534   ;;  %vm1302_vm9 = vsmask.f32 6400  ;;  %vm1305_vm12 = vcmask 1047559   ;;  %v1309_v39 = vld [vmem:[%s2322_s1] sm:$0xff] }
  0xb2   :  { %vm1299_vm10 = vmand %vm1297_vm4, %vm1298_vm5  ;;  %vm1306_vm13 = vsmask.f32 7424  ;;  %v1011_v8 = vcombine.low %v1003_v30, %v1010_v60  ;;  %v1060_v40 = vcombine.low %v1052_v6, %v1059_v36  ;;  %v1109_v45 = vcombine.low %v1101_v35, %v1108_v53 }
  0xb3   :  { %vm1300_vm11 = vmor %vm1299_vm10, %vm2279_vm7  ;;  %v1158_v54 = vcombine.low %v1150_v24, %v1157_v4  ;;  %v1207_v1 = vcombine.low %v1199_v58, %v1206_v62  ;;  %v1256_v11 = vcombine.low %v1248_v17, %v1255_v59 }
  0xb4   :  { %vm1303_vm1 = vmand %vm1301_vm8, %vm1302_vm9 }
  0xb5   :  { %vm1304_vm14 = vmor %vm1303_vm1, %vm1300_vm11 }
  0xb6   :  { %vm1307_vm15 = vmand %vm1305_vm12, %vm1306_vm13 }
  0xb7   :  { %vm1308_vm0 = vmor %vm1307_vm15, %vm1304_vm14 }
  0xb8   :  { %v1310_v0 = vsel %vm1308_vm0, %v1011_v8, %v1309_v39  ;;  %v1313_v21 = vsel %vm1308_vm0, %v1060_v40, %v1312_v56  ;;  %v1316_v33 = vsel %vm1308_vm0, %v1109_v45, %v1315_v37  ;;  %v1319_v25 = vsel %vm1308_vm0, %v1158_v54, %v1318_v51 }
  0xb9   :  { %1311 = vst [vmem:[%s2322_s1] sm:$0xff] %v1310_v0  ;;  %1314 = vst [vmem:[%s2322_s1 + $0x8] sm:$0xff] %v1313_v21  ;;  %v1322_v57 = vsel %vm1308_vm0, %v1207_v1, %v1321_v34  ;;  %v1325_v63 = vsel %vm1308_vm0, %v1256_v11, %v1324_v41 }
  0xba   :  { %1317 = vst [vmem:[%s2322_s1 + $0x10] sm:$0xff] %v1316_v33  ;;  %1320 = vst [vmem:[%s2322_s1 + $0x18] sm:$0xff] %v1319_v25 }
  0xbb   :  { %1323 = vst [vmem:[%s2322_s1 + $0x20] sm:$0xff] %v1322_v57  ;;  %1326 = vst [vmem:[%s2322_s1 + $0x28] sm:$0xff] %v1325_v63 }

// kernel: squeeze.1
= control target key start
LH: loop header
LB: loop body
LE: loop exit
PB: predicated region body
PF: predicated region fallthrough
CT: control target
= control target key end

     0   :  { %vm114_vm0 = vcmask 261120   ;;  %vm214_vm1 = vcmask 1047557   ;;  %vm229_vm2 = vcmask 1044483   ;;  %vm248_vm3 = vcmask 1047559   ;;  %s1018_s14 = smov 64   ;;  %s1019_s15 = smov 32   ;;  %s1211_s0 = inlined_call_operand.vmem [shape: bf16[6400], index: 0, kind: input, shape index: {}]   ;;  %s1212_s1 = inlined_call_operand.vmem [shape: bf16[2,10,10,32], index: 1, kind: output, shape index: {}]  }
   0x1   :  { %v791_v0 = vld [vmem:[%s1211_s0 + $0x18] sm:$0xf]  ;;  %v949_v1 = vld [vmem:[%s1211_s0 + $0x8] sm:$0xff]   ;;  %v845_v2 = vld [vmem:[%s1211_s0] sm:$0xff]  }
   0x2   :  { %v17_v3 = vunpack.c.l.bf16 %v791_v0  ;;  %v842_v4 = vunpack.c.l.bf16 %v949_v1  ;;  %v843_v5 = vunpack.c.h.bf16 %v949_v1  ;;  %v846_v6 = vunpack.c.l.bf16 %v845_v2  ;;  %v948_v7 = vld [vmem:[%s1211_s0 + $0x10] sm:$0xff]   ;;  %s1017_s0 = smov 96  }
   0x3   :  { %v847_v8 = vunpack.c.h.bf16 %v845_v2  ;;  %v838_v9 = vunpack.c.l.bf16 %v948_v7  ;;  %v839_v10 = vunpack.c.h.bf16 %v948_v7 }
   0x4   :  { %20 = vst [vmem:[#allocation1 + $0x30] sm:$0xff] %v17_v3  ;;  %84 = vst [vmem:[#allocation1 + $0x10] sm:$0xff] %v842_v4 }
   0x5   :  { %68 = vst [vmem:[#allocation1 + $0x18] sm:$0xff] %v843_v5  ;;  %99 = vst [vmem:[#allocation1 + $0x8] sm:$0xff] %v847_v8 }
   0x6   :  { %52 = vst [vmem:[#allocation1 + $0x20] sm:$0xff] %v838_v9  ;;  %36 = vst [vmem:[#allocation1 + $0x28] sm:$0xff] %v839_v10 }
   0x7   :  { %115 = vst.msk [vmem:[#allocation0] ss:$4 sm:$0x7] %vm114_vm0, %v846_v6   ;;  %117 = vst.msk [vmem:[#allocation0 + $0x6] ss:$4 sm:$0x18] %vm114_vm0, %v846_v6  }
   0x8   :  { %119 = vst.msk [vmem:[#allocation0 + $0xc] ss:$4 sm:$0xe0] %vm114_vm0, %v846_v6   ;;  %126 = vst.msk [vmem:[#allocation0 + $0x38] ss:$4 sm:$0x1c] %vm114_vm0, %v847_v8  }
   0x9   :  { %130 = vst.msk [vmem:[#allocation0 + $0x59] sm:$0x80] %vm114_vm0, %v847_v8   ;;  %135 = vst.msk [vmem:[#allocation0 + $0x64] ss:$4 sm:$0x3] %vm114_vm0, %v842_v4  }
   0xa   :  { %124 = vst.msk [vmem:[#allocation0 + $0x32] ss:$4 sm:$0x3] %vm114_vm0, %v847_v8   ;;  %128 = vst.msk [vmem:[#allocation0 + $0x3e] ss:$4 sm:$0x60] %vm114_vm0, %v847_v8  }
   0xb   :  { %137 = vst.msk [vmem:[#allocation0 + $0x6a] ss:$4 sm:$0xc] %vm114_vm0, %v842_v4   ;;  %139 = vst.msk [vmem:[#allocation0 + $0x70] ss:$4 sm:$0x70] %vm114_vm0, %v842_v4  }
   0xc   :  { %141 = vst.msk [vmem:[#allocation0 + $0x8b] sm:$0x80] %vm114_vm0, %v842_v4   ;;  %146 = vst.msk [vmem:[#allocation0 + $0x96] ss:$10 sm:$0x3] %vm114_vm0, %v843_v5  }
   0xd   :  { %148 = vst.msk [vmem:[#allocation0 + $0x9c] ss:$4 sm:$0xc] %vm114_vm0, %v843_v5   ;;  %152 = vst.msk [vmem:[#allocation0 + $0xa8] ss:$4 sm:$0xc0] %vm114_vm0, %v843_v5  }
   0xe   :  { %157 = vst.msk [vmem:[#allocation0 + $0xc8] ss:$10 sm:$0x3] %vm114_vm0, %v838_v9   ;;  %159 = vst.msk [vmem:[#allocation0 + $0xc2] ss:$10 sm:$0xc] %vm114_vm0, %v838_v9  }
   0xf   :  { %161 = vst.msk [vmem:[#allocation0 + $0xd4] ss:$4 sm:$0x30] %vm114_vm0, %v838_v9   ;;  %150 = vst.msk [vmem:[#allocation0 + $0xa2] ss:$4 sm:$0x30] %vm114_vm0, %v843_v5  }
  0x10   :  { %163 = vst.msk [vmem:[#allocation0 + $0xda] ss:$4 sm:$0xc0] %vm114_vm0, %v838_v9   ;;  %168 = vst.msk [vmem:[#allocation0 + $0x100] ss:$4 sm:$0x7] %vm114_vm0, %v839_v10  }
  0x11   :  { %172 = vst.msk [vmem:[#allocation0 + $0x10c] ss:$4 sm:$0xe0] %vm114_vm0, %v839_v10   ;;  %170 = vst.msk [vmem:[#allocation0 + $0x106] ss:$4 sm:$0x18] %vm114_vm0, %v839_v10  }
  0x12   :  { %v262_v11 = vld [vmem:[#allocation1 + $0x30] sm:$0x3]   ;;  %v228_v13 = vld [vmem:[#allocation1 + $0x14] sm:$0x18]   ;;  %v309_v18 = vld [vmem:[#allocation1 + $0x1e] sm:$0xe0]  }
  0x13   :  { %v362_v12 = vld [vmem:[#allocation1 + $0x30] sm:$0x3]   ;;  %263 = vrot.lane.b32.xlu1 %v262_v11, %s1017_s0  ;;  %v294_v15 = vld.sshfl [vmem:[#allocation1 + $0xd] sm:$0xff pattern:$0xedc10987]  }
  0x14   :  { %v189_v14 = vld.sshfl [vmem:[#allocation1 + $0x8] sm:$0xff pattern:$0x98710432]   ;;  %v307_v17 = vld.sshfl [vmem:[#allocation1 + $0x12] sm:$0xff pattern:$0x11110edc]  }
  0x15   :  { %v972_v16 = vpack.i.bf16 %v189_v14, %v846_v6  ;;  %v311_v19 = vsel %vm214_vm1, %v309_v18, %v307_v17  ;;  %v213_v20 = vld [vmem:[#allocation1 + $0x1e] sm:$0xe0]   ;;  %v226_v21 = vld [vmem:[#allocation1 + $0x28] sm:$0x7]   ;;  %v232_v22 = vld [vmem:[#allocation1 + $0x28] sm:$0xe0]  }
  0x16   :  { %v230_v23 = vsel %vm229_vm2, %v228_v13, %v226_v21  ;;  %v245_v24 = vld.sshfl [vmem:[#allocation1 + $0x1c] sm:$0xff pattern:$0xffba6510]   ;;  %v247_v25 = vld [vmem:[#allocation1 + $0x25] sm:$0x80]   ;;  %v987_v26 = vpack.i.bf16 %v311_v19, %v294_v15  ;;  %v215_v27 = vsel %vm214_vm1, %v213_v20, %v307_v17 }
  0x17   :  { %973 = vrot.lane.b32.xlu0 %v972_v16, %s1017_s0  ;;  %363 = vrot.lane.b32.xlu1 %v362_v12, %s1018_s14  ;;  %v324_v28 = vld [vmem:[#allocation1 + $0x28] sm:$0x7]   ;;  %v326_v29 = vld [vmem:[#allocation1 + $0x14] sm:$0x18]   ;;  %v234_v30 = vsel %vm214_vm1, %v232_v22, %v230_v23  ;;  %v249_v31 = vsel %vm248_vm3, %v247_v25, %v245_v24  ;;  %v330_v33 = vld [vmem:[#allocation1 + $0x28] sm:$0xe0]   ;;  %v982_v36 = vpack.i.bf16 %v215_v27, %v294_v15 }
  0x18   :  { %v328_v32 = vsel %vm229_vm2, %v326_v29, %v324_v28  ;;  %v347_v34 = vld [vmem:[#allocation1 + $0x25] sm:$0x80]   ;;  %v409_v35 = vld [vmem:[#allocation1 + $0x1e] sm:$0xe0]   ;;  %v992_v37 = vpack.i.bf16 %v249_v31, %v234_v30  ;;  %v424_v41 = vld [vmem:[#allocation1 + $0x28] sm:$0x7]  }
  0x19   :  { %v332_v38 = vsel %vm214_vm1, %v330_v33, %v328_v32  ;;  %v349_v39 = vsel %vm248_vm3, %v347_v34, %v245_v24  ;;  %v411_v40 = vsel %vm214_vm1, %v409_v35, %v307_v17  ;;  %v426_v42 = vld [vmem:[#allocation1 + $0x14] sm:$0x18]   ;;  %v430_v46 = vld [vmem:[#allocation1 + $0x28] sm:$0xe0]   ;;  %v447_v47 = vld [vmem:[#allocation1 + $0x25] sm:$0x80]  }
  0x1a   :  { %v997_v43 = vpack.i.bf16 %v349_v39, %v332_v38  ;;  %v1007_v44 = vpack.i.bf16 %v411_v40, %v294_v15  ;;  %v428_v45 = vsel %vm229_vm2, %v426_v42, %v424_v41  ;;  %v174_v48 = vld [vmem:[#allocation1 + $0x30] sm:$0x3]   ;;  %v449_v50 = vsel %vm248_vm3, %v447_v47, %v245_v24 }
  0x1b   :  { %978 = vrot.lane.b32.xlu0 %v972_v16, %s1018_s14  ;;  %988 = vrot.lane.b32.xlu1 %v987_v26, %s1018_s14  ;;  %177 = vst.msk [vmem:[#allocation0 + $0x132] ss:$4 sm:$0x3] %vm114_vm0, %v174_v48   ;;  %v432_v49 = vsel %vm214_vm1, %v430_v46, %v428_v45  ;;  %v462_v51 = vld [vmem:[#allocation1 + $0x30] sm:$0x3]  }
  0x1c   :  { %v1012_v52 = vpack.i.bf16 %v449_v50, %v432_v49 }
  0x1f   :  { %983 = vrot.lane.b32.xlu0 %v982_v36, %s1017_s0  ;;  %993 = vrot.lane.b32.xlu1 %v992_v37, %s1017_s0 }
  0x23   :  { %998 = vrot.lane.b32.xlu0 %v997_v43, %s1018_s14  ;;  %1008 = vrot.lane.b32.xlu1 %v1007_v44, %s1019_s15 }
  0x27   :  { %1003 = vrot.lane.b32.xlu0 %v972_v16, %s1019_s15  ;;  %463 = vrot.lane.b32.xlu1 %v462_v51, %s1019_s15 }
  0x2b   :  { %1013 = vrot.lane.b32.xlu0 %v1012_v52, %s1019_s15 }
  0x85   :  { %v264_v53 = vpop.permute.xlu1 %263  }
  0x86   :  { %267 = vst.msk [vmem:[#allocation0 + $0x133] ss:$4 sm:$0x3] %vm114_vm0, %v264_v53  }
  0x89   :  { %v974_v54 = vpop.permute.xlu0 %973  ;;  %v364_v57 = vpop.permute.xlu1 %363  }
  0x8a   :  { %v976_v55 = vunpack.i.h.bf16 %v974_v54  ;;  %v975_v56 = vunpack.i.l.bf16 %v974_v54  ;;  %367 = vst.msk [vmem:[#allocation0 + $0x134] ss:$4 sm:$0x3] %vm114_vm0, %v364_v57  }
  0x8c   :  { %194 = vst.msk [vmem:[#allocation0 + $0x41] ss:$4 sm:$0x7] %vm114_vm0, %v976_v55   ;;  %196 = vst.msk [vmem:[#allocation0 + $0x27] ss:$4 sm:$0x18] %vm114_vm0, %v976_v55  }
  0x8d   :  { %198 = vst.msk [vmem:[#allocation0 + $0x4d] ss:$4 sm:$0xe0] %vm114_vm0, %v976_v55   ;;  %183 = vst.msk [vmem:[#allocation0 + $0x1] ss:$4 sm:$0x7] %vm114_vm0, %v975_v56   ;;  %v979_v58 = vpop.permute.xlu0 %978  ;;  %v989_v61 = vpop.permute.xlu1 %988 }
  0x8e   :  { %185 = vst.msk [vmem:[#allocation0 + $0x7] ss:$4 sm:$0x18] %vm114_vm0, %v975_v56   ;;  %187 = vst.msk [vmem:[#allocation0 + $0xd] ss:$4 sm:$0xe0] %vm114_vm0, %v975_v56   ;;  %v981_v59 = vunpack.i.h.bf16 %v979_v58  ;;  %v980_v60 = vunpack.i.l.bf16 %v979_v58  ;;  %v991_v62 = vunpack.i.h.bf16 %v989_v61  ;;  %v990_v63 = vunpack.i.l.bf16 %v989_v61 }
  0x90   :  { %286 = vst.msk [vmem:[#allocation0 + $0x42] ss:$4 sm:$0x3] %vm114_vm0, %v981_v59   ;;  %288 = vst.msk [vmem:[#allocation0 + $0x88] ss:$-28 sm:$0xc] %vm114_vm0, %v981_v59  }
  0x91   :  { %290 = vst.msk [vmem:[#allocation0 - $0x70] ss:$42 sm:$0x30] %vm114_vm0, %v981_v59   ;;  %292 = vst.msk [vmem:[#allocation0 + $0x2a] ss:$10 sm:$0xc0] %vm114_vm0, %v981_v59   ;;  %v984_v0 = vpop.permute.xlu0 %983  ;;  %v994_v3 = vpop.permute.xlu1 %993 }
  0x92   :  { %273 = vst.msk [vmem:[#allocation0 + $0x2] ss:$4 sm:$0x3] %vm114_vm0, %v980_v60   ;;  %275 = vst.msk [vmem:[#allocation0 + $0x8] ss:$4 sm:$0x1c] %vm114_vm0, %v980_v60   ;;  %v986_v1 = vunpack.i.h.bf16 %v984_v0  ;;  %v985_v2 = vunpack.i.l.bf16 %v984_v0  ;;  %v996_v4 = vunpack.i.h.bf16 %v994_v3  ;;  %v995_v5 = vunpack.i.l.bf16 %v994_v3 }
  0x93   :  { %277 = vst.msk [vmem:[#allocation0 + $0xe] ss:$4 sm:$0x60] %vm114_vm0, %v980_v60   ;;  %279 = vst.msk [vmem:[#allocation0 + $0x29] sm:$0x80] %vm114_vm0, %v980_v60   ;;  %v532_v33 = vld [vmem:[#allocation0 + $0x48] sm:$0xff] }
  0x94   :  { %316 = vst.msk [vmem:[#allocation0 + $0xc2] ss:$4 sm:$0x3] %vm114_vm0, %v991_v62   ;;  %318 = vst.msk [vmem:[#allocation0 + $0x188] ss:$-92 sm:$0xc] %vm114_vm0, %v991_v62  }
  0x95   :  { %320 = vst.msk [vmem:[#allocation0 - $0x130] ss:$106 sm:$0x30] %vm114_vm0, %v991_v62   ;;  %322 = vst.msk [vmem:[#allocation0 + $0xaa] ss:$10 sm:$0xc0] %vm114_vm0, %v991_v62   ;;  %v999_v6 = vpop.permute.xlu0 %998  ;;  %v1009_v9 = vpop.permute.xlu1 %1008 }
  0x96   :  { %299 = vst.msk [vmem:[#allocation0 + $0x82] ss:$4 sm:$0x3] %vm114_vm0, %v990_v63   ;;  %301 = vst.msk [vmem:[#allocation0 + $0x108] ss:$-60 sm:$0xc] %vm114_vm0, %v990_v63   ;;  %v1001_v7 = vunpack.i.h.bf16 %v999_v6  ;;  %v1000_v8 = vunpack.i.l.bf16 %v999_v6  ;;  %v1011_v10 = vunpack.i.h.bf16 %v1009_v9  ;;  %v1010_v11 = vunpack.i.l.bf16 %v1009_v9 }
  0x97   :  { %303 = vst.msk [vmem:[#allocation0 - $0xd0] ss:$74 sm:$0x30] %vm114_vm0, %v990_v63   ;;  %305 = vst.msk [vmem:[#allocation0 + $0x6a] ss:$10 sm:$0xc0] %vm114_vm0, %v990_v63  }
  0x98   :  { %220 = vst.msk [vmem:[#allocation0 + $0xc1] ss:$4 sm:$0x7] %vm114_vm0, %v986_v1   ;;  %222 = vst.msk [vmem:[#allocation0 + $0x67] ss:$4 sm:$0x18] %vm114_vm0, %v986_v1  }
  0x99   :  { %224 = vst.msk [vmem:[#allocation0 + $0xcd] ss:$4 sm:$0xe0] %vm114_vm0, %v986_v1   ;;  %205 = vst.msk [vmem:[#allocation0 + $0x81] ss:$4 sm:$0x7] %vm114_vm0, %v985_v2   ;;  %v1004_v12 = vpop.permute.xlu0 %1003  ;;  %v464_v15 = vpop.permute.xlu1 %463  }
  0x9a   :  { %207 = vst.msk [vmem:[#allocation0 + $0x47] ss:$4 sm:$0x18] %vm114_vm0, %v985_v2   ;;  %209 = vst.msk [vmem:[#allocation0 + $0x8d] ss:$4 sm:$0xe0] %vm114_vm0, %v985_v2   ;;  %v1006_v13 = vunpack.i.h.bf16 %v1004_v12  ;;  %v1005_v14 = vunpack.i.l.bf16 %v1004_v12 }
  0x9b   :  { %254 = vst.msk [vmem:[#allocation0 + $0xb3] ss:$4 sm:$0x3] %vm114_vm0, %v996_v4   ;;  %256 = vst.msk [vmem:[#allocation0 + $0xcb] ss:$4 sm:$0xc] %vm114_vm0, %v996_v4  }
  0x9c   :  { %258 = vst.msk [vmem:[#allocation0 + $0xe3] ss:$4 sm:$0x30] %vm114_vm0, %v996_v4   ;;  %260 = vst.msk [vmem:[#allocation0 + $0xfb] ss:$4 sm:$0xc0] %vm114_vm0, %v996_v4  }
  0x9d   :  { %239 = vst.msk [vmem:[#allocation0 + $0x101] ss:$4 sm:$0x7] %vm114_vm0, %v995_v5   ;;  %241 = vst.msk [vmem:[#allocation0 + $0x87] ss:$4 sm:$0x18] %vm114_vm0, %v995_v5   ;;  %v1014_v16 = vpop.permute.xlu0 %1013 }
  0x9e   :  { %243 = vst.msk [vmem:[#allocation0 + $0x10d] ss:$4 sm:$0xe0] %vm114_vm0, %v995_v5   ;;  %354 = vst.msk [vmem:[#allocation0 + $0xb4] ss:$4 sm:$0x3] %vm114_vm0, %v1001_v7   ;;  %v1016_v17 = vunpack.i.h.bf16 %v1014_v16  ;;  %v1015_v18 = vunpack.i.l.bf16 %v1014_v16 }
  0x9f   :  { %356 = vst.msk [vmem:[#allocation0 + $0xcc] ss:$4 sm:$0xc] %vm114_vm0, %v1001_v7   ;;  %358 = vst.msk [vmem:[#allocation0 + $0xe4] ss:$4 sm:$0x30] %vm114_vm0, %v1001_v7  }
  0xa0   :  { %360 = vst.msk [vmem:[#allocation0 + $0xfc] ss:$4 sm:$0xc0] %vm114_vm0, %v1001_v7   ;;  %337 = vst.msk [vmem:[#allocation0 + $0x102] ss:$4 sm:$0x3] %vm114_vm0, %v1000_v8  }
  0xa1   :  { %339 = vst.msk [vmem:[#allocation0 + $0x208] ss:$-124 sm:$0xc] %vm114_vm0, %v1000_v8   ;;  %341 = vst.msk [vmem:[#allocation0 - $0x190] ss:$138 sm:$0x30] %vm114_vm0, %v1000_v8  }
  0xa2   :  { %343 = vst.msk [vmem:[#allocation0 + $0xea] ss:$10 sm:$0xc0] %vm114_vm0, %v1000_v8   ;;  %416 = vst.msk [vmem:[#allocation0 + $0xc3] ss:$4 sm:$0x3] %vm114_vm0, %v1011_v10  }
  0xa3   :  { %418 = vst.msk [vmem:[#allocation0 + $0x189] ss:$-92 sm:$0xc] %vm114_vm0, %v1011_v10   ;;  %420 = vst.msk [vmem:[#allocation0 - $0x12f] ss:$106 sm:$0x30] %vm114_vm0, %v1011_v10  }
  0xa4   :  { %422 = vst.msk [vmem:[#allocation0 + $0xab] ss:$10 sm:$0xc0] %vm114_vm0, %v1011_v10   ;;  %399 = vst.msk [vmem:[#allocation0 + $0x83] ss:$4 sm:$0x3] %vm114_vm0, %v1010_v11  }
  0xa5   :  { %401 = vst.msk [vmem:[#allocation0 + $0x109] ss:$-60 sm:$0xc] %vm114_vm0, %v1010_v11   ;;  %403 = vst.msk [vmem:[#allocation0 - $0xcf] ss:$74 sm:$0x30] %vm114_vm0, %v1010_v11  }
  0xa6   :  { %405 = vst.msk [vmem:[#allocation0 + $0x6b] ss:$10 sm:$0xc0] %vm114_vm0, %v1010_v11   ;;  %467 = vst.msk [vmem:[#allocation0 + $0x135] ss:$4 sm:$0x3] %vm114_vm0, %v464_v15  }
  0xa7   :  { %386 = vst.msk [vmem:[#allocation0 + $0x43] ss:$4 sm:$0x3] %vm114_vm0, %v1006_v13   ;;  %388 = vst.msk [vmem:[#allocation0 + $0x89] ss:$-28 sm:$0xc] %vm114_vm0, %v1006_v13  }
  0xa8   :  { %390 = vst.msk [vmem:[#allocation0 - $0x6f] ss:$42 sm:$0x30] %vm114_vm0, %v1006_v13   ;;  %392 = vst.msk [vmem:[#allocation0 + $0x2b] ss:$10 sm:$0xc0] %vm114_vm0, %v1006_v13  }
  0xa9   :  { %373 = vst.msk [vmem:[#allocation0 + $0x3] ss:$4 sm:$0x3] %vm114_vm0, %v1005_v14   ;;  %375 = vst.msk [vmem:[#allocation0 + $0x9] ss:$4 sm:$0x1c] %vm114_vm0, %v1005_v14  }
  0xaa   :  { %377 = vst.msk [vmem:[#allocation0 + $0xf] ss:$4 sm:$0x60] %vm114_vm0, %v1005_v14   ;;  %379 = vst.msk [vmem:[#allocation0 + $0x2a] sm:$0x80] %vm114_vm0, %v1005_v14   ;;  %v588_v19 = vld [vmem:[#allocation0 + $0x88] sm:$0xff] }
  0xab   :  { %v616_v20 = vld [vmem:[#allocation0 + $0xa8] sm:$0xff]  ;;  %v581_v23 = vld [vmem:[#allocation0 + $0x80] sm:$0xff]  ;;  %454 = vst.msk [vmem:[#allocation0 + $0xb5] ss:$4 sm:$0x3] %vm114_vm0, %v1016_v17   ;;  %v574_v49 = vld [vmem:[#allocation0 + $0x78] sm:$0xff] }
  0xac   :  { %v644_v21 = vld [vmem:[#allocation0 + $0xc8] sm:$0xff]  ;;  %456 = vst.msk [vmem:[#allocation0 + $0xcd] ss:$4 sm:$0xc] %vm114_vm0, %v1016_v17   ;;  %v637_v25 = vld [vmem:[#allocation0 + $0xc0] sm:$0xff]  ;;  %v891_v27 = vpack.c.bf16 %v588_v19, %v581_v23  ;;  %v546_v35 = vld [vmem:[#allocation0 + $0x58] sm:$0xff] }
  0xad   :  { %v672_v22 = vld [vmem:[#allocation0 + $0xe8] sm:$0xff]  ;;  %458 = vst.msk [vmem:[#allocation0 + $0xe5] ss:$4 sm:$0x30] %vm114_vm0, %v1016_v17   ;;  %v609_v24 = vld [vmem:[#allocation0 + $0xa0] sm:$0xff]  ;;  %v911_v31 = vpack.c.bf16 %v644_v21, %v637_v25  ;;  %v742_v9 = vld [vmem:[#allocation0 + $0x138] sm:$0xff] }
  0xae   :  { %460 = vst.msk [vmem:[#allocation0 + $0xfd] ss:$4 sm:$0xc0] %vm114_vm0, %v1016_v17   ;;  %437 = vst.msk [vmem:[#allocation0 + $0x103] ss:$4 sm:$0x3] %vm114_vm0, %v1015_v18   ;;  %v901_v30 = vpack.c.bf16 %v616_v20, %v609_v24 }
  0xaf   :  { %439 = vst.msk [vmem:[#allocation0 + $0x209] ss:$-124 sm:$0xc] %vm114_vm0, %v1015_v18   ;;  %441 = vst.msk [vmem:[#allocation0 - $0x18f] ss:$138 sm:$0x30] %vm114_vm0, %v1015_v18  }
  0xb0   :  { %443 = vst.msk [vmem:[#allocation0 + $0xeb] ss:$10 sm:$0xc0] %vm114_vm0, %v1015_v18   ;;  %v665_v26 = vld [vmem:[#allocation0 + $0xe0] sm:$0xff]  ;;  %v477_v28 = vld [vmem:[#allocation0 + $0x8] sm:$0xff]  ;;  %v518_v36 = vld [vmem:[#allocation0 + $0x38] sm:$0xff] }
  0xb1   :  { %v504_v29 = vld [vmem:[#allocation0 + $0x28] sm:$0xff]  ;;  %v921_v32 = vpack.c.bf16 %v672_v22, %v665_v26  ;;  %v511_v37 = vld [vmem:[#allocation0 + $0x30] sm:$0xff]  ;;  %v472_v38 = vld [vmem:[#allocation0] sm:$0xff]  ;;  %957 = vst [vmem:[%s1212_s1 + $0x40] sm:$0xff] %v891_v27  }
  0xb2   :  { %v560_v34 = vld [vmem:[#allocation0 + $0x68] sm:$0xff]  ;;  %v866_v39 = vpack.c.bf16 %v518_v36, %v511_v37  ;;  %v483_v40 = vld [vmem:[#allocation0 + $0x10] sm:$0xff]  ;;  %v490_v41 = vld [vmem:[#allocation0 + $0x18] sm:$0xff]  ;;  %v851_v43 = vpack.c.bf16 %v477_v28, %v472_v38  ;;  %959 = vst [vmem:[%s1212_s1 + $0x50] sm:$0xff] %v901_v30  }
  0xb3   :  { %v497_v42 = vld [vmem:[#allocation0 + $0x20] sm:$0xff]  ;;  %961 = vst [vmem:[%s1212_s1 + $0x60] sm:$0xff] %v911_v31   ;;  %963 = vst [vmem:[%s1212_s1 + $0x70] sm:$0xff] %v921_v32   ;;  %v539_v45 = vld [vmem:[#allocation0 + $0x50] sm:$0xff]  ;;  %v856_v47 = vpack.c.bf16 %v490_v41, %v483_v40 }
  0xb4   :  { %v525_v44 = vld [vmem:[#allocation0 + $0x40] sm:$0xff]  ;;  %v861_v48 = vpack.c.bf16 %v504_v29, %v497_v42  ;;  %952 = vst [vmem:[%s1212_s1 + $0x18] sm:$0xff] %v866_v39   ;;  %v567_v50 = vld [vmem:[#allocation0 + $0x70] sm:$0xff]  ;;  %v876_v52 = vpack.c.bf16 %v546_v35, %v539_v45  ;;  %852 = vst [vmem:[%s1212_s1] sm:$0xff] %v851_v43  }
  0xb5   :  { %v553_v46 = vld [vmem:[#allocation0 + $0x60] sm:$0xff]  ;;  %v871_v51 = vpack.c.bf16 %v532_v33, %v525_v44  ;;  %v886_v54 = vpack.c.bf16 %v574_v49, %v567_v50  ;;  %v623_v57 = vld [vmem:[#allocation0 + $0xb0] sm:$0xff]  ;;  %950 = vst [vmem:[%s1212_s1 + $0x8] sm:$0xff] %v856_v47   ;;  %v700_v58 = vld [vmem:[#allocation0 + $0x108] sm:$0xff] }
  0xb6   :  { %v881_v53 = vpack.c.bf16 %v560_v34, %v553_v46  ;;  %v595_v55 = vld [vmem:[#allocation0 + $0x90] sm:$0xff]  ;;  %v602_v56 = vld [vmem:[#allocation0 + $0x98] sm:$0xff]  ;;  %951 = vst [vmem:[%s1212_s1 + $0x10] sm:$0xff] %v861_v48   ;;  %v728_v59 = vld [vmem:[#allocation0 + $0x128] sm:$0xff] }
  0xb7   :  { %v896_v60 = vpack.c.bf16 %v602_v56, %v595_v55  ;;  %v630_v61 = vld [vmem:[#allocation0 + $0xb8] sm:$0xff]  ;;  %v651_v62 = vld [vmem:[#allocation0 + $0xd0] sm:$0xff]  ;;  %953 = vst [vmem:[%s1212_s1 + $0x20] sm:$0xff] %v871_v51   ;;  %954 = vst [vmem:[%s1212_s1 + $0x28] sm:$0xff] %v876_v52  }
  0xb8   :  { %v658_v63 = vld [vmem:[#allocation0 + $0xd8] sm:$0xff]  ;;  %955 = vst [vmem:[%s1212_s1 + $0x30] sm:$0xff] %v881_v53   ;;  %v906_v0 = vpack.c.bf16 %v630_v61, %v623_v57  ;;  %v679_v2 = vld [vmem:[#allocation0 + $0xf0] sm:$0xff]  ;;  %956 = vst [vmem:[%s1212_s1 + $0x38] sm:$0xff] %v886_v54  }
  0xb9   :  { %v916_v1 = vpack.c.bf16 %v658_v63, %v651_v62  ;;  %v686_v3 = vld [vmem:[#allocation0 + $0xf8] sm:$0xff]  ;;  %v707_v4 = vld [vmem:[#allocation0 + $0x110] sm:$0xff]  ;;  %958 = vst [vmem:[%s1212_s1 + $0x48] sm:$0xff] %v896_v60   ;;  %v693_v7 = vld [vmem:[#allocation0 + $0x100] sm:$0xff] }
  0xba   :  { %v926_v5 = vpack.c.bf16 %v686_v3, %v679_v2  ;;  %v714_v6 = vld [vmem:[#allocation0 + $0x118] sm:$0xff]  ;;  %v721_v8 = vld [vmem:[#allocation0 + $0x120] sm:$0xff]  ;;  %960 = vst [vmem:[%s1212_s1 + $0x58] sm:$0xff] %v906_v0   ;;  %v931_v11 = vpack.c.bf16 %v700_v58, %v693_v7  ;;  %v735_v13 = vld [vmem:[#allocation0 + $0x130] sm:$0xff] }
  0xbb   :  { %962 = vst [vmem:[%s1212_s1 + $0x68] sm:$0xff] %v916_v1   ;;  %v936_v10 = vpack.c.bf16 %v714_v6, %v707_v4  ;;  %v941_v12 = vpack.c.bf16 %v728_v59, %v721_v8  ;;  %v946_v14 = vpack.c.bf16 %v742_v9, %v735_v13 }
  0xbc   :  { %964 = vst [vmem:[%s1212_s1 + $0x78] sm:$0xff] %v926_v5   ;;  %965 = vst [vmem:[%s1212_s1 + $0x80] sm:$0xff] %v931_v11  }
  0xbd   :  { %966 = vst [vmem:[%s1212_s1 + $0x88] sm:$0xff] %v936_v10   ;;  %967 = vst [vmem:[%s1212_s1 + $0x90] sm:$0xff] %v941_v12  }
  0xbe   :  { %968 = vst [vmem:[%s1212_s1 + $0x98] sm:$0xff] %v946_v14  }

// kernel: net_forward.10
= control target key start
LH: loop header
LB: loop body
LE: loop exit
PB: predicated region body
PF: predicated region fallthrough
CT: control target
= control target key end

     0   :  { %vm210_vm0 = vcmask 261120   ;;  %vm336_vm1 = vcmask 130048   ;;  %vm412_vm2 = vcmask 60416   ;;  %s659_s1 = inlined_call_operand.vmem [shape: bf16[288,16], index: 1, kind: input, shape index: {}]   ;;  %s660_s0 = inlined_call_operand.vmem [shape: bf16[32,288], index: 0, kind: input, shape index: {}]   ;;  %s661_s3 = inlined_call_operand.vmem [shape: bf16[16,8], index: 3, kind: input, shape index: {}]   ;;  %s662_s2 = inlined_call_operand.vmem [shape: f32[1,16], index: 2, kind: input, shape index: {}]   ;;  %s663_s4 = inlined_call_operand.vmem [shape: f32[1,8], index: 4, kind: input, shape index: {}]   ;;  %s664_s5 = inlined_call_operand.vmem [shape: bf16[32,8], index: 5, kind: output, shape index: {}]  }
   0x1   :  { %v509_v0 = vld [vmem:[%s659_s1 + $0x40] sm:$0xff]   ;;  %v511_v2 = vld [vmem:[%s659_s1 + $0x48] sm:$0xff]   ;;  %v513_v4 = vld [vmem:[%s659_s1 + $0x50] sm:$0xff]  }
   0x2   :  { %v510_v1 = vld [vmem:[%s659_s1] sm:$0xff]   ;;  %460 = vmatprep.subr.bf16.mxu0 %v509_v0  ;;  %v512_v3 = vld [vmem:[%s659_s1 + $0x8] sm:$0xff]   ;;  %v514_v5 = vld [vmem:[%s659_s1 + $0x10] sm:$0xff]  }
   0x3   :  { %461 = vmatpush3.bf16.msra.mxu0 %v510_v1  ;;  %v515_v6 = vld [vmem:[%s659_s1 + $0x58] sm:$0xff]   ;;  %v517_v8 = vld [vmem:[%s659_s1 + $0x60] sm:$0xff]   ;;  %v519_v11 = vld [vmem:[%s659_s1 + $0x68] sm:$0xff]  }
   0x4   :  { %462 = vmatprep.subr.bf16.mxu0 %v511_v2  ;;  %v516_v7 = vld [vmem:[%s659_s1 + $0x18] sm:$0xff]   ;;  %v518_v9 = vld [vmem:[%s659_s1 + $0x20] sm:$0xff]   ;;  %v520_v12 = vld [vmem:[%s659_s1 + $0x28] sm:$0xff]  }
   0x5   :  { %v524_v10 = vld [vmem:[%s659_s1 + $0x80] sm:$0xff]   ;;  %v521_v13 = vld [vmem:[%s659_s1 + $0x70] sm:$0xff]   ;;  %v529_v15 = vld [vmem:[%s659_s1 + $0x88] sm:$0xff]  }
   0x6   :  { %495 = vmatprep.subr.bf16.mxu1 %v524_v10  ;;  %v528_v14 = vld [vmem:[%s660_s0 + $0x4] ss:$12 sps:$4 sm:$0xff]   ;;  %v530_v16 = vld [vmem:[%s660_s0 + $0x8] ss:$12 sps:$4 sm:$0xff]   ;;  %v531_v17 = vld [vmem:[%s660_s0 + $0x20] ss:$12 sps:$4 sm:$0xff]  }
   0x7   :  { %463 = vmatpush3.bf16.msra.mxu0 %v512_v3  ;;  %496 = vmatpush3.bf16.msra.mxu1 %v524_v10  ;;  %v522_v18 = vld [vmem:[%s659_s1 + $0x30] sm:$0xff]   ;;  %v523_v19 = vld [vmem:[%s659_s1 + $0x78] sm:$0xff]   ;;  %v526_v21 = vld [vmem:[%s660_s0] ss:$12 sps:$4 sm:$0xff]  }
   0x8   :  { %464 = vmatprep.subr.bf16.mxu0 %v513_v4  ;;  %249 = vmatprep.mubr.bf16.mxu0 %v528_v14  ;;  %v525_v20 = vld [vmem:[%s659_s1 + $0x38] sm:$0xff]   ;;  %v535_v24 = vld [vmem:[%s661_s3] sm:$0xff]  }
   0x9   :  { %497 = vmatprep.subr.bf16.mxu1 %v529_v15  ;;  %499 = vmatprep.mubr.msk.bf16.mxu1 %vm210_vm0, %v530_v16  ;;  %v532_v22 = vld [vmem:[%s660_s0 + $0x1c] ss:$12 sps:$4 sm:$0xff]   ;;  %v534_v23 = vld [vmem:[%s660_s0 + $0x18] ss:$12 sps:$4 sm:$0xff]   ;;  %v421_v31 = vld [vmem:[%s662_s2] ss:$0 sm:$0xff] }
   0xa   :  { %v448_v56 = vld [vmem:[%s663_s4] ss:$0 sm:$0xff] }
   0xb   :  { %465 = vmatpush3.bf16.msra.mxu0 %v514_v5  ;;  %498 = vmatpush3.bf16.msra.mxu1 %v529_v15 }
   0xc   :  { %466 = vmatprep.subr.bf16.mxu0 %v515_v6  ;;  %503 = vmatprep.subr.bf16.mxu1 %v535_v24 }
   0xe   :  { %500 = vmatmul.mubr.msk.bf16.vlgmr.msra.gmra.mrb[0].mxu1 %vm210_vm0, %v531_v17 }
   0xf   :  { %467 = vmatpush3.bf16.msra.mxu0 %v516_v7  ;;  %504 = vmatpush3.bf16.msra.mxu1 %v535_v24 }
  0x10   :  { %468 = vmatprep.subr.bf16.mxu0 %v517_v8 }
  0x13   :  { %469 = vmatpush3.bf16.msra.mxu0 %v518_v9 }
  0x14   :  { %470 = vmatprep.subr.bf16.mxu0 %v519_v11 }
  0x17   :  { %471 = vmatpush3.bf16.msra.mxu0 %v520_v12 }
  0x18   :  { %472 = vmatprep.subr.bf16.mxu0 %v521_v13 }
  0x1b   :  { %473 = vmatpush3.bf16.msra.mxu0 %v522_v18 }
  0x1c   :  { %474 = vmatprep.subr.bf16.mxu0 %v523_v19 }
  0x1f   :  { %475 = vmatpush3.bf16.msra.mxu0 %v525_v20 }
  0x22   :  { %250 = vmatmul.mubr.bf16.vlgmr.msra.gmra.mrb[0].mxu0 %v526_v21 }
  0x23   :  { %257 = vmatprep.mubr.bf16.mxu0 %v532_v22 }
  0x2a   :  { %258 = vmatmul.mubr.bf16.gmra.mrb[4].mxu0 %v534_v23 }
  0xe1   :  { %v501_v25 = vpop.f32.mrb[0].mxu1 }
  0xe2   :  { %v300_v26 = vpop.f32.mrb[1].mxu1 }
  0xe3   :  { %v502_v27 = vpop.f32.mrb[2].mxu1 }
  0xe4   :  { %v303_v28 = vpop.f32.mrb[3].mxu1 }
  0xf5   :  { %v476_v29 = vpop.f32.mrb[0].mxu0 }
  0xf6   :  { %v477_v30 = vpop.f32.mrb[1].mxu0 }
  0xf7   :  { %v478_v32 = vadd.f32 %v477_v30, %v476_v29  ;;  %v479_v33 = vpop.f32.mrb[2].mxu0 }
  0xf8   :  { %v480_v34 = vpop.f32.mrb[3].mxu0 }
  0xf9   :  { %v481_v35 = vadd.f32 %v480_v34, %v479_v33  ;;  %v252_v36 = vadd.f32 %v478_v32, %v421_v31 }
  0xfb   :  { %v301_v37 = vadd.f32 %v300_v26, %v252_v36  ;;  %v255_v38 = vadd.f32 %v481_v35, %v421_v31 }
  0xfd   :  { %v304_v39 = vadd.f32 %v303_v28, %v255_v38  ;;  %v482_v40 = vpop.f32.mrb[4].mxu0  ;;  %v315_v42 = vmax.f32 %v301_v37, 0.0 }
  0xfe   :  { %v483_v41 = vpop.f32.mrb[5].mxu0 }
  0xff   :  { %v316_v43 = vmax.f32 %v304_v39, 0.0  ;;  %v484_v44 = vadd.f32 %v483_v41, %v482_v40  ;;  %v485_v45 = vpop.f32.mrb[6].mxu0 }
 0x100   :  { %v486_v46 = vpop.f32.mrb[7].mxu0 }
 0x101   :  { %v319_v47 = vpack.c.bf16 %v316_v43, %v315_v42  ;;  %v260_v48 = vadd.f32 %v484_v44, %v421_v31  ;;  %v487_v49 = vadd.f32 %v486_v46, %v485_v45 }
 0x103   :  { %v309_v50 = vadd.f32 %v501_v25, %v260_v48  ;;  %v263_v51 = vadd.f32 %v487_v49, %v421_v31  ;;  %505 = vmatprep.mubr.msk.bf16.mxu1 %vm336_vm1, %v319_v47 }
 0x105   :  { %v312_v52 = vadd.f32 %v502_v27, %v263_v51  ;;  %v317_v53 = vmax.f32 %v309_v50, 0.0 }
 0x107   :  { %v318_v54 = vmax.f32 %v312_v52, 0.0 }
 0x109   :  { %v320_v55 = vpack.c.bf16 %v318_v54, %v317_v53 }
 0x10b   :  { %506 = vmatmul.mubr.msk.bf16.vlgmr.msra.gmra.mrb[4].mxu1 %vm336_vm1, %v320_v55 }
 0x1de   :  { %v507_v57 = vpop.f32.mrb[4].mxu1 }
 0x1df   :  { %v386_v58 = vadd.f32 %v507_v57, %v448_v56  ;;  %v377_v59 = vpop.f32.mrb[5].mxu1 }
 0x1e0   :  { %v378_v60 = vadd.f32 %v448_v56, %v377_v59  ;;  %v508_v61 = vpop.f32.mrb[6].mxu1 }
 0x1e1   :  { %v394_v62 = vmax.f32 %v386_v58, 0.0  ;;  %v389_v63 = vadd.f32 %v508_v61, %v448_v56  ;;  %v380_v0 = vpop.f32.mrb[7].mxu1 }
 0x1e2   :  { %v392_v1 = vmax.f32 %v378_v60, 0.0  ;;  %v381_v2 = vadd.f32 %v448_v56, %v380_v0 }
 0x1e3   :  { %v458_v3 = vpack.c.bf16 %v394_v62, %v394_v62  ;;  %v395_v4 = vmax.f32 %v389_v63, 0.0 }
 0x1e4   :  { %v456_v5 = vpack.c.bf16 %v392_v1, %v392_v1  ;;  %v393_v6 = vmax.f32 %v381_v2, 0.0 }
 0x1e5   :  { %415 = vst.msk [vmem:[%s664_s5 + $0x8] sm:$0xf] %vm412_vm2, %v458_v3  ;;  %v459_v7 = vpack.c.bf16 %v395_v4, %v395_v4 }
 0x1e6   :  { %413 = vst.msk [vmem:[%s664_s5] sm:$0xf] %vm412_vm2, %v456_v5  ;;  %v457_v8 = vpack.c.bf16 %v393_v6, %v393_v6 }
 0x1e7   :  { %416 = vst.msk [vmem:[%s664_s5 + $0xc] sm:$0xf] %vm412_vm2, %v459_v7 }
 0x1e8   :  { %414 = vst.msk [vmem:[%s664_s5 + $0x4] sm:$0xf] %vm412_vm2, %v457_v8 }

// kernel: net_forward.11
= control target key start
LH: loop header
LB: loop body
LE: loop exit
PB: predicated region body
PF: predicated region fallthrough
CT: control target
= control target key end

     0   :  { %v619_v1 = vmov 0   ;;  %v620_v34 = vmov 0.0   ;;  %v46_v41 = vlaneseq  ;;  %vm621_vm0 = vmmov 0   ;;  %s797_s1 = inlined_call_operand.vmem [shape: bf16[128,256], index: 1, kind: input, shape index: {}]   ;;  %s798_s3 = inlined_call_operand.vmem [shape: bf16[256,128], index: 3, kind: input, shape index: {}]   ;;  %s799_s0 = inlined_call_operand.vmem [shape: bf16[8,128], index: 0, kind: input, shape index: {}]   ;;  %s800_s5 = inlined_call_operand.vmem [shape: bf16[128,101], index: 5, kind: input, shape index: {}]   ;;  %s801_s2 = inlined_call_operand.vmem [shape: f32[1,256], index: 2, kind: input, shape index: {}]   ;;  %s802_s4 = inlined_call_operand.vmem [shape: f32[1,128], index: 4, kind: input, shape index: {}]   ;;  %s803_s6 = inlined_call_operand.vmem [shape: f32[1,101], index: 6, kind: input, shape index: {}]   ;;  %s804_s7 = inlined_call_operand.vmem [shape: f32[8,101], index: 7, kind: output, shape index: {}]  }
   0x1   :  { %v571_v0 = vld [vmem:[%s797_s1 + $0x4] ss:$8 sps:$4 sm:$0xff]   ;;  %168 = vmatprep.mubr.bf16.mxu0 %v619_v1  ;;  %v573_v2 = vld [vmem:[%s797_s1] ss:$8 sps:$4 sm:$0xff]   ;;  %v574_v3 = vld [vmem:[%s797_s1 + $0x14] ss:$8 sps:$4 sm:$0xff]  }
   0x2   :  { %136 = vmatprep.subr.bf16.mxu0 %v571_v0  ;;  %v576_v4 = vld [vmem:[%s797_s1 + $0x10] ss:$8 sps:$4 sm:$0xff]   ;;  %v577_v5 = vld [vmem:[%s797_s1 + $0x24] ss:$8 sps:$4 sm:$0xff]   ;;  %v579_v6 = vld [vmem:[%s797_s1 + $0x20] ss:$8 sps:$4 sm:$0xff]  }
   0x3   :  { %137 = vmatpush1.bf16.msra.mxu0 %v573_v2  ;;  %v580_v7 = vld [vmem:[%s797_s1 + $0x34] ss:$8 sps:$4 sm:$0xff]   ;;  %v582_v8 = vld [vmem:[%s797_s1 + $0x30] ss:$8 sps:$4 sm:$0xff]   ;;  %v583_v9 = vld [vmem:[%s797_s1 + $0x44] ss:$8 sps:$4 sm:$0xff]  }
   0x4   :  { %138 = vmatprep.subr.bf16.mxu0 %v574_v3  ;;  %v595_v10 = vld [vmem:[%s798_s3 + $0x40] sm:$0xff]   ;;  %v597_v13 = vld [vmem:[%s798_s3 + $0x48] sm:$0xff]   ;;  %v599_v15 = vld [vmem:[%s798_s3 + $0x50] sm:$0xff]   ;;  %v47_v42 = vshrl.u32 %v46_v41, 7  ;;  %vm469_vm1 = vcmask 826368  }
   0x5   :  { %v596_v11 = vld [vmem:[%s798_s3] sm:$0xff]   ;;  %517 = vmatprep.subr.bf16.mxu1 %v595_v10  ;;  %v598_v14 = vld [vmem:[%s798_s3 + $0x8] sm:$0xff]   ;;  %v586_v16 = vld [vmem:[%s797_s1 + $0x54] ss:$8 sps:$4 sm:$0xff]  }
   0x6   :  { %v585_v12 = vld [vmem:[%s797_s1 + $0x40] ss:$8 sps:$4 sm:$0xff]   ;;  %518 = vmatpush3.bf16.msra.mxu1 %v596_v11  ;;  %v588_v17 = vld [vmem:[%s797_s1 + $0x50] ss:$8 sps:$4 sm:$0xff]   ;;  %v589_v20 = vld [vmem:[%s797_s1 + $0x64] ss:$8 sps:$4 sm:$0xff]  }
   0x7   :  { %139 = vmatpush1.bf16.msra.mxu0 %v576_v4  ;;  %519 = vmatprep.subr.bf16.mxu1 %v597_v13  ;;  %v600_v18 = vld [vmem:[%s798_s3 + $0x10] sm:$0xff]   ;;  %v601_v19 = vld [vmem:[%s798_s3 + $0x58] sm:$0xff]   ;;  %v591_v21 = vld [vmem:[%s797_s1 + $0x60] ss:$8 sps:$4 sm:$0xff]   ;;  %v48_v43 = vsub.s32 0, %v47_v42  ;;  %v52_v45 = vsub.s32 1, %v47_v42 }
   0x8   :  { %140 = vmatprep.subr.bf16.mxu0 %v577_v5  ;;  %v592_v22 = vld [vmem:[%s797_s1 + $0x74] ss:$8 sps:$4 sm:$0xff]   ;;  %v603_v24 = vld [vmem:[%s798_s3 + $0x60] sm:$0xff]   ;;  %v594_v26 = vld [vmem:[%s797_s1 + $0x70] ss:$8 sps:$4 sm:$0xff]  }
   0x9   :  { %v602_v23 = vld [vmem:[%s798_s3 + $0x18] sm:$0xff]   ;;  %v604_v25 = vld [vmem:[%s798_s3 + $0x20] sm:$0xff]   ;;  %v605_v27 = vld [vmem:[%s798_s3 + $0x68] sm:$0xff]  }
   0xa   :  { %520 = vmatpush3.bf16.msra.mxu1 %v598_v14  ;;  %v606_v28 = vld [vmem:[%s798_s3 + $0x28] sm:$0xff]   ;;  %v27_v29 = vld [vmem:[%s799_s0] sm:$0xf]  ;;  %v607_v30 = vld [vmem:[%s798_s3 + $0x70] sm:$0xff]  }
   0xb   :  { %141 = vmatpush1.bf16.msra.mxu0 %v579_v6  ;;  %521 = vmatprep.subr.bf16.mxu1 %v599_v15  ;;  %v608_v31 = vld [vmem:[%s798_s3 + $0x30] sm:$0xff]   ;;  %v609_v32 = vld [vmem:[%s798_s3 + $0x78] sm:$0xff]   ;;  %v611_v35 = vld [vmem:[%s800_s5] sm:$0xff]  }
   0xc   :  { %142 = vmatprep.subr.bf16.mxu0 %v580_v7  ;;  %v610_v33 = vld [vmem:[%s798_s3 + $0x38] sm:$0xff]   ;;  %v612_v36 = vld [vmem:[%s800_s5 + $0x8] sm:$0xff]   ;;  %v613_v37 = vld [vmem:[%s800_s5 + $0x10] sm:$0xff]  }
   0xd   :  { %v614_v38 = vld [vmem:[%s800_s5 + $0x18] sm:$0xff]   ;;  %v615_v39 = vld [vmem:[%s800_s5 + $0x20] sm:$0xff]   ;;  %v616_v40 = vld [vmem:[%s800_s5 + $0x28] sm:$0xff]  }
   0xe   :  { %522 = vmatpush3.bf16.msra.mxu1 %v600_v18  ;;  %v44_v44 = vld [vmem:[%s801_s2] sm:$0x3]  ;;  %v617_v58 = vld [vmem:[%s800_s5 + $0x30] sm:$0xff]   ;;  %v618_v59 = vld [vmem:[%s800_s5 + $0x38] sm:$0xff]  }
   0xf   :  { %143 = vmatpush1.bf16.msra.mxu0 %v582_v8  ;;  %523 = vmatprep.subr.bf16.mxu1 %v601_v19  ;;  %v49_v46 = vrot.slane %v44_v44, %v48_v43  ;;  %v53_v47 = vrot.slane %v44_v44, %v52_v45  ;;  %v491_v61 = vld [vmem:[%s802_s4] ss:$0 sm:$0xff] }
  0x10   :  { %144 = vmatprep.subr.bf16.mxu0 %v583_v9  ;;  %v508_v5 = vld [vmem:[%s803_s6] ss:$0 sm:$0xff] }
  0x12   :  { %524 = vmatpush3.bf16.msra.mxu1 %v602_v23 }
  0x13   :  { %145 = vmatpush1.bf16.msra.mxu0 %v585_v12  ;;  %525 = vmatprep.subr.bf16.mxu1 %v603_v24 }
  0x14   :  { %146 = vmatprep.subr.bf16.mxu0 %v586_v16 }
  0x16   :  { %526 = vmatpush3.bf16.msra.mxu1 %v604_v25 }
  0x17   :  { %147 = vmatpush1.bf16.msra.mxu0 %v588_v17  ;;  %527 = vmatprep.subr.bf16.mxu1 %v605_v27 }
  0x18   :  { %148 = vmatprep.subr.bf16.mxu0 %v589_v20 }
  0x1a   :  { %528 = vmatpush3.bf16.msra.mxu1 %v606_v28 }
  0x1b   :  { %149 = vmatpush1.bf16.msra.mxu0 %v591_v21  ;;  %529 = vmatprep.subr.bf16.mxu1 %v607_v30 }
  0x1c   :  { %150 = vmatprep.subr.bf16.mxu0 %v592_v22 }
  0x1e   :  { %530 = vmatpush3.bf16.msra.mxu1 %v608_v31 }
  0x1f   :  { %151 = vmatpush1.bf16.msra.mxu0 %v594_v26  ;;  %531 = vmatprep.subr.bf16.mxu1 %v609_v32 }
  0x20   :  { %548 = vmatprep.subr.bf16.mxu0 %v620_v34 }
  0x22   :  { %169 = vmatmul.mubr.bf16.vlgmr.msra.gmra.mrb[0].mxu0 %v27_v29  ;;  %532 = vmatpush3.bf16.msra.mxu1 %v610_v33 }
  0x23   :  { %549 = vmatpush3.bf16.msra.mxu0 %v611_v35  ;;  %564 = vmatprep.mubr.msk.bf16.mxu0 %vm621_vm0, %v620_v34 }
  0x24   :  { %550 = vmatprep.subr.bf16.mxu0 %v620_v34 }
  0x27   :  { %551 = vmatpush3.bf16.msra.mxu0 %v612_v36 }
  0x28   :  { %552 = vmatprep.subr.bf16.mxu0 %v620_v34 }
  0x2b   :  { %553 = vmatpush3.bf16.msra.mxu0 %v613_v37 }
  0x2c   :  { %554 = vmatprep.subr.bf16.mxu0 %v620_v34 }
  0x2f   :  { %555 = vmatpush3.bf16.msra.mxu0 %v614_v38 }
  0x30   :  { %556 = vmatprep.subr.bf16.mxu0 %v620_v34 }
  0x33   :  { %557 = vmatpush3.bf16.msra.mxu0 %v615_v39 }
  0x34   :  { %558 = vmatprep.subr.bf16.mxu0 %v620_v34 }
  0x37   :  { %559 = vmatpush3.bf16.msra.mxu0 %v616_v40 }
  0x38   :  { %560 = vmatprep.subr.bf16.mxu0 %v620_v34 }
  0x3b   :  { %561 = vmatpush3.bf16.msra.mxu0 %v617_v58 }
  0x3c   :  { %562 = vmatprep.subr.bf16.mxu0 %v620_v34 }
  0x3f   :  { %563 = vmatpush3.bf16.msra.mxu0 %v618_v59 }
  0xf5   :  { %v170_v48 = vpop.f32.mrb[0].mxu0 }
  0xf6   :  { %v171_v49 = vadd.f32 %v170_v48, %v49_v46  ;;  %v172_v50 = vpop.f32.mrb[1].mxu0 }
  0xf7   :  { %v173_v51 = vadd.f32 %v172_v50, %v53_v47  ;;  %v174_v52 = vpop.f32.mrb[2].mxu0 }
  0xf8   :  { %v177_v53 = vmax.f32 %v171_v49, 0.0  ;;  %v175_v54 = vpop.f32.mrb[3].mxu0 }
  0xf9   :  { %v178_v55 = vmax.f32 %v173_v51, 0.0 }
  0xfa   :  { %v179_v57 = vpack.c.bf16 %v177_v53, %v177_v53 }
  0xfb   :  { %v180_v56 = vpack.c.bf16 %v178_v55, %v178_v55 }
  0xfd   :  { %348 = vmatprep.mubr.bf16.mxu1 %v180_v56 }
  0xfe   :  { %349 = vmatmul.mubr.bf16.vlgmr.msra.gmra.mrb[0].mxu1 %v179_v57 }
 0x1d1   :  { %v533_v60 = vpop.f32.mrb[0].mxu1 }
 0x1d2   :  { %v534_v62 = vpop.f32.mrb[1].mxu1 }
 0x1d3   :  { %v535_v63 = vadd.f32 %v534_v62, %v533_v60  ;;  %v536_v0 = vpop.f32.mrb[2].mxu1 }
 0x1d4   :  { %v537_v1 = vpop.f32.mrb[3].mxu1 }
 0x1d5   :  { %v351_v2 = vadd.f32 %v535_v63, %v491_v61 }
 0x1d7   :  { %v356_v3 = vmax.f32 %v351_v2, 0.0 }
 0x1d9   :  { %v357_v4 = vpack.c.bf16 %v356_v3, %v356_v3 }
 0x1db   :  { %565 = vmatmul.mubr.bf16.vlgmr.msra.gmra.mrb[4].mxu0 %v357_v4 }
 0x2ae   :  { %v463_v6 = vpop.f32.mrb[4].mxu0 }
 0x2af   :  { %v464_v7 = vadd.f32 %v508_v5, %v463_v6  ;;  %v566_v8 = vpop.f32.mrb[5].mxu0 }
 0x2b0   :  { %v466_v9 = vpop.f32.mrb[6].mxu0 }
 0x2b1   :  { %470 = vst.msk [vmem:[%s804_s7] sm:$0xff] %vm469_vm1, %v464_v7  ;;  %v567_v10 = vpop.f32.mrb[7].mxu0 }

</bundles_post_ra>
